<compile_context>
chip_gen: v6e
topology: v6e:2x2x1
jax: 0.10.0
libtpu: 0.0.40
codegen_flags: <defaults>
</compile_context>

<pallas_src>
import jax
import jax.numpy as jnp
from jax.experimental import pallas as pl
from jax.experimental.pallas import tpu as pltpu

EPS = 1e-5
KSIZES = (1, 3, 5)               # conv_1x1, conv_3x3, conv_5x5 branches
KMAX = max(KSIZES)               # every branch expressed in the KMAX x KMAX tap grid
MAXPAD = KMAX // 2               # = 2


def _pick_tile_h(H, W, target_rows):
    """Largest divisor TH of H with (TH*W) % 8 == 0 and TH*W <= target_rows."""
    best = None
    for th in range(1, H + 1):
        if H % th:
            continue
        if (th * W) % 8 and th != H:
            continue
        if th * W <= target_rows:
            best = th
    if best is not None:
        return best
    for th in range(1, H + 1):                       # smallest valid tile as fallback
        if H % th == 0 and ((th * W) % 8 == 0 or th == H):
            return th
    return H


def _mixed_layer_kernel(arc_ref,                     # SMEM (N,) int32  (index_maps only)
                        half_ref,                    # SMEM (N,) int32  selected ks // 2
                        x_ref,                       # VMEM (1, H, W, Cinp) f32
                        scale_ref, shift_ref,        # VMEM (1, 1, Cinp) folded cond-BN affine
                        w_ref,                       # VMEM (1, 25, Cinp, Coutp) selected branch
                        b_ref,                       # VMEM (1, 1, Coutp) selected branch bias
                        o_ref,                       # VMEM (1, TH*W, Coutp) lane-dense output
                        pad_ref,                     # VMEM (H+4, W+4, Cinp) mxu_dtype scratch
                        acc_ref):                    # VMEM (TH*W, Coutp) f32 accumulator
    b = pl.program_id(0)
    h = pl.program_id(1)
    _, H, W, Cinp = x_ref.shape
    TH = o_ref.shape[1] // W
    Wp = W + 2 * MAXPAD
    half = half_ref[b]                               # footprint half-width of selected branch

    # ---- once per sample: cond-BN + ReLU into the pad scratch (halo-only zeroing) ----
    @pl.when(h == 0)
    def _fill_pad():
        act = jnp.maximum(x_ref[0] * scale_ref[0] + shift_ref[0], 0.0)      # (H, W, Cinp) f32
        zrow = jnp.zeros((MAXPAD, Wp, Cinp), pad_ref.dtype)
        zcol = jnp.zeros((H, MAXPAD, Cinp), pad_ref.dtype)
        pad_ref[0:MAXPAD, :, :] = zrow                                       # top halo
        pad_ref[MAXPAD + H:MAXPAD + H + MAXPAD, :, :] = zrow                 # bottom halo
        pad_ref[MAXPAD:MAXPAD + H, 0:MAXPAD, :] = zcol                       # left halo
        pad_ref[MAXPAD:MAXPAD + H, MAXPAD + W:MAXPAD + W + MAXPAD, :] = zcol # right halo
        pad_ref[MAXPAD:MAXPAD + H, MAXPAD:MAXPAD + W, :] = act.astype(pad_ref.dtype)

    # ---- per-tap MXU accumulation for this H-tile, skipping taps outside the footprint ----
    r0 = pl.multiple_of(h * TH, TH)

    def tap_dot(ky, kx):
        slab = pad_ref[pl.ds(r0 + ky, TH), kx:kx + W, :].reshape(TH * W, Cinp)
        return jnp.dot(slab, w_ref[0, ky * KMAX + kx],
                       preferred_element_type=jnp.float32)                   # (TH*W, Coutp) f32

    # center tap is inside every branch's footprint -> unconditional, also inits acc.
    acc_ref[...] = tap_dot(MAXPAD, MAXPAD)
    for ky in range(KMAX):
        for kx in range(KMAX):
            r = max(abs(ky - MAXPAD), abs(kx - MAXPAD))
            if r == 0:
                continue                                                     # center done above

            @pl.when(half >= r)                                              # tap in footprint?
            def _(ky=ky, kx=kx):
                acc_ref[...] += tap_dot(ky, kx)

    o_ref[0] = acc_ref[...] + b_ref[0]                                       # bias, full-lane store


def mixed_layer_cond_shared_weights(x_nchw, y, sample_arc, params, *,
                                    mxu_dtype=jnp.bfloat16, target_rows=256):
    """x_nchw: (N, Cin, H, W) f32, y: (N, Ydim) f32, sample_arc: (N,) int."""
    x = jnp.transpose(x_nchw, (0, 2, 3, 1)).astype(jnp.float32)              # NCHW -> NHWC
    N, H, W, Cin = x.shape
    Cout = params["b1"].shape[0]
    lane_mult = 256 if Cout > 128 else 128                                   # v6e/v7x MXU is 256-wide
    Coutp = -(-Cout // lane_mult) * lane_mult
    Cinp = -(-Cin // 128) * 128                                              # lane-fill the K dim

    # ---- batch-stat cond-BN folded into per-sample affine: h = relu(x*scale + shift) ----
    mean = jnp.mean(x, axis=(0, 1, 2))                                       # (Cin,)
    var = jnp.mean(jnp.square(x - mean), axis=(0, 1, 2))                     # biased var (BN)
    invstd = 1.0 / jnp.sqrt(var + EPS)
    gain = 1.0 + y.astype(jnp.float32) @ params["Wg"]                        # (N, Cin)
    bias = y.astype(jnp.float32) @ params["Wb"]                              # (N, Cin)
    scale = gain * invstd
    shift = bias - mean * gain * invstd

    if Cinp != Cin:                                                          # zero-pad channels
        x = jnp.pad(x, ((0, 0), (0, 0), (0, 0), (0, Cinp - Cin)))
        scale = jnp.pad(scale, ((0, 0), (0, Cinp - Cin)))
        shift = jnp.pad(shift, ((0, 0), (0, Cinp - Cin)))
    scale = scale.reshape(N, 1, Cinp)
    shift = shift.reshape(N, 1, Cinp)

    # ---- per-branch weights as (25, Cinp, Coutp) taps (1x1/3x3 zero-embedded centered) ----
    def to_taps(w_oihw, ks):
        w = jnp.transpose(w_oihw, (2, 3, 1, 0)).astype(jnp.float32)          # (ks, ks, Cin, Cout)
        p = (KMAX - ks) // 2
        w = jnp.pad(w, ((p, p), (p, p), (0, Cinp - Cin), (0, Coutp - Cout)))
        return w.reshape(KMAX * KMAX, Cinp, Coutp).astype(mxu_dtype)

    w_all = jnp.stack([to_taps(params["w" + k], ks)
                       for k, ks in zip(("1", "3", "5"), KSIZES)])           # (3, 25, Cinp, Coutp)
    b_all = jnp.stack([jnp.pad(params["b" + k].astype(jnp.float32), (0, Coutp - Cout))
                       for k in ("1", "3", "5")]).reshape(len(KSIZES), 1, Coutp)

    # ---- sort by branch so the arc-indexed weight DMA is O(#branches), not O(N) ----
    arc = sample_arc.astype(jnp.int32)
    perm = jnp.argsort(arc)
    inv = jnp.argsort(perm)
    arc_s = arc[perm]
    halfs = jnp.asarray([k // 2 for k in KSIZES], jnp.int32)[arc_s]          # (N,) selected ks//2
    x_s, scale_s, shift_s = x[perm], scale[perm], shift[perm]

    TH = _pick_tile_h(H, W, target_rows)
    HT = H // TH
    KK = KMAX * KMAX

    # ---- explicit VMEM budget (double-buffered ins/outs + scratch) with headroom ----
    wb = jnp.dtype(mxu_dtype).itemsize
    budget = (2 * H * W * Cinp * 4                      # x block (resident per sample)
              + 2 * 2 * Cinp * 4                        # scale / shift
              + 2 * KK * Cinp * Coutp * wb              # weight block (double-buffered)
              + 2 * Coutp * 4                           # bias
              + 2 * TH * W * Coutp * 4                  # output block (double-buffered)
              + (H + 2 * MAXPAD) * (W + 2 * MAXPAD) * Cinp * wb   # pad scratch
              + TH * W * Coutp * 4)                     # f32 accumulator
    vmem_limit = min(max(int(budget * 1.25), 16 << 20), 100 << 20)

    out = pl.pallas_call(
        _mixed_layer_kernel,
        out_shape=jax.ShapeDtypeStruct((N, H * W, Coutp), jnp.float32),
        grid_spec=pltpu.PrefetchScalarGridSpec(
            num_scalar_prefetch=2,                                           # arc, half -> SMEM
            grid=(N, HT),
            in_specs=[
                pl.BlockSpec((1, H, W, Cinp), lambda b, h, arc, hf: (b, 0, 0, 0)),
                pl.BlockSpec((1, 1, Cinp), lambda b, h, arc, hf: (b, 0, 0)),
                pl.BlockSpec((1, 1, Cinp), lambda b, h, arc, hf: (b, 0, 0)),
                # data-dependent branch selection: only the chosen branch's weights are DMA'd
                pl.BlockSpec((1, KK, Cinp, Coutp), lambda b, h, arc, hf: (arc[b], 0, 0, 0)),
                pl.BlockSpec((1, 1, Coutp), lambda b, h, arc, hf: (arc[b], 0, 0)),
            ],
            out_specs=pl.BlockSpec((1, TH * W, Coutp), lambda b, h, arc, hf: (b, h, 0)),
            scratch_shapes=[
                pltpu.VMEM((H + 2 * MAXPAD, W + 2 * MAXPAD, Cinp), mxu_dtype),
                pltpu.VMEM((TH * W, Coutp), jnp.float32),
            ],
        ),
        compiler_params=pltpu.CompilerParams(
            dimension_semantics=("parallel", "arbitrary"),                   # batch || , H-tiles seq
            vmem_limit_bytes=vmem_limit),
    )(arc_s, halfs, x_s, scale_s, shift_s, w_all, b_all)

    out = out[inv][:, :, :Cout].reshape(N, H, W, Cout)                       # unsort, unpad
    return jnp.transpose(out, (0, 3, 1, 2))                                  # NHWC -> NCHW


def reference_forward(x, y, sample_arc, params):
    """Pure-JAX reference reproducing the torch forward (NCHW)."""
    mean = jnp.mean(x, axis=(0, 2, 3), keepdims=True)
    var = jnp.mean((x - mean) ** 2, axis=(0, 2, 3), keepdims=True)
    xn = (x - mean) / jnp.sqrt(var + EPS)
    gain = 1.0 + y @ params["Wg"]
    bias = y @ params["Wb"]
    h = jnp.maximum(xn * gain[:, :, None, None] + bias[:, :, None, None], 0.0)
    outs = []
    for k, ks in zip(("1", "3", "5"), KSIZES):
        o = jax.lax.conv_general_dilated(
            h, params["w" + k], window_strides=(1, 1),
            padding=[(ks // 2, ks // 2)] * 2,
            dimension_numbers=("NCHW", "OIHW", "NCHW"))
        outs.append(o + params["b" + k][None, :, None, None])
    stacked = jnp.stack(outs, axis=1)                                        # (N, n_branch, Cout, H, W)
    onehot = jax.nn.one_hot(sample_arc, len(KSIZES), dtype=x.dtype)[:, :, None, None, None]
    return jnp.sum(onehot * stacked, axis=1)


if __name__ == "__main__":
    N, Cin, Cout, H, Wsp, Ydim = 2, 4, 4, 16, 16, 8
    keys = jax.random.split(jax.random.PRNGKey(0), 10)
    params = {
        "w1": jax.random.normal(keys[0], (Cout, Cin, 1, 1), jnp.float32),    # shared weight '1x1'
        "b1": jax.random.normal(keys[1], (Cout,), jnp.float32),
        "w3": jax.random.normal(keys[2], (Cout, Cin, 3, 3), jnp.float32),    # shared weight '3x3'
        "b3": jax.random.normal(keys[3], (Cout,), jnp.float32),
        "w5": jax.random.normal(keys[4], (Cout, Cin, 5, 5), jnp.float32),    # shared weight '5x5'
        "b5": jax.random.normal(keys[5], (Cout,), jnp.float32),
        "Wg": 0.1 * jax.random.normal(keys[6], (Ydim, Cin), jnp.float32),    # ccbn gain proj
        "Wb": 0.1 * jax.random.normal(keys[7], (Ydim, Cin), jnp.float32),    # ccbn bias proj
    }
    x = jax.random.normal(keys[8], (N, Cin, H, Wsp), jnp.float32)
    y = jax.random.normal(keys[9], (N, Ydim), jnp.float32)
    sample_arc = jnp.array([2, 0], dtype=jnp.int32)     # unsorted: exercises sort/unsort + skipping

    ref = reference_forward(x, y, sample_arc, params)

    # f32 MXU path: bit-accurate check (target_rows=128 -> 2 H-tiles, exercises tiling).
    out32 = jax.block_until_ready(mixed_layer_cond_shared_weights(
        x, y, sample_arc, params, mxu_dtype=jnp.float32, target_rows=128))
    assert out32.shape == (N, Cout, H, Wsp)
    assert jnp.allclose(out32, ref, rtol=1e-4, atol=1e-3), float(jnp.max(jnp.abs(out32 - ref)))

    # default bf16 MXU path (f32 accumulation): looser tolerance per review.
    outbf = jax.block_until_ready(mixed_layer_cond_shared_weights(
        x, y, sample_arc, params, target_rows=128))
    assert outbf.shape == (N, Cout, H, Wsp)
    assert jnp.allclose(outbf, ref, rtol=5e-2, atol=2e-1), float(jnp.max(jnp.abs(outbf - ref)))

    print("KERNEL_OK")
</pallas_src>

<mosaic_0001>
module attributes {stable_mosaic.version = 11 : i64} {
  func.func @_mixed_layer_kernel(%arg0: i32, %arg1: i32, %arg2: memref<2xi32, #tpu.memory_space<smem>>, %arg3: memref<2xi32, #tpu.memory_space<smem>>, %arg4: memref<1x16x16x128xf32, #tpu.memory_space<vmem>>, %arg5: memref<1x1x128xf32, #tpu.memory_space<vmem>>, %arg6: memref<1x1x128xf32, #tpu.memory_space<vmem>>, %arg7: memref<1x25x128x128xf32, #tpu.memory_space<vmem>>, %arg8: memref<1x1x128xf32, #tpu.memory_space<vmem>>, %arg9: memref<1x128x128xf32, #tpu.memory_space<vmem>>, %arg10: memref<20x20x128xf32, #tpu.memory_space<vmem>>, %arg11: memref<128x128xf32, #tpu.memory_space<vmem>>) attributes {dimension_semantics = [#tpu.dimension_semantics<parallel>, #tpu.dimension_semantics<arbitrary>], iteration_bounds = array<i64: 2, 2>, scalar_prefetch = 2 : i64, scratch_operands = 2 : i64, tpu.core_type = #tpu.core_type<tc>, window_params = [{transform_indices = @transform_0, window_bounds = array<i64: 1, 16, 16, 128>}, {transform_indices = @transform_1, window_bounds = array<i64: 1, 1, 128>}, {transform_indices = @transform_2, window_bounds = array<i64: 1, 1, 128>}, {transform_indices = @transform_3, window_bounds = array<i64: 1, 25, 128, 128>}, {transform_indices = @transform_4, window_bounds = array<i64: 1, 1, 128>}, {transform_indices = @transform_5, window_bounds = array<i64: 1, 128, 128>}]} {
    %0 = arith.index_cast %arg0 : i32 to index
    %1 = memref.load %arg3[%0] : memref<2xi32, #tpu.memory_space<smem>>
    %c0_i32 = arith.constant 0 : i32
    %2 = arith.cmpi eq, %arg1, %c0_i32 : i32
    %3 = arith.extui %2 : i1 to i32
    %c0_i32_0 = arith.constant 0 : i32
    %4 = arith.cmpi ne, %3, %c0_i32_0 : i32
    scf.if %4 {
      %c0_61 = arith.constant 0 : index
      %c0_62 = arith.constant 0 : index
      %c0_63 = arith.constant 0 : index
      %c0_64 = arith.constant 0 : index
      %95 = vector.load %arg4[%c0_61, %c0_62, %c0_63, %c0_64] : memref<1x16x16x128xf32, #tpu.memory_space<vmem>>, vector<1x16x16x128xf32>
      %96 = vector.shape_cast %95 : vector<1x16x16x128xf32> to vector<16x16x128xf32>
      %c0_65 = arith.constant 0 : index
      %c0_66 = arith.constant 0 : index
      %c0_67 = arith.constant 0 : index
      %97 = vector.load %arg5[%c0_65, %c0_66, %c0_67] : memref<1x1x128xf32, #tpu.memory_space<vmem>>, vector<1x1x128xf32>
      %98 = vector.shape_cast %97 : vector<1x1x128xf32> to vector<1x128xf32>
      %99 = vector.shape_cast %98 : vector<1x128xf32> to vector<1x1x128xf32>
      %100 = vector.broadcast %99 : vector<1x1x128xf32> to vector<16x16x128xf32>
      %101 = arith.mulf %96, %100 : vector<16x16x128xf32>
      %c0_68 = arith.constant 0 : index
      %c0_69 = arith.constant 0 : index
      %c0_70 = arith.constant 0 : index
      %102 = vector.load %arg6[%c0_68, %c0_69, %c0_70] : memref<1x1x128xf32, #tpu.memory_space<vmem>>, vector<1x1x128xf32>
      %103 = vector.shape_cast %102 : vector<1x1x128xf32> to vector<1x128xf32>
      %104 = vector.shape_cast %103 : vector<1x128xf32> to vector<1x1x128xf32>
      %105 = vector.broadcast %104 : vector<1x1x128xf32> to vector<16x16x128xf32>
      %106 = arith.addf %101, %105 : vector<16x16x128xf32>
      %cst_71 = arith.constant 0.000000e+00 : f32
      %107 = vector.broadcast %cst_71 : f32 to vector<16x16x128xf32>
      %108 = arith.maximumf %106, %107 : vector<16x16x128xf32>
      %cst_72 = arith.constant 0.000000e+00 : f32
      %109 = vector.broadcast %cst_72 : f32 to vector<2x20x128xf32>
      %cst_73 = arith.constant 0.000000e+00 : f32
      %110 = vector.broadcast %cst_73 : f32 to vector<16x2x128xf32>
      %c0_74 = arith.constant 0 : index
      %c0_75 = arith.constant 0 : index
      %c0_76 = arith.constant 0 : index
      %111 = vector.load %arg10[%c0_74, %c0_75, %c0_76] : memref<20x20x128xf32, #tpu.memory_space<vmem>>, vector<2x20x128xf32>
      tpu.vector_store %arg10[%c0_74, %c0_75, %c0_76], %109 {strides = array<i32>} : memref<20x20x128xf32, #tpu.memory_space<vmem>>, vector<2x20x128xf32>,
      %c18 = arith.constant 18 : index
      %c0_77 = arith.constant 0 : index
      %c0_78 = arith.constant 0 : index
      %112 = vector.load %arg10[%c18, %c0_77, %c0_78] : memref<20x20x128xf32, #tpu.memory_space<vmem>>, vector<2x20x128xf32>
      tpu.vector_store %arg10[%c18, %c0_77, %c0_78], %109 {strides = array<i32>} : memref<20x20x128xf32, #tpu.memory_space<vmem>>, vector<2x20x128xf32>,
      %c2_79 = arith.constant 2 : index
      %c0_80 = arith.constant 0 : index
      %c0_81 = arith.constant 0 : index
      %113 = vector.load %arg10[%c2_79, %c0_80, %c0_81] : memref<20x20x128xf32, #tpu.memory_space<vmem>>, vector<16x2x128xf32>
      tpu.vector_store %arg10[%c2_79, %c0_80, %c0_81], %110 {strides = array<i32>} : memref<20x20x128xf32, #tpu.memory_space<vmem>>, vector<16x2x128xf32>,
      %c2_82 = arith.constant 2 : index
      %c18_83 = arith.constant 18 : index
      %c0_84 = arith.constant 0 : index
      %114 = vector.load %arg10[%c2_82, %c18_83, %c0_84] : memref<20x20x128xf32, #tpu.memory_space<vmem>>, vector<16x2x128xf32>
      tpu.vector_store %arg10[%c2_82, %c18_83, %c0_84], %110 {strides = array<i32>} : memref<20x20x128xf32, #tpu.memory_space<vmem>>, vector<16x2x128xf32>,
      %c2_85 = arith.constant 2 : index
      %c2_86 = arith.constant 2 : index
      %c0_87 = arith.constant 0 : index
      %115 = vector.load %arg10[%c2_85, %c2_86, %c0_87] : memref<20x20x128xf32, #tpu.memory_space<vmem>>, vector<16x16x128xf32>
      tpu.vector_store %arg10[%c2_85, %c2_86, %c0_87], %108 {strides = array<i32>} : memref<20x20x128xf32, #tpu.memory_space<vmem>>, vector<16x16x128xf32>,
    } else {
    }
    %c8_i32 = arith.constant 8 : i32
    %5 = arith.muli %arg1, %c8_i32 : i32
    %6 = tpu.assume_multiple %5, 8 : i32
    %c2_i32 = arith.constant 2 : i32
    %7 = arith.addi %6, %c2_i32 : i32
    %8 = arith.index_cast %7 : i32 to index
    %c2 = arith.constant 2 : index
    %c0 = arith.constant 0 : index
    %9 = vector.load %arg10[%8, %c2, %c0] : memref<20x20x128xf32, #tpu.memory_space<vmem>>, vector<8x16x128xf32>
    %10 = vector.shape_cast %9 : vector<8x16x128xf32> to vector<128x128xf32>
    %c0_1 = arith.constant 0 : index
    %c12 = arith.constant 12 : index
    %c0_2 = arith.constant 0 : index
    %c0_3 = arith.constant 0 : index
    %11 = vector.load %arg7[%c0_1, %c12, %c0_2, %c0_3] : memref<1x25x128x128xf32, #tpu.memory_space<vmem>>, vector<1x1x128x128xf32>
    %12 = vector.shape_cast %11 : vector<1x1x128x128xf32> to vector<128x128xf32>
    %cst = arith.constant dense<0.000000e+00> : vector<128x128xf32>
    %13 = tpu.matmul %10, %12, %cst {dimension_numbers = #tpu.dot_dimension_numbers<[1], [0], [0], [1], [0, 0, 1, 1], [], []>} : vector<128x128xf32>, vector<128x128xf32>, vector<128x128xf32> -> vector<128x128xf32>
    %c0_4 = arith.constant 0 : index
    %c0_5 = arith.constant 0 : index
    %14 = vector.load %arg11[%c0_4, %c0_5] : memref<128x128xf32, #tpu.memory_space<vmem>>, vector<128x128xf32>
    tpu.vector_store %arg11[%c0_4, %c0_5], %13 {strides = array<i32>} : memref<128x128xf32, #tpu.memory_space<vmem>>, vector<128x128xf32>,
    %c2_i32_6 = arith.constant 2 : i32
    %15 = arith.cmpi sge, %1, %c2_i32_6 : i32
    %16 = arith.extui %15 : i1 to i32
    %c0_i32_7 = arith.constant 0 : i32
    %17 = arith.cmpi ne, %16, %c0_i32_7 : i32
    scf.if %17 {
      %c0_61 = arith.constant 0 : index
      %c0_62 = arith.constant 0 : index
      %95 = vector.load %arg11[%c0_61, %c0_62] : memref<128x128xf32, #tpu.memory_space<vmem>>, vector<128x128xf32>
      %c0_i32_63 = arith.constant 0 : i32
      %96 = arith.addi %6, %c0_i32_63 : i32
      %97 = arith.index_cast %96 : i32 to index
      %c0_64 = arith.constant 0 : index
      %c0_65 = arith.constant 0 : index
      %98 = vector.load %arg10[%97, %c0_64, %c0_65] : memref<20x20x128xf32, #tpu.memory_space<vmem>>, vector<8x16x128xf32>
      %99 = vector.shape_cast %98 : vector<8x16x128xf32> to vector<128x128xf32>
      %c0_66 = arith.constant 0 : index
      %c0_67 = arith.constant 0 : index
      %c0_68 = arith.constant 0 : index
      %c0_69 = arith.constant 0 : index
      %100 = vector.load %arg7[%c0_66, %c0_67, %c0_68, %c0_69] : memref<1x25x128x128xf32, #tpu.memory_space<vmem>>, vector<1x1x128x128xf32>
      %101 = vector.shape_cast %100 : vector<1x1x128x128xf32> to vector<128x128xf32>
      %cst_70 = arith.constant dense<0.000000e+00> : vector<128x128xf32>
      %102 = tpu.matmul %99, %101, %cst_70 {dimension_numbers = #tpu.dot_dimension_numbers<[1], [0], [0], [1], [0, 0, 1, 1], [], []>} : vector<128x128xf32>, vector<128x128xf32>, vector<128x128xf32> -> vector<128x128xf32>
      %103 = arith.addf %95, %102 : vector<128x128xf32>
      %c0_71 = arith.constant 0 : index
      %c0_72 = arith.constant 0 : index
      %104 = vector.load %arg11[%c0_71, %c0_72] : memref<128x128xf32, #tpu.memory_space<vmem>>, vector<128x128xf32>
      tpu.vector_store %arg11[%c0_71, %c0_72], %103 {strides = array<i32>} : memref<128x128xf32, #tpu.memory_space<vmem>>, vector<128x128xf32>,
    } else {
    }
    %c2_i32_8 = arith.constant 2 : i32
    %18 = arith.cmpi sge, %1, %c2_i32_8 : i32
    %19 = arith.extui %18 : i1 to i32
    %c0_i32_9 = arith.constant 0 : i32
    %20 = arith.cmpi ne, %19, %c0_i32_9 : i32
    scf.if %20 {
      %c0_61 = arith.constant 0 : index
      %c0_62 = arith.constant 0 : index
      %95 = vector.load %arg11[%c0_61, %c0_62] : memref<128x128xf32, #tpu.memory_space<vmem>>, vector<128x128xf32>
      %c0_i32_63 = arith.constant 0 : i32
      %96 = arith.addi %6, %c0_i32_63 : i32
      %97 = arith.index_cast %96 : i32 to index
      %c1 = arith.constant 1 : index
      %c0_64 = arith.constant 0 : index
      %98 = vector.load %arg10[%97, %c1, %c0_64] : memref<20x20x128xf32, #tpu.memory_space<vmem>>, vector<8x16x128xf32>
      %99 = vector.shape_cast %98 : vector<8x16x128xf32> to vector<128x128xf32>
      %c0_65 = arith.constant 0 : index
      %c1_66 = arith.constant 1 : index
      %c0_67 = arith.constant 0 : index
      %c0_68 = arith.constant 0 : index
      %100 = vector.load %arg7[%c0_65, %c1_66, %c0_67, %c0_68] : memref<1x25x128x128xf32, #tpu.memory_space<vmem>>, vector<1x1x128x128xf32>
      %101 = vector.shape_cast %100 : vector<1x1x128x128xf32> to vector<128x128xf32>
      %cst_69 = arith.constant dense<0.000000e+00> : vector<128x128xf32>
      %102 = tpu.matmul %99, %101, %cst_69 {dimension_numbers = #tpu.dot_dimension_numbers<[1], [0], [0], [1], [0, 0, 1, 1], [], []>} : vector<128x128xf32>, vector<128x128xf32>, vector<128x128xf32> -> vector<128x128xf32>
      %103 = arith.addf %95, %102 : vector<128x128xf32>
      %c0_70 = arith.constant 0 : index
      %c0_71 = arith.constant 0 : index
      %104 = vector.load %arg11[%c0_70, %c0_71] : memref<128x128xf32, #tpu.memory_space<vmem>>, vector<128x128xf32>
      tpu.vector_store %arg11[%c0_70, %c0_71], %103 {strides = array<i32>} : memref<128x128xf32, #tpu.memory_space<vmem>>, vector<128x128xf32>,
    } else {
    }
    %c2_i32_10 = arith.constant 2 : i32
    %21 = arith.cmpi sge, %1, %c2_i32_10 : i32
    %22 = arith.extui %21 : i1 to i32
    %c0_i32_11 = arith.constant 0 : i32
    %23 = arith.cmpi ne, %22, %c0_i32_11 : i32
    scf.if %23 {
      %c0_61 = arith.constant 0 : index
      %c0_62 = arith.constant 0 : index
      %95 = vector.load %arg11[%c0_61, %c0_62] : memref<128x128xf32, #tpu.memory_space<vmem>>, vector<128x128xf32>
      %c0_i32_63 = arith.constant 0 : i32
      %96 = arith.addi %6, %c0_i32_63 : i32
      %97 = arith.index_cast %96 : i32 to index
      %c2_64 = arith.constant 2 : index
      %c0_65 = arith.constant 0 : index
      %98 = vector.load %arg10[%97, %c2_64, %c0_65] : memref<20x20x128xf32, #tpu.memory_space<vmem>>, vector<8x16x128xf32>
      %99 = vector.shape_cast %98 : vector<8x16x128xf32> to vector<128x128xf32>
      %c0_66 = arith.constant 0 : index
      %c2_67 = arith.constant 2 : index
      %c0_68 = arith.constant 0 : index
      %c0_69 = arith.constant 0 : index
      %100 = vector.load %arg7[%c0_66, %c2_67, %c0_68, %c0_69] : memref<1x25x128x128xf32, #tpu.memory_space<vmem>>, vector<1x1x128x128xf32>
      %101 = vector.shape_cast %100 : vector<1x1x128x128xf32> to vector<128x128xf32>
      %cst_70 = arith.constant dense<0.000000e+00> : vector<128x128xf32>
      %102 = tpu.matmul %99, %101, %cst_70 {dimension_numbers = #tpu.dot_dimension_numbers<[1], [0], [0], [1], [0, 0, 1, 1], [], []>} : vector<128x128xf32>, vector<128x128xf32>, vector<128x128xf32> -> vector<128x128xf32>
      %103 = arith.addf %95, %102 : vector<128x128xf32>
      %c0_71 = arith.constant 0 : index
      %c0_72 = arith.constant 0 : index
      %104 = vector.load %arg11[%c0_71, %c0_72] : memref<128x128xf32, #tpu.memory_space<vmem>>, vector<128x128xf32>
      tpu.vector_store %arg11[%c0_71, %c0_72], %103 {strides = array<i32>} : memref<128x128xf32, #tpu.memory_space<vmem>>, vector<128x128xf32>,
    } else {
    }
    %c2_i32_12 = arith.constant 2 : i32
    %24 = arith.cmpi sge, %1, %c2_i32_12 : i32
    %25 = arith.extui %24 : i1 to i32
    %c0_i32_13 = arith.constant 0 : i32
    %26 = arith.cmpi ne, %25, %c0_i32_13 : i32
    scf.if %26 {
      %c0_61 = arith.constant 0 : index
      %c0_62 = arith.constant 0 : index
      %95 = vector.load %arg11[%c0_61, %c0_62] : memref<128x128xf32, #tpu.memory_space<vmem>>, vector<128x128xf32>
      %c0_i32_63 = arith.constant 0 : i32
      %96 = arith.addi %6, %c0_i32_63 : i32
      %97 = arith.index_cast %96 : i32 to index
      %c3 = arith.constant 3 : index
      %c0_64 = arith.constant 0 : index
      %98 = vector.load %arg10[%97, %c3, %c0_64] : memref<20x20x128xf32, #tpu.memory_space<vmem>>, vector<8x16x128xf32>
      %99 = vector.shape_cast %98 : vector<8x16x128xf32> to vector<128x128xf32>
      %c0_65 = arith.constant 0 : index
      %c3_66 = arith.constant 3 : index
      %c0_67 = arith.constant 0 : index
      %c0_68 = arith.constant 0 : index
      %100 = vector.load %arg7[%c0_65, %c3_66, %c0_67, %c0_68] : memref<1x25x128x128xf32, #tpu.memory_space<vmem>>, vector<1x1x128x128xf32>
      %101 = vector.shape_cast %100 : vector<1x1x128x128xf32> to vector<128x128xf32>
      %cst_69 = arith.constant dense<0.000000e+00> : vector<128x128xf32>
      %102 = tpu.matmul %99, %101, %cst_69 {dimension_numbers = #tpu.dot_dimension_numbers<[1], [0], [0], [1], [0, 0, 1, 1], [], []>} : vector<128x128xf32>, vector<128x128xf32>, vector<128x128xf32> -> vector<128x128xf32>
      %103 = arith.addf %95, %102 : vector<128x128xf32>
      %c0_70 = arith.constant 0 : index
      %c0_71 = arith.constant 0 : index
      %104 = vector.load %arg11[%c0_70, %c0_71] : memref<128x128xf32, #tpu.memory_space<vmem>>, vector<128x128xf32>
      tpu.vector_store %arg11[%c0_70, %c0_71], %103 {strides = array<i32>} : memref<128x128xf32, #tpu.memory_space<vmem>>, vector<128x128xf32>,
    } else {
    }
    %c2_i32_14 = arith.constant 2 : i32
    %27 = arith.cmpi sge, %1, %c2_i32_14 : i32
    %28 = arith.extui %27 : i1 to i32
    %c0_i32_15 = arith.constant 0 : i32
    %29 = arith.cmpi ne, %28, %c0_i32_15 : i32
    scf.if %29 {
      %c0_61 = arith.constant 0 : index
      %c0_62 = arith.constant 0 : index
      %95 = vector.load %arg11[%c0_61, %c0_62] : memref<128x128xf32, #tpu.memory_space<vmem>>, vector<128x128xf32>
      %c0_i32_63 = arith.constant 0 : i32
      %96 = arith.addi %6, %c0_i32_63 : i32
      %97 = arith.index_cast %96 : i32 to index
      %c4 = arith.constant 4 : index
      %c0_64 = arith.constant 0 : index
      %98 = vector.load %arg10[%97, %c4, %c0_64] : memref<20x20x128xf32, #tpu.memory_space<vmem>>, vector<8x16x128xf32>
      %99 = vector.shape_cast %98 : vector<8x16x128xf32> to vector<128x128xf32>
      %c0_65 = arith.constant 0 : index
      %c4_66 = arith.constant 4 : index
      %c0_67 = arith.constant 0 : index
      %c0_68 = arith.constant 0 : index
      %100 = vector.load %arg7[%c0_65, %c4_66, %c0_67, %c0_68] : memref<1x25x128x128xf32, #tpu.memory_space<vmem>>, vector<1x1x128x128xf32>
      %101 = vector.shape_cast %100 : vector<1x1x128x128xf32> to vector<128x128xf32>
      %cst_69 = arith.constant dense<0.000000e+00> : vector<128x128xf32>
      %102 = tpu.matmul %99, %101, %cst_69 {dimension_numbers = #tpu.dot_dimension_numbers<[1], [0], [0], [1], [0, 0, 1, 1], [], []>} : vector<128x128xf32>, vector<128x128xf32>, vector<128x128xf32> -> vector<128x128xf32>
      %103 = arith.addf %95, %102 : vector<128x128xf32>
      %c0_70 = arith.constant 0 : index
      %c0_71 = arith.constant 0 : index
      %104 = vector.load %arg11[%c0_70, %c0_71] : memref<128x128xf32, #tpu.memory_space<vmem>>, vector<128x128xf32>
      tpu.vector_store %arg11[%c0_70, %c0_71], %103 {strides = array<i32>} : memref<128x128xf32, #tpu.memory_space<vmem>>, vector<128x128xf32>,
    } else {
    }
    %c2_i32_16 = arith.constant 2 : i32
    %30 = arith.cmpi sge, %1, %c2_i32_16 : i32
    %31 = arith.extui %30 : i1 to i32
    %c0_i32_17 = arith.constant 0 : i32
    %32 = arith.cmpi ne, %31, %c0_i32_17 : i32
    scf.if %32 {
      %c0_61 = arith.constant 0 : index
      %c0_62 = arith.constant 0 : index
      %95 = vector.load %arg11[%c0_61, %c0_62] : memref<128x128xf32, #tpu.memory_space<vmem>>, vector<128x128xf32>
      %c1_i32_63 = arith.constant 1 : i32
      %96 = arith.addi %6, %c1_i32_63 : i32
      %97 = arith.index_cast %96 : i32 to index
      %c0_64 = arith.constant 0 : index
      %c0_65 = arith.constant 0 : index
      %98 = vector.load %arg10[%97, %c0_64, %c0_65] : memref<20x20x128xf32, #tpu.memory_space<vmem>>, vector<8x16x128xf32>
      %99 = vector.shape_cast %98 : vector<8x16x128xf32> to vector<128x128xf32>
      %c0_66 = arith.constant 0 : index
      %c5 = arith.constant 5 : index
      %c0_67 = arith.constant 0 : index
      %c0_68 = arith.constant 0 : index
      %100 = vector.load %arg7[%c0_66, %c5, %c0_67, %c0_68] : memref<1x25x128x128xf32, #tpu.memory_space<vmem>>, vector<1x1x128x128xf32>
      %101 = vector.shape_cast %100 : vector<1x1x128x128xf32> to vector<128x128xf32>
      %cst_69 = arith.constant dense<0.000000e+00> : vector<128x128xf32>
      %102 = tpu.matmul %99, %101, %cst_69 {dimension_numbers = #tpu.dot_dimension_numbers<[1], [0], [0], [1], [0, 0, 1, 1], [], []>} : vector<128x128xf32>, vector<128x128xf32>, vector<128x128xf32> -> vector<128x128xf32>
      %103 = arith.addf %95, %102 : vector<128x128xf32>
      %c0_70 = arith.constant 0 : index
      %c0_71 = arith.constant 0 : index
      %104 = vector.load %arg11[%c0_70, %c0_71] : memref<128x128xf32, #tpu.memory_space<vmem>>, vector<128x128xf32>
      tpu.vector_store %arg11[%c0_70, %c0_71], %103 {strides = array<i32>} : memref<128x128xf32, #tpu.memory_space<vmem>>, vector<128x128xf32>,
    } else {
    }
    %c1_i32 = arith.constant 1 : i32
    %33 = arith.cmpi sge, %1, %c1_i32 : i32
    %34 = arith.extui %33 : i1 to i32
    %c0_i32_18 = arith.constant 0 : i32
    %35 = arith.cmpi ne, %34, %c0_i32_18 : i32
    scf.if %35 {
      %c0_61 = arith.constant 0 : index
      %c0_62 = arith.constant 0 : index
      %95 = vector.load %arg11[%c0_61, %c0_62] : memref<128x128xf32, #tpu.memory_space<vmem>>, vector<128x128xf32>
      %c1_i32_63 = arith.constant 1 : i32
      %96 = arith.addi %6, %c1_i32_63 : i32
      %97 = arith.index_cast %96 : i32 to index
      %c1 = arith.constant 1 : index
      %c0_64 = arith.constant 0 : index
      %98 = vector.load %arg10[%97, %c1, %c0_64] : memref<20x20x128xf32, #tpu.memory_space<vmem>>, vector<8x16x128xf32>
      %99 = vector.shape_cast %98 : vector<8x16x128xf32> to vector<128x128xf32>
      %c0_65 = arith.constant 0 : index
      %c6 = arith.constant 6 : index
      %c0_66 = arith.constant 0 : index
      %c0_67 = arith.constant 0 : index
      %100 = vector.load %arg7[%c0_65, %c6, %c0_66, %c0_67] : memref<1x25x128x128xf32, #tpu.memory_space<vmem>>, vector<1x1x128x128xf32>
      %101 = vector.shape_cast %100 : vector<1x1x128x128xf32> to vector<128x128xf32>
      %cst_68 = arith.constant dense<0.000000e+00> : vector<128x128xf32>
      %102 = tpu.matmul %99, %101, %cst_68 {dimension_numbers = #tpu.dot_dimension_numbers<[1], [0], [0], [1], [0, 0, 1, 1], [], []>} : vector<128x128xf32>, vector<128x128xf32>, vector<128x128xf32> -> vector<128x128xf32>
      %103 = arith.addf %95, %102 : vector<128x128xf32>
      %c0_69 = arith.constant 0 : index
      %c0_70 = arith.constant 0 : index
      %104 = vector.load %arg11[%c0_69, %c0_70] : memref<128x128xf32, #tpu.memory_space<vmem>>, vector<128x128xf32>
      tpu.vector_store %arg11[%c0_69, %c0_70], %103 {strides = array<i32>} : memref<128x128xf32, #tpu.memory_space<vmem>>, vector<128x128xf32>,
    } else {
    }
    %c1_i32_19 = arith.constant 1 : i32
    %36 = arith.cmpi sge, %1, %c1_i32_19 : i32
    %37 = arith.extui %36 : i1 to i32
    %c0_i32_20 = arith.constant 0 : i32
    %38 = arith.cmpi ne, %37, %c0_i32_20 : i32
    scf.if %38 {
      %c0_61 = arith.constant 0 : index
      %c0_62 = arith.constant 0 : index
      %95 = vector.load %arg11[%c0_61, %c0_62] : memref<128x128xf32, #tpu.memory_space<vmem>>, vector<128x128xf32>
      %c1_i32_63 = arith.constant 1 : i32
      %96 = arith.addi %6, %c1_i32_63 : i32
      %97 = arith.index_cast %96 : i32 to index
      %c2_64 = arith.constant 2 : index
      %c0_65 = arith.constant 0 : index
      %98 = vector.load %arg10[%97, %c2_64, %c0_65] : memref<20x20x128xf32, #tpu.memory_space<vmem>>, vector<8x16x128xf32>
      %99 = vector.shape_cast %98 : vector<8x16x128xf32> to vector<128x128xf32>
      %c0_66 = arith.constant 0 : index
      %c7 = arith.constant 7 : index
      %c0_67 = arith.constant 0 : index
      %c0_68 = arith.constant 0 : index
      %100 = vector.load %arg7[%c0_66, %c7, %c0_67, %c0_68] : memref<1x25x128x128xf32, #tpu.memory_space<vmem>>, vector<1x1x128x128xf32>
      %101 = vector.shape_cast %100 : vector<1x1x128x128xf32> to vector<128x128xf32>
      %cst_69 = arith.constant dense<0.000000e+00> : vector<128x128xf32>
      %102 = tpu.matmul %99, %101, %cst_69 {dimension_numbers = #tpu.dot_dimension_numbers<[1], [0], [0], [1], [0, 0, 1, 1], [], []>} : vector<128x128xf32>, vector<128x128xf32>, vector<128x128xf32> -> vector<128x128xf32>
      %103 = arith.addf %95, %102 : vector<128x128xf32>
      %c0_70 = arith.constant 0 : index
      %c0_71 = arith.constant 0 : index
      %104 = vector.load %arg11[%c0_70, %c0_71] : memref<128x128xf32, #tpu.memory_space<vmem>>, vector<128x128xf32>
      tpu.vector_store %arg11[%c0_70, %c0_71], %103 {strides = array<i32>} : memref<128x128xf32, #tpu.memory_space<vmem>>, vector<128x128xf32>,
    } else {
    }
    %c1_i32_21 = arith.constant 1 : i32
    %39 = arith.cmpi sge, %1, %c1_i32_21 : i32
    %40 = arith.extui %39 : i1 to i32
    %c0_i32_22 = arith.constant 0 : i32
    %41 = arith.cmpi ne, %40, %c0_i32_22 : i32
    scf.if %41 {
      %c0_61 = arith.constant 0 : index
      %c0_62 = arith.constant 0 : index
      %95 = vector.load %arg11[%c0_61, %c0_62] : memref<128x128xf32, #tpu.memory_space<vmem>>, vector<128x128xf32>
      %c1_i32_63 = arith.constant 1 : i32
      %96 = arith.addi %6, %c1_i32_63 : i32
      %97 = arith.index_cast %96 : i32 to index
      %c3 = arith.constant 3 : index
      %c0_64 = arith.constant 0 : index
      %98 = vector.load %arg10[%97, %c3, %c0_64] : memref<20x20x128xf32, #tpu.memory_space<vmem>>, vector<8x16x128xf32>
      %99 = vector.shape_cast %98 : vector<8x16x128xf32> to vector<128x128xf32>
      %c0_65 = arith.constant 0 : index
      %c8 = arith.constant 8 : index
      %c0_66 = arith.constant 0 : index
      %c0_67 = arith.constant 0 : index
      %100 = vector.load %arg7[%c0_65, %c8, %c0_66, %c0_67] : memref<1x25x128x128xf32, #tpu.memory_space<vmem>>, vector<1x1x128x128xf32>
      %101 = vector.shape_cast %100 : vector<1x1x128x128xf32> to vector<128x128xf32>
      %cst_68 = arith.constant dense<0.000000e+00> : vector<128x128xf32>
      %102 = tpu.matmul %99, %101, %cst_68 {dimension_numbers = #tpu.dot_dimension_numbers<[1], [0], [0], [1], [0, 0, 1, 1], [], []>} : vector<128x128xf32>, vector<128x128xf32>, vector<128x128xf32> -> vector<128x128xf32>
      %103 = arith.addf %95, %102 : vector<128x128xf32>
      %c0_69 = arith.constant 0 : index
      %c0_70 = arith.constant 0 : index
      %104 = vector.load %arg11[%c0_69, %c0_70] : memref<128x128xf32, #tpu.memory_space<vmem>>, vector<128x128xf32>
      tpu.vector_store %arg11[%c0_69, %c0_70], %103 {strides = array<i32>} : memref<128x128xf32, #tpu.memory_space<vmem>>, vector<128x128xf32>,
    } else {
    }
    %c2_i32_23 = arith.constant 2 : i32
    %42 = arith.cmpi sge, %1, %c2_i32_23 : i32
    %43 = arith.extui %42 : i1 to i32
    %c0_i32_24 = arith.constant 0 : i32
    %44 = arith.cmpi ne, %43, %c0_i32_24 : i32
    scf.if %44 {
      %c0_61 = arith.constant 0 : index
      %c0_62 = arith.constant 0 : index
      %95 = vector.load %arg11[%c0_61, %c0_62] : memref<128x128xf32, #tpu.memory_space<vmem>>, vector<128x128xf32>
      %c1_i32_63 = arith.constant 1 : i32
      %96 = arith.addi %6, %c1_i32_63 : i32
      %97 = arith.index_cast %96 : i32 to index
      %c4 = arith.constant 4 : index
      %c0_64 = arith.constant 0 : index
      %98 = vector.load %arg10[%97, %c4, %c0_64] : memref<20x20x128xf32, #tpu.memory_space<vmem>>, vector<8x16x128xf32>
      %99 = vector.shape_cast %98 : vector<8x16x128xf32> to vector<128x128xf32>
      %c0_65 = arith.constant 0 : index
      %c9 = arith.constant 9 : index
      %c0_66 = arith.constant 0 : index
      %c0_67 = arith.constant 0 : index
      %100 = vector.load %arg7[%c0_65, %c9, %c0_66, %c0_67] : memref<1x25x128x128xf32, #tpu.memory_space<vmem>>, vector<1x1x128x128xf32>
      %101 = vector.shape_cast %100 : vector<1x1x128x128xf32> to vector<128x128xf32>
      %cst_68 = arith.constant dense<0.000000e+00> : vector<128x128xf32>
      %102 = tpu.matmul %99, %101, %cst_68 {dimension_numbers = #tpu.dot_dimension_numbers<[1], [0], [0], [1], [0, 0, 1, 1], [], []>} : vector<128x128xf32>, vector<128x128xf32>, vector<128x128xf32> -> vector<128x128xf32>
      %103 = arith.addf %95, %102 : vector<128x128xf32>
      %c0_69 = arith.constant 0 : index
      %c0_70 = arith.constant 0 : index
      %104 = vector.load %arg11[%c0_69, %c0_70] : memref<128x128xf32, #tpu.memory_space<vmem>>, vector<128x128xf32>
      tpu.vector_store %arg11[%c0_69, %c0_70], %103 {strides = array<i32>} : memref<128x128xf32, #tpu.memory_space<vmem>>, vector<128x128xf32>,
    } else {
    }
    %c2_i32_25 = arith.constant 2 : i32
    %45 = arith.cmpi sge, %1, %c2_i32_25 : i32
    %46 = arith.extui %45 : i1 to i32
    %c0_i32_26 = arith.constant 0 : i32
    %47 = arith.cmpi ne, %46, %c0_i32_26 : i32
    scf.if %47 {
      %c0_61 = arith.constant 0 : index
      %c0_62 = arith.constant 0 : index
      %95 = vector.load %arg11[%c0_61, %c0_62] : memref<128x128xf32, #tpu.memory_space<vmem>>, vector<128x128xf32>
      %c2_i32_63 = arith.constant 2 : i32
      %96 = arith.addi %6, %c2_i32_63 : i32
      %97 = arith.index_cast %96 : i32 to index
      %c0_64 = arith.constant 0 : index
      %c0_65 = arith.constant 0 : index
      %98 = vector.load %arg10[%97, %c0_64, %c0_65] : memref<20x20x128xf32, #tpu.memory_space<vmem>>, vector<8x16x128xf32>
      %99 = vector.shape_cast %98 : vector<8x16x128xf32> to vector<128x128xf32>
      %c0_66 = arith.constant 0 : index
      %c10 = arith.constant 10 : index
      %c0_67 = arith.constant 0 : index
      %c0_68 = arith.constant 0 : index
      %100 = vector.load %arg7[%c0_66, %c10, %c0_67, %c0_68] : memref<1x25x128x128xf32, #tpu.memory_space<vmem>>, vector<1x1x128x128xf32>
      %101 = vector.shape_cast %100 : vector<1x1x128x128xf32> to vector<128x128xf32>
      %cst_69 = arith.constant dense<0.000000e+00> : vector<128x128xf32>
      %102 = tpu.matmul %99, %101, %cst_69 {dimension_numbers = #tpu.dot_dimension_numbers<[1], [0], [0], [1], [0, 0, 1, 1], [], []>} : vector<128x128xf32>, vector<128x128xf32>, vector<128x128xf32> -> vector<128x128xf32>
      %103 = arith.addf %95, %102 : vector<128x128xf32>
      %c0_70 = arith.constant 0 : index
      %c0_71 = arith.constant 0 : index
      %104 = vector.load %arg11[%c0_70, %c0_71] : memref<128x128xf32, #tpu.memory_space<vmem>>, vector<128x128xf32>
      tpu.vector_store %arg11[%c0_70, %c0_71], %103 {strides = array<i32>} : memref<128x128xf32, #tpu.memory_space<vmem>>, vector<128x128xf32>,
    } else {
    }
    %c1_i32_27 = arith.constant 1 : i32
    %48 = arith.cmpi sge, %1, %c1_i32_27 : i32
    %49 = arith.extui %48 : i1 to i32
    %c0_i32_28 = arith.constant 0 : i32
    %50 = arith.cmpi ne, %49, %c0_i32_28 : i32
    scf.if %50 {
      %c0_61 = arith.constant 0 : index
      %c0_62 = arith.constant 0 : index
      %95 = vector.load %arg11[%c0_61, %c0_62] : memref<128x128xf32, #tpu.memory_space<vmem>>, vector<128x128xf32>
      %c2_i32_63 = arith.constant 2 : i32
      %96 = arith.addi %6, %c2_i32_63 : i32
      %97 = arith.index_cast %96 : i32 to index
      %c1 = arith.constant 1 : index
      %c0_64 = arith.constant 0 : index
      %98 = vector.load %arg10[%97, %c1, %c0_64] : memref<20x20x128xf32, #tpu.memory_space<vmem>>, vector<8x16x128xf32>
      %99 = vector.shape_cast %98 : vector<8x16x128xf32> to vector<128x128xf32>
      %c0_65 = arith.constant 0 : index
      %c11 = arith.constant 11 : index
      %c0_66 = arith.constant 0 : index
      %c0_67 = arith.constant 0 : index
      %100 = vector.load %arg7[%c0_65, %c11, %c0_66, %c0_67] : memref<1x25x128x128xf32, #tpu.memory_space<vmem>>, vector<1x1x128x128xf32>
      %101 = vector.shape_cast %100 : vector<1x1x128x128xf32> to vector<128x128xf32>
      %cst_68 = arith.constant dense<0.000000e+00> : vector<128x128xf32>
      %102 = tpu.matmul %99, %101, %cst_68 {dimension_numbers = #tpu.dot_dimension_numbers<[1], [0], [0], [1], [0, 0, 1, 1], [], []>} : vector<128x128xf32>, vector<128x128xf32>, vector<128x128xf32> -> vector<128x128xf32>
      %103 = arith.addf %95, %102 : vector<128x128xf32>
      %c0_69 = arith.constant 0 : index
      %c0_70 = arith.constant 0 : index
      %104 = vector.load %arg11[%c0_69, %c0_70] : memref<128x128xf32, #tpu.memory_space<vmem>>, vector<128x128xf32>
      tpu.vector_store %arg11[%c0_69, %c0_70], %103 {strides = array<i32>} : memref<128x128xf32, #tpu.memory_space<vmem>>, vector<128x128xf32>,
    } else {
    }
    %c1_i32_29 = arith.constant 1 : i32
    %51 = arith.cmpi sge, %1, %c1_i32_29 : i32
    %52 = arith.extui %51 : i1 to i32
    %c0_i32_30 = arith.constant 0 : i32
    %53 = arith.cmpi ne, %52, %c0_i32_30 : i32
    scf.if %53 {
      %c0_61 = arith.constant 0 : index
      %c0_62 = arith.constant 0 : index
      %95 = vector.load %arg11[%c0_61, %c0_62] : memref<128x128xf32, #tpu.memory_space<vmem>>, vector<128x128xf32>
      %c2_i32_63 = arith.constant 2 : i32
      %96 = arith.addi %6, %c2_i32_63 : i32
      %97 = arith.index_cast %96 : i32 to index
      %c3 = arith.constant 3 : index
      %c0_64 = arith.constant 0 : index
      %98 = vector.load %arg10[%97, %c3, %c0_64] : memref<20x20x128xf32, #tpu.memory_space<vmem>>, vector<8x16x128xf32>
      %99 = vector.shape_cast %98 : vector<8x16x128xf32> to vector<128x128xf32>
      %c0_65 = arith.constant 0 : index
      %c13 = arith.constant 13 : index
      %c0_66 = arith.constant 0 : index
      %c0_67 = arith.constant 0 : index
      %100 = vector.load %arg7[%c0_65, %c13, %c0_66, %c0_67] : memref<1x25x128x128xf32, #tpu.memory_space<vmem>>, vector<1x1x128x128xf32>
      %101 = vector.shape_cast %100 : vector<1x1x128x128xf32> to vector<128x128xf32>
      %cst_68 = arith.constant dense<0.000000e+00> : vector<128x128xf32>
      %102 = tpu.matmul %99, %101, %cst_68 {dimension_numbers = #tpu.dot_dimension_numbers<[1], [0], [0], [1], [0, 0, 1, 1], [], []>} : vector<128x128xf32>, vector<128x128xf32>, vector<128x128xf32> -> vector<128x128xf32>
      %103 = arith.addf %95, %102 : vector<128x128xf32>
      %c0_69 = arith.constant 0 : index
      %c0_70 = arith.constant 0 : index
      %104 = vector.load %arg11[%c0_69, %c0_70] : memref<128x128xf32, #tpu.memory_space<vmem>>, vector<128x128xf32>
      tpu.vector_store %arg11[%c0_69, %c0_70], %103 {strides = array<i32>} : memref<128x128xf32, #tpu.memory_space<vmem>>, vector<128x128xf32>,
    } else {
    }
    %c2_i32_31 = arith.constant 2 : i32
    %54 = arith.cmpi sge, %1, %c2_i32_31 : i32
    %55 = arith.extui %54 : i1 to i32
    %c0_i32_32 = arith.constant 0 : i32
    %56 = arith.cmpi ne, %55, %c0_i32_32 : i32
    scf.if %56 {
      %c0_61 = arith.constant 0 : index
      %c0_62 = arith.constant 0 : index
      %95 = vector.load %arg11[%c0_61, %c0_62] : memref<128x128xf32, #tpu.memory_space<vmem>>, vector<128x128xf32>
      %c2_i32_63 = arith.constant 2 : i32
      %96 = arith.addi %6, %c2_i32_63 : i32
      %97 = arith.index_cast %96 : i32 to index
      %c4 = arith.constant 4 : index
      %c0_64 = arith.constant 0 : index
      %98 = vector.load %arg10[%97, %c4, %c0_64] : memref<20x20x128xf32, #tpu.memory_space<vmem>>, vector<8x16x128xf32>
      %99 = vector.shape_cast %98 : vector<8x16x128xf32> to vector<128x128xf32>
      %c0_65 = arith.constant 0 : index
      %c14 = arith.constant 14 : index
      %c0_66 = arith.constant 0 : index
      %c0_67 = arith.constant 0 : index
      %100 = vector.load %arg7[%c0_65, %c14, %c0_66, %c0_67] : memref<1x25x128x128xf32, #tpu.memory_space<vmem>>, vector<1x1x128x128xf32>
      %101 = vector.shape_cast %100 : vector<1x1x128x128xf32> to vector<128x128xf32>
      %cst_68 = arith.constant dense<0.000000e+00> : vector<128x128xf32>
      %102 = tpu.matmul %99, %101, %cst_68 {dimension_numbers = #tpu.dot_dimension_numbers<[1], [0], [0], [1], [0, 0, 1, 1], [], []>} : vector<128x128xf32>, vector<128x128xf32>, vector<128x128xf32> -> vector<128x128xf32>
      %103 = arith.addf %95, %102 : vector<128x128xf32>
      %c0_69 = arith.constant 0 : index
      %c0_70 = arith.constant 0 : index
      %104 = vector.load %arg11[%c0_69, %c0_70] : memref<128x128xf32, #tpu.memory_space<vmem>>, vector<128x128xf32>
      tpu.vector_store %arg11[%c0_69, %c0_70], %103 {strides = array<i32>} : memref<128x128xf32, #tpu.memory_space<vmem>>, vector<128x128xf32>,
    } else {
    }
    %c2_i32_33 = arith.constant 2 : i32
    %57 = arith.cmpi sge, %1, %c2_i32_33 : i32
    %58 = arith.extui %57 : i1 to i32
    %c0_i32_34 = arith.constant 0 : i32
    %59 = arith.cmpi ne, %58, %c0_i32_34 : i32
    scf.if %59 {
      %c0_61 = arith.constant 0 : index
      %c0_62 = arith.constant 0 : index
      %95 = vector.load %arg11[%c0_61, %c0_62] : memref<128x128xf32, #tpu.memory_space<vmem>>, vector<128x128xf32>
      %c3_i32 = arith.constant 3 : i32
      %96 = arith.addi %6, %c3_i32 : i32
      %97 = arith.index_cast %96 : i32 to index
      %c0_63 = arith.constant 0 : index
      %c0_64 = arith.constant 0 : index
      %98 = vector.load %arg10[%97, %c0_63, %c0_64] : memref<20x20x128xf32, #tpu.memory_space<vmem>>, vector<8x16x128xf32>
      %99 = vector.shape_cast %98 : vector<8x16x128xf32> to vector<128x128xf32>
      %c0_65 = arith.constant 0 : index
      %c15 = arith.constant 15 : index
      %c0_66 = arith.constant 0 : index
      %c0_67 = arith.constant 0 : index
      %100 = vector.load %arg7[%c0_65, %c15, %c0_66, %c0_67] : memref<1x25x128x128xf32, #tpu.memory_space<vmem>>, vector<1x1x128x128xf32>
      %101 = vector.shape_cast %100 : vector<1x1x128x128xf32> to vector<128x128xf32>
      %cst_68 = arith.constant dense<0.000000e+00> : vector<128x128xf32>
      %102 = tpu.matmul %99, %101, %cst_68 {dimension_numbers = #tpu.dot_dimension_numbers<[1], [0], [0], [1], [0, 0, 1, 1], [], []>} : vector<128x128xf32>, vector<128x128xf32>, vector<128x128xf32> -> vector<128x128xf32>
      %103 = arith.addf %95, %102 : vector<128x128xf32>
      %c0_69 = arith.constant 0 : index
      %c0_70 = arith.constant 0 : index
      %104 = vector.load %arg11[%c0_69, %c0_70] : memref<128x128xf32, #tpu.memory_space<vmem>>, vector<128x128xf32>
      tpu.vector_store %arg11[%c0_69, %c0_70], %103 {strides = array<i32>} : memref<128x128xf32, #tpu.memory_space<vmem>>, vector<128x128xf32>,
    } else {
    }
    %c1_i32_35 = arith.constant 1 : i32
    %60 = arith.cmpi sge, %1, %c1_i32_35 : i32
    %61 = arith.extui %60 : i1 to i32
    %c0_i32_36 = arith.constant 0 : i32
    %62 = arith.cmpi ne, %61, %c0_i32_36 : i32
    scf.if %62 {
      %c0_61 = arith.constant 0 : index
      %c0_62 = arith.constant 0 : index
      %95 = vector.load %arg11[%c0_61, %c0_62] : memref<128x128xf32, #tpu.memory_space<vmem>>, vector<128x128xf32>
      %c3_i32 = arith.constant 3 : i32
      %96 = arith.addi %6, %c3_i32 : i32
      %97 = arith.index_cast %96 : i32 to index
      %c1 = arith.constant 1 : index
      %c0_63 = arith.constant 0 : index
      %98 = vector.load %arg10[%97, %c1, %c0_63] : memref<20x20x128xf32, #tpu.memory_space<vmem>>, vector<8x16x128xf32>
      %99 = vector.shape_cast %98 : vector<8x16x128xf32> to vector<128x128xf32>
      %c0_64 = arith.constant 0 : index
      %c16 = arith.constant 16 : index
      %c0_65 = arith.constant 0 : index
      %c0_66 = arith.constant 0 : index
      %100 = vector.load %arg7[%c0_64, %c16, %c0_65, %c0_66] : memref<1x25x128x128xf32, #tpu.memory_space<vmem>>, vector<1x1x128x128xf32>
      %101 = vector.shape_cast %100 : vector<1x1x128x128xf32> to vector<128x128xf32>
      %cst_67 = arith.constant dense<0.000000e+00> : vector<128x128xf32>
      %102 = tpu.matmul %99, %101, %cst_67 {dimension_numbers = #tpu.dot_dimension_numbers<[1], [0], [0], [1], [0, 0, 1, 1], [], []>} : vector<128x128xf32>, vector<128x128xf32>, vector<128x128xf32> -> vector<128x128xf32>
      %103 = arith.addf %95, %102 : vector<128x128xf32>
      %c0_68 = arith.constant 0 : index
      %c0_69 = arith.constant 0 : index
      %104 = vector.load %arg11[%c0_68, %c0_69] : memref<128x128xf32, #tpu.memory_space<vmem>>, vector<128x128xf32>
      tpu.vector_store %arg11[%c0_68, %c0_69], %103 {strides = array<i32>} : memref<128x128xf32, #tpu.memory_space<vmem>>, vector<128x128xf32>,
    } else {
    }
    %c1_i32_37 = arith.constant 1 : i32
    %63 = arith.cmpi sge, %1, %c1_i32_37 : i32
    %64 = arith.extui %63 : i1 to i32
    %c0_i32_38 = arith.constant 0 : i32
    %65 = arith.cmpi ne, %64, %c0_i32_38 : i32
    scf.if %65 {
      %c0_61 = arith.constant 0 : index
      %c0_62 = arith.constant 0 : index
      %95 = vector.load %arg11[%c0_61, %c0_62] : memref<128x128xf32, #tpu.memory_space<vmem>>, vector<128x128xf32>
      %c3_i32 = arith.constant 3 : i32
      %96 = arith.addi %6, %c3_i32 : i32
      %97 = arith.index_cast %96 : i32 to index
      %c2_63 = arith.constant 2 : index
      %c0_64 = arith.constant 0 : index
      %98 = vector.load %arg10[%97, %c2_63, %c0_64] : memref<20x20x128xf32, #tpu.memory_space<vmem>>, vector<8x16x128xf32>
      %99 = vector.shape_cast %98 : vector<8x16x128xf32> to vector<128x128xf32>
      %c0_65 = arith.constant 0 : index
      %c17 = arith.constant 17 : index
      %c0_66 = arith.constant 0 : index
      %c0_67 = arith.constant 0 : index
      %100 = vector.load %arg7[%c0_65, %c17, %c0_66, %c0_67] : memref<1x25x128x128xf32, #tpu.memory_space<vmem>>, vector<1x1x128x128xf32>
      %101 = vector.shape_cast %100 : vector<1x1x128x128xf32> to vector<128x128xf32>
      %cst_68 = arith.constant dense<0.000000e+00> : vector<128x128xf32>
      %102 = tpu.matmul %99, %101, %cst_68 {dimension_numbers = #tpu.dot_dimension_numbers<[1], [0], [0], [1], [0, 0, 1, 1], [], []>} : vector<128x128xf32>, vector<128x128xf32>, vector<128x128xf32> -> vector<128x128xf32>
      %103 = arith.addf %95, %102 : vector<128x128xf32>
      %c0_69 = arith.constant 0 : index
      %c0_70 = arith.constant 0 : index
      %104 = vector.load %arg11[%c0_69, %c0_70] : memref<128x128xf32, #tpu.memory_space<vmem>>, vector<128x128xf32>
      tpu.vector_store %arg11[%c0_69, %c0_70], %103 {strides = array<i32>} : memref<128x128xf32, #tpu.memory_space<vmem>>, vector<128x128xf32>,
    } else {
    }
    %c1_i32_39 = arith.constant 1 : i32
    %66 = arith.cmpi sge, %1, %c1_i32_39 : i32
    %67 = arith.extui %66 : i1 to i32
    %c0_i32_40 = arith.constant 0 : i32
    %68 = arith.cmpi ne, %67, %c0_i32_40 : i32
    scf.if %68 {
      %c0_61 = arith.constant 0 : index
      %c0_62 = arith.constant 0 : index
      %95 = vector.load %arg11[%c0_61, %c0_62] : memref<128x128xf32, #tpu.memory_space<vmem>>, vector<128x128xf32>
      %c3_i32 = arith.constant 3 : i32
      %96 = arith.addi %6, %c3_i32 : i32
      %97 = arith.index_cast %96 : i32 to index
      %c3 = arith.constant 3 : index
      %c0_63 = arith.constant 0 : index
      %98 = vector.load %arg10[%97, %c3, %c0_63] : memref<20x20x128xf32, #tpu.memory_space<vmem>>, vector<8x16x128xf32>
      %99 = vector.shape_cast %98 : vector<8x16x128xf32> to vector<128x128xf32>
      %c0_64 = arith.constant 0 : index
      %c18 = arith.constant 18 : index
      %c0_65 = arith.constant 0 : index
      %c0_66 = arith.constant 0 : index
      %100 = vector.load %arg7[%c0_64, %c18, %c0_65, %c0_66] : memref<1x25x128x128xf32, #tpu.memory_space<vmem>>, vector<1x1x128x128xf32>
      %101 = vector.shape_cast %100 : vector<1x1x128x128xf32> to vector<128x128xf32>
      %cst_67 = arith.constant dense<0.000000e+00> : vector<128x128xf32>
      %102 = tpu.matmul %99, %101, %cst_67 {dimension_numbers = #tpu.dot_dimension_numbers<[1], [0], [0], [1], [0, 0, 1, 1], [], []>} : vector<128x128xf32>, vector<128x128xf32>, vector<128x128xf32> -> vector<128x128xf32>
      %103 = arith.addf %95, %102 : vector<128x128xf32>
      %c0_68 = arith.constant 0 : index
      %c0_69 = arith.constant 0 : index
      %104 = vector.load %arg11[%c0_68, %c0_69] : memref<128x128xf32, #tpu.memory_space<vmem>>, vector<128x128xf32>
      tpu.vector_store %arg11[%c0_68, %c0_69], %103 {strides = array<i32>} : memref<128x128xf32, #tpu.memory_space<vmem>>, vector<128x128xf32>,
    } else {
    }
    %c2_i32_41 = arith.constant 2 : i32
    %69 = arith.cmpi sge, %1, %c2_i32_41 : i32
    %70 = arith.extui %69 : i1 to i32
    %c0_i32_42 = arith.constant 0 : i32
    %71 = arith.cmpi ne, %70, %c0_i32_42 : i32
    scf.if %71 {
      %c0_61 = arith.constant 0 : index
      %c0_62 = arith.constant 0 : index
      %95 = vector.load %arg11[%c0_61, %c0_62] : memref<128x128xf32, #tpu.memory_space<vmem>>, vector<128x128xf32>
      %c3_i32 = arith.constant 3 : i32
      %96 = arith.addi %6, %c3_i32 : i32
      %97 = arith.index_cast %96 : i32 to index
      %c4 = arith.constant 4 : index
      %c0_63 = arith.constant 0 : index
      %98 = vector.load %arg10[%97, %c4, %c0_63] : memref<20x20x128xf32, #tpu.memory_space<vmem>>, vector<8x16x128xf32>
      %99 = vector.shape_cast %98 : vector<8x16x128xf32> to vector<128x128xf32>
      %c0_64 = arith.constant 0 : index
      %c19 = arith.constant 19 : index
      %c0_65 = arith.constant 0 : index
      %c0_66 = arith.constant 0 : index
      %100 = vector.load %arg7[%c0_64, %c19, %c0_65, %c0_66] : memref<1x25x128x128xf32, #tpu.memory_space<vmem>>, vector<1x1x128x128xf32>
      %101 = vector.shape_cast %100 : vector<1x1x128x128xf32> to vector<128x128xf32>
      %cst_67 = arith.constant dense<0.000000e+00> : vector<128x128xf32>
      %102 = tpu.matmul %99, %101, %cst_67 {dimension_numbers = #tpu.dot_dimension_numbers<[1], [0], [0], [1], [0, 0, 1, 1], [], []>} : vector<128x128xf32>, vector<128x128xf32>, vector<128x128xf32> -> vector<128x128xf32>
      %103 = arith.addf %95, %102 : vector<128x128xf32>
      %c0_68 = arith.constant 0 : index
      %c0_69 = arith.constant 0 : index
      %104 = vector.load %arg11[%c0_68, %c0_69] : memref<128x128xf32, #tpu.memory_space<vmem>>, vector<128x128xf32>
      tpu.vector_store %arg11[%c0_68, %c0_69], %103 {strides = array<i32>} : memref<128x128xf32, #tpu.memory_space<vmem>>, vector<128x128xf32>,
    } else {
    }
    %c2_i32_43 = arith.constant 2 : i32
    %72 = arith.cmpi sge, %1, %c2_i32_43 : i32
    %73 = arith.extui %72 : i1 to i32
    %c0_i32_44 = arith.constant 0 : i32
    %74 = arith.cmpi ne, %73, %c0_i32_44 : i32
    scf.if %74 {
      %c0_61 = arith.constant 0 : index
      %c0_62 = arith.constant 0 : index
      %95 = vector.load %arg11[%c0_61, %c0_62] : memref<128x128xf32, #tpu.memory_space<vmem>>, vector<128x128xf32>
      %c4_i32 = arith.constant 4 : i32
      %96 = arith.addi %6, %c4_i32 : i32
      %97 = arith.index_cast %96 : i32 to index
      %c0_63 = arith.constant 0 : index
      %c0_64 = arith.constant 0 : index
      %98 = vector.load %arg10[%97, %c0_63, %c0_64] : memref<20x20x128xf32, #tpu.memory_space<vmem>>, vector<8x16x128xf32>
      %99 = vector.shape_cast %98 : vector<8x16x128xf32> to vector<128x128xf32>
      %c0_65 = arith.constant 0 : index
      %c20 = arith.constant 20 : index
      %c0_66 = arith.constant 0 : index
      %c0_67 = arith.constant 0 : index
      %100 = vector.load %arg7[%c0_65, %c20, %c0_66, %c0_67] : memref<1x25x128x128xf32, #tpu.memory_space<vmem>>, vector<1x1x128x128xf32>
      %101 = vector.shape_cast %100 : vector<1x1x128x128xf32> to vector<128x128xf32>
      %cst_68 = arith.constant dense<0.000000e+00> : vector<128x128xf32>
      %102 = tpu.matmul %99, %101, %cst_68 {dimension_numbers = #tpu.dot_dimension_numbers<[1], [0], [0], [1], [0, 0, 1, 1], [], []>} : vector<128x128xf32>, vector<128x128xf32>, vector<128x128xf32> -> vector<128x128xf32>
      %103 = arith.addf %95, %102 : vector<128x128xf32>
      %c0_69 = arith.constant 0 : index
      %c0_70 = arith.constant 0 : index
      %104 = vector.load %arg11[%c0_69, %c0_70] : memref<128x128xf32, #tpu.memory_space<vmem>>, vector<128x128xf32>
      tpu.vector_store %arg11[%c0_69, %c0_70], %103 {strides = array<i32>} : memref<128x128xf32, #tpu.memory_space<vmem>>, vector<128x128xf32>,
    } else {
    }
    %c2_i32_45 = arith.constant 2 : i32
    %75 = arith.cmpi sge, %1, %c2_i32_45 : i32
    %76 = arith.extui %75 : i1 to i32
    %c0_i32_46 = arith.constant 0 : i32
    %77 = arith.cmpi ne, %76, %c0_i32_46 : i32
    scf.if %77 {
      %c0_61 = arith.constant 0 : index
      %c0_62 = arith.constant 0 : index
      %95 = vector.load %arg11[%c0_61, %c0_62] : memref<128x128xf32, #tpu.memory_space<vmem>>, vector<128x128xf32>
      %c4_i32 = arith.constant 4 : i32
      %96 = arith.addi %6, %c4_i32 : i32
      %97 = arith.index_cast %96 : i32 to index
      %c1 = arith.constant 1 : index
      %c0_63 = arith.constant 0 : index
      %98 = vector.load %arg10[%97, %c1, %c0_63] : memref<20x20x128xf32, #tpu.memory_space<vmem>>, vector<8x16x128xf32>
      %99 = vector.shape_cast %98 : vector<8x16x128xf32> to vector<128x128xf32>
      %c0_64 = arith.constant 0 : index
      %c21 = arith.constant 21 : index
      %c0_65 = arith.constant 0 : index
      %c0_66 = arith.constant 0 : index
      %100 = vector.load %arg7[%c0_64, %c21, %c0_65, %c0_66] : memref<1x25x128x128xf32, #tpu.memory_space<vmem>>, vector<1x1x128x128xf32>
      %101 = vector.shape_cast %100 : vector<1x1x128x128xf32> to vector<128x128xf32>
      %cst_67 = arith.constant dense<0.000000e+00> : vector<128x128xf32>
      %102 = tpu.matmul %99, %101, %cst_67 {dimension_numbers = #tpu.dot_dimension_numbers<[1], [0], [0], [1], [0, 0, 1, 1], [], []>} : vector<128x128xf32>, vector<128x128xf32>, vector<128x128xf32> -> vector<128x128xf32>
      %103 = arith.addf %95, %102 : vector<128x128xf32>
      %c0_68 = arith.constant 0 : index
      %c0_69 = arith.constant 0 : index
      %104 = vector.load %arg11[%c0_68, %c0_69] : memref<128x128xf32, #tpu.memory_space<vmem>>, vector<128x128xf32>
      tpu.vector_store %arg11[%c0_68, %c0_69], %103 {strides = array<i32>} : memref<128x128xf32, #tpu.memory_space<vmem>>, vector<128x128xf32>,
    } else {
    }
    %c2_i32_47 = arith.constant 2 : i32
    %78 = arith.cmpi sge, %1, %c2_i32_47 : i32
    %79 = arith.extui %78 : i1 to i32
    %c0_i32_48 = arith.constant 0 : i32
    %80 = arith.cmpi ne, %79, %c0_i32_48 : i32
    scf.if %80 {
      %c0_61 = arith.constant 0 : index
      %c0_62 = arith.constant 0 : index
      %95 = vector.load %arg11[%c0_61, %c0_62] : memref<128x128xf32, #tpu.memory_space<vmem>>, vector<128x128xf32>
      %c4_i32 = arith.constant 4 : i32
      %96 = arith.addi %6, %c4_i32 : i32
      %97 = arith.index_cast %96 : i32 to index
      %c2_63 = arith.constant 2 : index
      %c0_64 = arith.constant 0 : index
      %98 = vector.load %arg10[%97, %c2_63, %c0_64] : memref<20x20x128xf32, #tpu.memory_space<vmem>>, vector<8x16x128xf32>
      %99 = vector.shape_cast %98 : vector<8x16x128xf32> to vector<128x128xf32>
      %c0_65 = arith.constant 0 : index
      %c22 = arith.constant 22 : index
      %c0_66 = arith.constant 0 : index
      %c0_67 = arith.constant 0 : index
      %100 = vector.load %arg7[%c0_65, %c22, %c0_66, %c0_67] : memref<1x25x128x128xf32, #tpu.memory_space<vmem>>, vector<1x1x128x128xf32>
      %101 = vector.shape_cast %100 : vector<1x1x128x128xf32> to vector<128x128xf32>
      %cst_68 = arith.constant dense<0.000000e+00> : vector<128x128xf32>
      %102 = tpu.matmul %99, %101, %cst_68 {dimension_numbers = #tpu.dot_dimension_numbers<[1], [0], [0], [1], [0, 0, 1, 1], [], []>} : vector<128x128xf32>, vector<128x128xf32>, vector<128x128xf32> -> vector<128x128xf32>
      %103 = arith.addf %95, %102 : vector<128x128xf32>
      %c0_69 = arith.constant 0 : index
      %c0_70 = arith.constant 0 : index
      %104 = vector.load %arg11[%c0_69, %c0_70] : memref<128x128xf32, #tpu.memory_space<vmem>>, vector<128x128xf32>
      tpu.vector_store %arg11[%c0_69, %c0_70], %103 {strides = array<i32>} : memref<128x128xf32, #tpu.memory_space<vmem>>, vector<128x128xf32>,
    } else {
    }
    %c2_i32_49 = arith.constant 2 : i32
    %81 = arith.cmpi sge, %1, %c2_i32_49 : i32
    %82 = arith.extui %81 : i1 to i32
    %c0_i32_50 = arith.constant 0 : i32
    %83 = arith.cmpi ne, %82, %c0_i32_50 : i32
    scf.if %83 {
      %c0_61 = arith.constant 0 : index
      %c0_62 = arith.constant 0 : index
      %95 = vector.load %arg11[%c0_61, %c0_62] : memref<128x128xf32, #tpu.memory_space<vmem>>, vector<128x128xf32>
      %c4_i32 = arith.constant 4 : i32
      %96 = arith.addi %6, %c4_i32 : i32
      %97 = arith.index_cast %96 : i32 to index
      %c3 = arith.constant 3 : index
      %c0_63 = arith.constant 0 : index
      %98 = vector.load %arg10[%97, %c3, %c0_63] : memref<20x20x128xf32, #tpu.memory_space<vmem>>, vector<8x16x128xf32>
      %99 = vector.shape_cast %98 : vector<8x16x128xf32> to vector<128x128xf32>
      %c0_64 = arith.constant 0 : index
      %c23 = arith.constant 23 : index
      %c0_65 = arith.constant 0 : index
      %c0_66 = arith.constant 0 : index
      %100 = vector.load %arg7[%c0_64, %c23, %c0_65, %c0_66] : memref<1x25x128x128xf32, #tpu.memory_space<vmem>>, vector<1x1x128x128xf32>
      %101 = vector.shape_cast %100 : vector<1x1x128x128xf32> to vector<128x128xf32>
      %cst_67 = arith.constant dense<0.000000e+00> : vector<128x128xf32>
      %102 = tpu.matmul %99, %101, %cst_67 {dimension_numbers = #tpu.dot_dimension_numbers<[1], [0], [0], [1], [0, 0, 1, 1], [], []>} : vector<128x128xf32>, vector<128x128xf32>, vector<128x128xf32> -> vector<128x128xf32>
      %103 = arith.addf %95, %102 : vector<128x128xf32>
      %c0_68 = arith.constant 0 : index
      %c0_69 = arith.constant 0 : index
      %104 = vector.load %arg11[%c0_68, %c0_69] : memref<128x128xf32, #tpu.memory_space<vmem>>, vector<128x128xf32>
      tpu.vector_store %arg11[%c0_68, %c0_69], %103 {strides = array<i32>} : memref<128x128xf32, #tpu.memory_space<vmem>>, vector<128x128xf32>,
    } else {
    }
    %c2_i32_51 = arith.constant 2 : i32
    %84 = arith.cmpi sge, %1, %c2_i32_51 : i32
    %85 = arith.extui %84 : i1 to i32
    %c0_i32_52 = arith.constant 0 : i32
    %86 = arith.cmpi ne, %85, %c0_i32_52 : i32
    scf.if %86 {
      %c0_61 = arith.constant 0 : index
      %c0_62 = arith.constant 0 : index
      %95 = vector.load %arg11[%c0_61, %c0_62] : memref<128x128xf32, #tpu.memory_space<vmem>>, vector<128x128xf32>
      %c4_i32 = arith.constant 4 : i32
      %96 = arith.addi %6, %c4_i32 : i32
      %97 = arith.index_cast %96 : i32 to index
      %c4 = arith.constant 4 : index
      %c0_63 = arith.constant 0 : index
      %98 = vector.load %arg10[%97, %c4, %c0_63] : memref<20x20x128xf32, #tpu.memory_space<vmem>>, vector<8x16x128xf32>
      %99 = vector.shape_cast %98 : vector<8x16x128xf32> to vector<128x128xf32>
      %c0_64 = arith.constant 0 : index
      %c24 = arith.constant 24 : index
      %c0_65 = arith.constant 0 : index
      %c0_66 = arith.constant 0 : index
      %100 = vector.load %arg7[%c0_64, %c24, %c0_65, %c0_66] : memref<1x25x128x128xf32, #tpu.memory_space<vmem>>, vector<1x1x128x128xf32>
      %101 = vector.shape_cast %100 : vector<1x1x128x128xf32> to vector<128x128xf32>
      %cst_67 = arith.constant dense<0.000000e+00> : vector<128x128xf32>
      %102 = tpu.matmul %99, %101, %cst_67 {dimension_numbers = #tpu.dot_dimension_numbers<[1], [0], [0], [1], [0, 0, 1, 1], [], []>} : vector<128x128xf32>, vector<128x128xf32>, vector<128x128xf32> -> vector<128x128xf32>
      %103 = arith.addf %95, %102 : vector<128x128xf32>
      %c0_68 = arith.constant 0 : index
      %c0_69 = arith.constant 0 : index
      %104 = vector.load %arg11[%c0_68, %c0_69] : memref<128x128xf32, #tpu.memory_space<vmem>>, vector<128x128xf32>
      tpu.vector_store %arg11[%c0_68, %c0_69], %103 {strides = array<i32>} : memref<128x128xf32, #tpu.memory_space<vmem>>, vector<128x128xf32>,
    } else {
    }
    %c0_53 = arith.constant 0 : index
    %c0_54 = arith.constant 0 : index
    %87 = vector.load %arg11[%c0_53, %c0_54] : memref<128x128xf32, #tpu.memory_space<vmem>>, vector<128x128xf32>
    %c0_55 = arith.constant 0 : index
    %c0_56 = arith.constant 0 : index
    %c0_57 = arith.constant 0 : index
    %88 = vector.load %arg8[%c0_55, %c0_56, %c0_57] : memref<1x1x128xf32, #tpu.memory_space<vmem>>, vector<1x1x128xf32>
    %89 = vector.shape_cast %88 : vector<1x1x128xf32> to vector<1x128xf32>
    %90 = vector.broadcast %89 : vector<1x128xf32> to vector<128x128xf32>
    %91 = arith.addf %87, %90 : vector<128x128xf32>
    %c0_58 = arith.constant 0 : index
    %c0_59 = arith.constant 0 : index
    %c0_60 = arith.constant 0 : index
    %92 = vector.load %arg9[%c0_58, %c0_59, %c0_60] : memref<1x128x128xf32, #tpu.memory_space<vmem>>, vector<1x128x128xf32>
    %93 = vector.shape_cast %92 : vector<1x128x128xf32> to vector<128x128xf32>
    %94 = vector.shape_cast %91 : vector<128x128xf32> to vector<1x128x128xf32>
    tpu.vector_store %arg9[%c0_58, %c0_59, %c0_60], %94 {strides = array<i32>} : memref<1x128x128xf32, #tpu.memory_space<vmem>>, vector<1x128x128xf32>,
    return
  }
  func.func @transform_0(%arg0: i32, %arg1: i32, %arg2: memref<2xi32, #tpu.memory_space<smem>>, %arg3: memref<2xi32, #tpu.memory_space<smem>>) -> (i32, i32, i32, i32) {
    %c0_i32 = arith.constant 0 : i32
    %c0_i32_0 = arith.constant 0 : i32
    %c0_i32_1 = arith.constant 0 : i32
    %c0_i32_2 = arith.constant 0 : i32
    return %arg0, %c0_i32, %c0_i32_0, %c0_i32_1 : i32, i32, i32, i32
  }
  func.func @transform_1(%arg0: i32, %arg1: i32, %arg2: memref<2xi32, #tpu.memory_space<smem>>, %arg3: memref<2xi32, #tpu.memory_space<smem>>) -> (i32, i32, i32) {
    %c0_i32 = arith.constant 0 : i32
    %c0_i32_0 = arith.constant 0 : i32
    %c0_i32_1 = arith.constant 0 : i32
    return %arg0, %c0_i32, %c0_i32_0 : i32, i32, i32
  }
  func.func @transform_2(%arg0: i32, %arg1: i32, %arg2: memref<2xi32, #tpu.memory_space<smem>>, %arg3: memref<2xi32, #tpu.memory_space<smem>>) -> (i32, i32, i32) {
    %c0_i32 = arith.constant 0 : i32
    %c0_i32_0 = arith.constant 0 : i32
    %c0_i32_1 = arith.constant 0 : i32
    return %arg0, %c0_i32, %c0_i32_0 : i32, i32, i32
  }
  func.func @transform_3(%arg0: i32, %arg1: i32, %arg2: memref<2xi32, #tpu.memory_space<smem>>, %arg3: memref<2xi32, #tpu.memory_space<smem>>) -> (i32, i32, i32, i32) {
    %0 = arith.index_cast %arg0 : i32 to index
    %1 = memref.load %arg2[%0] : memref<2xi32, #tpu.memory_space<smem>>
    %c0_i32 = arith.constant 0 : i32
    %c0_i32_0 = arith.constant 0 : i32
    %c0_i32_1 = arith.constant 0 : i32
    %c0_i32_2 = arith.constant 0 : i32
    return %1, %c0_i32, %c0_i32_0, %c0_i32_1 : i32, i32, i32, i32
  }
  func.func @transform_4(%arg0: i32, %arg1: i32, %arg2: memref<2xi32, #tpu.memory_space<smem>>, %arg3: memref<2xi32, #tpu.memory_space<smem>>) -> (i32, i32, i32) {
    %0 = arith.index_cast %arg0 : i32 to index
    %1 = memref.load %arg2[%0] : memref<2xi32, #tpu.memory_space<smem>>
    %c0_i32 = arith.constant 0 : i32
    %c0_i32_0 = arith.constant 0 : i32
    %c0_i32_1 = arith.constant 0 : i32
    return %1, %c0_i32, %c0_i32_0 : i32, i32, i32
  }
  func.func @transform_5(%arg0: i32, %arg1: i32, %arg2: memref<2xi32, #tpu.memory_space<smem>>, %arg3: memref<2xi32, #tpu.memory_space<smem>>) -> (i32, i32, i32) {
    %c0_i32 = arith.constant 0 : i32
    %c0_i32_0 = arith.constant 0 : i32
    return %arg0, %arg1, %c0_i32 : i32, i32, i32
  }
}

</mosaic_0001>

<bundles_post_ra>
// kernel: tpu_custom_call.1
= control target key start
LH: loop header
LB: loop body
LE: loop exit
PB: predicated region body
PF: predicated region fallthrough
CT: control target
= control target key end

     0   :  { %s10149_s24 = smov [#allocation5]   ;;  %s10150_s27 = smov [#allocation6]   ;;  %s12088_s0 = inlined_call_operand.hbm [shape: s32[2], index: 0, kind: input, shape index: {}]   ;;  %s12089_s2 = inlined_call_operand.hbm [shape: f32[2,16,16,128], index: 2, kind: input, shape index: {}]   ;;  %s12090_s3 = inlined_call_operand.hbm [shape: f32[2,1,128], index: 3, kind: input, shape index: {}]   ;;  %s12091_s4 = inlined_call_operand.hbm [shape: f32[2,1,128], index: 4, kind: input, shape index: {}]   ;;  %s12092_s5 = inlined_call_operand.hbm [shape: f32[3,25,128,128], index: 5, kind: input, shape index: {}]   ;;  %s12093_s6 = inlined_call_operand.hbm [shape: f32[3,1,128], index: 6, kind: input, shape index: {}]   ;;  %s12094_s7 = inlined_call_operand.hbm [shape: f32[2,256,128], index: 7, kind: output, shape index: {}]   ;;  %s12095_s1 = inlined_call_operand.hbm [shape: s32[2], index: 1, kind: input, shape index: {}]  }
   0x1   :  { %12125 = sst [smem:[#allocation69_spill]] %s12090_s3 }
   0x2   :  { %12126 = sst [smem:[#allocation70_spill]] %s12091_s4 }
   0x3   :  { %12127 = sst [smem:[#allocation71_spill]] %s12094_s7 }
   0x4   :  { %13 = dma.hbm_to_smem %s12088_s0, 16, %s10149_s24, [#allocation4] }
   0x5   :  { %15 = dma.hbm_to_smem %s12095_s1, 16, %s10150_s27, [#allocation4] }
   0x6   :  { %10059 = dma.done.wait [#allocation4], 32 }
   0x7   :  { %10060 = vsyncadd [#allocation4], 4294967264 }
   0x8   :  { %17 = sfence }
   0x9   :  { %18 = vsyncpa [#allocation8], 0 }
   0xa   :  { %20 = vsyncpa [#allocation8 + $0x1], 0 }
   0xb   :  { %21 = vsyncpa [#allocation11], 0 }
   0xc   :  { %23 = vsyncpa [#allocation11 + $0x1], 0 }
   0xd   :  { %24 = vsyncpa [#allocation14], 0 }
   0xe   :  { %26 = vsyncpa [#allocation14 + $0x1], 0 }
   0xf   :  { %27 = vsyncpa [#allocation9], 0 }
  0x10   :  { %29 = vsyncpa [#allocation9 + $0x1], 0  ;;  %s10208_s30 = smov 0   ;;  %s10210_s8 = smov 0  }
  0x11   :  { %s10212_s0 = smov 0   ;;  %s10214_s9 = smov 0  }
  0x12   :  { %s10216_s1 = smov 0   ;;  %s10218_s10 = smov 0  }
  0x13   :  { %s10220_s11 = smov 0   ;;  %s10222_s12 = smov 0  }
  0x14   :  { %s10224_s13 = smov 0   ;;  %s10226_s14 = smov 0  }
  0x15   :  { %s10228_s15 = smov 0   ;;  %s10230_s16 = smov 0  }
  0x16   :  { %s10232_s17 = smov 0   ;;  %s10234_s18 = smov 0  }
  0x17   :  { %s10236_s19 = smov 0   ;;  %s10238_s20 = smov 0  }
  0x18   :  { %s10240_s21 = smov 0  }
  0x19 LB: > { %12128 = sst [smem:[#allocation27_spill]] %s10083_s30  ;;  %s10292_s22 = sadd.s32 4294967295, %s10147_s21   ;;  %s10147_s21 = sphi %s10240_s21, %s35_s21   ;;  %s10143_s20 = sphi %s10238_s20, %s12256_s20   ;;  %s10139_s19 = sphi %s10236_s19, %s12250_s19   ;;  %s10135_s18 = sphi %s10234_s18, %s12255_s18   ;;  %s10131_s17 = sphi %s10232_s17, %s12249_s17   ;;  %s10127_s16 = sphi %s10230_s16, %s12248_s16   ;;  %s10123_s15 = sphi %s10228_s15, %s12254_s15   ;;  %s10119_s14 = sphi %s10226_s14, %s12246_s14   ;;  %s10115_s13 = sphi %s10224_s13, %s12245_s13   ;;  %s10111_s12 = sphi %s10222_s12, %s12244_s12   ;;  %s10107_s11 = sphi %s10220_s11, %s12243_s11   ;;  %s10103_s10 = sphi %s10218_s10, %s12253_s10   ;;  %s10099_s1 = sphi %s10216_s1, %s12252_s1   ;;  %s10095_s9 = sphi %s10214_s9, %s12251_s9   ;;  %s10091_s0 = sphi %s10212_s0, %s12242_s0   ;;  %s10087_s8 = sphi %s10210_s8, %s12241_s8   ;;  %s10083_s30 = sphi %s10208_s30, %s12240_s30  }
  0x1a   : > { %12129 = sst [smem:[#allocation28_spill]] %s10087_s8  ;;  %s6572_s23 = sadd.s32 4294967294, %s10147_s21  }
  0x1b   : > { %12130 = sst [smem:[#allocation29_spill]] %s10091_s0  ;;  %s44_s24 = sadd.s32 1, %s10139_s19 }
  0x1c   : > { %12131 = sst [smem:[#allocation30_spill]] %s10111_s12  ;;  %s47_s25 = sadd.s32 1, %s10143_s20 }
  0x1d   : > { %12132 = sst [smem:[#allocation31_spill]] %s10115_s13  ;;  %p45_p0 = scmp.ge.s32.totalorder %s44_s24, 2 }
  0x1e   : > { %12133 = sst [smem:[#allocation32_spill]] %s10123_s15  ;;  %s54_s26 = sadd.s32 1, %s10127_s16 }
  0x1f   : > { %12134 = sst [smem:[#allocation33_spill]] %s10127_s16  ;;  %p61_p1 = scmp.ne.s32.totalorder %s10127_s16, %s10123_s15 }
  0x20   : > { %12135 = sst [smem:[#allocation34_spill]] %s10131_s17  ;;  %p12117_p2 = scmp.eq.s32.totalorder %s10147_s21, 0 }
  0x21   : > { %12136 = sst [smem:[#allocation35_spill]] %s10135_s18  ;;  %s12258_s24 = smov (%p45_p0, %s44_s24), 0 }
  0x22   : > { %12137 = sst [smem:[#allocation36_spill]] %s10139_s19  ;;  %s12260_s25 = smov (!%p45_p0, %s47_s25), %s10143_s20 }
  0x23   : > { %12138 = sst [smem:[#allocation37_spill]] %s12258_s24  ;;  %p10306_p3 = por %p12117_p2, %p61_p1 }
  0x24   : > { %p67_p4 = scmp.ne.s32.totalorder %s10123_s15, %s10119_s14  ;;  %p49_p5 = scmp.ge.s32.totalorder %s12260_s25, 2 }
  0x25   : > { %p12112_p6 = scmp.eq.s32.totalorder %s10292_s22, 0  ;;  %s186_s28 = ssub.s32 %s10139_s19, %s12258_s24 }
  0x26   : > { %s190_s29 = sadd.s32 1, %s10091_s0  ;;  %s12262_s25 = smov (%p49_p5, %s12260_s25), 0 }
  0x27   : > { %p10319_p7 = por %p12112_p6, %p67_p4  ;;  %p200_p8 = scmp.ne.s32.totalorder %s10091_s0, %s10087_s8 }
  0x28   : > { %s51_s14 = ssub.s32 %s10143_s20, %s12262_s25  ;;  %p201_p9 = scmp.eq.s32.totalorder %s10292_s22, 3 }
  0x29   : > { %s12140_s7 = scalar_select %p10319_p7, 1, 0 }
  0x2a   : > { %p52_p10 = scmp.eq.s32.totalorder %s51_s14, 0  ;;  %s187_s17 = sor.u32 %s186_s28, %s51_s14 }
  0x2b   : > { %12141 = sst [smem:[#allocation38_spill]] %s12140_s7  ;;  %p188_p11 = scmp.eq.s32.totalorder %s187_s17, 0 }
  0x2c   : > { %p10328_p12 = por %p201_p9, %p200_p8  ;;  %p206_p13 = scmp.ne.s32.totalorder %s10087_s8, %s10083_s30 }
  0x2d   : > { %s10333_s19 = scalar_select %p52_p10, %s10127_s16, %s54_s26  }
  0x2e   : > { %s12142_s24 = scalar_select %p10328_p12, 1, 0 }
  0x2f   : > { %12144 = sst [smem:[#allocation40_spill]] %s10333_s19  ;;  %p207_p0 = scmp.eq.s32.totalorder %s6572_s23, 3 }
  0x30   : > { %12143 = sst [smem:[#allocation39_spill]] %s12142_s24  ;;  %p12106_p1 = scmp.lt.s32.totalorder %s10147_s21, 4 }
  0x31   : > { %s10336_s18 = scalar_select %p188_p11, %s10091_s0, %s190_s29  }
  0x32   : > { %p10341_p4 = por %p207_p0, %p206_p13  ;;  %s10346_s15 = sand.u32 1, %s10127_s16  }
  0x33   : > { %12145 = sst [smem:[#allocation41_spill]] %s10336_s18  ;;  %p10352_p5 = pnand %p12106_p1, %p10306_p3 }
  0x34   : > { %s12146_s7 = scalar_select %p10341_p4, 1, 0 }
  0x35   : > { %s12148_s17 = scalar_select %p10352_p5, 1, 0 }
  0x36   : > { %12147 = sst [smem:[#allocation42_spill]] %s12146_s7  ;;  %s12107_s26 = sand.u32 1, %s10147_s21  }
  0x37   : > { %s6578_s28 = sshll.u32 %s10143_s20, 4  ;;  %s12149_s3 = sld [smem:[#allocation69_spill]] }
  0x38   : > { %s251_s19 = scalar_lea.vmem [#allocation10], %s10346_s15  ;;  %s12150_s4 = sld [smem:[#allocation70_spill]] }
  0x39   : > { %s258_s18 = sshll.u32 %s251_s19, 4  ;;  %s10369_s7 = scalar_lea.sflag [#allocation11], %s12107_s26  ;;  %s259_s18 = int_to_ptr.vmem [resolvable:$true] %s258_s18 }
  0x3a   : > { %p12118_p3 = pneg %p10352_p5  ;;  %s9838_s30 = scalar_lea.vmem %s259_s18, 16 }
  0x3b   : > { %p9839_p8 = scmp.ne.s32.totalorder %s259_s18, %s9838_s30  ;;  %s10151_s29 = smov [#allocation10]  }
  0x3c   : > { %s9843_s23 = sshll.u32 %s10151_s29, 4  ;;  %s9844_s23 = int_to_ptr.vmem [resolvable:$false] %s9843_s23 }
  0x3d   : > { %s256_s14 = scalar_lea.hbm %s12149_s3, %s6578_s28  ;;  %p9841_p9 = pnand %p9839_p8, %p12118_p3 }
  0x3e   : > { %s10365_s27 = scalar_lea.hbm %s12150_s4, %s6578_s28  ;;  %s9845_s19 = scalar_lea.vmem %s9844_s23, 32 }
  0x3f   : > { %p9842_p10 = pneg %p9841_p9  ;;  %p9846_p11 = scmp.lt.s32.totalorder %s259_s18, %s9844_s23 }
  0x40   : > { %p9847_p13 = scmp.lt.s32.totalorder %s9845_s19, %s9838_s30 }
  0x42   : > { %p9848_p0 = por %p9847_p13, %p9846_p11 }
  0x44   : > { %p9849_p1 = pnand %p9848_p0, %p9842_p10 }
  0x46   : > { %9852 = shalt.err (!%p9849_p1)
}
  0x47   : > { %9646 = dma.hbm_to_vmem [thread:$0]  (!%p10352_p5), %s256_s14, 16, %s259_s18, %s10369_s7  }
  0x48   : > { %p6582_p8 = scmp.ge.s32.totalorder %s10147_s21, 1  ;;  %p320_p9 = scmp.lt.s32.totalorder %s10147_s21, 5 }
  0x49   : > { %s129_s0 = sld [smem:[#allocation5 + %s10143_s20]]  ;;  %s134_s16 = sadd.s32 1, %s10115_s13 }
  0x4a   : > { %p10381_p1 = pnand %p6582_p8, %p320_p9  ;;  %s130_s28 = sld [smem:[#allocation5 + %s12262_s25]] }
  0x4b   : > { %p141_p10 = scmp.ne.s32.totalorder %s10115_s13, %s10111_s12  ;;  %p147_p11 = scmp.ne.s32.totalorder %s10111_s12, %s10107_s11 }
  0x4c   : > { %s12151_s30 = scalar_select %p10381_p1, 1, 0 }
  0x4d   : > { %p10394_p13 = por %p141_p10, %p12117_p2  ;;  %p10400_p0 = por %p147_p11, %p12112_p6 }
  0x4e   : > { %s284_s14 = sand.u32 1, %s10115_s13   ;;  %p12155_p8 = scmp.lt.s32.totalorder %s10147_s21, 4 }
  0x4f   : > { %s12153_s18 = scalar_select %p10400_p0, 1, 0 }
  0x50   : > { %s9621_s23 = smul.u32 3200, %s284_s14  ;;  %p10409_p9 = pnand %p12155_p8, %p10394_p13 }
  0x51   : > { %12154 = sst [smem:[#allocation43_spill]] %s12153_s18  ;;  %s131_s26 = ssub.s32 %s129_s0, %s130_s28 }
  0x52   : > { %s9627_s19 = scalar_select %p10394_p13, [#allocation5], [#allocation17] }
  0x53   : > { %p132_p10 = scmp.eq.s32.totalorder %s131_s26, 0  ;;  %s286_s3 = scalar_lea.vmem [#allocation13], %s9621_s23 }
  0x54   : > { %s294_s4 = sshll.u32 %s286_s3, 4  ;;  %p12158_p11 = pmov %p12155_p8  ;;  %s10425_s4 = int_to_ptr.vmem [resolvable:$true] %s294_s4 }
  0x55   : > { %s9628_s24 = scalar_select %p10394_p13, %s10143_s20, 0 }
  0x56   : > { %s10419_s8 = scalar_select %p132_p10, %s10115_s13, %s134_s16  }
  0x57   : > { %s12264_s19 = smov (!%p12158_p11, %s9627_s19), [#allocation19]  ;;  %p12159_p6 = pmov %p12155_p8 }
  0x58   : > { %12157 = sst [smem:[#allocation44_spill]] %s10419_s8  ;;  %s6575_s18 = sshll.u32 %s10346_s15, 8 }
  0x59   : > { %s12266_s24 = smov (!%p12159_p6, %s9628_s24), 0  ;;  %s7324_s0 = sshll.u32 %s10143_s20, 12 }
  0x5a   : > { %s10427_s14 = sld [smem:[%s12264_s19 + %s12266_s24]]  ;;  %s237_s3 = scalar_lea.hbm %s12089_s2, %s7324_s0 }
  0x5b   : > { %s231_s29 = scalar_lea.vmem [#allocation7], %s6575_s18  ;;  %s228_s16 = scalar_lea.sflag [#allocation8], %s10346_s15 }
  0x5c   : > { %s238_s23 = sshll.u32 %s231_s29, 4  ;;  %s10152_s24 = smov [#allocation7]   ;;  %s239_s23 = int_to_ptr.vmem [resolvable:$true] %s238_s23 }
  0x5d   : > { %s9866_s8 = scalar_lea.vmem %s239_s23, 4096  ;;  %s9871_s19 = sshll.u32 %s10152_s24, 4  ;;  %s9872_s19 = int_to_ptr.vmem [resolvable:$false] %s9871_s19 }
  0x5e   : > { %p9867_p13 = scmp.ne.s32.totalorder %s239_s23, %s9866_s8  ;;  %s9873_s13 = scalar_lea.vmem %s9872_s19, 8192 }
  0x5f   : > { %p9874_p10 = scmp.lt.s32.totalorder %s239_s23, %s9872_s19  ;;  %p9875_p11 = scmp.lt.s32.totalorder %s9873_s13, %s9866_s8 }
  0x60   : > { %s9622_s12 = smul.u32 51200, %s10427_s14  ;;  %p9869_p6 = pnand %p9867_p13, %p12118_p3 }
  0x61   : > { %p9876_p2 = por %p9875_p11, %p9874_p10 }
  0x62   : > { %p9870_p8 = pneg %p9869_p6 }
  0x64   : > { %p9877_p4 = pnand %p9876_p2, %p9870_p8 }
  0x66   : > { %9880 = shalt.err (!%p9877_p4)
}
  0x67   : > { %s10153_s18 = smov 128   ;;  %s10154_s14 = smov 8  }
  0x68   : > { %9643 = dma.hbm_to_vmem [thread:$0]  (!%p10352_p5), %s237_s3, 4096, %s239_s23, %s228_s16, %s10153_s18, %s10153_s18, %s10154_s14  }
  0x69   : > { %s10447_s28 = scalar_lea.hbm %s12092_s5, %s9622_s12  ;;  %s268_s8 = scalar_lea.vmem [#allocation12], %s10346_s15 }
  0x6a   : > { %s10450_s13 = sshll.u32 %s268_s8, 4  ;;  %s12160_s29 = sand.u32 1, %s10147_s21   ;;  %s276_s13 = int_to_ptr.vmem [resolvable:$true] %s10450_s13 }
  0x6b   : > { %s10454_s24 = scalar_lea.sflag [#allocation14], %s12160_s29  ;;  %s9881_s19 = scalar_lea.hbm %s10447_s28, 51200 }
  0x6c   : > { %p9882_p2 = scmp.ne.s32.totalorder %s10447_s28, %s9881_s19  ;;  %p9883_p4 = pneg %p10409_p9 }
  0x6d   : > { %s9886_s12 = scalar_lea.hbm %s12092_s5, 153600  ;;  %p9887_p8 = scmp.lt.s32.totalorder %s10447_s28, %s12092_s5 }
  0x6e   : > { %p9884_p13 = pnand %p9883_p4, %p9882_p2  ;;  %p9888_p10 = scmp.lt.s32.totalorder %s9886_s12, %s9881_s19 }
  0x70   : > { %p9885_p6 = pneg %p9884_p13  ;;  %p9889_p11 = por %p9888_p10, %p9887_p8 }
  0x72   : > { %p9890_p3 = pnand %p9889_p11, %p9885_p6 }
  0x74   : > { %9893 = shalt.err (!%p9890_p3)
}
  0x75   : > { %s9894_s15 = scalar_lea.vmem %s10425_s4, 51200  ;;  %s10155_s26 = smov [#allocation13]  }
  0x76   : > { %p9895_p12 = scmp.ne.s32.totalorder %s10425_s4, %s9894_s15  ;;  %s9899_s8 = sshll.u32 %s10155_s26, 4  ;;  %s9900_s8 = int_to_ptr.vmem [resolvable:$false] %s9899_s8 }
  0x77   : > { %s9901_s29 = scalar_lea.vmem %s9900_s8, 102400  ;;  %p9902_p13 = scmp.lt.s32.totalorder %s10425_s4, %s9900_s8 }
  0x78   : > { %p9897_p0 = pnand %p9895_p12, %p9883_p4  ;;  %p9903_p7 = scmp.lt.s32.totalorder %s9901_s29, %s9894_s15 }
  0x7a   : > { %p9898_p2 = pneg %p9897_p0  ;;  %p9904_p1 = por %p9903_p7, %p9902_p13 }
  0x7c   : > { %p9905_p5 = pnand %p9904_p1, %p9898_p2 }
  0x7e   : > { %9908 = shalt.err (!%p9905_p5)
}
  0x7f   : > { %9654 = dma.hbm_to_vmem [thread:$0]  (!%p10409_p9), %s10447_s28, 51200, %s10425_s4, %s10454_s24, %s10153_s18, %s10153_s18, %s10154_s14  }
  0x80   : > { %s9922_s19 = scalar_lea.vmem %s276_s13, 16  ;;  %p12161_p3 = scmp.ne.s32.totalorder %s12148_s17, 0 }
  0x81   : > { %p9923_p12 = scmp.ne.s32.totalorder %s276_s13, %s9922_s19  ;;  %s10156_s3 = smov [#allocation12]  }
  0x82   : > { %p12162_p0 = pneg %p12161_p3  ;;  %s9927_s23 = sshll.u32 %s10156_s3, 4  ;;  %s9928_s23 = int_to_ptr.vmem [resolvable:$false] %s9927_s23 }
  0x83   : > { %s9929_s11 = scalar_lea.vmem %s9928_s23, 32  ;;  %p9930_p5 = scmp.lt.s32.totalorder %s276_s13, %s9928_s23 }
  0x84   : > { %p9925_p4 = pnand %p9923_p12, %p12162_p0  ;;  %p9931_p1 = scmp.lt.s32.totalorder %s9929_s11, %s9922_s19 }
  0x86   : > { %p9926_p7 = pneg %p9925_p4  ;;  %p9932_p6 = por %p9931_p1, %p9930_p5 }
  0x88   : > { %p9933_p8 = pnand %p9932_p6, %p9926_p7 }
  0x8a   : > { %9936 = shalt.err (!%p9933_p8)
}
  0x8b   : > { %9649 = dma.hbm_to_vmem [thread:$0]  (!%p12161_p3), %s10365_s27, 16, %s276_s13, %s10369_s7  }
  0x8c   : > { %s157_s4 = sld [smem:[#allocation5 + %s10143_s20]]  ;;  %p169_p9 = scmp.ne.s32.totalorder %s10103_s10, %s10099_s1 }
  0x8d   : > { %s158_s17 = sld [smem:[#allocation5 + %s12262_s25]]  ;;  %p175_p10 = scmp.ne.s32.totalorder %s10099_s1, %s10095_s9 }
  0x8e   : > { %p12163_p11 = scmp.eq.s32.totalorder %s10147_s21, 0  ;;  %p12164_p13 = scmp.eq.s32.totalorder %s10292_s22, 0 }
  0x8f   : > { %s162_s12 = sadd.s32 1, %s10103_s10  ;;  %s306_s16 = sand.u32 1, %s10103_s10  }
  0x90   : > { %p171_p2 = por %p169_p9, %p12163_p11  ;;  %p10496_p12 = por %p175_p10, %p12164_p13 }
  0x91   : > { %p12166_p3 = scmp.lt.s32.totalorder %s10147_s21, 4  ;;  %s307_s27 = scalar_lea.vmem [#allocation15], %s306_s16 }
  0x92   : > { %s12165_s18 = scalar_select %p10496_p12, 1, 0 }
  0x93   : > { %s9630_s14 = scalar_select %p171_p2, [#allocation5], [#allocation18] }
  0x94   : > { %s159_s28 = ssub.s32 %s157_s4, %s158_s17  ;;  %p12167_p4 = pmov %p12166_p3 }
  0x95   : > { %p160_p0 = scmp.eq.s32.totalorder %s159_s28, 0  ;;  %s12268_s14 = smov (!%p12166_p3, %s9630_s14), [#allocation20] }
  0x96   : > { %s9631_s0 = scalar_select %p171_p2, %s10143_s20, 0 }
  0x97   : > { %s10504_s15 = scalar_select %p160_p0, %s10103_s10, %s162_s12  }
  0x98   : > { %s12270_s0 = smov (!%p12167_p4, %s9631_s0), 0  ;;  %p12168_p7 = pmov %p12166_p3 }
  0x99   : > { %s308_s9 = sld [smem:[%s12268_s14 + %s12270_s0]]  ;;  %s315_s13 = sshll.u32 %s307_s27, 4  ;;  %s316_s13 = int_to_ptr.vmem [resolvable:$true] %s315_s13 }
  0x9a   : > { %p10512_p5 = pnand %p12168_p7, %p171_p2  ;;  %s9942_s4 = scalar_lea.hbm %s12093_s6, 48 }
  0x9c   : > { %p9939_p6 = pneg %p10512_p5 }
  0x9f   : > { %s6581_s26 = sshll.u32 %s308_s9, 4 }
  0xa0   : > { %s313_s19 = scalar_lea.hbm %s12093_s6, %s6581_s26 }
  0xa1   : > { %s9937_s3 = scalar_lea.hbm %s313_s19, 16  ;;  %p9943_p10 = scmp.lt.s32.totalorder %s313_s19, %s12093_s6 }
  0xa2   : > { %p9938_p1 = scmp.ne.s32.totalorder %s313_s19, %s9937_s3  ;;  %p9944_p11 = scmp.lt.s32.totalorder %s9942_s4, %s9937_s3 }
  0xa4   : > { %p9940_p8 = pnand %p9939_p6, %p9938_p1  ;;  %p9945_p2 = por %p9944_p11, %p9943_p10 }
  0xa6   : > { %p9941_p9 = pneg %p9940_p8 }
  0xa8   : > { %p9946_p13 = pnand %p9945_p2, %p9941_p9 }
  0xaa   : > { %9949 = shalt.err (!%p9946_p13)
}
  0xab   : > { %s9950_s28 = scalar_lea.vmem %s316_s13, 16  ;;  %s10157_s12 = smov [#allocation15]  }
  0xac   : > { %p9951_p0 = scmp.ne.s32.totalorder %s316_s13, %s9950_s28  ;;  %s9955_s16 = sshll.u32 %s10157_s12, 4  ;;  %s9956_s16 = int_to_ptr.vmem [resolvable:$false] %s9955_s16 }
  0xad   : > { %s9957_s0 = scalar_lea.vmem %s9956_s16, 32  ;;  %p9958_p7 = scmp.lt.s32.totalorder %s316_s13, %s9956_s16 }
  0xae   : > { %p9953_p3 = pnand %p9951_p0, %p9939_p6  ;;  %p9959_p1 = scmp.lt.s32.totalorder %s9957_s0, %s9950_s28 }
  0xb0   : > { %p9954_p4 = pneg %p9953_p3  ;;  %p9960_p8 = por %p9959_p1, %p9958_p7 }
  0xb2   : > { %p9961_p12 = pnand %p9960_p8, %p9954_p4 }
  0xb4   : > { %9964 = shalt.err (!%p9961_p12)
}
  0xb5   : > { %9659 = dma.hbm_to_vmem [thread:$0]  (!%p10512_p5), %s313_s19, 16, %s316_s13, %s10454_s24  }
  0xb6   : > { %p12170_p9 = scmp.ne.s32.totalorder %s12151_s30, 0 }
  0xb7   : > { %s12171_s9 = sld [smem:[#allocation32_spill]] (!%p12170_p9) }
  0xb8   : > { %324 = sbr.rel (%p12170_p9) target bundleno = 2658 (0xa62), region = 40  ;;  %s12172_s27 = sld [smem:[#allocation38_spill]] (!%p12170_p9) }
  0xbd   : > { %s10533_s26 = sand.u32 1, %s12171_s9  }
  0xbe   : > { %s6583_s8 = sshll.u32 %s10533_s26, 8  ;;  %s327_s29 = scalar_lea.sflag [#allocation8], %s10533_s26 }
  0xbf   : > { %s10537_s3 = scalar_lea.vmem [#allocation7], %s6583_s8  ;;  %p12173_p6 = scmp.ne.s32.totalorder %s12172_s27, 0 }
  0xc1   : > { %10062 = dma.done.wait (%p12173_p6), %s327_s29, 4096  }
  0xc2   : > { %10064 = vsyncadd (%p12173_p6), %s327_s29, 4294963200  ;;  %s335_s30 = sand.u32 1, %s10292_s22   ;;  %s338_s7 = scalar_lea.vmem [#allocation10], %s10533_s26 }
  0xc3   : > { %s336_s24 = scalar_lea.sflag [#allocation11], %s335_s30 }
  0xc4   : > { %10066 = dma.done.wait (%p12173_p6), %s336_s24, 32  }
  0xc5   : > { %10068 = vsyncadd (%p12173_p6), %s336_s24, 4294967264  ;;  %s12174_s13 = sld [smem:[#allocation30_spill]]  ;;  %s346_s4 = scalar_lea.vmem [#allocation12], %s10533_s26 }
  0xc6   : > { %s12175_s19 = sld [smem:[#allocation43_spill]]  ;;  %s352_s17 = scalar_lea.sflag [#allocation14], %s335_s30 }
  0xcb   : > { %s353_s23 = sand.u32 1, %s12174_s13  }
  0xcc   : > { %s9623_s11 = smul.u32 3200, %s353_s23  ;;  %p12176_p12 = scmp.ne.s32.totalorder %s12175_s19, 0 }
  0xce   : > { %s10551_s14 = scalar_lea.vmem [#allocation13], %s9623_s11 }
  0xcf   : > { %10070 = dma.done.wait (%p12176_p12), %s352_s17, 51200  }
  0xd0   : > { %10072 = vsyncadd (%p12176_p12), %s352_s17, 4294916096  ;;  %s362_s22 = sand.u32 1, %s10099_s1   ;;  %p12177_p5 = scmp.ne.s32.totalorder %s12165_s18, 0 }
  0xd1   : > { %s10558_s28 = scalar_lea.vmem [#allocation15], %s362_s22 }
  0xd2   : > { %10074 = dma.done.wait (%p12177_p5), %s352_s17, 16  }
  0xd3   : > { %10076 = vsyncadd (%p12177_p5), %s352_s17, 4294967280  ;;  %s12178_s12 = sld [smem:[#allocation28_spill]] }
  0xd4   : > { %s12179_s16 = sld [smem:[#allocation35_spill]] }
  0xd5   : > { %s12180_s8 = sld [smem:[#allocation34_spill]] }
  0xd9   : > { %s404_s0 = sand.u32 1, %s12178_s12  }
  0xda   : > { %s10566_s9 = sld [smem:[#allocation6 + %s12179_s16]]  ;;  %s6584_s27 = sshll.u32 %s404_s0, 7 }
  0xdb   : > { %s10570_s26 = scalar_lea.vmem [#allocation16], %s6584_s27  ;;  %p6585_p10 = scmp.ne.s32.totalorder %s12180_s8, 0 }
  0xdd   : > { %414 = sbr.rel (%p6585_p10) target bundleno = 265 (0x109), region = 64 }
  0xe2   : > { %v415_v0 = vld [vmem:[%s10537_s3] sm:$0xff]  ;;  %v10158_v3 = vmov 0.0   ;;  %v416_v5 = vld [vmem:[%s10537_s3 + $0x8] sm:$0xff]  ;;  %v417_v6 = vld [vmem:[%s10537_s3 + $0x10] sm:$0xff] }
  0xe3   : > { %v10574_v1 = vld [vmem:[%s338_s7] ss:$0 sm:$0xff]  ;;  %557 = vst [vmem:[#allocation2] sm:$0xff] %v10158_v3  ;;  %558 = vst [vmem:[#allocation2 + $0x8] sm:$0xff] %v10158_v3  ;;  %v418_v7 = vld [vmem:[%s10537_s3 + $0x18] sm:$0xff] }
  0xe4   : > { %v10576_v2 = vld [vmem:[%s346_s4] ss:$0 sm:$0xff]  ;;  %559 = vst [vmem:[#allocation2 + $0x10] sm:$0xf] %v10158_v3  ;;  %560 = vst [vmem:[#allocation2 + $0x18] sm:$0xff] %v10158_v3  ;;  %v454_v4 = vmul.f32 %v10574_v1, %v415_v0  ;;  %v455_v8 = vmul.f32 %v10574_v1, %v416_v5  ;;  %v456_v9 = vmul.f32 %v10574_v1, %v417_v6  ;;  %v420_v12 = vld [vmem:[%s10537_s3 + $0x28] sm:$0xff] }
  0xe5   : > { %561 = vst [vmem:[#allocation2 + $0x20] sm:$0xff] %v10158_v3  ;;  %562 = vst [vmem:[#allocation2 + $0x28] sm:$0xf] %v10158_v3  ;;  %v457_v10 = vmul.f32 %v10574_v1, %v418_v7  ;;  %v419_v11 = vld [vmem:[%s10537_s3 + $0x20] sm:$0xff]  ;;  %v421_v13 = vld [vmem:[%s10537_s3 + $0x30] sm:$0xff]  ;;  %v459_v16 = vmul.f32 %v10574_v1, %v420_v12 }
  0xe6   : > { %564 = vst [vmem:[#allocation2 + $0x1b0] sm:$0xff] %v10158_v3  ;;  %565 = vst [vmem:[#allocation2 + $0x1b8] sm:$0xff] %v10158_v3  ;;  %v493_v14 = vadd.f32 %v10576_v2, %v454_v4  ;;  %v458_v15 = vmul.f32 %v10574_v1, %v419_v11  ;;  %v460_v17 = vmul.f32 %v10574_v1, %v421_v13  ;;  %v422_v18 = vld [vmem:[%s10537_s3 + $0x38] sm:$0xff]  ;;  %v423_v23 = vld [vmem:[%s10537_s3 + $0x40] sm:$0xff] }
  0xe7   : > { %566 = vst [vmem:[#allocation2 + $0x1c0] sm:$0xf] %v10158_v3  ;;  %567 = vst [vmem:[#allocation2 + $0x1c8] sm:$0xff] %v10158_v3  ;;  %v494_v19 = vadd.f32 %v10576_v2, %v455_v8  ;;  %v495_v20 = vadd.f32 %v10576_v2, %v456_v9  ;;  %v496_v21 = vadd.f32 %v10576_v2, %v457_v10  ;;  %v424_v28 = vld [vmem:[%s10537_s3 + $0x48] sm:$0xff]  ;;  %v425_v29 = vld [vmem:[%s10537_s3 + $0x50] sm:$0xff] }
  0xe8   : > { %568 = vst [vmem:[#allocation2 + $0x1d0] sm:$0xff] %v10158_v3  ;;  %569 = vst [vmem:[#allocation2 + $0x1d8] sm:$0xf] %v10158_v3  ;;  %v461_v22 = vmul.f32 %v10574_v1, %v422_v18  ;;  %v525_v24 = vmax.f32 %v493_v14, 0.0  ;;  %v497_v25 = vadd.f32 %v10576_v2, %v458_v15  ;;  %v498_v26 = vadd.f32 %v10576_v2, %v459_v16  ;;  %v426_v30 = vld [vmem:[%s10537_s3 + $0x58] sm:$0xff]  ;;  %v427_v35 = vld [vmem:[%s10537_s3 + $0x60] sm:$0xff] }
  0xe9   : > { %571 = vst [vmem:[#allocation2 + $0x30] sm:$0x3] %v10158_v3  ;;  %572 = vst [vmem:[#allocation2 + $0x48] sm:$0x3] %v10158_v3  ;;  %v499_v27 = vadd.f32 %v10576_v2, %v460_v17  ;;  %v526_v31 = vmax.f32 %v494_v19, 0.0  ;;  %v527_v32 = vmax.f32 %v495_v20, 0.0  ;;  %v462_v41 = vmul.f32 %v10574_v1, %v423_v23 }
  0xea   : > { %573 = vst [vmem:[#allocation2 + $0x60] sm:$0x3] %v10158_v3  ;;  %574 = vst [vmem:[#allocation2 + $0x78] sm:$0x3] %v10158_v3  ;;  %v528_v33 = vmax.f32 %v496_v21, 0.0  ;;  %v500_v34 = vadd.f32 %v10576_v2, %v461_v22  ;;  %v428_v36 = vld [vmem:[%s10537_s3 + $0x68] sm:$0xff]  ;;  %v463_v44 = vmul.f32 %v10574_v1, %v424_v28  ;;  %v464_v45 = vmul.f32 %v10574_v1, %v425_v29 }
  0xeb   : > { %575 = vst [vmem:[#allocation2 + $0x90] sm:$0x3] %v10158_v3  ;;  %576 = vst [vmem:[#allocation2 + $0xa8] sm:$0x3] %v10158_v3  ;;  %v429_v37 = vld [vmem:[%s10537_s3 + $0x70] sm:$0xff]  ;;  %v529_v38 = vmax.f32 %v497_v25, 0.0  ;;  %v465_v46 = vmul.f32 %v10574_v1, %v426_v30  ;;  %v501_v47 = vadd.f32 %v10576_v2, %v462_v41  ;;  %v466_v48 = vmul.f32 %v10574_v1, %v427_v35 }
  0xec   : > { %577 = vst [vmem:[#allocation2 + $0xc0] sm:$0x3] %v10158_v3  ;;  %578 = vst [vmem:[#allocation2 + $0xd8] sm:$0x3] %v10158_v3  ;;  %v530_v39 = vmax.f32 %v498_v26, 0.0  ;;  %v531_v40 = vmax.f32 %v499_v27, 0.0  ;;  %v467_v49 = vmul.f32 %v10574_v1, %v428_v36  ;;  %v468_v50 = vmul.f32 %v10574_v1, %v429_v37 }
  0xed   : > { %579 = vst [vmem:[#allocation2 + $0xf0] sm:$0x3] %v10158_v3  ;;  %580 = vst [vmem:[#allocation2 + $0x108] sm:$0x3] %v10158_v3  ;;  %v430_v42 = vld [vmem:[%s10537_s3 + $0x78] sm:$0xff]  ;;  %v532_v43 = vmax.f32 %v500_v34, 0.0  ;;  %v502_v51 = vadd.f32 %v10576_v2, %v463_v44  ;;  %v503_v52 = vadd.f32 %v10576_v2, %v464_v45  ;;  %v504_v53 = vadd.f32 %v10576_v2, %v465_v46 }
  0xee   : > { %581 = vst [vmem:[#allocation2 + $0x120] sm:$0x3] %v10158_v3  ;;  %582 = vst [vmem:[#allocation2 + $0x138] sm:$0x3] %v10158_v3  ;;  %v469_v54 = vmul.f32 %v10574_v1, %v430_v42  ;;  %v431_v55 = vld [vmem:[%s10537_s3 + $0x80] sm:$0xff]  ;;  %v533_v56 = vmax.f32 %v501_v47, 0.0  ;;  %v505_v57 = vadd.f32 %v10576_v2, %v466_v48  ;;  %v506_v58 = vadd.f32 %v10576_v2, %v467_v49 }
  0xef   : > { %583 = vst [vmem:[#allocation2 + $0x150] sm:$0x3] %v10158_v3  ;;  %584 = vst [vmem:[#allocation2 + $0x168] sm:$0x3] %v10158_v3  ;;  %v507_v59 = vadd.f32 %v10576_v2, %v468_v50  ;;  %v432_v60 = vld [vmem:[%s10537_s3 + $0x88] sm:$0xff]  ;;  %v433_v61 = vld [vmem:[%s10537_s3 + $0x90] sm:$0xff]  ;;  %v470_v11 = vmul.f32 %v10574_v1, %v431_v55 }
  0xf0   : > { %585 = vst [vmem:[#allocation2 + $0x180] sm:$0x3] %v10158_v3  ;;  %586 = vst [vmem:[#allocation2 + $0x198] sm:$0x3] %v10158_v3  ;;  %v434_v62 = vld [vmem:[%s10537_s3 + $0x98] sm:$0xff]  ;;  %v534_v63 = vmax.f32 %v502_v51, 0.0  ;;  %v508_v4 = vadd.f32 %v10576_v2, %v469_v54  ;;  %v471_v14 = vmul.f32 %v10574_v1, %v432_v60  ;;  %v472_v15 = vmul.f32 %v10574_v1, %v433_v61 }
  0xf1   : > { %587 = vst [vmem:[#allocation2 + $0x42] sm:$0x3] %v10158_v3  ;;  %588 = vst [vmem:[#allocation2 + $0x5a] sm:$0x3] %v10158_v3  ;;  %v535_v0 = vmax.f32 %v503_v52, 0.0  ;;  %v435_v5 = vld [vmem:[%s10537_s3 + $0xa0] sm:$0xff]  ;;  %v473_v16 = vmul.f32 %v10574_v1, %v434_v62  ;;  %v509_v17 = vadd.f32 %v10576_v2, %v470_v11 }
  0xf2   : > { %589 = vst [vmem:[#allocation2 + $0x72] sm:$0x3] %v10158_v3  ;;  %590 = vst [vmem:[#allocation2 + $0x8a] sm:$0x3] %v10158_v3  ;;  %v436_v6 = vld [vmem:[%s10537_s3 + $0xa8] sm:$0xff]  ;;  %v437_v7 = vld [vmem:[%s10537_s3 + $0xb0] sm:$0xff]  ;;  %v474_v18 = vmul.f32 %v10574_v1, %v435_v5  ;;  %v510_v21 = vadd.f32 %v10576_v2, %v471_v14  ;;  %v511_v22 = vadd.f32 %v10576_v2, %v472_v15 }
  0xf3   : > { %591 = vst [vmem:[#allocation2 + $0xa2] sm:$0x3] %v10158_v3  ;;  %592 = vst [vmem:[#allocation2 + $0xba] sm:$0x3] %v10158_v3  ;;  %v537_v8 = vmax.f32 %v505_v57, 0.0  ;;  %v538_v9 = vmax.f32 %v506_v58, 0.0  ;;  %v475_v19 = vmul.f32 %v10574_v1, %v436_v6  ;;  %v476_v20 = vmul.f32 %v10574_v1, %v437_v7 }
  0xf4   : > { %593 = vst [vmem:[#allocation2 + $0xd2] sm:$0x3] %v10158_v3  ;;  %594 = vst [vmem:[#allocation2 + $0xea] sm:$0x3] %v10158_v3  ;;  %v539_v10 = vmax.f32 %v507_v59, 0.0  ;;  %v438_v12 = vld [vmem:[%s10537_s3 + $0xb8] sm:$0xff]  ;;  %v512_v23 = vadd.f32 %v10576_v2, %v473_v16  ;;  %v513_v27 = vadd.f32 %v10576_v2, %v474_v18 }
  0xf5   : > { %595 = vst [vmem:[#allocation2 + $0x102] sm:$0x3] %v10158_v3  ;;  %596 = vst [vmem:[#allocation2 + $0x11a] sm:$0x3] %v10158_v3  ;;  %v540_v13 = vmax.f32 %v508_v4, 0.0  ;;  %v439_v25 = vld [vmem:[%s10537_s3 + $0xc0] sm:$0xff]  ;;  %v514_v28 = vadd.f32 %v10576_v2, %v475_v19  ;;  %v515_v29 = vadd.f32 %v10576_v2, %v476_v20 }
  0xf6   : > { %597 = vst [vmem:[#allocation2 + $0x132] sm:$0x3] %v10158_v3  ;;  %598 = vst [vmem:[#allocation2 + $0x14a] sm:$0x3] %v10158_v3  ;;  %v541_v26 = vmax.f32 %v509_v17, 0.0  ;;  %v440_v30 = vld [vmem:[%s10537_s3 + $0xc8] sm:$0xff] }
  0xf7   : > { %599 = vst [vmem:[#allocation2 + $0x162] sm:$0x3] %v10158_v3  ;;  %600 = vst [vmem:[#allocation2 + $0x17a] sm:$0x3] %v10158_v3  ;;  %v543_v34 = vmax.f32 %v511_v22, 0.0  ;;  %v544_v35 = vmax.f32 %v512_v23, 0.0  ;;  %v479_v46 = vmul.f32 %v10574_v1, %v440_v30 }
  0xf8   : > { %601 = vst [vmem:[#allocation2 + $0x192] sm:$0x3] %v10158_v3  ;;  %602 = vst [vmem:[#allocation2 + $0x1aa] sm:$0x3] %v10158_v3  ;;  %v536_v3 = vmax.f32 %v504_v53, 0.0  ;;  %v443_v37 = vld [vmem:[%s10537_s3 + $0xe0] sm:$0xff] }
  0xf9   : > { %603 = vst [vmem:[#allocation2 + $0x32] sm:$0xff] %v525_v24  ;;  %604 = vst [vmem:[#allocation2 + $0x3a] sm:$0xff] %v526_v31  ;;  %v477_v24 = vmul.f32 %v10574_v1, %v438_v12  ;;  %v441_v31 = vld [vmem:[%s10537_s3 + $0xd0] sm:$0xff]  ;;  %v546_v41 = vmax.f32 %v514_v28, 0.0  ;;  %v547_v42 = vmax.f32 %v515_v29, 0.0  ;;  %v446_v44 = vld [vmem:[%s10537_s3 + $0xf8] sm:$0xff]  ;;  %v482_v50 = vmul.f32 %v10574_v1, %v443_v37 }
  0xfa   : > { %605 = vst [vmem:[#allocation2 + $0x4a] sm:$0xff] %v527_v32  ;;  %606 = vst [vmem:[#allocation2 + $0x52] sm:$0xff] %v528_v33  ;;  %v442_v32 = vld [vmem:[%s10537_s3 + $0xd8] sm:$0xff]  ;;  %v542_v33 = vmax.f32 %v510_v21, 0.0  ;;  %v480_v47 = vmul.f32 %v10574_v1, %v441_v31  ;;  %v518_v53 = vadd.f32 %v10576_v2, %v479_v46 }
  0xfb   : > { %607 = vst [vmem:[#allocation2 + $0x62] sm:$0xff] %v529_v38  ;;  %608 = vst [vmem:[#allocation2 + $0x6a] sm:$0xff] %v530_v39  ;;  %v516_v36 = vadd.f32 %v10576_v2, %v477_v24  ;;  %v444_v38 = vld [vmem:[%s10537_s3 + $0xe8] sm:$0xff]  ;;  %v445_v39 = vld [vmem:[%s10537_s3 + $0xf0] sm:$0xff]  ;;  %v481_v48 = vmul.f32 %v10574_v1, %v442_v32  ;;  %v521_v58 = vadd.f32 %v10576_v2, %v482_v50 }
  0xfc   : > { %609 = vst [vmem:[#allocation2 + $0x7a] sm:$0xff] %v531_v40  ;;  %610 = vst [vmem:[#allocation2 + $0x82] sm:$0xff] %v532_v43  ;;  %v545_v40 = vmax.f32 %v513_v27, 0.0  ;;  %v478_v43 = vmul.f32 %v10574_v1, %v439_v25  ;;  %v483_v51 = vmul.f32 %v10574_v1, %v444_v38  ;;  %v484_v52 = vmul.f32 %v10574_v1, %v445_v39 }
  0xfd   : > { %611 = vst [vmem:[#allocation2 + $0x92] sm:$0xff] %v533_v56  ;;  %612 = vst [vmem:[#allocation2 + $0x9a] sm:$0xff] %v534_v63  ;;  %v548_v45 = vmax.f32 %v516_v36, 0.0  ;;  %v519_v54 = vadd.f32 %v10576_v2, %v480_v47  ;;  %v520_v55 = vadd.f32 %v10576_v2, %v481_v48  ;;  %v485_v56 = vmul.f32 %v10574_v1, %v446_v44 }
  0xfe   : > { %613 = vst [vmem:[#allocation2 + $0xaa] sm:$0xff] %v535_v0  ;;  %614 = vst [vmem:[#allocation2 + $0xb2] sm:$0xff] %v536_v3  ;;  %v517_v49 = vadd.f32 %v10576_v2, %v478_v43  ;;  %v522_v59 = vadd.f32 %v10576_v2, %v483_v51  ;;  %v523_v60 = vadd.f32 %v10576_v2, %v484_v52  ;;  %v550_v61 = vmax.f32 %v518_v53, 0.0 }
  0xff   : > { %615 = vst [vmem:[#allocation2 + $0xc2] sm:$0xff] %v537_v8  ;;  %616 = vst [vmem:[#allocation2 + $0xca] sm:$0xff] %v538_v9  ;;  %v551_v62 = vmax.f32 %v519_v54, 0.0  ;;  %v552_v63 = vmax.f32 %v520_v55, 0.0  ;;  %v524_v0 = vadd.f32 %v10576_v2, %v485_v56  ;;  %v553_v3 = vmax.f32 %v521_v58, 0.0 }
 0x100   : > { %617 = vst [vmem:[#allocation2 + $0xda] sm:$0xff] %v539_v10  ;;  %618 = vst [vmem:[#allocation2 + $0xe2] sm:$0xff] %v540_v13  ;;  %v549_v57 = vmax.f32 %v517_v49, 0.0  ;;  %v554_v4 = vmax.f32 %v522_v59, 0.0  ;;  %v555_v5 = vmax.f32 %v523_v60, 0.0 }
 0x101   : > { %619 = vst [vmem:[#allocation2 + $0xf2] sm:$0xff] %v541_v26  ;;  %620 = vst [vmem:[#allocation2 + $0xfa] sm:$0xff] %v542_v33  ;;  %v556_v1 = vmax.f32 %v524_v0, 0.0 }
 0x102   : > { %621 = vst [vmem:[#allocation2 + $0x10a] sm:$0xff] %v543_v34  ;;  %622 = vst [vmem:[#allocation2 + $0x112] sm:$0xff] %v544_v35 }
 0x103   : > { %623 = vst [vmem:[#allocation2 + $0x122] sm:$0xff] %v545_v40  ;;  %624 = vst [vmem:[#allocation2 + $0x12a] sm:$0xff] %v546_v41 }
 0x104   : > { %625 = vst [vmem:[#allocation2 + $0x13a] sm:$0xff] %v547_v42  ;;  %626 = vst [vmem:[#allocation2 + $0x142] sm:$0xff] %v548_v45 }
 0x105   : > { %627 = vst [vmem:[#allocation2 + $0x152] sm:$0xff] %v549_v57  ;;  %628 = vst [vmem:[#allocation2 + $0x15a] sm:$0xff] %v550_v61 }
 0x106   : > { %629 = vst [vmem:[#allocation2 + $0x16a] sm:$0xff] %v551_v62  ;;  %630 = vst [vmem:[#allocation2 + $0x172] sm:$0xff] %v552_v63 }
 0x107   : > { %631 = vst [vmem:[#allocation2 + $0x182] sm:$0xff] %v553_v3  ;;  %632 = vst [vmem:[#allocation2 + $0x18a] sm:$0xff] %v554_v4 }
 0x108   : > { %633 = vst [vmem:[#allocation2 + $0x19a] sm:$0xff] %v555_v5  ;;  %634 = vst [vmem:[#allocation2 + $0x1a2] sm:$0xff] %v556_v1 }
 0x109 PF: > { %v6622_v6 = vld [vmem:[%s10551_s14 + $0x678] sm:$0xff]  ;;  %v6621_v2 = vld [vmem:[%s10551_s14 + $0x670] sm:$0xff]  ;;  %v6620_v7 = vld [vmem:[%s10551_s14 + $0x668] sm:$0xff]  ;;  %s12181_s18 = sld [smem:[#allocation34_spill]]  ;;  %p6623_p11 = scmp.lt.s32.totalorder %s10566_s9, 2 }
 0x10a   : > { %8125 = vmatprep.subr.mxu0 %v6622_v6  ;;  %9525 = vmatprep.subr.mxu1 %v6622_v6  ;;  %v6619_v8 = vld [vmem:[%s10551_s14 + $0x660] sm:$0xff]  ;;  %v6618_v9 = vld [vmem:[%s10551_s14 + $0x658] sm:$0xff]  ;;  %v6617_v10 = vld [vmem:[%s10551_s14 + $0x650] sm:$0xff] }
 0x10b   : > { %8126 = vmatpush3.msra.mxu0 %v6622_v6  ;;  %9541 = vmatpush3.msra.mxu1 %v6622_v6  ;;  %v6616_v11 = vld [vmem:[%s10551_s14 + $0x648] sm:$0xff]  ;;  %v6615_v12 = vld [vmem:[%s10551_s14 + $0x640] sm:$0xff]  ;;  %v6614_v13 = vld [vmem:[%s10551_s14 + $0x638] sm:$0xff] }
 0x10c   : > { %8127 = vmatprep.subr.mxu0 %v6621_v2  ;;  %9526 = vmatprep.subr.mxu1 %v6621_v2  ;;  %v6613_v14 = vld [vmem:[%s10551_s14 + $0x630] sm:$0xff]  ;;  %v6612_v15 = vld [vmem:[%s10551_s14 + $0x628] sm:$0xff]  ;;  %v6611_v16 = vld [vmem:[%s10551_s14 + $0x620] sm:$0xff] }
 0x10d   : > { %8128 = vmatpush3.msra.mxu0 %v6621_v2  ;;  %9542 = vmatpush3.msra.mxu1 %v6621_v2  ;;  %v6610_v17 = vld [vmem:[%s10551_s14 + $0x618] sm:$0xff]  ;;  %v6609_v18 = vld [vmem:[%s10551_s14 + $0x610] sm:$0xff]  ;;  %v6608_v19 = vld [vmem:[%s10551_s14 + $0x608] sm:$0xff] }
 0x10e   : > { %8129 = vmatprep.subr.mxu0 %v6620_v7  ;;  %9527 = vmatprep.subr.mxu1 %v6620_v7  ;;  %v6607_v20 = vld [vmem:[%s10551_s14 + $0x600] sm:$0xff] }
 0x10f   : > { %8130 = vmatpush3.msra.mxu0 %v6620_v7  ;;  %9543 = vmatpush3.msra.mxu1 %v6620_v7  ;;  %s6590_s29 = smul.u32 192, %s12181_s18 }
 0x110   : > { %8131 = vmatprep.subr.mxu0 %v6619_v8  ;;  %9528 = vmatprep.subr.mxu1 %v6619_v8 }
 0x111   : > { %8132 = vmatpush3.msra.mxu0 %v6619_v8  ;;  %9544 = vmatpush3.msra.mxu1 %v6619_v8  ;;  %s10690_s3 = scalar_lea.vmem [#allocation2], %s6590_s29 }
 0x112   : > { %8133 = vmatprep.subr.mxu0 %v6618_v9  ;;  %9529 = vmatprep.subr.mxu1 %v6618_v9  ;;  %v6591_v21 = vld [vmem:[%s10690_s3 + $0x32] sm:$0xff]  ;;  %v6592_v23 = vld [vmem:[%s10690_s3 + $0x3a] sm:$0xff]  ;;  %v6593_v25 = vld [vmem:[%s10690_s3 + $0x4a] sm:$0xff] }
 0x113   : > { %8134 = vmatpush3.msra.mxu0 %v6618_v9  ;;  %9545 = vmatpush3.msra.mxu1 %v6618_v9  ;;  %v6599_v22 = vld [vmem:[%s10690_s3 + $0x92] sm:$0xff]  ;;  %v6600_v24 = vld [vmem:[%s10690_s3 + $0x9a] sm:$0xff]  ;;  %v6601_v26 = vld [vmem:[%s10690_s3 + $0xaa] sm:$0xff] }
 0x114   : > { %8135 = vmatprep.subr.mxu0 %v6617_v10  ;;  %9530 = vmatprep.subr.mxu1 %v6617_v10  ;;  %v6594_v27 = vld [vmem:[%s10690_s3 + $0x52] sm:$0xff]  ;;  %v6595_v29 = vld [vmem:[%s10690_s3 + $0x62] sm:$0xff]  ;;  %v6596_v31 = vld [vmem:[%s10690_s3 + $0x6a] sm:$0xff] }
 0x115   : > { %8136 = vmatpush3.msra.mxu0 %v6617_v10  ;;  %9546 = vmatpush3.msra.mxu1 %v6617_v10  ;;  %v6602_v28 = vld [vmem:[%s10690_s3 + $0xb2] sm:$0xff]  ;;  %v6603_v30 = vld [vmem:[%s10690_s3 + $0xc2] sm:$0xff]  ;;  %v6604_v32 = vld [vmem:[%s10690_s3 + $0xca] sm:$0xff] }
 0x116   : > { %8137 = vmatprep.subr.mxu0 %v6616_v11  ;;  %9531 = vmatprep.subr.mxu1 %v6616_v11  ;;  %v6597_v33 = vld [vmem:[%s10690_s3 + $0x7a] sm:$0xff]  ;;  %v6598_v35 = vld [vmem:[%s10690_s3 + $0x82] sm:$0xff] }
 0x117   : > { %8138 = vmatpush3.msra.mxu0 %v6616_v11  ;;  %9547 = vmatpush3.msra.mxu1 %v6616_v11  ;;  %v6605_v34 = vld [vmem:[%s10690_s3 + $0xda] sm:$0xff]  ;;  %v6606_v36 = vld [vmem:[%s10690_s3 + $0xe2] sm:$0xff] }
 0x118   : > { %8139 = vmatprep.subr.mxu0 %v6615_v12  ;;  %9532 = vmatprep.subr.mxu1 %v6615_v12 }
 0x119   : > { %8140 = vmatpush3.msra.mxu0 %v6615_v12  ;;  %9548 = vmatpush3.msra.mxu1 %v6615_v12 }
 0x11a   : > { %8141 = vmatprep.subr.mxu0 %v6614_v13  ;;  %9533 = vmatprep.subr.mxu1 %v6614_v13 }
 0x11b   : > { %8142 = vmatpush3.msra.mxu0 %v6614_v13  ;;  %9549 = vmatpush3.msra.mxu1 %v6614_v13 }
 0x11c   : > { %8143 = vmatprep.subr.mxu0 %v6613_v14  ;;  %9534 = vmatprep.subr.mxu1 %v6613_v14 }
 0x11d   : > { %8144 = vmatpush3.msra.mxu0 %v6613_v14  ;;  %9550 = vmatpush3.msra.mxu1 %v6613_v14 }
 0x11e   : > { %8145 = vmatprep.subr.mxu0 %v6612_v15  ;;  %9535 = vmatprep.subr.mxu1 %v6612_v15 }
 0x11f   : > { %8146 = vmatpush3.msra.mxu0 %v6612_v15  ;;  %9551 = vmatpush3.msra.mxu1 %v6612_v15 }
 0x120   : > { %8147 = vmatprep.subr.mxu0 %v6611_v16  ;;  %9536 = vmatprep.subr.mxu1 %v6611_v16 }
 0x121   : > { %8148 = vmatpush3.msra.mxu0 %v6611_v16  ;;  %9552 = vmatpush3.msra.mxu1 %v6611_v16 }
 0x122   : > { %8149 = vmatprep.subr.mxu0 %v6610_v17  ;;  %9537 = vmatprep.subr.mxu1 %v6610_v17 }
 0x123   : > { %8150 = vmatpush3.msra.mxu0 %v6610_v17  ;;  %9553 = vmatpush3.msra.mxu1 %v6610_v17 }
 0x124   : > { %8151 = vmatprep.subr.mxu0 %v6609_v18  ;;  %9538 = vmatprep.subr.mxu1 %v6609_v18 }
 0x125   : > { %8152 = vmatpush3.msra.mxu0 %v6609_v18  ;;  %9554 = vmatpush3.msra.mxu1 %v6609_v18 }
 0x126   : > { %8153 = vmatprep.subr.mxu0 %v6608_v19  ;;  %9539 = vmatprep.subr.mxu1 %v6608_v19 }
 0x127   : > { %8154 = vmatpush3.msra.mxu0 %v6608_v19  ;;  %9555 = vmatpush3.msra.mxu1 %v6608_v19 }
 0x128   : > { %8155 = vmatprep.subr.mxu0 %v6607_v20  ;;  %9540 = vmatprep.subr.mxu1 %v6607_v20 }
 0x129   : > { %8156 = vmatpush3.msra.mxu0 %v6607_v20  ;;  %9556 = vmatpush3.msra.mxu1 %v6607_v20 }
 0x12a   : > { %8157 = vmatprep.mubr.f32.mxu0 %v6591_v21  ;;  %8169 = vmatprep.mubr.f32.mxu1 %v6599_v22 }
 0x12b   : > { %8158 = vmatmul.mubr.f32.vlgmr.msra.gmra.mxu0 %v6592_v23  ;;  %8170 = vmatmul.mubr.f32.vlgmr.msra.gmra.mxu1 %v6600_v24 }
 0x12c   : > { %8160 = vmatprep.mubr.f32.mxu0 %v6593_v25  ;;  %8172 = vmatprep.mubr.f32.mxu1 %v6601_v26 }
 0x12f   : > { %8161 = vmatmul.mubr.f32.gmra.mxu0 %v6594_v27  ;;  %8173 = vmatmul.mubr.f32.gmra.mxu1 %v6602_v28 }
 0x130   : > { %8163 = vmatprep.mubr.f32.mxu0 %v6595_v29  ;;  %8175 = vmatprep.mubr.f32.mxu1 %v6603_v30 }
 0x133   : > { %8164 = vmatmul.mubr.f32.gmra.mxu0 %v6596_v31  ;;  %8176 = vmatmul.mubr.f32.gmra.mxu1 %v6604_v32 }
 0x134   : > { %8166 = vmatprep.mubr.f32.mxu0 %v6597_v33  ;;  %8178 = vmatprep.mubr.f32.mxu1 %v6605_v34 }
 0x137   : > { %8167 = vmatmul.mubr.f32.gmra.mxu0 %v6598_v35  ;;  %8179 = vmatmul.mubr.f32.gmra.mxu1 %v6606_v36 }
 0x1eb   : > { %v8159_v37 = vpop.f32.mrf.mxu0  ;;  %v8171_v38 = vpop.f32.mrf.mxu1 }
 0x1ec   : > { %818 = vst [vmem:[#allocation3] sm:$0xff] %v8159_v37  ;;  %826 = vst [vmem:[#allocation3 + $0x20] sm:$0xff] %v8171_v38 }
 0x1ed   : > { %v738_v39 = vpop.f32.mrf.mxu0  ;;  %v778_v40 = vpop.f32.mrf.mxu1 }
 0x1ee   : > { %817 = vst [vmem:[#allocation3 + $0x30] sm:$0xff] %v738_v39  ;;  %825 = vst [vmem:[#allocation3 + $0x40] sm:$0xff] %v778_v40 }
 0x1ef   : > { %v8162_v41 = vpop.f32.mrf.mxu0  ;;  %v8174_v42 = vpop.f32.mrf.mxu1 }
 0x1f0   : > { %820 = vst [vmem:[#allocation3 + $0x18] sm:$0xff] %v8162_v41  ;;  %828 = vst [vmem:[#allocation3 + $0x38] sm:$0xff] %v8174_v42 }
 0x1f1   : > { %v748_v43 = vpop.f32.mrf.mxu0  ;;  %v788_v44 = vpop.f32.mrf.mxu1 }
 0x1f2   : > { %819 = vst [vmem:[#allocation3 + $0x58] sm:$0xff] %v748_v43  ;;  %827 = vst [vmem:[#allocation3 + $0x10] sm:$0xff] %v788_v44 }
 0x1f3   : > { %v8165_v45 = vpop.f32.mrf.mxu0  ;;  %v8177_v46 = vpop.f32.mrf.mxu1 }
 0x1f4   : > { %822 = vst [vmem:[#allocation3 + $0x68] sm:$0xff] %v8165_v45  ;;  %830 = vst [vmem:[#allocation3 + $0x70] sm:$0xff] %v8177_v46 }
 0x1f5   : > { %v758_v47 = vpop.f32.mrf.mxu0  ;;  %v798_v48 = vpop.f32.mrf.mxu1 }
 0x1f6   : > { %821 = vst [vmem:[#allocation3 + $0x50] sm:$0xff] %v758_v47  ;;  %829 = vst [vmem:[#allocation3 + $0x60] sm:$0xff] %v798_v48  ;;  %836 = sbr.rel (%p6623_p11) target bundleno = 866 (0x362), region = 68 }
 0x1f7   : > { %v8168_v49 = vpop.f32.mrf.mxu0  ;;  %v8180_v50 = vpop.f32.mrf.mxu1 }
 0x1f8   : > { %824 = vst [vmem:[#allocation3 + $0x48] sm:$0xff] %v8168_v49  ;;  %832 = vst [vmem:[#allocation3 + $0x28] sm:$0xff] %v8180_v50 }
 0x1f9   : > { %v768_v51 = vpop.f32.mrf.mxu0  ;;  %v808_v52 = vpop.f32.mrf.mxu1 }
 0x1fa   : > { %823 = vst [vmem:[#allocation3 + $0x8] sm:$0xff] %v768_v51  ;;  %831 = vst [vmem:[#allocation3 + $0x78] sm:$0xff] %v808_v52 }
 0x1fb   : > { %v886_v53 = vld [vmem:[%s10551_s14 + $0x78] sm:$0xff]  ;;  %v885_v54 = vld [vmem:[%s10551_s14 + $0x70] sm:$0xff]  ;;  %v884_v56 = vld [vmem:[%s10551_s14 + $0x68] sm:$0xff] }
 0x1fc   : > { %8181 = vmatprep.subr.mxu0 %v886_v53  ;;  %v6640_v55 = vld [vmem:[%s10551_s14 + $0xf8] sm:$0xff]  ;;  %v6639_v57 = vld [vmem:[%s10551_s14 + $0xf0] sm:$0xff]  ;;  %v6638_v58 = vld [vmem:[%s10551_s14 + $0xe8] sm:$0xff] }
 0x1fd   : > { %8182 = vmatpush3.msra.mxu0 %v886_v53  ;;  %8237 = vmatprep.subr.mxu1 %v6640_v55  ;;  %v883_v59 = vld [vmem:[%s10551_s14 + $0x60] sm:$0xff]  ;;  %v882_v61 = vld [vmem:[%s10551_s14 + $0x58] sm:$0xff]  ;;  %v881_v63 = vld [vmem:[%s10551_s14 + $0x50] sm:$0xff] }
 0x1fe   : > { %8183 = vmatprep.subr.mxu0 %v885_v54  ;;  %8238 = vmatpush3.msra.mxu1 %v6640_v55  ;;  %v6637_v60 = vld [vmem:[%s10551_s14 + $0xe0] sm:$0xff]  ;;  %v6636_v62 = vld [vmem:[%s10551_s14 + $0xd8] sm:$0xff]  ;;  %v6635_v0 = vld [vmem:[%s10551_s14 + $0xd0] sm:$0xff] }
 0x1ff   : > { %8184 = vmatpush3.msra.mxu0 %v885_v54  ;;  %8239 = vmatprep.subr.mxu1 %v6639_v57  ;;  %v880_v3 = vld [vmem:[%s10551_s14 + $0x48] sm:$0xff]  ;;  %v879_v5 = vld [vmem:[%s10551_s14 + $0x40] sm:$0xff]  ;;  %v878_v6 = vld [vmem:[%s10551_s14 + $0x38] sm:$0xff] }
 0x200   : > { %8185 = vmatprep.subr.mxu0 %v884_v56  ;;  %8240 = vmatpush3.msra.mxu1 %v6639_v57  ;;  %v6634_v4 = vld [vmem:[%s10551_s14 + $0xc8] sm:$0xff]  ;;  %v6633_v1 = vld [vmem:[%s10551_s14 + $0xc0] sm:$0xff]  ;;  %v6632_v2 = vld [vmem:[%s10551_s14 + $0xb8] sm:$0xff] }
 0x201   : > { %8186 = vmatpush3.msra.mxu0 %v884_v56  ;;  %8241 = vmatprep.subr.mxu1 %v6638_v58  ;;  %v877_v7 = vld [vmem:[%s10551_s14 + $0x30] sm:$0xff]  ;;  %v876_v9 = vld [vmem:[%s10551_s14 + $0x28] sm:$0xff]  ;;  %v875_v11 = vld [vmem:[%s10551_s14 + $0x20] sm:$0xff] }
 0x202   : > { %8187 = vmatprep.subr.mxu0 %v883_v59  ;;  %8242 = vmatpush3.msra.mxu1 %v6638_v58  ;;  %v6631_v8 = vld [vmem:[%s10551_s14 + $0xb0] sm:$0xff]  ;;  %v6630_v10 = vld [vmem:[%s10551_s14 + $0xa8] sm:$0xff]  ;;  %v855_v12 = vld [vmem:[%s10690_s3] sm:$0xff] }
 0x203   : > { %8188 = vmatpush3.msra.mxu0 %v883_v59  ;;  %8243 = vmatprep.subr.mxu1 %v6637_v60  ;;  %v874_v13 = vld [vmem:[%s10551_s14 + $0x18] sm:$0xff]  ;;  %v6629_v14 = vld [vmem:[%s10551_s14 + $0xa0] sm:$0xff]  ;;  %v873_v15 = vld [vmem:[%s10551_s14 + $0x10] sm:$0xff] }
 0x204   : > { %8189 = vmatprep.subr.mxu0 %v882_v61  ;;  %8244 = vmatpush3.msra.mxu1 %v6637_v60  ;;  %v6628_v16 = vld [vmem:[%s10551_s14 + $0x98] sm:$0xff]  ;;  %v872_v17 = vld [vmem:[%s10551_s14 + $0x8] sm:$0xff]  ;;  %v6627_v18 = vld [vmem:[%s10551_s14 + $0x90] sm:$0xff] }
 0x205   : > { %8190 = vmatpush3.msra.mxu0 %v882_v61  ;;  %8245 = vmatprep.subr.mxu1 %v6636_v62  ;;  %v871_v19 = vld [vmem:[%s10551_s14] sm:$0xff]  ;;  %v6626_v20 = vld [vmem:[%s10551_s14 + $0x88] sm:$0xff]  ;;  %v6656_v22 = vld [vmem:[%s10551_s14 + $0x178] sm:$0xff] }
 0x206   : > { %8191 = vmatprep.subr.mxu0 %v881_v63  ;;  %8246 = vmatpush3.msra.mxu1 %v6636_v62  ;;  %v856_v21 = vld [vmem:[%s10690_s3 + $0x8] sm:$0xff]  ;;  %v10746_v23 = vld [vmem:[%s10690_s3 + $0x18] sm:$0xff]  ;;  %v10752_v26 = vld [vmem:[%s10690_s3 + $0x20] sm:$0xff] }
 0x207   : > { %8192 = vmatpush3.msra.mxu0 %v881_v63  ;;  %8247 = vmatprep.subr.mxu1 %v6635_v0  ;;  %v6655_v24 = vld [vmem:[%s10551_s14 + $0x170] sm:$0xff]  ;;  %v6625_v25 = vld [vmem:[%s10551_s14 + $0x80] sm:$0xff]  ;;  %v6654_v27 = vld [vmem:[%s10551_s14 + $0x168] sm:$0xff] }
 0x208   : > { %8193 = vmatprep.subr.mxu0 %v880_v3  ;;  %8248 = vmatpush3.msra.mxu1 %v6635_v0  ;;  %v10756_v28 = vld [vmem:[%s10690_s3 + $0x30] sm:$0xff]  ;;  %v6653_v29 = vld [vmem:[%s10551_s14 + $0x160] sm:$0xff]  ;;  %v10764_v32 = vld [vmem:[%s10690_s3 + $0x38] sm:$0xff] }
 0x209   : > { %8194 = vmatpush3.msra.mxu0 %v880_v3  ;;  %8249 = vmatprep.subr.mxu1 %v6634_v4  ;;  %v1080_v30 = vld [vmem:[%s10690_s3 + $0x1] sm:$0xff]  ;;  %v1081_v31 = vld [vmem:[%s10690_s3 + $0x9] sm:$0xff]  ;;  %v6651_v35 = vld [vmem:[%s10551_s14 + $0x150] sm:$0xff] }
 0x20a   : > { %8195 = vmatprep.subr.mxu0 %v879_v5  ;;  %8250 = vmatpush3.msra.mxu1 %v6634_v4  ;;  %v6652_v33 = vld [vmem:[%s10551_s14 + $0x158] sm:$0xff]  ;;  %v10771_v36 = vld [vmem:[%s10690_s3 + $0x48] sm:$0xff]  ;;  %v6671_v37 = vld [vmem:[%s10551_s14 + $0x1f0] sm:$0xff] }
 0x20b   : > { %8196 = vmatpush3.msra.mxu0 %v879_v5  ;;  %8251 = vmatprep.subr.mxu1 %v6633_v1  ;;  %v6672_v34 = vld [vmem:[%s10551_s14 + $0x1f8] sm:$0xff]  ;;  %v10775_v38 = vld [vmem:[%s10690_s3 + $0x50] sm:$0xff]  ;;  %v6649_v43 = vld [vmem:[%s10551_s14 + $0x140] sm:$0xff] }
 0x20c   : > { %8197 = vmatprep.subr.mxu0 %v878_v6  ;;  %8252 = vmatpush3.msra.mxu1 %v6633_v1  ;;  %v1082_v39 = vld [vmem:[%s10690_s3 + $0x19] sm:$0xff]  ;;  %v6650_v40 = vld [vmem:[%s10551_s14 + $0x148] sm:$0xff]  ;;  %v1083_v41 = vld [vmem:[%s10690_s3 + $0x21] sm:$0xff] }
 0x20d   : > { %8198 = vmatpush3.msra.mxu0 %v878_v6  ;;  %8253 = vmatprep.subr.mxu1 %v6632_v2  ;;  %v6670_v42 = vld [vmem:[%s10551_s14 + $0x1e8] sm:$0xff]  ;;  %v10785_v44 = vld [vmem:[%s10690_s3 + $0x60] sm:$0xff]  ;;  %v6647_v51 = vld [vmem:[%s10551_s14 + $0x130] sm:$0xff] }
 0x20e   : > { %8199 = vmatprep.subr.mxu0 %v877_v7  ;;  %8254 = vmatpush3.msra.mxu1 %v6632_v2  ;;  %v6669_v45 = vld [vmem:[%s10551_s14 + $0x1e0] sm:$0xff]  ;;  %v1084_v47 = vld [vmem:[%s10690_s3 + $0x31] sm:$0xff]  ;;  %v6648_v48 = vld [vmem:[%s10551_s14 + $0x138] sm:$0xff] }
 0x20f   : > { %8200 = vmatpush3.msra.mxu0 %v877_v7  ;;  %8255 = vmatprep.subr.mxu1 %v6631_v8  ;;  %v10789_v46 = vld [vmem:[%s10690_s3 + $0x68] sm:$0xff]  ;;  %v1085_v49 = vld [vmem:[%s10690_s3 + $0x39] sm:$0xff]  ;;  %v1087_v57 = vld [vmem:[%s10690_s3 + $0x51] sm:$0xff] }
 0x210   : > { %8201 = vmatprep.subr.mxu0 %v876_v9  ;;  %8256 = vmatpush3.msra.mxu1 %v6631_v8  ;;  %v6668_v50 = vld [vmem:[%s10551_s14 + $0x1d8] sm:$0xff]  ;;  %v6667_v53 = vld [vmem:[%s10551_s14 + $0x1d0] sm:$0xff]  ;;  %v1086_v55 = vld [vmem:[%s10690_s3 + $0x49] sm:$0xff] }
 0x211   : > { %8202 = vmatpush3.msra.mxu0 %v876_v9  ;;  %8257 = vmatprep.subr.mxu1 %v6630_v10  ;;  %v10799_v52 = vld [vmem:[%s10690_s3 + $0x78] sm:$0xff]  ;;  %v10803_v54 = vld [vmem:[%s10690_s3 + $0x80] sm:$0xff]  ;;  %v6646_v56 = vld [vmem:[%s10551_s14 + $0x128] sm:$0xff] }
 0x212   : > { %8203 = vmatprep.subr.mxu0 %v875_v11  ;;  %8258 = vmatpush3.msra.mxu1 %v6630_v10  ;;  %v6666_v58 = vld [vmem:[%s10551_s14 + $0x1c8] sm:$0xff]  ;;  %v6645_v59 = vld [vmem:[%s10551_s14 + $0x120] sm:$0xff]  ;;  %v10817_v62 = vld [vmem:[%s10690_s3 + $0x98] sm:$0xff] }
 0x213   : > { %8204 = vmatpush3.msra.mxu0 %v875_v11  ;;  %8213 = vmatprep.mubr.f32.mxu0 %v855_v12  ;;  %v10813_v60 = vld [vmem:[%s10690_s3 + $0x90] sm:$0xff]  ;;  %v6665_v61 = vld [vmem:[%s10551_s14 + $0x1c0] sm:$0xff]  ;;  %v6644_v0 = vld [vmem:[%s10551_s14 + $0x118] sm:$0xff] }
 0x214   : > { %8205 = vmatprep.subr.mxu0 %v874_v13  ;;  %8259 = vmatprep.subr.mxu1 %v6629_v14  ;;  %v1088_v63 = vld [vmem:[%s10690_s3 + $0x61] sm:$0xff]  ;;  %v1089_v3 = vld [vmem:[%s10690_s3 + $0x69] sm:$0xff]  ;;  %v6643_v5 = vld [vmem:[%s10551_s14 + $0x110] sm:$0xff] }
 0x215   : > { %8206 = vmatpush3.msra.mxu0 %v874_v13  ;;  %8260 = vmatpush3.msra.mxu1 %v6629_v14  ;;  %v6664_v4 = vld [vmem:[%s10551_s14 + $0x1b8] sm:$0xff]  ;;  %v10827_v1 = vld [vmem:[%s10690_s3 + $0xa8] sm:$0xff]  ;;  %v6663_v6 = vld [vmem:[%s10551_s14 + $0x1b0] sm:$0xff] }
 0x216   : > { %8207 = vmatprep.subr.mxu0 %v873_v15  ;;  %8261 = vmatprep.subr.mxu1 %v6628_v16  ;;  %v10831_v2 = vld [vmem:[%s10690_s3 + $0xb0] sm:$0xff]  ;;  %v1090_v7 = vld [vmem:[%s10690_s3 + $0x79] sm:$0xff]  ;;  %v1091_v9 = vld [vmem:[%s10690_s3 + $0x81] sm:$0xff] }
 0x217   : > { %8208 = vmatpush3.msra.mxu0 %v873_v15  ;;  %8262 = vmatpush3.msra.mxu1 %v6628_v16  ;;  %v6642_v8 = vld [vmem:[%s10551_s14 + $0x108] sm:$0xff]  ;;  %v6641_v11 = vld [vmem:[%s10551_s14 + $0x100] sm:$0xff]  ;;  %v6688_v16 = vld [vmem:[%s10551_s14 + $0x278] sm:$0xff] }
 0x218   : > { %8209 = vmatprep.subr.mxu0 %v872_v17  ;;  %8263 = vmatprep.subr.mxu1 %v6627_v18  ;;  %v6662_v10 = vld [vmem:[%s10551_s14 + $0x1a8] sm:$0xff]  ;;  %v1306_v12 = vld [vmem:[%s10690_s3 + $0x2] sm:$0xff] }
 0x219   : > { %8210 = vmatpush3.msra.mxu0 %v872_v17  ;;  %8264 = vmatpush3.msra.mxu1 %v6627_v18  ;;  %v6661_v13 = vld [vmem:[%s10551_s14 + $0x1a0] sm:$0xff]  ;;  %v1092_v14 = vld [vmem:[%s10690_s3 + $0x91] sm:$0xff]  ;;  %v1093_v17 = vld [vmem:[%s10690_s3 + $0x99] sm:$0xff] }
 0x21a   : > { %8211 = vmatprep.subr.mxu0 %v871_v19  ;;  %8265 = vmatprep.subr.mxu1 %v6626_v20  ;;  %v1307_v15 = vld [vmem:[%s10690_s3 + $0xa] sm:$0xff]  ;;  %v6660_v18 = vld [vmem:[%s10551_s14 + $0x198] sm:$0xff] }
 0x21b   : > { %8212 = vmatpush3.msra.mxu0 %v871_v19  ;;  %8266 = vmatpush3.msra.mxu1 %v6626_v20  ;;  %v6687_v19 = vld [vmem:[%s10551_s14 + $0x270] sm:$0xff] }
 0x21c   : > { %8214 = vmatmul.mubr.f32.vlgmr.msra.gmra.mxu0 %v856_v21  ;;  %8293 = vmatprep.subr.mxu0 %v6656_v22  ;;  %v1308_v20 = vld [vmem:[%s10690_s3 + $0x1a] sm:$0xff] }
 0x21d   : > { %8294 = vmatpush3.msra.mxu0 %v6656_v22  ;;  %8216 = vmatprep.mubr.f32.mxu0 %v10746_v23  ;;  %v6659_v21 = vld [vmem:[%s10551_s14 + $0x190] sm:$0xff]  ;;  %v1094_v22 = vld [vmem:[%s10690_s3 + $0xa9] sm:$0xff] }
 0x21e   : > { %8295 = vmatprep.subr.mxu0 %v6655_v24  ;;  %8267 = vmatprep.subr.mxu1 %v6625_v25 }
 0x21f   : > { %8296 = vmatpush3.msra.mxu0 %v6655_v24  ;;  %8268 = vmatpush3.msra.mxu1 %v6625_v25  ;;  %v1309_v24 = vld [vmem:[%s10690_s3 + $0x22] sm:$0xff]  ;;  %v6686_v25 = vld [vmem:[%s10551_s14 + $0x268] sm:$0xff] }
 0x220   : > { %8217 = vmatmul.mubr.f32.gmra.mxu0 %v10752_v26  ;;  %8297 = vmatprep.subr.mxu0 %v6654_v27 }
 0x221   : > { %8298 = vmatpush3.msra.mxu0 %v6654_v27  ;;  %8219 = vmatprep.mubr.f32.mxu0 %v10756_v28  ;;  %v1095_v27 = vld [vmem:[%s10690_s3 + $0xb1] sm:$0xff] }
 0x222   : > { %8299 = vmatprep.subr.mxu0 %v6653_v29  ;;  %8269 = vmatprep.mubr.f32.mxu1 %v1080_v30  ;;  %v6685_v30 = vld [vmem:[%s10551_s14 + $0x260] sm:$0xff] }
 0x223   : > { %8300 = vmatpush3.msra.mxu0 %v6653_v29  ;;  %8270 = vmatmul.mubr.f32.vlgmr.msra.gmra.mxu1 %v1081_v31  ;;  %v6658_v29 = vld [vmem:[%s10551_s14 + $0x188] sm:$0xff] }
 0x224   : > { %8220 = vmatmul.mubr.f32.gmra.mxu0 %v10764_v32  ;;  %8301 = vmatprep.subr.mxu0 %v6652_v33  ;;  %v1310_v31 = vld [vmem:[%s10690_s3 + $0x32] sm:$0xff] }
 0x225   : > { %8302 = vmatpush3.msra.mxu0 %v6652_v33  ;;  %8349 = vmatprep.subr.mxu1 %v6672_v34  ;;  %v6657_v33 = vld [vmem:[%s10551_s14 + $0x180] sm:$0xff] }
 0x226   : > { %8303 = vmatprep.subr.mxu0 %v6651_v35  ;;  %8350 = vmatpush3.msra.mxu1 %v6672_v34  ;;  %v1311_v34 = vld [vmem:[%s10690_s3 + $0x3a] sm:$0xff] }
 0x227   : > { %8222 = vmatprep.mubr.f32.mxu0 %v10771_v36  ;;  %8304 = vmatpush3.msra.mxu0 %v6651_v35  ;;  %v1532_v35 = vld [vmem:[%s10690_s3 + $0x3] sm:$0xff] }
 0x228   : > { %8351 = vmatprep.subr.mxu1 %v6671_v37  ;;  %8223 = vmatmul.mubr.f32.gmra.mxu0 %v10775_v38 }
 0x229   : > { %8272 = vmatprep.mubr.f32.mxu1 %v1082_v39  ;;  %8305 = vmatprep.subr.mxu0 %v6650_v40  ;;  %v1533_v39 = vld [vmem:[%s10690_s3 + $0xb] sm:$0xff] }
 0x22a   : > { %8352 = vmatpush3.msra.mxu1 %v6671_v37  ;;  %8306 = vmatpush3.msra.mxu0 %v6650_v40  ;;  %v6684_v37 = vld [vmem:[%s10551_s14 + $0x258] sm:$0xff] }
 0x22b   : > { %8273 = vmatmul.mubr.f32.gmra.mxu1 %v1083_v41  ;;  %8353 = vmatprep.subr.mxu1 %v6670_v42  ;;  %v6722_v40 = vld [vmem:[%s10551_s14 + $0x2f8] sm:$0xff]  ;;  %v6683_v41 = vld [vmem:[%s10551_s14 + $0x250] sm:$0xff] }
 0x22c   : > { %8307 = vmatprep.subr.mxu0 %v6649_v43  ;;  %8354 = vmatpush3.msra.mxu1 %v6670_v42  ;;  %v1312_v42 = vld [vmem:[%s10690_s3 + $0x4a] sm:$0xff] }
 0x22d   : > { %8225 = vmatprep.mubr.f32.mxu0 %v10785_v44  ;;  %8308 = vmatpush3.msra.mxu0 %v6649_v43  ;;  %v6721_v43 = vld [vmem:[%s10551_s14 + $0x2f0] sm:$0xff] }
 0x22e   : > { %8355 = vmatprep.subr.mxu1 %v6669_v45  ;;  %8226 = vmatmul.mubr.f32.gmra.mxu0 %v10789_v46 }
 0x22f   : > { %8275 = vmatprep.mubr.f32.mxu1 %v1084_v47  ;;  %8309 = vmatprep.subr.mxu0 %v6648_v48  ;;  %v1534_v47 = vld [vmem:[%s10690_s3 + $0x1b] sm:$0xff] }
 0x230   : > { %8356 = vmatpush3.msra.mxu1 %v6669_v45  ;;  %8310 = vmatpush3.msra.mxu0 %v6648_v48  ;;  %v1313_v45 = vld [vmem:[%s10690_s3 + $0x52] sm:$0xff] }
 0x231   : > { %8276 = vmatmul.mubr.f32.gmra.mxu1 %v1085_v49  ;;  %8357 = vmatprep.subr.mxu1 %v6668_v50  ;;  %v6682_v48 = vld [vmem:[%s10551_s14 + $0x248] sm:$0xff]  ;;  %v1535_v49 = vld [vmem:[%s10690_s3 + $0x23] sm:$0xff] }
 0x232   : > { %8311 = vmatprep.subr.mxu0 %v6647_v51  ;;  %8358 = vmatpush3.msra.mxu1 %v6668_v50  ;;  %v6720_v50 = vld [vmem:[%s10551_s14 + $0x2e8] sm:$0xff] }
 0x233   : > { %8228 = vmatprep.mubr.f32.mxu0 %v10799_v52  ;;  %8312 = vmatpush3.msra.mxu0 %v6647_v51  ;;  %v6681_v51 = vld [vmem:[%s10551_s14 + $0x240] sm:$0xff] }
 0x234   : > { %8359 = vmatprep.subr.mxu1 %v6667_v53  ;;  %8229 = vmatmul.mubr.f32.gmra.mxu0 %v10803_v54 }
 0x235   : > { %8278 = vmatprep.mubr.f32.mxu1 %v1086_v55  ;;  %8313 = vmatprep.subr.mxu0 %v6646_v56  ;;  %v6719_v55 = vld [vmem:[%s10551_s14 + $0x2e0] sm:$0xff] }
 0x236   : > { %8360 = vmatpush3.msra.mxu1 %v6667_v53  ;;  %8314 = vmatpush3.msra.mxu0 %v6646_v56  ;;  %v1314_v53 = vld [vmem:[%s10690_s3 + $0x62] sm:$0xff]  ;;  %v1315_v56 = vld [vmem:[%s10690_s3 + $0x6a] sm:$0xff] }
 0x237   : > { %8279 = vmatmul.mubr.f32.gmra.mxu1 %v1087_v57  ;;  %8361 = vmatprep.subr.mxu1 %v6666_v58  ;;  %v1536_v57 = vld [vmem:[%s10690_s3 + $0x33] sm:$0xff] }
 0x238   : > { %8315 = vmatprep.subr.mxu0 %v6645_v59  ;;  %8362 = vmatpush3.msra.mxu1 %v6666_v58  ;;  %v6680_v58 = vld [vmem:[%s10551_s14 + $0x238] sm:$0xff] }
 0x239   : > { %8231 = vmatprep.mubr.f32.mxu0 %v10813_v60  ;;  %8316 = vmatpush3.msra.mxu0 %v6645_v59  ;;  %v1537_v59 = vld [vmem:[%s10690_s3 + $0x3b] sm:$0xff] }
 0x23a   : > { %8363 = vmatprep.subr.mxu1 %v6665_v61  ;;  %8232 = vmatmul.mubr.f32.gmra.mxu0 %v10817_v62 }
 0x23b   : > { %8281 = vmatprep.mubr.f32.mxu1 %v1088_v63  ;;  %8317 = vmatprep.subr.mxu0 %v6644_v0  ;;  %v6679_v63 = vld [vmem:[%s10551_s14 + $0x230] sm:$0xff] }
 0x23c   : > { %8364 = vmatpush3.msra.mxu1 %v6665_v61  ;;  %8318 = vmatpush3.msra.mxu0 %v6644_v0  ;;  %v6718_v61 = vld [vmem:[%s10551_s14 + $0x2d8] sm:$0xff] }
 0x23d   : > { %8282 = vmatmul.mubr.f32.gmra.mxu1 %v1089_v3  ;;  %8365 = vmatprep.subr.mxu1 %v6664_v4  ;;  %v1316_v0 = vld [vmem:[%s10690_s3 + $0x7a] sm:$0xff] }
 0x23e   : > { %8319 = vmatprep.subr.mxu0 %v6643_v5  ;;  %8366 = vmatpush3.msra.mxu1 %v6664_v4  ;;  %v6717_v3 = vld [vmem:[%s10551_s14 + $0x2d0] sm:$0xff]  ;;  %v1317_v4 = vld [vmem:[%s10690_s3 + $0x82] sm:$0xff] }
 0x23f   : > { %8234 = vmatprep.mubr.f32.mxu0 %v10827_v1  ;;  %8320 = vmatpush3.msra.mxu0 %v6643_v5  ;;  %v1538_v5 = vld [vmem:[%s10690_s3 + $0x4b] sm:$0xff] }
 0x240   : > { %8367 = vmatprep.subr.mxu1 %v6663_v6  ;;  %8235 = vmatmul.mubr.f32.gmra.mxu0 %v10831_v2 }
 0x241   : > { %8284 = vmatprep.mubr.f32.mxu1 %v1090_v7  ;;  %8321 = vmatprep.subr.mxu0 %v6642_v8  ;;  %v1539_v7 = vld [vmem:[%s10690_s3 + $0x53] sm:$0xff] }
 0x242   : > { %8368 = vmatpush3.msra.mxu1 %v6663_v6  ;;  %8322 = vmatpush3.msra.mxu0 %v6642_v8  ;;  %v6678_v6 = vld [vmem:[%s10551_s14 + $0x228] sm:$0xff] }
 0x243   : > { %8285 = vmatmul.mubr.f32.gmra.mxu1 %v1091_v9  ;;  %8369 = vmatprep.subr.mxu1 %v6662_v10  ;;  %v6716_v8 = vld [vmem:[%s10551_s14 + $0x2c8] sm:$0xff]  ;;  %v6677_v9 = vld [vmem:[%s10551_s14 + $0x220] sm:$0xff] }
 0x244   : > { %8323 = vmatprep.subr.mxu0 %v6641_v11  ;;  %8370 = vmatpush3.msra.mxu1 %v6662_v10  ;;  %v1318_v10 = vld [vmem:[%s10690_s3 + $0x92] sm:$0xff] }
 0x245   : > { %8324 = vmatpush3.msra.mxu0 %v6641_v11  ;;  %8325 = vmatprep.mubr.f32.mxu0 %v1306_v12  ;;  %v6715_v11 = vld [vmem:[%s10551_s14 + $0x2c0] sm:$0xff]  ;;  %v1319_v12 = vld [vmem:[%s10690_s3 + $0x9a] sm:$0xff] }
 0x246   : > { %8371 = vmatprep.subr.mxu1 %v6661_v13  ;;  %8287 = vmatprep.mubr.f32.mxu1 %v1092_v14  ;;  %v6676_v14 = vld [vmem:[%s10551_s14 + $0x218] sm:$0xff] }
 0x247   : > { %8326 = vmatmul.mubr.f32.vlgmr.msra.gmra.mxu0 %v1307_v15  ;;  %8372 = vmatpush3.msra.mxu1 %v6661_v13  ;;  %v1540_v13 = vld [vmem:[%s10690_s3 + $0x63] sm:$0xff]  ;;  %v1541_v15 = vld [vmem:[%s10690_s3 + $0x6b] sm:$0xff] }
 0x248   : > { %8405 = vmatprep.subr.mxu0 %v6688_v16  ;;  %8288 = vmatmul.mubr.f32.gmra.mxu1 %v1093_v17  ;;  %v6675_v17 = vld [vmem:[%s10551_s14 + $0x210] sm:$0xff] }
 0x249   : > { %8373 = vmatprep.subr.mxu1 %v6660_v18  ;;  %8406 = vmatpush3.msra.mxu0 %v6688_v16  ;;  %v6714_v16 = vld [vmem:[%s10551_s14 + $0x2b8] sm:$0xff] }
 0x24a   : > { %8374 = vmatpush3.msra.mxu1 %v6660_v18  ;;  %8407 = vmatprep.subr.mxu0 %v6687_v19  ;;  %v1320_v18 = vld [vmem:[%s10690_s3 + $0xaa] sm:$0xff] }
 0x24b   : > { %8328 = vmatprep.mubr.f32.mxu0 %v1308_v20  ;;  %8375 = vmatprep.subr.mxu1 %v6659_v21  ;;  %v1321_v20 = vld [vmem:[%s10690_s3 + $0xb2] sm:$0xff] }
 0x24c   : > { %8408 = vmatpush3.msra.mxu0 %v6687_v19  ;;  %8290 = vmatprep.mubr.f32.mxu1 %v1094_v22  ;;  %v6713_v19 = vld [vmem:[%s10551_s14 + $0x2b0] sm:$0xff]  ;;  %v6674_v22 = vld [vmem:[%s10551_s14 + $0x208] sm:$0xff] }
 0x24d   : > { %8329 = vmatmul.mubr.f32.gmra.mxu0 %v1309_v24  ;;  %8376 = vmatpush3.msra.mxu1 %v6659_v21  ;;  %v1542_v21 = vld [vmem:[%s10690_s3 + $0x7b] sm:$0xff]  ;;  %v1543_v24 = vld [vmem:[%s10690_s3 + $0x83] sm:$0xff] }
 0x24e   : > { %8409 = vmatprep.subr.mxu0 %v6686_v25  ;;  %8291 = vmatmul.mubr.f32.gmra.mxu1 %v1095_v27  ;;  %v6673_v27 = vld [vmem:[%s10551_s14 + $0x200] sm:$0xff] }
 0x24f   : > { %8377 = vmatprep.subr.mxu1 %v6658_v29  ;;  %8410 = vmatpush3.msra.mxu0 %v6686_v25  ;;  %v6712_v25 = vld [vmem:[%s10551_s14 + $0x2a8] sm:$0xff] }
 0x250   : > { %8378 = vmatpush3.msra.mxu1 %v6658_v29  ;;  %8411 = vmatprep.subr.mxu0 %v6685_v30  ;;  %v1758_v29 = vld [vmem:[%s10690_s3 + $0x4] sm:$0xff] }
 0x251   : > { %8331 = vmatprep.mubr.f32.mxu0 %v1310_v31  ;;  %8379 = vmatprep.subr.mxu1 %v6657_v33  ;;  %v1544_v31 = vld [vmem:[%s10690_s3 + $0x93] sm:$0xff] }
 0x252   : > { %8412 = vmatpush3.msra.mxu0 %v6685_v30  ;;  %8380 = vmatpush3.msra.mxu1 %v6657_v33  ;;  %v6711_v30 = vld [vmem:[%s10551_s14 + $0x2a0] sm:$0xff]  ;;  %v1759_v33 = vld [vmem:[%s10690_s3 + $0xc] sm:$0xff] }
 0x253   : > { %8332 = vmatmul.mubr.f32.gmra.mxu0 %v1311_v34  ;;  %8381 = vmatprep.mubr.f32.mxu1 %v1532_v35  ;;  %v1545_v34 = vld [vmem:[%s10690_s3 + $0x9b] sm:$0xff] }
 0x254   : > { %8413 = vmatprep.subr.mxu0 %v6684_v37  ;;  %8382 = vmatmul.mubr.f32.vlgmr.msra.gmra.mxu1 %v1533_v39  ;;  %v6710_v35 = vld [vmem:[%s10551_s14 + $0x298] sm:$0xff]  ;;  %v6709_v39 = vld [vmem:[%s10551_s14 + $0x290] sm:$0xff] }
 0x255   : > { %8414 = vmatpush3.msra.mxu0 %v6684_v37  ;;  %8461 = vmatprep.subr.mxu1 %v6722_v40  ;;  %v1760_v37 = vld [vmem:[%s10690_s3 + $0x1c] sm:$0xff] }
 0x256   : > { %8415 = vmatprep.subr.mxu0 %v6683_v41  ;;  %8462 = vmatpush3.msra.mxu1 %v6722_v40  ;;  %v1546_v40 = vld [vmem:[%s10690_s3 + $0xab] sm:$0xff] }
 0x257   : > { %8334 = vmatprep.mubr.f32.mxu0 %v1312_v42  ;;  %8416 = vmatpush3.msra.mxu0 %v6683_v41  ;;  %v1761_v41 = vld [vmem:[%s10690_s3 + $0x24] sm:$0xff]  ;;  %v1547_v42 = vld [vmem:[%s10690_s3 + $0xb3] sm:$0xff] }
 0x258   : > { %8463 = vmatprep.subr.mxu1 %v6721_v43  ;;  %8335 = vmatmul.mubr.f32.gmra.mxu0 %v1313_v45  ;;  %v1762_v45 = vld [vmem:[%s10690_s3 + $0x34] sm:$0xff] }
 0x259   : > { %8384 = vmatprep.mubr.f32.mxu1 %v1534_v47  ;;  %8417 = vmatprep.subr.mxu0 %v6682_v48  ;;  %v6707_v47 = vld [vmem:[%s10551_s14 + $0x280] sm:$0xff] }
 0x25a   : > { %8464 = vmatpush3.msra.mxu1 %v6721_v43  ;;  %8418 = vmatpush3.msra.mxu0 %v6682_v48  ;;  %v6708_v43 = vld [vmem:[%s10551_s14 + $0x288] sm:$0xff]  ;;  %v1763_v48 = vld [vmem:[%s10690_s3 + $0x3c] sm:$0xff] }
 0x25b   : > { %8385 = vmatmul.mubr.f32.gmra.mxu1 %v1535_v49  ;;  %8465 = vmatprep.subr.mxu1 %v6720_v50  ;;  %v1764_v49 = vld [vmem:[%s10690_s3 + $0x4c] sm:$0xff] }
 0x25c   : > { %8419 = vmatprep.subr.mxu0 %v6681_v51  ;;  %8466 = vmatpush3.msra.mxu1 %v6720_v50  ;;  %v1765_v50 = vld [vmem:[%s10690_s3 + $0x54] sm:$0xff] }
 0x25d   : > { %8337 = vmatprep.mubr.f32.mxu0 %v1314_v53  ;;  %8420 = vmatpush3.msra.mxu0 %v6681_v51  ;;  %v1766_v51 = vld [vmem:[%s10690_s3 + $0x64] sm:$0xff]  ;;  %v1767_v53 = vld [vmem:[%s10690_s3 + $0x6c] sm:$0xff] }
 0x25e   : > { %8467 = vmatprep.subr.mxu1 %v6719_v55  ;;  %8338 = vmatmul.mubr.f32.gmra.mxu0 %v1315_v56 }
 0x25f   : > { %8387 = vmatprep.mubr.f32.mxu1 %v1536_v57  ;;  %8421 = vmatprep.subr.mxu0 %v6680_v58 }
 0x260   : > { %8468 = vmatpush3.msra.mxu1 %v6719_v55  ;;  %8422 = vmatpush3.msra.mxu0 %v6680_v58 }
 0x261   : > { %8388 = vmatmul.mubr.f32.gmra.mxu1 %v1537_v59  ;;  %8469 = vmatprep.subr.mxu1 %v6718_v61 }
 0x262   : > { %8423 = vmatprep.subr.mxu0 %v6679_v63  ;;  %8470 = vmatpush3.msra.mxu1 %v6718_v61 }
 0x263   : > { %8340 = vmatprep.mubr.f32.mxu0 %v1316_v0  ;;  %8424 = vmatpush3.msra.mxu0 %v6679_v63 }
 0x264   : > { %8471 = vmatprep.subr.mxu1 %v6717_v3  ;;  %8341 = vmatmul.mubr.f32.gmra.mxu0 %v1317_v4 }
 0x265   : > { %8390 = vmatprep.mubr.f32.mxu1 %v1538_v5  ;;  %8425 = vmatprep.subr.mxu0 %v6678_v6 }
 0x266   : > { %8472 = vmatpush3.msra.mxu1 %v6717_v3  ;;  %8426 = vmatpush3.msra.mxu0 %v6678_v6 }
 0x267   : > { %8391 = vmatmul.mubr.f32.gmra.mxu1 %v1539_v7  ;;  %8473 = vmatprep.subr.mxu1 %v6716_v8 }
 0x268   : > { %8427 = vmatprep.subr.mxu0 %v6677_v9  ;;  %8474 = vmatpush3.msra.mxu1 %v6716_v8 }
 0x269   : > { %8343 = vmatprep.mubr.f32.mxu0 %v1318_v10  ;;  %8428 = vmatpush3.msra.mxu0 %v6677_v9 }
 0x26a   : > { %8475 = vmatprep.subr.mxu1 %v6715_v11  ;;  %8344 = vmatmul.mubr.f32.gmra.mxu0 %v1319_v12 }
 0x26b   : > { %8393 = vmatprep.mubr.f32.mxu1 %v1540_v13  ;;  %8429 = vmatprep.subr.mxu0 %v6676_v14 }
 0x26c   : > { %8476 = vmatpush3.msra.mxu1 %v6715_v11  ;;  %8430 = vmatpush3.msra.mxu0 %v6676_v14 }
 0x26d   : > { %8394 = vmatmul.mubr.f32.gmra.mxu1 %v1541_v15  ;;  %8477 = vmatprep.subr.mxu1 %v6714_v16 }
 0x26e   : > { %8431 = vmatprep.subr.mxu0 %v6675_v17  ;;  %8478 = vmatpush3.msra.mxu1 %v6714_v16 }
 0x26f   : > { %8346 = vmatprep.mubr.f32.mxu0 %v1320_v18  ;;  %8432 = vmatpush3.msra.mxu0 %v6675_v17 }
 0x270   : > { %8479 = vmatprep.subr.mxu1 %v6713_v19  ;;  %8347 = vmatmul.mubr.f32.gmra.mxu0 %v1321_v20 }
 0x271   : > { %8396 = vmatprep.mubr.f32.mxu1 %v1542_v21  ;;  %8433 = vmatprep.subr.mxu0 %v6674_v22 }
 0x272   : > { %8480 = vmatpush3.msra.mxu1 %v6713_v19  ;;  %8434 = vmatpush3.msra.mxu0 %v6674_v22 }
 0x273   : > { %8397 = vmatmul.mubr.f32.gmra.mxu1 %v1543_v24  ;;  %8481 = vmatprep.subr.mxu1 %v6712_v25 }
 0x274   : > { %8435 = vmatprep.subr.mxu0 %v6673_v27  ;;  %8482 = vmatpush3.msra.mxu1 %v6712_v25 }
 0x275   : > { %8436 = vmatpush3.msra.mxu0 %v6673_v27  ;;  %8437 = vmatprep.mubr.f32.mxu0 %v1758_v29 }
 0x276   : > { %8483 = vmatprep.subr.mxu1 %v6711_v30  ;;  %8399 = vmatprep.mubr.f32.mxu1 %v1544_v31 }
 0x277   : > { %8438 = vmatmul.mubr.f32.vlgmr.msra.gmra.mxu0 %v1759_v33  ;;  %8484 = vmatpush3.msra.mxu1 %v6711_v30 }
 0x278   : > { %8400 = vmatmul.mubr.f32.gmra.mxu1 %v1545_v34  ;;  %8485 = vmatprep.subr.mxu1 %v6710_v35 }
 0x279   : > { %8486 = vmatpush3.msra.mxu1 %v6710_v35  ;;  %8440 = vmatprep.mubr.f32.mxu0 %v1760_v37 }
 0x27a   : > { %8487 = vmatprep.subr.mxu1 %v6709_v39  ;;  %8402 = vmatprep.mubr.f32.mxu1 %v1546_v40 }
 0x27b   : > { %8441 = vmatmul.mubr.f32.gmra.mxu0 %v1761_v41  ;;  %8488 = vmatpush3.msra.mxu1 %v6709_v39 }
 0x27c   : > { %8403 = vmatmul.mubr.f32.gmra.mxu1 %v1547_v42  ;;  %8489 = vmatprep.subr.mxu1 %v6708_v43 }
 0x27d   : > { %8490 = vmatpush3.msra.mxu1 %v6708_v43  ;;  %8443 = vmatprep.mubr.f32.mxu0 %v1762_v45 }
 0x27e   : > { %8491 = vmatprep.subr.mxu1 %v6707_v47  ;;  %8493 = vmatprep.mubr.f32.mxu1 %v10746_v23  ;;  %v1768_v23 = vld [vmem:[%s10690_s3 + $0x7c] sm:$0xff] }
 0x27f   : > { %8444 = vmatmul.mubr.f32.gmra.mxu0 %v1763_v48  ;;  %8492 = vmatpush3.msra.mxu1 %v6707_v47 }
 0x280   : > { %8494 = vmatmul.mubr.f32.vlgmr.msra.gmra.mxu1 %v10752_v26  ;;  %8446 = vmatprep.mubr.f32.mxu0 %v1764_v49  ;;  %v1769_v26 = vld [vmem:[%s10690_s3 + $0x84] sm:$0xff] }
 0x281   : > { %8496 = vmatprep.mubr.f32.mxu1 %v10756_v28  ;;  %v1770_v28 = vld [vmem:[%s10690_s3 + $0x94] sm:$0xff] }
 0x283   : > { %8447 = vmatmul.mubr.f32.gmra.mxu0 %v1765_v50 }
 0x284   : > { %8497 = vmatmul.mubr.f32.gmra.mxu1 %v10764_v32  ;;  %8449 = vmatprep.mubr.f32.mxu0 %v1766_v51  ;;  %v1771_v32 = vld [vmem:[%s10690_s3 + $0x9c] sm:$0xff] }
 0x285   : > { %8499 = vmatprep.mubr.f32.mxu1 %v10771_v36  ;;  %v1772_v36 = vld [vmem:[%s10690_s3 + $0xac] sm:$0xff] }
 0x287   : > { %8450 = vmatmul.mubr.f32.gmra.mxu0 %v1767_v53  ;;  %v838_v53 = vld [vmem:[#allocation3] sm:$0xff] }
 0x288   : > { %8500 = vmatmul.mubr.f32.gmra.mxu1 %v10775_v38  ;;  %8452 = vmatprep.mubr.f32.mxu0 %v1768_v23  ;;  %v1773_v38 = vld [vmem:[%s10690_s3 + $0xb4] sm:$0xff] }
 0x289   : > { %8502 = vmatprep.mubr.f32.mxu1 %v10785_v44  ;;  %v6705_v44 = vld [vmem:[%s10690_s3 + $0xc0] sm:$0xff] }
 0x28b   : > { %8453 = vmatmul.mubr.f32.gmra.mxu0 %v1769_v26  ;;  %v837_v26 = vld [vmem:[#allocation3 + $0x30] sm:$0xff] }
 0x28c   : > { %8503 = vmatmul.mubr.f32.gmra.mxu1 %v10789_v46  ;;  %8455 = vmatprep.mubr.f32.mxu0 %v1770_v28  ;;  %v6706_v46 = vld [vmem:[%s10690_s3 + $0xc8] sm:$0xff] }
 0x28d   : > { %8505 = vmatprep.mubr.f32.mxu1 %v10799_v52 }
 0x28f   : > { %8456 = vmatmul.mubr.f32.gmra.mxu0 %v1771_v32 }
 0x290   : > { %8506 = vmatmul.mubr.f32.gmra.mxu1 %v10803_v54  ;;  %8458 = vmatprep.mubr.f32.mxu0 %v1772_v36  ;;  %v840_v36 = vld [vmem:[#allocation3 + $0x18] sm:$0xff] }
 0x291   : > { %8508 = vmatprep.mubr.f32.mxu1 %v10813_v60 }
 0x293   : > { %8459 = vmatmul.mubr.f32.gmra.mxu0 %v1773_v38 }
 0x294   : > { %8509 = vmatmul.mubr.f32.gmra.mxu1 %v10817_v62 }
 0x295   : > { %8511 = vmatprep.mubr.f32.mxu1 %v10827_v1 }
 0x298   : > { %8512 = vmatmul.mubr.f32.gmra.mxu1 %v10831_v2 }
 0x299   : > { %8514 = vmatprep.mubr.f32.mxu1 %v6705_v44 }
 0x29c   : > { %8515 = vmatmul.mubr.f32.gmra.mxu1 %v6706_v46 }
 0x2dc   : > { %v8215_v52 = vpop.f32.mrf.mxu0 }
 0x2dd   : > { %v1033_v32 = vadd.f32 %v8215_v52, %v838_v53  ;;  %v841_v52 = vld [vmem:[#allocation3 + $0x50] sm:$0xff] }
 0x2de   : > { %v953_v55 = vpop.f32.mrf.mxu0 }
 0x2df   : > { %v1032_v38 = vadd.f32 %v953_v55, %v837_v26  ;;  %v844_v26 = vld [vmem:[#allocation3 + $0x48] sm:$0xff] }
 0x2e0   : > { %v10945_v56 = vpop.f32.mrf.mxu0 }
 0x2e2   : > { %v10947_v54 = vpop.f32.mrf.mxu0 }
 0x2e3   : > { %v8271_v57 = vpop.f32.mrf.mxu1 }
 0x2e4   : > { %v10949_v58 = vpop.f32.mrf.mxu0 }
 0x2e5   : > { %v10953_v62 = vpop.f32.mrf.mxu1 }
 0x2e6   : > { %v10951_v60 = vpop.f32.mrf.mxu0 }
 0x2e8   : > { %v10955_v1 = vpop.f32.mrf.mxu0 }
 0x2ea   : > { %v10957_v59 = vpop.f32.mrf.mxu0 }
 0x2eb   : > { %v10959_v2 = vpop.f32.mrf.mxu1 }
 0x2ed   : > { %v10961_v61 = vpop.f32.mrf.mxu1 }
 0x2ee   : > { %v10963_v63 = vpop.f32.mrf.mxu0 }
 0x2f0   : > { %v10965_v0 = vpop.f32.mrf.mxu0 }
 0x2f1   : > { %v10967_v3 = vpop.f32.mrf.mxu1 }
 0x2f3   : > { %v10969_v4 = vpop.f32.mrf.mxu1 }
 0x2f4   : > { %v10971_v5 = vpop.f32.mrf.mxu0 }
 0x2f6   : > { %v10973_v6 = vpop.f32.mrf.mxu0 }
 0x2f7   : > { %v10975_v7 = vpop.f32.mrf.mxu1 }
 0x2f9   : > { %v10977_v8 = vpop.f32.mrf.mxu1 }
 0x2fa   : > { %v10979_v9 = vpop.f32.mrf.mxu0 }
 0x2fc   : > { %v10981_v10 = vpop.f32.mrf.mxu0 }
 0x2fd   : > { %v10983_v11 = vpop.f32.mrf.mxu1 }
 0x2ff   : > { %v10985_v12 = vpop.f32.mrf.mxu1 }
 0x300   : > { %v10987_v13 = vpop.f32.mrf.mxu0 }
 0x302   : > { %v10991_v15 = vpop.f32.mrf.mxu0 }
 0x303   : > { %v10989_v14 = vpop.f32.mrf.mxu1  ;;  %12182 = vst [vmem:[#allocation45_spill] sm:$0xff] %v10991_v15 }
 0x305   : > { %v10993_v16 = vpop.f32.mrf.mxu1 }
 0x307   : > { %v8327_v17 = vpop.f32.mrf.mxu0 }
 0x308   : > { %v10995_v18 = vpop.f32.mrf.mxu1 }
 0x309   : > { %v1405_v19 = vpop.f32.mrf.mxu0 }
 0x30a   : > { %v10997_v20 = vpop.f32.mrf.mxu1 }
 0x30b   : > { %12183 = vst [vmem:[#allocation46_spill] sm:$0xff] %v10997_v20  ;;  %v842_v20 = vld [vmem:[#allocation3 + $0x68] sm:$0xff] }
 0x30c   : > { %v1037_v55 = vadd.f32 %v10949_v58, %v842_v20  ;;  %v846_v58 = vld [vmem:[#allocation3 + $0x20] sm:$0xff] }
 0x30d   : > { %v8330_v21 = vpop.f32.mrf.mxu0 }
 0x30e   : > { %v10999_v22 = vpop.f32.mrf.mxu1  ;;  %v1263_v20 = vadd.f32 %v10967_v3, %v1037_v55 }
 0x30f   : > { %12184 = vst [vmem:[#allocation47_spill] sm:$0xff] %v10999_v22  ;;  %v1415_v24 = vpop.f32.mrf.mxu0  ;;  %v1035_v22 = vadd.f32 %v10945_v56, %v840_v36  ;;  %v843_v36 = vld [vmem:[#allocation3 + $0x8] sm:$0xff] }
 0x310   : > { %v11001_v25 = vpop.f32.mrf.mxu1 }
 0x311   : > { %12185 = vst [vmem:[#allocation48_spill] sm:$0xff] %v11001_v25  ;;  %v839_v25 = vld [vmem:[#allocation3 + $0x58] sm:$0xff] }
 0x312   : > { %v1034_v15 = vadd.f32 %v10947_v54, %v839_v25 }
 0x313   : > { %v11003_v27 = vpop.f32.mrf.mxu0 }
 0x314   : > { %v8383_v29 = vpop.f32.mrf.mxu1  ;;  %v1260_v54 = vadd.f32 %v10961_v61, %v1034_v15  ;;  %v1489_v15 = vadd.f32 %v11003_v27, %v1263_v20 }
 0x315   : > { %v11005_v30 = vpop.f32.mrf.mxu0 }
 0x316   : > { %v1631_v31 = vpop.f32.mrf.mxu1 }
 0x318   : > { %v11007_v33 = vpop.f32.mrf.mxu0 }
 0x31a   : > { %v11009_v34 = vpop.f32.mrf.mxu0 }
 0x31b   : > { %v8386_v35 = vpop.f32.mrf.mxu1 }
 0x31d   : > { %v11011_v37 = vpop.f32.mrf.mxu1 }
 0x31e   : > { %v11013_v39 = vpop.f32.mrf.mxu0 }
 0x320   : > { %v11015_v40 = vpop.f32.mrf.mxu0 }
 0x321   : > { %v11017_v41 = vpop.f32.mrf.mxu1 }
 0x323   : > { %v11019_v42 = vpop.f32.mrf.mxu1 }
 0x324   : > { %v11021_v43 = vpop.f32.mrf.mxu0 }
 0x326   : > { %v11023_v45 = vpop.f32.mrf.mxu0 }
 0x327   : > { %12186 = vst [vmem:[#allocation49_spill] sm:$0xff] %v11023_v45  ;;  %v11025_v47 = vpop.f32.mrf.mxu1 }
 0x329   : > { %v11027_v48 = vpop.f32.mrf.mxu1 }
 0x32a   : > { %v11029_v49 = vpop.f32.mrf.mxu0 }
 0x32b   : > { %12187 = vst [vmem:[#allocation50_spill] sm:$0xff] %v11029_v49  ;;  %v1259_v49 = vadd.f32 %v8271_v57, %v1033_v32  ;;  %v1036_v32 = vadd.f32 %v10951_v60, %v841_v52  ;;  %v845_v52 = vld [vmem:[#allocation3 + $0x40] sm:$0xff] }
 0x32c   : > { %v11031_v50 = vpop.f32.mrf.mxu0 }
 0x32d   : > { %12188 = vst [vmem:[#allocation51_spill] sm:$0xff] %v11031_v50  ;;  %v11033_v51 = vpop.f32.mrf.mxu1  ;;  %v1485_v45 = vadd.f32 %v8327_v17, %v1259_v49  ;;  %v1039_v49 = vadd.f32 %v10955_v1, %v844_v26  ;;  %v1262_v61 = vadd.f32 %v10969_v4, %v1036_v32  ;;  %v1040_v4 = vadd.f32 %v10965_v0, %v845_v52  ;;  %v847_v26 = vld [vmem:[#allocation3 + $0x10] sm:$0xff] }
 0x32f   : > { %v11035_v23 = vpop.f32.mrf.mxu1  ;;  %v1711_v17 = vadd.f32 %v8383_v29, %v1485_v45  ;;  %v1041_v45 = vadd.f32 %v10963_v63, %v846_v58  ;;  %v1265_v3 = vadd.f32 %v10975_v7, %v1039_v49  ;;  %v1715_v63 = vadd.f32 %v11017_v41, %v1489_v15  ;;  %v849_v58 = vld [vmem:[#allocation3 + $0x60] sm:$0xff] }
 0x330   : > { %12189 = vst [vmem:[#allocation52_spill] sm:$0xff] %v11035_v23  ;;  %v11037_v28 = vpop.f32.mrf.mxu0  ;;  %v1258_v23 = vadd.f32 %v10953_v62, %v1032_v38  ;;  %v1042_v41 = vadd.f32 %v10973_v6, %v847_v26 }
 0x331   : > { %12190 = vst [vmem:[#allocation53_spill] sm:$0xff] %v11037_v28 }
 0x332   : > { %v11041_v46 = vpop.f32.mrf.mxu0  ;;  %v1268_v15 = vadd.f32 %v10993_v16, %v1042_v41 }
 0x333   : > { %v11039_v44 = vpop.f32.mrf.mxu1  ;;  %12192 = vst [vmem:[#allocation55_spill] sm:$0xff] %v11041_v46  ;;  %v1261_v46 = vadd.f32 %v10959_v2, %v1035_v22  ;;  %v1486_v2 = vadd.f32 %v1415_v24, %v1260_v54 }
 0x334   : > { %12191 = vst [vmem:[#allocation54_spill] sm:$0xff] %v11039_v44  ;;  %v1484_v44 = vadd.f32 %v1405_v19, %v1258_v23 }
 0x335   : > { %v11044_v50 = vpop.f32.mrf.mxu1  ;;  %v1487_v62 = vadd.f32 %v8330_v21, %v1261_v46 }
 0x336   : > { %v1710_v19 = vadd.f32 %v1631_v31, %v1484_v44  ;;  %v848_v31 = vld [vmem:[#allocation3 + $0x38] sm:$0xff] }
 0x337   : > { %v8439_v28 = vpop.f32.mrf.mxu0  ;;  %v1713_v21 = vadd.f32 %v8386_v35, %v1487_v62  ;;  %v850_v62 = vld [vmem:[#allocation3 + $0x70] sm:$0xff] }
 0x338   : > { %v11048_v53 = vpop.f32.mrf.mxu1  ;;  %v1937_v22 = vadd.f32 %v8439_v28, %v1711_v17  ;;  %v1488_v28 = vadd.f32 %v11005_v30, %v1262_v61  ;;  %v1043_v30 = vadd.f32 %v10971_v5, %v848_v31  ;;  %v12194_v31 = vld [vmem:[#allocation49_spill] sm:$0xff] }
 0x339   : > { %v1857_v56 = vpop.f32.mrf.mxu0 }
 0x33a   : > { %v11052_v57 = vpop.f32.mrf.mxu1  ;;  %v1936_v1 = vadd.f32 %v1857_v56, %v1710_v19  ;;  %v1491_v56 = vadd.f32 %v11007_v33, %v1265_v3  ;;  %v1269_v19 = vadd.f32 %v10989_v14, %v1043_v30 }
 0x33b   : > { %12193 = vst [vmem:[#allocation56_spill] sm:$0xff] %v11052_v57  ;;  %v8442_v25 = vpop.f32.mrf.mxu0  ;;  %v1038_v57 = vadd.f32 %v10957_v59, %v843_v36  ;;  %v1712_v59 = vadd.f32 %v11011_v37, %v1486_v2  ;;  %v1267_v37 = vadd.f32 %v10983_v11, %v1041_v45 }
 0x33c   : > { %v11057_v38 = vpop.f32.mrf.mxu1  ;;  %v1939_v44 = vadd.f32 %v8442_v25, %v1713_v21  ;;  %v1266_v25 = vadd.f32 %v10985_v12, %v1040_v4  ;;  %v1717_v11 = vadd.f32 %v11025_v47, %v1491_v56  ;;  %v1044_v47 = vadd.f32 %v10981_v10, %v849_v58  ;;  %v12195_v10 = vld [vmem:[#allocation52_spill] sm:$0xff]  ;;  %v12199_v56 = vld [vmem:[#allocation54_spill] sm:$0xff] }
 0x33d   : > { %v1867_v23 = vpop.f32.mrf.mxu0  ;;  %v1264_v27 = vadd.f32 %v10977_v8, %v1038_v57  ;;  %v1714_v8 = vadd.f32 %v11019_v42, %v1488_v28  ;;  %v1493_v5 = vadd.f32 %v11013_v39, %v1267_v37  ;;  %v1045_v42 = vadd.f32 %v10979_v9, %v850_v62  ;;  %v12201_v37 = vld [vmem:[#allocation51_spill] sm:$0xff] }
 0x33e   : > { %v11061_v60 = vpop.f32.mrf.mxu1  ;;  %v1938_v7 = vadd.f32 %v1867_v23, %v1712_v59  ;;  %v852_v23 = vld [vmem:[#allocation3 + $0x28] sm:$0xff]  ;;  %v1492_v6 = vadd.f32 %v11015_v40, %v1266_v25  ;;  %v1495_v9 = vadd.f32 %v11021_v43, %v1269_v19  ;;  %v1494_v28 = vadd.f32 %v12194_v31, %v1268_v15 }
 0x33f   : > { %v8445_v29 = vpop.f32.mrf.mxu0  ;;  %v1490_v0 = vadd.f32 %v11009_v34, %v1264_v27  ;;  %v1719_v14 = vadd.f32 %v11033_v51, %v1493_v5  ;;  %v1271_v3 = vadd.f32 %v10995_v18, %v1045_v42  ;;  %v12196_v43 = vld [vmem:[#allocation45_spill] sm:$0xff]  ;;  %v12197_v51 = vld [vmem:[#allocation46_spill] sm:$0xff] }
 0x340   : > { %v8495_v24 = vpop.f32.mrf.mxu1  ;;  %v1941_v57 = vadd.f32 %v8445_v29, %v1715_v63  ;;  %v1718_v59 = vadd.f32 %v12195_v10, %v1492_v6  ;;  %v1270_v4 = vadd.f32 %v12197_v51, %v1044_v47  ;;  %v1720_v62 = vadd.f32 %v11044_v50, %v1494_v28  ;;  %v12203_v25 = vld [vmem:[#allocation53_spill] sm:$0xff] }
 0x341   : > { %v2166_v46 = vadd.f32 %v8495_v24, %v1937_v22  ;;  %v1877_v55 = vpop.f32.mrf.mxu0  ;;  %v1716_v12 = vadd.f32 %v11027_v48, %v1490_v0  ;;  %v1047_v48 = vadd.f32 %v10987_v13, %v852_v23  ;;  %v1721_v13 = vadd.f32 %v12199_v56, %v1495_v9 }
 0x342   : > { %v2086_v35 = vpop.f32.mrf.mxu1  ;;  %v1940_v20 = vadd.f32 %v1877_v55, %v1714_v8  ;;  %v12205_v19 = vld [vmem:[#allocation56_spill] sm:$0xff] }
 0x343   : > { %2182 = vst [vmem:[#allocation3] sm:$0xff] %v2166_v46  ;;  %v2165_v32 = vadd.f32 %v2086_v35, %v1936_v1  ;;  %v8448_v36 = vpop.f32.mrf.mxu0  ;;  %v851_v1 = vld [vmem:[#allocation3 + $0x78] sm:$0xff]  ;;  %v12198_v35 = vld [vmem:[#allocation50_spill] sm:$0xff] }
 0x344   : > { %v8498_v54 = vpop.f32.mrf.mxu1  ;;  %v1943_v52 = vadd.f32 %v8448_v36, %v1717_v11  ;;  %v1046_v55 = vadd.f32 %v12196_v43, %v851_v1  ;;  %v1497_v26 = vadd.f32 %v12198_v35, %v1271_v3 }
 0x345   : > { %2181 = vst [vmem:[#allocation3 + $0x30] sm:$0xff] %v2165_v32  ;;  %v2168_v17 = vadd.f32 %v8498_v54, %v1939_v44  ;;  %v1887_v33 = vpop.f32.mrf.mxu0  ;;  %v12200_v32 = vld [vmem:[#allocation47_spill] sm:$0xff]  ;;  %v1496_v54 = vadd.f32 %v12201_v37, %v1270_v4 }
 0x346   : > { %v2096_v49 = vpop.f32.mrf.mxu1  ;;  %v1942_v29 = vadd.f32 %v1887_v33, %v1716_v12  ;;  %v1273_v36 = vadd.f32 %v12200_v32, %v1047_v48  ;;  %v1723_v58 = vadd.f32 %v11048_v53, %v1497_v26 }
 0x347   : > { %2184 = vst [vmem:[#allocation3 + $0x18] sm:$0xff] %v2168_v17  ;;  %v2167_v2 = vadd.f32 %v2096_v49, %v1938_v7  ;;  %v8451_v34 = vpop.f32.mrf.mxu0  ;;  %v12202_v17 = vld [vmem:[#allocation48_spill] sm:$0xff]  ;;  %v1722_v50 = vadd.f32 %v12205_v19, %v1496_v54 }
 0x348   : > { %v8501_v22 = vpop.f32.mrf.mxu1  ;;  %v1945_v16 = vadd.f32 %v8451_v34, %v1719_v14  ;;  %v1272_v33 = vadd.f32 %v12202_v17, %v1046_v55  ;;  %v1499_v49 = vadd.f32 %v12203_v25, %v1273_v36  ;;  %v12204_v34 = vld [vmem:[#allocation55_spill] sm:$0xff] }
 0x349   : > { %2183 = vst [vmem:[#allocation3 + $0x58] sm:$0xff] %v2167_v2  ;;  %v2170_v61 = vadd.f32 %v8501_v22, %v1941_v57  ;;  %v1897_v39 = vpop.f32.mrf.mxu0 }
 0x34a   : > { %v2106_v21 = vpop.f32.mrf.mxu1  ;;  %v1944_v63 = vadd.f32 %v1897_v39, %v1718_v59  ;;  %v1498_v42 = vadd.f32 %v12204_v34, %v1272_v33  ;;  %v1725_v12 = vadd.f32 %v11057_v38, %v1499_v49 }
 0x34b   : > { %2186 = vst [vmem:[#allocation3 + $0x68] sm:$0xff] %v2170_v61  ;;  %v2169_v45 = vadd.f32 %v2106_v21, %v1940_v20  ;;  %v8454_v40 = vpop.f32.mrf.mxu0 }
 0x34c   : > { %v8504_v24 = vpop.f32.mrf.mxu1  ;;  %v1947_v0 = vadd.f32 %v8454_v40, %v1721_v13  ;;  %v1724_v47 = vadd.f32 %v11061_v60, %v1498_v42 }
 0x34d   : > { %2185 = vst [vmem:[#allocation3 + $0x50] sm:$0xff] %v2169_v45  ;;  %v2172_v44 = vadd.f32 %v8504_v24, %v1943_v52  ;;  %v1907_v46 = vpop.f32.mrf.mxu0 }
 0x34e   : > { %v2116_v27 = vpop.f32.mrf.mxu1  ;;  %v1946_v5 = vadd.f32 %v1907_v46, %v1720_v62 }
 0x34f   : > { %2188 = vst [vmem:[#allocation3 + $0x48] sm:$0xff] %v2172_v44  ;;  %v2171_v18 = vadd.f32 %v2116_v27, %v1942_v29  ;;  %v8457_v7 = vpop.f32.mrf.mxu0 }
 0x350   : > { %v8507_v30 = vpop.f32.mrf.mxu1  ;;  %v1949_v22 = vadd.f32 %v8457_v7, %v1723_v58 }
 0x351   : > { %2187 = vst [vmem:[#allocation3 + $0x8] sm:$0xff] %v2171_v18  ;;  %v2174_v8 = vadd.f32 %v8507_v30, %v1945_v16  ;;  %v1917_v57 = vpop.f32.mrf.mxu0 }
 0x352   : > { %v2126_v41 = vpop.f32.mrf.mxu1  ;;  %v1948_v52 = vadd.f32 %v1917_v57, %v1722_v50 }
 0x353   : > { %2190 = vst [vmem:[#allocation3 + $0x20] sm:$0xff] %v2174_v8  ;;  %v2173_v11 = vadd.f32 %v2126_v41, %v1944_v63  ;;  %v8460_v20 = vpop.f32.mrf.mxu0 }
 0x354   : > { %v8510_v2 = vpop.f32.mrf.mxu1  ;;  %v1951_v15 = vadd.f32 %v8460_v20, %v1725_v12 }
 0x355   : > { %2189 = vst [vmem:[#allocation3 + $0x40] sm:$0xff] %v2173_v11  ;;  %v2176_v23 = vadd.f32 %v8510_v2, %v1947_v0  ;;  %v1927_v39 = vpop.f32.mrf.mxu0 }
 0x356   : > { %v2136_v6 = vpop.f32.mrf.mxu1  ;;  %v1950_v9 = vadd.f32 %v1927_v39, %v1724_v47 }
 0x357   : > { %2192 = vst [vmem:[#allocation3 + $0x38] sm:$0xff] %v2176_v23  ;;  %v2175_v61 = vadd.f32 %v2136_v6, %v1946_v5 }
 0x358   : > { %v8513_v53 = vpop.f32.mrf.mxu1 }
 0x359   : > { %2191 = vst [vmem:[#allocation3 + $0x10] sm:$0xff] %v2175_v61  ;;  %v2178_v21 = vadd.f32 %v8513_v53, %v1949_v22 }
 0x35a   : > { %v2146_v1 = vpop.f32.mrf.mxu1 }
 0x35b   : > { %2194 = vst [vmem:[#allocation3 + $0x70] sm:$0xff] %v2178_v21  ;;  %v2177_v14 = vadd.f32 %v2146_v1, %v1948_v52 }
 0x35c   : > { %v8516_v29 = vpop.f32.mrf.mxu1 }
 0x35d   : > { %2193 = vst [vmem:[#allocation3 + $0x60] sm:$0xff] %v2177_v14  ;;  %v2180_v45 = vadd.f32 %v8516_v29, %v1951_v15 }
 0x35e   : > { %v2156_v40 = vpop.f32.mrf.mxu1 }
 0x35f   : > { %2196 = vst [vmem:[#allocation3 + $0x28] sm:$0xff] %v2180_v45  ;;  %v2179_v38 = vadd.f32 %v2156_v40, %v1950_v9 }
 0x361   : > { %2195 = vst [vmem:[#allocation3 + $0x78] sm:$0xff] %v2179_v38 }
 0x362 PF: > { %p6723_p2 = scmp.lt.s32.totalorder %s10566_s9, 1 }
 0x364   : > { %2200 = sbr.rel (%p6723_p2) target bundleno = 1166 (0x48e), region = 72 }
 0x369   : > { %v6757_v60 = vld [vmem:[%s10551_s14 + $0x378] sm:$0xff]  ;;  %v6756_v48 = vld [vmem:[%s10551_s14 + $0x370] sm:$0xff]  ;;  %v6755_v31 = vld [vmem:[%s10551_s14 + $0x368] sm:$0xff] }
 0x36a   : > { %v6789_v3 = vld [vmem:[%s10551_s14 + $0x3f8] sm:$0xff]  ;;  %8517 = vmatprep.subr.mxu0 %v6757_v60  ;;  %v6788_v24 = vld [vmem:[%s10551_s14 + $0x3f0] sm:$0xff]  ;;  %v6787_v28 = vld [vmem:[%s10551_s14 + $0x3e8] sm:$0xff] }
 0x36b   : > { %8573 = vmatprep.subr.mxu1 %v6789_v3  ;;  %8518 = vmatpush3.msra.mxu0 %v6757_v60  ;;  %v6754_v10 = vld [vmem:[%s10551_s14 + $0x360] sm:$0xff]  ;;  %v6753_v16 = vld [vmem:[%s10551_s14 + $0x358] sm:$0xff]  ;;  %v6752_v46 = vld [vmem:[%s10551_s14 + $0x350] sm:$0xff] }
 0x36c   : > { %8574 = vmatpush3.msra.mxu1 %v6789_v3  ;;  %8519 = vmatprep.subr.mxu0 %v6756_v48  ;;  %v6786_v59 = vld [vmem:[%s10551_s14 + $0x3e0] sm:$0xff]  ;;  %v6785_v44 = vld [vmem:[%s10551_s14 + $0x3d8] sm:$0xff]  ;;  %v6784_v43 = vld [vmem:[%s10551_s14 + $0x3d0] sm:$0xff] }
 0x36d   : > { %8575 = vmatprep.subr.mxu1 %v6788_v24  ;;  %8520 = vmatpush3.msra.mxu0 %v6756_v48  ;;  %v6751_v55 = vld [vmem:[%s10551_s14 + $0x348] sm:$0xff]  ;;  %v6750_v4 = vld [vmem:[%s10551_s14 + $0x340] sm:$0xff]  ;;  %v6749_v35 = vld [vmem:[%s10551_s14 + $0x338] sm:$0xff] }
 0x36e   : > { %8576 = vmatpush3.msra.mxu1 %v6788_v24  ;;  %8521 = vmatprep.subr.mxu0 %v6755_v31  ;;  %v6783_v51 = vld [vmem:[%s10551_s14 + $0x3c8] sm:$0xff]  ;;  %v6782_v27 = vld [vmem:[%s10551_s14 + $0x3c0] sm:$0xff]  ;;  %v6781_v26 = vld [vmem:[%s10551_s14 + $0x3b8] sm:$0xff] }
 0x36f   : > { %8577 = vmatprep.subr.mxu1 %v6787_v28  ;;  %8522 = vmatpush3.msra.mxu0 %v6755_v31  ;;  %v6748_v56 = vld [vmem:[%s10551_s14 + $0x330] sm:$0xff]  ;;  %v6747_v63 = vld [vmem:[%s10551_s14 + $0x328] sm:$0xff]  ;;  %v6746_v7 = vld [vmem:[%s10551_s14 + $0x320] sm:$0xff] }
 0x370   : > { %8578 = vmatpush3.msra.mxu1 %v6787_v28  ;;  %8523 = vmatprep.subr.mxu0 %v6754_v10  ;;  %v6780_v13 = vld [vmem:[%s10551_s14 + $0x3b0] sm:$0xff]  ;;  %v6779_v18 = vld [vmem:[%s10551_s14 + $0x3a8] sm:$0xff]  ;;  %v6778_v32 = vld [vmem:[%s10551_s14 + $0x3a0] sm:$0xff] }
 0x371   : > { %8579 = vmatprep.subr.mxu1 %v6786_v59  ;;  %8524 = vmatpush3.msra.mxu0 %v6754_v10  ;;  %v6745_v36 = vld [vmem:[%s10551_s14 + $0x318] sm:$0xff]  ;;  %v6744_v37 = vld [vmem:[%s10551_s14 + $0x310] sm:$0xff]  ;;  %v6743_v62 = vld [vmem:[%s10551_s14 + $0x308] sm:$0xff] }
 0x372   : > { %8580 = vmatpush3.msra.mxu1 %v6786_v59  ;;  %8525 = vmatprep.subr.mxu0 %v6753_v16  ;;  %v6777_v30 = vld [vmem:[%s10551_s14 + $0x398] sm:$0xff]  ;;  %v6776_v54 = vld [vmem:[%s10551_s14 + $0x390] sm:$0xff]  ;;  %v6775_v0 = vld [vmem:[%s10551_s14 + $0x388] sm:$0xff] }
 0x373   : > { %8581 = vmatprep.subr.mxu1 %v6785_v44  ;;  %8526 = vmatpush3.msra.mxu0 %v6753_v16  ;;  %v6726_v8 = vld [vmem:[%s10690_s3 + $0x19] sm:$0xff]  ;;  %v6742_v57 = vld [vmem:[%s10551_s14 + $0x300] sm:$0xff]  ;;  %v6728_v5 = vld [vmem:[%s10690_s3 + $0x31] sm:$0xff] }
 0x374   : > { %8582 = vmatpush3.msra.mxu1 %v6785_v44  ;;  %8527 = vmatprep.subr.mxu0 %v6752_v46  ;;  %v6774_v17 = vld [vmem:[%s10551_s14 + $0x380] sm:$0xff]  ;;  %v6821_v41 = vld [vmem:[%s10551_s14 + $0x478] sm:$0xff]  ;;  %v6820_v58 = vld [vmem:[%s10551_s14 + $0x470] sm:$0xff] }
 0x375   : > { %8583 = vmatprep.subr.mxu1 %v6784_v43  ;;  %8528 = vmatpush3.msra.mxu0 %v6752_v46  ;;  %v6727_v33 = vld [vmem:[%s10690_s3 + $0x21] sm:$0xff]  ;;  %v6729_v11 = vld [vmem:[%s10690_s3 + $0x39] sm:$0xff]  ;;  %v6819_v20 = vld [vmem:[%s10551_s14 + $0x468] sm:$0xff] }
 0x376   : > { %8584 = vmatpush3.msra.mxu1 %v6784_v43  ;;  %8529 = vmatprep.subr.mxu0 %v6751_v55  ;;  %v6758_v25 = vld [vmem:[%s10690_s3 + $0x1a] sm:$0xff]  ;;  %v6759_v49 = vld [vmem:[%s10690_s3 + $0x22] sm:$0xff]  ;;  %v6760_v2 = vld [vmem:[%s10690_s3 + $0x32] sm:$0xff] }
 0x377   : > { %8585 = vmatprep.subr.mxu1 %v6783_v51  ;;  %8530 = vmatpush3.msra.mxu0 %v6751_v55  ;;  %v6761_v34 = vld [vmem:[%s10690_s3 + $0x3a] sm:$0xff]  ;;  %v6818_v42 = vld [vmem:[%s10551_s14 + $0x460] sm:$0xff]  ;;  %v6731_v50 = vld [vmem:[%s10690_s3 + $0x51] sm:$0xff] }
 0x378   : > { %8586 = vmatpush3.msra.mxu1 %v6783_v51  ;;  %8531 = vmatprep.subr.mxu0 %v6750_v4  ;;  %v6730_v19 = vld [vmem:[%s10690_s3 + $0x49] sm:$0xff]  ;;  %v6817_v22 = vld [vmem:[%s10551_s14 + $0x458] sm:$0xff]  ;;  %v6763_v6 = vld [vmem:[%s10690_s3 + $0x52] sm:$0xff] }
 0x379   : > { %8587 = vmatprep.subr.mxu1 %v6782_v27  ;;  %8532 = vmatpush3.msra.mxu0 %v6750_v4  ;;  %v6762_v23 = vld [vmem:[%s10690_s3 + $0x4a] sm:$0xff]  ;;  %v6816_v12 = vld [vmem:[%s10551_s14 + $0x450] sm:$0xff]  ;;  %v6732_v52 = vld [vmem:[%s10690_s3 + $0x61] sm:$0xff] }
 0x37a   : > { %8588 = vmatpush3.msra.mxu1 %v6782_v27  ;;  %8533 = vmatprep.subr.mxu0 %v6749_v35  ;;  %v6733_v61 = vld [vmem:[%s10690_s3 + $0x69] sm:$0xff]  ;;  %v6734_v21 = vld [vmem:[%s10690_s3 + $0x79] sm:$0xff]  ;;  %v6735_v1 = vld [vmem:[%s10690_s3 + $0x81] sm:$0xff] }
 0x37b   : > { %8589 = vmatprep.subr.mxu1 %v6781_v26  ;;  %8534 = vmatpush3.msra.mxu0 %v6749_v35  ;;  %v6815_v39 = vld [vmem:[%s10551_s14 + $0x448] sm:$0xff]  ;;  %v6764_v53 = vld [vmem:[%s10690_s3 + $0x62] sm:$0xff]  ;;  %v6766_v14 = vld [vmem:[%s10690_s3 + $0x7a] sm:$0xff] }
 0x37c   : > { %8590 = vmatpush3.msra.mxu1 %v6781_v26  ;;  %8535 = vmatprep.subr.mxu0 %v6748_v56  ;;  %v6765_v47 = vld [vmem:[%s10690_s3 + $0x6a] sm:$0xff]  ;;  %v6813_v9 = vld [vmem:[%s10551_s14 + $0x438] sm:$0xff]  ;;  %v6812_v45 = vld [vmem:[%s10551_s14 + $0x430] sm:$0xff] }
 0x37d   : > { %8591 = vmatprep.subr.mxu1 %v6780_v13  ;;  %8536 = vmatpush3.msra.mxu0 %v6748_v56  ;;  %v6814_v15 = vld [vmem:[%s10551_s14 + $0x440] sm:$0xff]  ;;  %v6736_v40 = vld [vmem:[%s10690_s3 + $0x91] sm:$0xff]  ;;  %v6737_v38 = vld [vmem:[%s10690_s3 + $0x99] sm:$0xff] }
 0x37e   : > { %8592 = vmatpush3.msra.mxu1 %v6780_v13  ;;  %8537 = vmatprep.subr.mxu0 %v6747_v63  ;;  %v6767_v29 = vld [vmem:[%s10690_s3 + $0x82] sm:$0xff]  ;;  %v6811_v60 = vld [vmem:[%s10551_s14 + $0x428] sm:$0xff]  ;;  %v6769_v3 = vld [vmem:[%s10690_s3 + $0x9a] sm:$0xff] }
 0x37f   : > { %8593 = vmatprep.subr.mxu1 %v6779_v18  ;;  %8538 = vmatpush3.msra.mxu0 %v6747_v63  ;;  %v6768_v48 = vld [vmem:[%s10690_s3 + $0x92] sm:$0xff]  ;;  %v6810_v24 = vld [vmem:[%s10551_s14 + $0x420] sm:$0xff]  ;;  %v6809_v10 = vld [vmem:[%s10551_s14 + $0x418] sm:$0xff] }
 0x380   : > { %8594 = vmatpush3.msra.mxu1 %v6779_v18  ;;  %8539 = vmatprep.subr.mxu0 %v6746_v7  ;;  %v6738_v31 = vld [vmem:[%s10690_s3 + $0xa9] sm:$0xff]  ;;  %v6739_v28 = vld [vmem:[%s10690_s3 + $0xb1] sm:$0xff]  ;;  %v6740_v46 = vld [vmem:[%s10690_s3 + $0xc1] sm:$0xff] }
 0x381   : > { %8595 = vmatprep.subr.mxu1 %v6778_v32  ;;  %8540 = vmatpush3.msra.mxu0 %v6746_v7  ;;  %v6770_v59 = vld [vmem:[%s10690_s3 + $0xaa] sm:$0xff]  ;;  %v6771_v16 = vld [vmem:[%s10690_s3 + $0xb2] sm:$0xff]  ;;  %v6772_v51 = vld [vmem:[%s10690_s3 + $0xc2] sm:$0xff] }
 0x382   : > { %8596 = vmatpush3.msra.mxu1 %v6778_v32  ;;  %8541 = vmatprep.subr.mxu0 %v6745_v36  ;;  %v6808_v44 = vld [vmem:[%s10551_s14 + $0x410] sm:$0xff]  ;;  %v6741_v43 = vld [vmem:[%s10690_s3 + $0xc9] sm:$0xff] }
 0x383   : > { %8597 = vmatprep.subr.mxu1 %v6777_v30  ;;  %8542 = vmatpush3.msra.mxu0 %v6745_v36  ;;  %v6807_v55 = vld [vmem:[%s10551_s14 + $0x408] sm:$0xff]  ;;  %v6806_v27 = vld [vmem:[%s10551_s14 + $0x400] sm:$0xff]  ;;  %v6790_v35 = vld [vmem:[%s10690_s3 + $0x1b] sm:$0xff] }
 0x384   : > { %8598 = vmatpush3.msra.mxu1 %v6777_v30  ;;  %8543 = vmatprep.subr.mxu0 %v6744_v37  ;;  %v6773_v4 = vld [vmem:[%s10690_s3 + $0xca] sm:$0xff]  ;;  %v6798_v56 = vld [vmem:[%s10690_s3 + $0x7b] sm:$0xff]  ;;  %v6792_v13 = vld [vmem:[%s10690_s3 + $0x33] sm:$0xff] }
 0x385   : > { %8599 = vmatprep.subr.mxu1 %v6776_v54  ;;  %8544 = vmatpush3.msra.mxu0 %v6744_v37  ;;  %v6791_v26 = vld [vmem:[%s10690_s3 + $0x23] sm:$0xff]  ;;  %v6800_v18 = vld [vmem:[%s10690_s3 + $0x93] sm:$0xff]  ;;  %v6793_v7 = vld [vmem:[%s10690_s3 + $0x3b] sm:$0xff] }
 0x386   : > { %8600 = vmatpush3.msra.mxu1 %v6776_v54  ;;  %8545 = vmatprep.subr.mxu0 %v6743_v62  ;;  %v6799_v63 = vld [vmem:[%s10690_s3 + $0x83] sm:$0xff]  ;;  %v6794_v32 = vld [vmem:[%s10690_s3 + $0x4b] sm:$0xff]  ;;  %v6801_v36 = vld [vmem:[%s10690_s3 + $0x9b] sm:$0xff] }
 0x387   : > { %8601 = vmatprep.subr.mxu1 %v6775_v0  ;;  %8546 = vmatpush3.msra.mxu0 %v6743_v62  ;;  %v6802_v30 = vld [vmem:[%s10690_s3 + $0xab] sm:$0xff]  ;;  %v6795_v37 = vld [vmem:[%s10690_s3 + $0x53] sm:$0xff]  ;;  %v6796_v54 = vld [vmem:[%s10690_s3 + $0x63] sm:$0xff] }
 0x388   : > { %8549 = vmatprep.mubr.f32.mxu0 %v6726_v8  ;;  %8547 = vmatprep.subr.mxu0 %v6742_v57  ;;  %v6803_v62 = vld [vmem:[%s10690_s3 + $0xb3] sm:$0xff]  ;;  %v6797_v8 = vld [vmem:[%s10690_s3 + $0x6b] sm:$0xff] }
 0x389   : > { %8602 = vmatpush3.msra.mxu1 %v6775_v0  ;;  %8548 = vmatpush3.msra.mxu0 %v6742_v57  ;;  %v6804_v0 = vld [vmem:[%s10690_s3 + $0xc3] sm:$0xff]  ;;  %v6805_v57 = vld [vmem:[%s10690_s3 + $0xcb] sm:$0xff] }
 0x38a   : > { %8603 = vmatprep.subr.mxu1 %v6774_v17  ;;  %8550 = vmatmul.mubr.f32.vlgmr.msra.gmra.mxu0 %v6727_v33 }
 0x38b   : > { %8629 = vmatprep.subr.mxu0 %v6821_v41  ;;  %8604 = vmatpush3.msra.mxu1 %v6774_v17 }
 0x38c   : > { %8605 = vmatprep.mubr.f32.mxu1 %v6758_v25  ;;  %8630 = vmatpush3.msra.mxu0 %v6821_v41 }
 0x38d   : > { %8606 = vmatmul.mubr.f32.vlgmr.msra.gmra.mxu1 %v6759_v49  ;;  %9557 = vmatprep.subr.mxu1 %v6821_v41 }
 0x38e   : > { %8631 = vmatprep.subr.mxu0 %v6820_v58  ;;  %8552 = vmatprep.mubr.f32.mxu0 %v6728_v5 }
 0x38f   : > { %9573 = vmatpush3.msra.mxu1 %v6821_v41  ;;  %8632 = vmatpush3.msra.mxu0 %v6820_v58 }
 0x390   : > { %9558 = vmatprep.subr.mxu1 %v6820_v58  ;;  %8553 = vmatmul.mubr.f32.gmra.mxu0 %v6729_v11 }
 0x391   : > { %8633 = vmatprep.subr.mxu0 %v6819_v20  ;;  %8608 = vmatprep.mubr.f32.mxu1 %v6760_v2 }
 0x392   : > { %9574 = vmatpush3.msra.mxu1 %v6820_v58  ;;  %8634 = vmatpush3.msra.mxu0 %v6819_v20 }
 0x393   : > { %8609 = vmatmul.mubr.f32.gmra.mxu1 %v6761_v34  ;;  %9559 = vmatprep.subr.mxu1 %v6819_v20 }
 0x394   : > { %8635 = vmatprep.subr.mxu0 %v6818_v42  ;;  %8555 = vmatprep.mubr.f32.mxu0 %v6730_v19 }
 0x395   : > { %9575 = vmatpush3.msra.mxu1 %v6819_v20  ;;  %8636 = vmatpush3.msra.mxu0 %v6818_v42 }
 0x396   : > { %9560 = vmatprep.subr.mxu1 %v6818_v42  ;;  %8556 = vmatmul.mubr.f32.gmra.mxu0 %v6731_v50 }
 0x397   : > { %8637 = vmatprep.subr.mxu0 %v6817_v22  ;;  %8611 = vmatprep.mubr.f32.mxu1 %v6762_v23 }
 0x398   : > { %9576 = vmatpush3.msra.mxu1 %v6818_v42  ;;  %8638 = vmatpush3.msra.mxu0 %v6817_v22 }
 0x399   : > { %8612 = vmatmul.mubr.f32.gmra.mxu1 %v6763_v6  ;;  %9561 = vmatprep.subr.mxu1 %v6817_v22 }
 0x39a   : > { %8639 = vmatprep.subr.mxu0 %v6816_v12  ;;  %8558 = vmatprep.mubr.f32.mxu0 %v6732_v52 }
 0x39b   : > { %9577 = vmatpush3.msra.mxu1 %v6817_v22  ;;  %8640 = vmatpush3.msra.mxu0 %v6816_v12 }
 0x39c   : > { %9562 = vmatprep.subr.mxu1 %v6816_v12  ;;  %8559 = vmatmul.mubr.f32.gmra.mxu0 %v6733_v61 }
 0x39d   : > { %8641 = vmatprep.subr.mxu0 %v6815_v39  ;;  %8614 = vmatprep.mubr.f32.mxu1 %v6764_v53 }
 0x39e   : > { %9578 = vmatpush3.msra.mxu1 %v6816_v12  ;;  %8642 = vmatpush3.msra.mxu0 %v6815_v39 }
 0x39f   : > { %8615 = vmatmul.mubr.f32.gmra.mxu1 %v6765_v47  ;;  %9563 = vmatprep.subr.mxu1 %v6815_v39 }
 0x3a0   : > { %8643 = vmatprep.subr.mxu0 %v6814_v15  ;;  %8561 = vmatprep.mubr.f32.mxu0 %v6734_v21 }
 0x3a1   : > { %9579 = vmatpush3.msra.mxu1 %v6815_v39  ;;  %8644 = vmatpush3.msra.mxu0 %v6814_v15 }
 0x3a2   : > { %9564 = vmatprep.subr.mxu1 %v6814_v15  ;;  %8562 = vmatmul.mubr.f32.gmra.mxu0 %v6735_v1 }
 0x3a3   : > { %8645 = vmatprep.subr.mxu0 %v6813_v9  ;;  %8617 = vmatprep.mubr.f32.mxu1 %v6766_v14  ;;  %v2202_v14 = vld [vmem:[#allocation3] sm:$0xff] }
 0x3a4   : > { %9580 = vmatpush3.msra.mxu1 %v6814_v15  ;;  %8646 = vmatpush3.msra.mxu0 %v6813_v9 }
 0x3a5   : > { %8618 = vmatmul.mubr.f32.gmra.mxu1 %v6767_v29  ;;  %9565 = vmatprep.subr.mxu1 %v6813_v9 }
 0x3a6   : > { %8647 = vmatprep.subr.mxu0 %v6812_v45  ;;  %8564 = vmatprep.mubr.f32.mxu0 %v6736_v40  ;;  %v2210_v40 = vld [vmem:[#allocation3 + $0x20] sm:$0xff] }
 0x3a7   : > { %9581 = vmatpush3.msra.mxu1 %v6813_v9  ;;  %8648 = vmatpush3.msra.mxu0 %v6812_v45 }
 0x3a8   : > { %9566 = vmatprep.subr.mxu1 %v6812_v45  ;;  %8565 = vmatmul.mubr.f32.gmra.mxu0 %v6737_v38 }
 0x3a9   : > { %8649 = vmatprep.subr.mxu0 %v6811_v60  ;;  %8620 = vmatprep.mubr.f32.mxu1 %v6768_v48  ;;  %v2204_v48 = vld [vmem:[#allocation3 + $0x18] sm:$0xff] }
 0x3aa   : > { %9582 = vmatpush3.msra.mxu1 %v6812_v45  ;;  %8650 = vmatpush3.msra.mxu0 %v6811_v60  ;;  %v2201_v45 = vld [vmem:[#allocation3 + $0x30] sm:$0xff] }
 0x3ab   : > { %8621 = vmatmul.mubr.f32.gmra.mxu1 %v6769_v3  ;;  %9567 = vmatprep.subr.mxu1 %v6811_v60  ;;  %v2209_v3 = vld [vmem:[#allocation3 + $0x40] sm:$0xff] }
 0x3ac   : > { %8651 = vmatprep.subr.mxu0 %v6810_v24  ;;  %8567 = vmatprep.mubr.f32.mxu0 %v6738_v31 }
 0x3ad   : > { %9583 = vmatpush3.msra.mxu1 %v6811_v60  ;;  %8652 = vmatpush3.msra.mxu0 %v6810_v24 }
 0x3ae   : > { %9568 = vmatprep.subr.mxu1 %v6810_v24  ;;  %8568 = vmatmul.mubr.f32.gmra.mxu0 %v6739_v28 }
 0x3af   : > { %8653 = vmatprep.subr.mxu0 %v6809_v10  ;;  %8623 = vmatprep.mubr.f32.mxu1 %v6770_v59 }
 0x3b0   : > { %9584 = vmatpush3.msra.mxu1 %v6810_v24  ;;  %8654 = vmatpush3.msra.mxu0 %v6809_v10 }
 0x3b1   : > { %8624 = vmatmul.mubr.f32.gmra.mxu1 %v6771_v16  ;;  %9569 = vmatprep.subr.mxu1 %v6809_v10 }
 0x3b2   : > { %8655 = vmatprep.subr.mxu0 %v6808_v44  ;;  %8570 = vmatprep.mubr.f32.mxu0 %v6740_v46 }
 0x3b3   : > { %9585 = vmatpush3.msra.mxu1 %v6809_v10  ;;  %8656 = vmatpush3.msra.mxu0 %v6808_v44  ;;  %v2203_v10 = vld [vmem:[#allocation3 + $0x58] sm:$0xff] }
 0x3b4   : > { %9570 = vmatprep.subr.mxu1 %v6808_v44  ;;  %8571 = vmatmul.mubr.f32.gmra.mxu0 %v6741_v43 }
 0x3b5   : > { %8657 = vmatprep.subr.mxu0 %v6807_v55  ;;  %8626 = vmatprep.mubr.f32.mxu1 %v6772_v51 }
 0x3b6   : > { %9586 = vmatpush3.msra.mxu1 %v6808_v44  ;;  %8658 = vmatpush3.msra.mxu0 %v6807_v55  ;;  %v2212_v44 = vld [vmem:[#allocation3 + $0x38] sm:$0xff] }
 0x3b7   : > { %8627 = vmatmul.mubr.f32.gmra.mxu1 %v6773_v4  ;;  %9571 = vmatprep.subr.mxu1 %v6807_v55 }
 0x3b8   : > { %8659 = vmatprep.subr.mxu0 %v6806_v27  ;;  %9587 = vmatpush3.msra.mxu1 %v6807_v55  ;;  %v2206_v55 = vld [vmem:[#allocation3 + $0x68] sm:$0xff] }
 0x3b9   : > { %8660 = vmatpush3.msra.mxu0 %v6806_v27  ;;  %8661 = vmatprep.mubr.f32.mxu0 %v6790_v35 }
 0x3ba   : > { %9572 = vmatprep.subr.mxu1 %v6806_v27  ;;  %8662 = vmatmul.mubr.f32.vlgmr.msra.gmra.mxu0 %v6791_v26 }
 0x3bb   : > { %9588 = vmatpush3.msra.mxu1 %v6806_v27  ;;  %8673 = vmatprep.mubr.f32.mxu1 %v6798_v56  ;;  %v2211_v27 = vld [vmem:[#allocation3 + $0x10] sm:$0xff] }
 0x3bc   : > { %8664 = vmatprep.mubr.f32.mxu0 %v6792_v13  ;;  %8674 = vmatmul.mubr.f32.vlgmr.msra.gmra.mxu1 %v6799_v63  ;;  %v2205_v56 = vld [vmem:[#allocation3 + $0x50] sm:$0xff] }
 0x3bd   : > { %8676 = vmatprep.mubr.f32.mxu1 %v6800_v18 }
 0x3be   : > { %8665 = vmatmul.mubr.f32.gmra.mxu0 %v6793_v7 }
 0x3bf   : > { %8667 = vmatprep.mubr.f32.mxu0 %v6794_v32 }
 0x3c0   : > { %8677 = vmatmul.mubr.f32.gmra.mxu1 %v6801_v36  ;;  %v2214_v36 = vld [vmem:[#allocation3 + $0x70] sm:$0xff] }
 0x3c1   : > { %8679 = vmatprep.mubr.f32.mxu1 %v6802_v30 }
 0x3c2   : > { %8668 = vmatmul.mubr.f32.gmra.mxu0 %v6795_v37 }
 0x3c3   : > { %8670 = vmatprep.mubr.f32.mxu0 %v6796_v54  ;;  %v2208_v54 = vld [vmem:[#allocation3 + $0x48] sm:$0xff] }
 0x3c4   : > { %8680 = vmatmul.mubr.f32.gmra.mxu1 %v6803_v62 }
 0x3c5   : > { %8682 = vmatprep.mubr.f32.mxu1 %v6804_v0 }
 0x3c6   : > { %8671 = vmatmul.mubr.f32.gmra.mxu0 %v6797_v8 }
 0x3c8   : > { %8683 = vmatmul.mubr.f32.gmra.mxu1 %v6805_v57 }
 0x44a   : > { %v8551_v17 = vpop.f32.mrf.mxu0 }
 0x44b   : > { %v2399_v60 = vadd.f32 %v8551_v17, %v2202_v14 }
 0x44c   : > { %v2319_v33 = vpop.f32.mrf.mxu0 }
 0x44d   : > { %v8607_v41 = vpop.f32.mrf.mxu1  ;;  %v2398_v28 = vadd.f32 %v2319_v33, %v2201_v45 }
 0x44e   : > { %v2625_v43 = vadd.f32 %v8607_v41, %v2399_v60  ;;  %v2213_v41 = vld [vmem:[#allocation3 + $0x60] sm:$0xff]  ;;  %v2215_v60 = vld [vmem:[#allocation3 + $0x78] sm:$0xff] }
 0x44f   : > { %v2545_v25 = vpop.f32.mrf.mxu1 }
 0x450   : > { %v8554_v49 = vpop.f32.mrf.mxu0  ;;  %v2624_v26 = vadd.f32 %v2545_v25, %v2398_v28 }
 0x451   : > { %v2401_v16 = vadd.f32 %v8554_v49, %v2204_v48 }
 0x452   : > { %v2329_v58 = vpop.f32.mrf.mxu0 }
 0x453   : > { %v8610_v5 = vpop.f32.mrf.mxu1  ;;  %v2400_v4 = vadd.f32 %v2329_v58, %v2203_v10  ;;  %v2207_v58 = vld [vmem:[#allocation3 + $0x8] sm:$0xff] }
 0x454   : > { %v2627_v7 = vadd.f32 %v8610_v5, %v2401_v16 }
 0x455   : > { %v2555_v11 = vpop.f32.mrf.mxu1 }
 0x456   : > { %v8557_v20 = vpop.f32.mrf.mxu0  ;;  %v2626_v17 = vadd.f32 %v2555_v11, %v2400_v4 }
 0x457   : > { %v2403_v32 = vadd.f32 %v8557_v20, %v2206_v55 }
 0x458   : > { %v2339_v2 = vpop.f32.mrf.mxu0 }
 0x459   : > { %v11206_v34 = vpop.f32.mrf.mxu1  ;;  %v2402_v33 = vadd.f32 %v2339_v2, %v2205_v56 }
 0x45b   : > { %v11208_v42 = vpop.f32.mrf.mxu1 }
 0x45c   : > { %v11210_v19 = vpop.f32.mrf.mxu0 }
 0x45e   : > { %v11212_v50 = vpop.f32.mrf.mxu0 }
 0x45f   : > { %v11214_v22 = vpop.f32.mrf.mxu1 }
 0x461   : > { %v11216_v23 = vpop.f32.mrf.mxu1 }
 0x462   : > { %v8563_v6 = vpop.f32.mrf.mxu0 }
 0x463   : > { %v2407_v59 = vadd.f32 %v8563_v6, %v2210_v40 }
 0x464   : > { %v2359_v12 = vpop.f32.mrf.mxu0 }
 0x465   : > { %v8619_v52 = vpop.f32.mrf.mxu1  ;;  %v2406_v51 = vadd.f32 %v2359_v12, %v2209_v3 }
 0x466   : > { %v2633_v13 = vadd.f32 %v8619_v52, %v2407_v59  ;;  %v2629_v52 = vadd.f32 %v11206_v34, %v2403_v32 }
 0x467   : > { %v2585_v61 = vpop.f32.mrf.mxu1 }
 0x468   : > { %v8566_v39 = vpop.f32.mrf.mxu0  ;;  %v2632_v62 = vadd.f32 %v2585_v61, %v2406_v51  ;;  %v2405_v61 = vadd.f32 %v11210_v19, %v2208_v54 }
 0x469   : > { %v2409_v63 = vadd.f32 %v8566_v39, %v2212_v44  ;;  %v2216_v39 = vld [vmem:[#allocation3 + $0x28] sm:$0xff] }
 0x46a   : > { %v2369_v53 = vpop.f32.mrf.mxu0 }
 0x46b   : > { %v8622_v47 = vpop.f32.mrf.mxu1  ;;  %v2408_v0 = vadd.f32 %v2369_v53, %v2211_v27 }
 0x46c   : > { %v2635_v6 = vadd.f32 %v8622_v47, %v2409_v63  ;;  %v2628_v47 = vadd.f32 %v11208_v42, %v2402_v33 }
 0x46d   : > { %v2595_v15 = vpop.f32.mrf.mxu1 }
 0x46e   : > { %v8569_v21 = vpop.f32.mrf.mxu0  ;;  %v2634_v45 = vadd.f32 %v2595_v15, %v2408_v0 }
 0x46f   : > { %v2411_v12 = vadd.f32 %v8569_v21, %v2214_v36  ;;  %v2404_v21 = vadd.f32 %v11212_v50, %v2207_v58 }
 0x470   : > { %v2379_v1 = vpop.f32.mrf.mxu0 }
 0x471   : > { %v11218_v9 = vpop.f32.mrf.mxu1  ;;  %v2410_v11 = vadd.f32 %v2379_v1, %v2213_v41  ;;  %v2631_v1 = vadd.f32 %v11214_v22, %v2405_v61 }
 0x472   : > { %v2637_v34 = vadd.f32 %v11218_v9, %v2411_v12 }
 0x473   : > { %v11220_v29 = vpop.f32.mrf.mxu1 }
 0x474   : > { %v11222_v38 = vpop.f32.mrf.mxu0  ;;  %v2636_v16 = vadd.f32 %v11220_v29, %v2410_v11 }
 0x475   : > { %v2413_v19 = vadd.f32 %v11222_v38, %v2216_v39  ;;  %v2630_v38 = vadd.f32 %v11216_v23, %v2404_v21 }
 0x476   : > { %v11224_v24 = vpop.f32.mrf.mxu0 }
 0x477   : > { %v11226_v31 = vpop.f32.mrf.mxu1  ;;  %v2412_v42 = vadd.f32 %v11224_v24, %v2215_v60 }
 0x478   : > { %v2639_v55 = vadd.f32 %v11226_v31, %v2413_v19 }
 0x479   : > { %v11228_v46 = vpop.f32.mrf.mxu1 }
 0x47a   : > { %v8663_v35 = vpop.f32.mrf.mxu0  ;;  %v2638_v29 = vadd.f32 %v11228_v46, %v2412_v42 }
 0x47b   : > { %v2851_v18 = vadd.f32 %v8663_v35, %v2625_v43 }
 0x47c   : > { %v2771_v30 = vpop.f32.mrf.mxu0  ;;  %v8675_v37 = vpop.f32.mrf.mxu1 }
 0x47d   : > { %2867 = vst [vmem:[#allocation3] sm:$0xff] %v2851_v18  ;;  %v2850_v8 = vadd.f32 %v2771_v30, %v2624_v26  ;;  %v2859_v57 = vadd.f32 %v8675_v37, %v2633_v13 }
 0x47e   : > { %v8666_v49 = vpop.f32.mrf.mxu0  ;;  %v2811_v25 = vpop.f32.mrf.mxu1 }
 0x47f   : > { %2866 = vst [vmem:[#allocation3 + $0x30] sm:$0xff] %v2850_v8  ;;  %2875 = vst [vmem:[#allocation3 + $0x20] sm:$0xff] %v2859_v57  ;;  %v2853_v5 = vadd.f32 %v8666_v49, %v2627_v7  ;;  %v2858_v20 = vadd.f32 %v2811_v25, %v2632_v62 }
 0x480   : > { %v2781_v53 = vpop.f32.mrf.mxu0  ;;  %v8678_v14 = vpop.f32.mrf.mxu1 }
 0x481   : > { %2869 = vst [vmem:[#allocation3 + $0x18] sm:$0xff] %v2853_v5  ;;  %2874 = vst [vmem:[#allocation3 + $0x40] sm:$0xff] %v2858_v20  ;;  %v2852_v2 = vadd.f32 %v2781_v53, %v2626_v17  ;;  %v2861_v40 = vadd.f32 %v8678_v14, %v2635_v6 }
 0x482   : > { %v8669_v48 = vpop.f32.mrf.mxu0  ;;  %v2821_v3 = vpop.f32.mrf.mxu1 }
 0x483   : > { %2868 = vst [vmem:[#allocation3 + $0x58] sm:$0xff] %v2852_v2  ;;  %2877 = vst [vmem:[#allocation3 + $0x38] sm:$0xff] %v2861_v40  ;;  %v2855_v28 = vadd.f32 %v8669_v48, %v2629_v52  ;;  %v2860_v15 = vadd.f32 %v2821_v3, %v2634_v45 }
 0x484   : > { %v2791_v10 = vpop.f32.mrf.mxu0  ;;  %v8681_v59 = vpop.f32.mrf.mxu1 }
 0x485   : > { %2871 = vst [vmem:[#allocation3 + $0x68] sm:$0xff] %v2855_v28  ;;  %2876 = vst [vmem:[#allocation3 + $0x10] sm:$0xff] %v2860_v15  ;;  %v2854_v50 = vadd.f32 %v2791_v10, %v2628_v47  ;;  %v2863_v44 = vadd.f32 %v8681_v59, %v2637_v34 }
 0x486   : > { %v8672_v43 = vpop.f32.mrf.mxu0  ;;  %v2831_v9 = vpop.f32.mrf.mxu1 }
 0x487   : > { %2870 = vst [vmem:[#allocation3 + $0x50] sm:$0xff] %v2854_v50  ;;  %2879 = vst [vmem:[#allocation3 + $0x70] sm:$0xff] %v2863_v44  ;;  %v2857_v51 = vadd.f32 %v8672_v43, %v2631_v1  ;;  %v2862_v22 = vadd.f32 %v2831_v9, %v2636_v16 }
 0x488   : > { %v2801_v4 = vpop.f32.mrf.mxu0  ;;  %v8684_v27 = vpop.f32.mrf.mxu1 }
 0x489   : > { %2873 = vst [vmem:[#allocation3 + $0x48] sm:$0xff] %v2857_v51  ;;  %2878 = vst [vmem:[#allocation3 + $0x60] sm:$0xff] %v2862_v22  ;;  %v2856_v24 = vadd.f32 %v2801_v4, %v2630_v38  ;;  %v2865_v35 = vadd.f32 %v8684_v27, %v2639_v55 }
 0x48a   : > { %v2841_v26 = vpop.f32.mrf.mxu1 }
 0x48b   : > { %2872 = vst [vmem:[#allocation3 + $0x8] sm:$0xff] %v2856_v24  ;;  %2881 = vst [vmem:[#allocation3 + $0x28] sm:$0xff] %v2865_v35  ;;  %v2864_v56 = vadd.f32 %v2841_v26, %v2638_v29 }
 0x48d   : > { %2880 = vst [vmem:[#allocation3 + $0x78] sm:$0xff] %v2864_v56 }
 0x48e PF: > { %2884 = sbr.rel (%p6623_p11) target bundleno = 1433 (0x599), region = 76 }
 0x493   : > { %v6856_v23 = vld [vmem:[%s10551_s14 + $0x4f8] sm:$0xff]  ;;  %v6855_v31 = vld [vmem:[%s10551_s14 + $0x4f0] sm:$0xff]  ;;  %v6854_v13 = vld [vmem:[%s10551_s14 + $0x4e8] sm:$0xff] }
 0x494   : > { %8685 = vmatprep.subr.mxu0 %v6856_v23  ;;  %v6888_v46 = vld [vmem:[%s10551_s14 + $0x578] sm:$0xff]  ;;  %v6887_v63 = vld [vmem:[%s10551_s14 + $0x570] sm:$0xff]  ;;  %v6886_v18 = vld [vmem:[%s10551_s14 + $0x568] sm:$0xff] }
 0x495   : > { %8686 = vmatpush3.msra.mxu0 %v6856_v23  ;;  %8741 = vmatprep.subr.mxu1 %v6888_v46  ;;  %v6853_v7 = vld [vmem:[%s10551_s14 + $0x4e0] sm:$0xff]  ;;  %v6852_v36 = vld [vmem:[%s10551_s14 + $0x4d8] sm:$0xff]  ;;  %v6851_v37 = vld [vmem:[%s10551_s14 + $0x4d0] sm:$0xff] }
 0x496   : > { %8687 = vmatprep.subr.mxu0 %v6855_v31  ;;  %8742 = vmatpush3.msra.mxu1 %v6888_v46  ;;  %v6885_v32 = vld [vmem:[%s10551_s14 + $0x560] sm:$0xff]  ;;  %v6884_v30 = vld [vmem:[%s10551_s14 + $0x558] sm:$0xff]  ;;  %v6883_v54 = vld [vmem:[%s10551_s14 + $0x550] sm:$0xff] }
 0x497   : > { %8688 = vmatpush3.msra.mxu0 %v6855_v31  ;;  %8743 = vmatprep.subr.mxu1 %v6887_v63  ;;  %v6850_v62 = vld [vmem:[%s10551_s14 + $0x4c8] sm:$0xff]  ;;  %v6849_v8 = vld [vmem:[%s10551_s14 + $0x4c0] sm:$0xff]  ;;  %v6848_v17 = vld [vmem:[%s10551_s14 + $0x4b8] sm:$0xff] }
 0x498   : > { %8689 = vmatprep.subr.mxu0 %v6854_v13  ;;  %8744 = vmatpush3.msra.mxu1 %v6887_v63  ;;  %v6882_v0 = vld [vmem:[%s10551_s14 + $0x548] sm:$0xff]  ;;  %v6881_v57 = vld [vmem:[%s10551_s14 + $0x540] sm:$0xff]  ;;  %v6880_v33 = vld [vmem:[%s10551_s14 + $0x538] sm:$0xff] }
 0x499   : > { %8690 = vmatpush3.msra.mxu0 %v6854_v13  ;;  %8745 = vmatprep.subr.mxu1 %v6886_v18  ;;  %v6847_v41 = vld [vmem:[%s10551_s14 + $0x4b0] sm:$0xff]  ;;  %v6846_v25 = vld [vmem:[%s10551_s14 + $0x4a8] sm:$0xff]  ;;  %v6845_v6 = vld [vmem:[%s10551_s14 + $0x4a0] sm:$0xff] }
 0x49a   : > { %8691 = vmatprep.subr.mxu0 %v6853_v7  ;;  %8746 = vmatpush3.msra.mxu1 %v6886_v18  ;;  %v6879_v49 = vld [vmem:[%s10551_s14 + $0x530] sm:$0xff]  ;;  %v6878_v58 = vld [vmem:[%s10551_s14 + $0x528] sm:$0xff]  ;;  %v6877_v12 = vld [vmem:[%s10551_s14 + $0x520] sm:$0xff] }
 0x49b   : > { %8692 = vmatpush3.msra.mxu0 %v6853_v7  ;;  %8747 = vmatprep.subr.mxu1 %v6885_v32  ;;  %v6844_v5 = vld [vmem:[%s10551_s14 + $0x498] sm:$0xff]  ;;  %v6843_v52 = vld [vmem:[%s10551_s14 + $0x490] sm:$0xff]  ;;  %v6842_v39 = vld [vmem:[%s10551_s14 + $0x488] sm:$0xff] }
 0x49c   : > { %8693 = vmatprep.subr.mxu0 %v6852_v36  ;;  %8748 = vmatpush3.msra.mxu1 %v6885_v32  ;;  %v6825_v20 = vld [vmem:[%s10690_s3 + $0x1c] sm:$0xff]  ;;  %v6875_v53 = vld [vmem:[%s10551_s14 + $0x510] sm:$0xff]  ;;  %v6841_v14 = vld [vmem:[%s10551_s14 + $0x480] sm:$0xff] }
 0x49d   : > { %8694 = vmatpush3.msra.mxu0 %v6852_v36  ;;  %8749 = vmatprep.subr.mxu1 %v6884_v30  ;;  %v6876_v61 = vld [vmem:[%s10551_s14 + $0x518] sm:$0xff]  ;;  %v6874_v45 = vld [vmem:[%s10551_s14 + $0x508] sm:$0xff]  ;;  %v6826_v11 = vld [vmem:[%s10690_s3 + $0x24] sm:$0xff] }
 0x49e   : > { %8695 = vmatprep.subr.mxu0 %v6851_v37  ;;  %8750 = vmatpush3.msra.mxu1 %v6884_v30  ;;  %v6873_v2 = vld [vmem:[%s10551_s14 + $0x500] sm:$0xff]  ;;  %v6827_v40 = vld [vmem:[%s10690_s3 + $0x34] sm:$0xff]  ;;  %v6828_v60 = vld [vmem:[%s10690_s3 + $0x3c] sm:$0xff] }
 0x49f   : > { %8696 = vmatpush3.msra.mxu0 %v6851_v37  ;;  %8751 = vmatprep.subr.mxu1 %v6883_v54  ;;  %v6857_v47 = vld [vmem:[%s10690_s3 + $0x30] sm:$0xff]  ;;  %v6858_v21 = vld [vmem:[%s10690_s3 + $0x38] sm:$0xff]  ;;  %v6859_v48 = vld [vmem:[%s10690_s3 + $0x48] sm:$0xff] }
 0x4a0   : > { %8697 = vmatprep.subr.mxu0 %v6850_v62  ;;  %8752 = vmatpush3.msra.mxu1 %v6883_v54  ;;  %v6829_v3 = vld [vmem:[%s10690_s3 + $0x4c] sm:$0xff]  ;;  %v6830_v19 = vld [vmem:[%s10690_s3 + $0x54] sm:$0xff]  ;;  %v6861_v28 = vld [vmem:[%s10690_s3 + $0x60] sm:$0xff] }
 0x4a1   : > { %8698 = vmatpush3.msra.mxu0 %v6850_v62  ;;  %8753 = vmatprep.subr.mxu1 %v6882_v0  ;;  %v6860_v34 = vld [vmem:[%s10690_s3 + $0x50] sm:$0xff]  ;;  %v6831_v15 = vld [vmem:[%s10690_s3 + $0x64] sm:$0xff]  ;;  %v6863_v59 = vld [vmem:[%s10690_s3 + $0x78] sm:$0xff] }
 0x4a2   : > { %8699 = vmatprep.subr.mxu0 %v6849_v8  ;;  %8754 = vmatpush3.msra.mxu1 %v6882_v0  ;;  %v6862_v1 = vld [vmem:[%s10690_s3 + $0x68] sm:$0xff]  ;;  %v6833_v16 = vld [vmem:[%s10690_s3 + $0x7c] sm:$0xff]  ;;  %v6865_v44 = vld [vmem:[%s10690_s3 + $0x90] sm:$0xff] }
 0x4a3   : > { %8700 = vmatpush3.msra.mxu0 %v6849_v8  ;;  %8755 = vmatprep.subr.mxu1 %v6881_v57  ;;  %v6832_v10 = vld [vmem:[%s10690_s3 + $0x6c] sm:$0xff]  ;;  %v6864_v42 = vld [vmem:[%s10690_s3 + $0x80] sm:$0xff]  ;;  %v6835_v43 = vld [vmem:[%s10690_s3 + $0x94] sm:$0xff] }
 0x4a4   : > { %8701 = vmatprep.subr.mxu0 %v6848_v17  ;;  %8756 = vmatpush3.msra.mxu1 %v6881_v57  ;;  %v6834_v50 = vld [vmem:[%s10690_s3 + $0x84] sm:$0xff]  ;;  %v6866_v9 = vld [vmem:[%s10690_s3 + $0x98] sm:$0xff]  ;;  %v6837_v51 = vld [vmem:[%s10690_s3 + $0xac] sm:$0xff] }
 0x4a5   : > { %8702 = vmatpush3.msra.mxu0 %v6848_v17  ;;  %8757 = vmatprep.subr.mxu1 %v6880_v33  ;;  %v6836_v38 = vld [vmem:[%s10690_s3 + $0x9c] sm:$0xff]  ;;  %v6867_v55 = vld [vmem:[%s10690_s3 + $0xa8] sm:$0xff]  ;;  %v6868_v22 = vld [vmem:[%s10690_s3 + $0xb0] sm:$0xff] }
 0x4a6   : > { %8703 = vmatprep.subr.mxu0 %v6847_v41  ;;  %8758 = vmatpush3.msra.mxu1 %v6880_v33  ;;  %v6838_v4 = vld [vmem:[%s10690_s3 + $0xb4] sm:$0xff]  ;;  %v6869_v27 = vld [vmem:[%s10690_s3 + $0xc0] sm:$0xff]  ;;  %v6870_v24 = vld [vmem:[%s10690_s3 + $0xc8] sm:$0xff] }
 0x4a7   : > { %8704 = vmatpush3.msra.mxu0 %v6847_v41  ;;  %8759 = vmatprep.subr.mxu1 %v6879_v49  ;;  %v6839_v29 = vld [vmem:[%s10690_s3 + $0xc4] sm:$0xff]  ;;  %v6840_v35 = vld [vmem:[%s10690_s3 + $0xcc] sm:$0xff]  ;;  %v6871_v26 = vld [vmem:[%s10690_s3 + $0xd8] sm:$0xff] }
 0x4a8   : > { %8705 = vmatprep.subr.mxu0 %v6846_v25  ;;  %8760 = vmatpush3.msra.mxu1 %v6879_v49  ;;  %v6872_v56 = vld [vmem:[%s10690_s3 + $0xe0] sm:$0xff]  ;;  %v2885_v46 = vld [vmem:[#allocation3 + $0x30] sm:$0xff]  ;;  %v2888_v18 = vld [vmem:[#allocation3 + $0x18] sm:$0xff] }
 0x4a9   : > { %8706 = vmatpush3.msra.mxu0 %v6846_v25  ;;  %8761 = vmatprep.subr.mxu1 %v6878_v58  ;;  %v2886_v23 = vld [vmem:[#allocation3] sm:$0xff]  ;;  %v2887_v30 = vld [vmem:[#allocation3 + $0x58] sm:$0xff]  ;;  %v2890_v8 = vld [vmem:[#allocation3 + $0x68] sm:$0xff] }
 0x4aa   : > { %8707 = vmatprep.subr.mxu0 %v6845_v6  ;;  %8762 = vmatpush3.msra.mxu1 %v6878_v58  ;;  %v2889_v49 = vld [vmem:[#allocation3 + $0x50] sm:$0xff] }
 0x4ab   : > { %8708 = vmatpush3.msra.mxu0 %v6845_v6  ;;  %8763 = vmatprep.subr.mxu1 %v6877_v12 }
 0x4ac   : > { %8709 = vmatprep.subr.mxu0 %v6844_v5  ;;  %8717 = vmatprep.mubr.f32.mxu0 %v6825_v20 }
 0x4ad   : > { %8710 = vmatpush3.msra.mxu0 %v6844_v5  ;;  %8764 = vmatpush3.msra.mxu1 %v6877_v12  ;;  %v2892_v5 = vld [vmem:[#allocation3 + $0x48] sm:$0xff] }
 0x4ae   : > { %8711 = vmatprep.subr.mxu0 %v6843_v52  ;;  %8765 = vmatprep.subr.mxu1 %v6876_v61 }
 0x4af   : > { %8712 = vmatpush3.msra.mxu0 %v6843_v52  ;;  %8766 = vmatpush3.msra.mxu1 %v6876_v61 }
 0x4b0   : > { %8713 = vmatprep.subr.mxu0 %v6842_v39  ;;  %8767 = vmatprep.subr.mxu1 %v6875_v53 }
 0x4b1   : > { %8714 = vmatpush3.msra.mxu0 %v6842_v39  ;;  %8768 = vmatpush3.msra.mxu1 %v6875_v53  ;;  %v2891_v53 = vld [vmem:[#allocation3 + $0x8] sm:$0xff] }
 0x4b2   : > { %8715 = vmatprep.subr.mxu0 %v6841_v14  ;;  %8769 = vmatprep.subr.mxu1 %v6874_v45 }
 0x4b3   : > { %8716 = vmatpush3.msra.mxu0 %v6841_v14  ;;  %8770 = vmatpush3.msra.mxu1 %v6874_v45 }
 0x4b4   : > { %8718 = vmatmul.mubr.f32.vlgmr.msra.gmra.mxu0 %v6826_v11  ;;  %8771 = vmatprep.subr.mxu1 %v6873_v2 }
 0x4b5   : > { %8720 = vmatprep.mubr.f32.mxu0 %v6827_v40  ;;  %8772 = vmatpush3.msra.mxu1 %v6873_v2  ;;  %v2894_v40 = vld [vmem:[#allocation3 + $0x20] sm:$0xff] }
 0x4b6   : > { %8773 = vmatprep.mubr.f32.mxu1 %v6857_v47 }
 0x4b7   : > { %8774 = vmatmul.mubr.f32.vlgmr.msra.gmra.mxu1 %v6858_v21 }
 0x4b8   : > { %8721 = vmatmul.mubr.f32.gmra.mxu0 %v6828_v60  ;;  %8776 = vmatprep.mubr.f32.mxu1 %v6859_v48 }
 0x4b9   : > { %8723 = vmatprep.mubr.f32.mxu0 %v6829_v3  ;;  %v2893_v3 = vld [vmem:[#allocation3 + $0x40] sm:$0xff] }
 0x4bb   : > { %8777 = vmatmul.mubr.f32.gmra.mxu1 %v6860_v34 }
 0x4bc   : > { %8724 = vmatmul.mubr.f32.gmra.mxu0 %v6830_v19  ;;  %8779 = vmatprep.mubr.f32.mxu1 %v6861_v28 }
 0x4bd   : > { %8726 = vmatprep.mubr.f32.mxu0 %v6831_v15 }
 0x4bf   : > { %8780 = vmatmul.mubr.f32.gmra.mxu1 %v6862_v1  ;;  %v2896_v1 = vld [vmem:[#allocation3 + $0x38] sm:$0xff] }
 0x4c0   : > { %8727 = vmatmul.mubr.f32.gmra.mxu0 %v6832_v10  ;;  %8782 = vmatprep.mubr.f32.mxu1 %v6863_v59 }
 0x4c1   : > { %8729 = vmatprep.mubr.f32.mxu0 %v6833_v16 }
 0x4c3   : > { %8783 = vmatmul.mubr.f32.gmra.mxu1 %v6864_v42 }
 0x4c4   : > { %8730 = vmatmul.mubr.f32.gmra.mxu0 %v6834_v50  ;;  %8785 = vmatprep.mubr.f32.mxu1 %v6865_v44  ;;  %v2895_v50 = vld [vmem:[#allocation3 + $0x10] sm:$0xff] }
 0x4c5   : > { %8732 = vmatprep.mubr.f32.mxu0 %v6835_v43 }
 0x4c7   : > { %8786 = vmatmul.mubr.f32.gmra.mxu1 %v6866_v9 }
 0x4c8   : > { %8733 = vmatmul.mubr.f32.gmra.mxu0 %v6836_v38  ;;  %8788 = vmatprep.mubr.f32.mxu1 %v6867_v55  ;;  %v2898_v55 = vld [vmem:[#allocation3 + $0x70] sm:$0xff] }
 0x4c9   : > { %8735 = vmatprep.mubr.f32.mxu0 %v6837_v51 }
 0x4cb   : > { %8789 = vmatmul.mubr.f32.gmra.mxu1 %v6868_v22 }
 0x4cc   : > { %8736 = vmatmul.mubr.f32.gmra.mxu0 %v6838_v4  ;;  %8791 = vmatprep.mubr.f32.mxu1 %v6869_v27 }
 0x4cd   : > { %8738 = vmatprep.mubr.f32.mxu0 %v6839_v29  ;;  %v2897_v29 = vld [vmem:[#allocation3 + $0x60] sm:$0xff] }
 0x4cf   : > { %8792 = vmatmul.mubr.f32.gmra.mxu1 %v6870_v24 }
 0x4d0   : > { %8739 = vmatmul.mubr.f32.gmra.mxu0 %v6840_v35  ;;  %8794 = vmatprep.mubr.f32.mxu1 %v6871_v26 }
 0x4d3   : > { %8795 = vmatmul.mubr.f32.gmra.mxu1 %v6872_v56 }
 0x574   : > { %v8719_v31 = vpop.f32.mrf.mxu0 }
 0x575   : > { %v3083_v13 = vadd.f32 %v8719_v31, %v2886_v23  ;;  %v2900_v23 = vld [vmem:[#allocation3 + $0x28] sm:$0xff] }
 0x576   : > { %v3003_v63 = vpop.f32.mrf.mxu0 }
 0x577   : > { %v3082_v7 = vadd.f32 %v3003_v63, %v2885_v46  ;;  %v8775_v32 = vpop.f32.mrf.mxu1 }
 0x578   : > { %v8722_v36 = vpop.f32.mrf.mxu0  ;;  %v3309_v37 = vadd.f32 %v8775_v32, %v3083_v13 }
 0x579   : > { %v3085_v54 = vadd.f32 %v8722_v36, %v2888_v18  ;;  %v3229_v62 = vpop.f32.mrf.mxu1  ;;  %v2899_v18 = vld [vmem:[#allocation3 + $0x78] sm:$0xff] }
 0x57a   : > { %v3013_v0 = vpop.f32.mrf.mxu0  ;;  %3325 = vst [vmem:[#allocation3] sm:$0xff] %v3309_v37  ;;  %v3308_v57 = vadd.f32 %v3229_v62, %v3082_v7 }
 0x57b   : > { %v3084_v17 = vadd.f32 %v3013_v0, %v2887_v30  ;;  %v8778_v33 = vpop.f32.mrf.mxu1 }
 0x57c   : > { %v8725_v41 = vpop.f32.mrf.mxu0  ;;  %3324 = vst [vmem:[#allocation3 + $0x30] sm:$0xff] %v3308_v57  ;;  %v3311_v25 = vadd.f32 %v8778_v33, %v3085_v54 }
 0x57d   : > { %v3087_v58 = vadd.f32 %v8725_v41, %v2890_v8  ;;  %v3239_v6 = vpop.f32.mrf.mxu1 }
 0x57e   : > { %v3023_v12 = vpop.f32.mrf.mxu0  ;;  %3327 = vst [vmem:[#allocation3 + $0x18] sm:$0xff] %v3311_v25  ;;  %v3310_v20 = vadd.f32 %v3239_v6, %v3084_v17 }
 0x57f   : > { %v3086_v52 = vadd.f32 %v3023_v12, %v2889_v49  ;;  %v8781_v61 = vpop.f32.mrf.mxu1 }
 0x580   : > { %v8728_v39 = vpop.f32.mrf.mxu0  ;;  %3326 = vst [vmem:[#allocation3 + $0x58] sm:$0xff] %v3310_v20  ;;  %v3313_v14 = vadd.f32 %v8781_v61, %v3087_v58 }
 0x581   : > { %v3089_v45 = vadd.f32 %v8728_v39, %v2892_v5  ;;  %v3249_v11 = vpop.f32.mrf.mxu1 }
 0x582   : > { %v3033_v2 = vpop.f32.mrf.mxu0  ;;  %3329 = vst [vmem:[#allocation3 + $0x68] sm:$0xff] %v3313_v14  ;;  %v3312_v47 = vadd.f32 %v3249_v11, %v3086_v52 }
 0x583   : > { %v3088_v21 = vadd.f32 %v3033_v2, %v2891_v53  ;;  %v8784_v60 = vpop.f32.mrf.mxu1 }
 0x584   : > { %v8731_v48 = vpop.f32.mrf.mxu0  ;;  %3328 = vst [vmem:[#allocation3 + $0x50] sm:$0xff] %v3312_v47  ;;  %v3315_v34 = vadd.f32 %v8784_v60, %v3089_v45 }
 0x585   : > { %v3091_v19 = vadd.f32 %v8731_v48, %v2894_v40  ;;  %v3259_v28 = vpop.f32.mrf.mxu1 }
 0x586   : > { %v3043_v15 = vpop.f32.mrf.mxu0  ;;  %3331 = vst [vmem:[#allocation3 + $0x48] sm:$0xff] %v3315_v34  ;;  %v3314_v10 = vadd.f32 %v3259_v28, %v3088_v21 }
 0x587   : > { %v3090_v59 = vadd.f32 %v3043_v15, %v2893_v3  ;;  %v8787_v16 = vpop.f32.mrf.mxu1 }
 0x588   : > { %v8734_v42 = vpop.f32.mrf.mxu0  ;;  %3330 = vst [vmem:[#allocation3 + $0x8] sm:$0xff] %v3314_v10  ;;  %v3317_v44 = vadd.f32 %v8787_v16, %v3091_v19 }
 0x589   : > { %v3093_v43 = vadd.f32 %v8734_v42, %v2896_v1  ;;  %v3269_v9 = vpop.f32.mrf.mxu1 }
 0x58a   : > { %v3053_v38 = vpop.f32.mrf.mxu0  ;;  %3333 = vst [vmem:[#allocation3 + $0x20] sm:$0xff] %v3317_v44  ;;  %v3316_v51 = vadd.f32 %v3269_v9, %v3090_v59 }
 0x58b   : > { %v3092_v22 = vadd.f32 %v3053_v38, %v2895_v50  ;;  %v8790_v4 = vpop.f32.mrf.mxu1 }
 0x58c   : > { %v8737_v27 = vpop.f32.mrf.mxu0  ;;  %3332 = vst [vmem:[#allocation3 + $0x40] sm:$0xff] %v3316_v51  ;;  %v3319_v24 = vadd.f32 %v8790_v4, %v3093_v43 }
 0x58d   : > { %v3095_v35 = vadd.f32 %v8737_v27, %v2898_v55  ;;  %v3279_v26 = vpop.f32.mrf.mxu1 }
 0x58e   : > { %v3063_v56 = vpop.f32.mrf.mxu0  ;;  %3335 = vst [vmem:[#allocation3 + $0x38] sm:$0xff] %v3319_v24  ;;  %v3318_v31 = vadd.f32 %v3279_v26, %v3092_v22 }
 0x58f   : > { %v3094_v46 = vadd.f32 %v3063_v56, %v2897_v29  ;;  %v8793_v13 = vpop.f32.mrf.mxu1 }
 0x590   : > { %v8740_v63 = vpop.f32.mrf.mxu0  ;;  %3334 = vst [vmem:[#allocation3 + $0x10] sm:$0xff] %v3318_v31  ;;  %v3321_v7 = vadd.f32 %v8793_v13, %v3095_v35 }
 0x591   : > { %v3097_v32 = vadd.f32 %v8740_v63, %v2900_v23  ;;  %v3289_v36 = vpop.f32.mrf.mxu1 }
 0x592   : > { %v3073_v30 = vpop.f32.mrf.mxu0  ;;  %3337 = vst [vmem:[#allocation3 + $0x70] sm:$0xff] %v3321_v7  ;;  %v3320_v37 = vadd.f32 %v3289_v36, %v3094_v46 }
 0x593   : > { %v3096_v54 = vadd.f32 %v3073_v30, %v2899_v18  ;;  %v8796_v62 = vpop.f32.mrf.mxu1 }
 0x594   : > { %3336 = vst [vmem:[#allocation3 + $0x60] sm:$0xff] %v3320_v37  ;;  %v3323_v0 = vadd.f32 %v8796_v62, %v3097_v32 }
 0x595   : > { %v3299_v8 = vpop.f32.mrf.mxu1 }
 0x596   : > { %3339 = vst [vmem:[#allocation3 + $0x28] sm:$0xff] %v3323_v0  ;;  %v3322_v57 = vadd.f32 %v3299_v8, %v3096_v54 }
 0x598   : > { %3338 = vst [vmem:[#allocation3 + $0x78] sm:$0xff] %v3322_v57 }
 0x599 PF: > { %3342 = sbr.rel (%p6723_p2) target bundleno = 1700 (0x6a4), region = 80 }
 0x59e   : > { %v6921_v17 = vld [vmem:[%s10551_s14 + $0x5f8] sm:$0xff]  ;;  %v6920_v33 = vld [vmem:[%s10551_s14 + $0x5f0] sm:$0xff]  ;;  %v6919_v49 = vld [vmem:[%s10551_s14 + $0x5e8] sm:$0xff] }
 0x59f   : > { %8797 = vmatprep.subr.mxu0 %v6921_v17  ;;  %v6953_v41 = vld [vmem:[%s10551_s14 + $0x6f8] sm:$0xff]  ;;  %v6952_v25 = vld [vmem:[%s10551_s14 + $0x6f0] sm:$0xff]  ;;  %v6951_v58 = vld [vmem:[%s10551_s14 + $0x6e8] sm:$0xff] }
 0x5a0   : > { %8798 = vmatpush3.msra.mxu0 %v6921_v17  ;;  %8853 = vmatprep.subr.mxu1 %v6953_v41  ;;  %v6918_v6 = vld [vmem:[%s10551_s14 + $0x5e0] sm:$0xff]  ;;  %v6917_v5 = vld [vmem:[%s10551_s14 + $0x5d8] sm:$0xff]  ;;  %v6916_v52 = vld [vmem:[%s10551_s14 + $0x5d0] sm:$0xff] }
 0x5a1   : > { %8799 = vmatprep.subr.mxu0 %v6920_v33  ;;  %8854 = vmatpush3.msra.mxu1 %v6953_v41  ;;  %v6950_v12 = vld [vmem:[%s10551_s14 + $0x6e0] sm:$0xff]  ;;  %v6949_v20 = vld [vmem:[%s10551_s14 + $0x6d8] sm:$0xff]  ;;  %v6948_v61 = vld [vmem:[%s10551_s14 + $0x6d0] sm:$0xff] }
 0x5a2   : > { %8800 = vmatpush3.msra.mxu0 %v6920_v33  ;;  %8855 = vmatprep.subr.mxu1 %v6952_v25  ;;  %v6915_v39 = vld [vmem:[%s10551_s14 + $0x5c8] sm:$0xff]  ;;  %v6914_v14 = vld [vmem:[%s10551_s14 + $0x5c0] sm:$0xff]  ;;  %v6913_v11 = vld [vmem:[%s10551_s14 + $0x5b8] sm:$0xff] }
 0x5a3   : > { %8801 = vmatprep.subr.mxu0 %v6919_v49  ;;  %8856 = vmatpush3.msra.mxu1 %v6952_v25  ;;  %v6947_v53 = vld [vmem:[%s10551_s14 + $0x6c8] sm:$0xff]  ;;  %v6946_v45 = vld [vmem:[%s10551_s14 + $0x6c0] sm:$0xff]  ;;  %v6945_v2 = vld [vmem:[%s10551_s14 + $0x6b8] sm:$0xff] }
 0x5a4   : > { %8802 = vmatpush3.msra.mxu0 %v6919_v49  ;;  %8857 = vmatprep.subr.mxu1 %v6951_v58  ;;  %v6912_v40 = vld [vmem:[%s10551_s14 + $0x5b0] sm:$0xff]  ;;  %v6911_v21 = vld [vmem:[%s10551_s14 + $0x5a8] sm:$0xff]  ;;  %v6910_v48 = vld [vmem:[%s10551_s14 + $0x5a0] sm:$0xff] }
 0x5a5   : > { %8803 = vmatprep.subr.mxu0 %v6918_v6  ;;  %8858 = vmatpush3.msra.mxu1 %v6951_v58  ;;  %v6944_v47 = vld [vmem:[%s10551_s14 + $0x6b0] sm:$0xff]  ;;  %v6943_v60 = vld [vmem:[%s10551_s14 + $0x6a8] sm:$0xff]  ;;  %v6942_v3 = vld [vmem:[%s10551_s14 + $0x6a0] sm:$0xff] }
 0x5a6   : > { %8804 = vmatpush3.msra.mxu0 %v6918_v6  ;;  %8859 = vmatprep.subr.mxu1 %v6950_v12  ;;  %v6909_v34 = vld [vmem:[%s10551_s14 + $0x598] sm:$0xff]  ;;  %v6890_v19 = vld [vmem:[%s10690_s3 + $0x31] sm:$0xff]  ;;  %v6906_v59 = vld [vmem:[%s10551_s14 + $0x580] sm:$0xff] }
 0x5a7   : > { %8805 = vmatprep.subr.mxu0 %v6917_v5  ;;  %8860 = vmatpush3.msra.mxu1 %v6950_v12  ;;  %v6908_v28 = vld [vmem:[%s10551_s14 + $0x590] sm:$0xff]  ;;  %v6941_v15 = vld [vmem:[%s10551_s14 + $0x698] sm:$0xff]  ;;  %v6907_v1 = vld [vmem:[%s10551_s14 + $0x588] sm:$0xff] }
 0x5a8   : > { %8806 = vmatpush3.msra.mxu0 %v6917_v5  ;;  %8861 = vmatprep.subr.mxu1 %v6949_v20  ;;  %v6940_v10 = vld [vmem:[%s10551_s14 + $0x690] sm:$0xff]  ;;  %v6939_v16 = vld [vmem:[%s10551_s14 + $0x688] sm:$0xff]  ;;  %v6938_v50 = vld [vmem:[%s10551_s14 + $0x680] sm:$0xff] }
 0x5a9   : > { %8807 = vmatprep.subr.mxu0 %v6916_v52  ;;  %8862 = vmatpush3.msra.mxu1 %v6949_v20  ;;  %v6891_v42 = vld [vmem:[%s10690_s3 + $0x39] sm:$0xff]  ;;  %v6892_v44 = vld [vmem:[%s10690_s3 + $0x49] sm:$0xff]  ;;  %v6893_v38 = vld [vmem:[%s10690_s3 + $0x51] sm:$0xff] }
 0x5aa   : > { %8808 = vmatpush3.msra.mxu0 %v6916_v52  ;;  %8863 = vmatprep.subr.mxu1 %v6948_v61  ;;  %v6922_v43 = vld [vmem:[%s10690_s3 + $0x33] sm:$0xff]  ;;  %v6923_v9 = vld [vmem:[%s10690_s3 + $0x3b] sm:$0xff]  ;;  %v6924_v55 = vld [vmem:[%s10690_s3 + $0x4b] sm:$0xff] }
 0x5ab   : > { %8809 = vmatprep.subr.mxu0 %v6915_v39  ;;  %8864 = vmatpush3.msra.mxu1 %v6948_v61  ;;  %v6894_v51 = vld [vmem:[%s10690_s3 + $0x61] sm:$0xff]  ;;  %v6925_v22 = vld [vmem:[%s10690_s3 + $0x53] sm:$0xff]  ;;  %v6895_v4 = vld [vmem:[%s10690_s3 + $0x69] sm:$0xff] }
 0x5ac   : > { %8810 = vmatpush3.msra.mxu0 %v6915_v39  ;;  %8865 = vmatprep.subr.mxu1 %v6947_v53  ;;  %v6926_v27 = vld [vmem:[%s10690_s3 + $0x63] sm:$0xff]  ;;  %v6896_v29 = vld [vmem:[%s10690_s3 + $0x79] sm:$0xff]  ;;  %v6927_v24 = vld [vmem:[%s10690_s3 + $0x6b] sm:$0xff] }
 0x5ad   : > { %8811 = vmatprep.subr.mxu0 %v6914_v14  ;;  %8866 = vmatpush3.msra.mxu1 %v6947_v53  ;;  %v6897_v35 = vld [vmem:[%s10690_s3 + $0x81] sm:$0xff]  ;;  %v6898_v56 = vld [vmem:[%s10690_s3 + $0x91] sm:$0xff]  ;;  %v6899_v31 = vld [vmem:[%s10690_s3 + $0x99] sm:$0xff] }
 0x5ae   : > { %8812 = vmatpush3.msra.mxu0 %v6914_v14  ;;  %8867 = vmatprep.subr.mxu1 %v6946_v45  ;;  %v6928_v26 = vld [vmem:[%s10690_s3 + $0x7b] sm:$0xff]  ;;  %v6929_v23 = vld [vmem:[%s10690_s3 + $0x83] sm:$0xff]  ;;  %v6930_v46 = vld [vmem:[%s10690_s3 + $0x93] sm:$0xff] }
 0x5af   : > { %8813 = vmatprep.subr.mxu0 %v6913_v11  ;;  %8868 = vmatpush3.msra.mxu1 %v6946_v45  ;;  %v6900_v13 = vld [vmem:[%s10690_s3 + $0xa9] sm:$0xff]  ;;  %v6931_v63 = vld [vmem:[%s10690_s3 + $0x9b] sm:$0xff]  ;;  %v6901_v18 = vld [vmem:[%s10690_s3 + $0xb1] sm:$0xff] }
 0x5b0   : > { %8814 = vmatpush3.msra.mxu0 %v6913_v11  ;;  %8869 = vmatprep.subr.mxu1 %v6945_v2  ;;  %v6932_v7 = vld [vmem:[%s10690_s3 + $0xab] sm:$0xff]  ;;  %v6902_v32 = vld [vmem:[%s10690_s3 + $0xc1] sm:$0xff]  ;;  %v6933_v36 = vld [vmem:[%s10690_s3 + $0xb3] sm:$0xff] }
 0x5b1   : > { %8815 = vmatprep.subr.mxu0 %v6912_v40  ;;  %8870 = vmatpush3.msra.mxu1 %v6945_v2  ;;  %v6903_v30 = vld [vmem:[%s10690_s3 + $0xc9] sm:$0xff]  ;;  %v6904_v54 = vld [vmem:[%s10690_s3 + $0xd9] sm:$0xff]  ;;  %v6905_v0 = vld [vmem:[%s10690_s3 + $0xe1] sm:$0xff] }
 0x5b2   : > { %8816 = vmatpush3.msra.mxu0 %v6912_v40  ;;  %8871 = vmatprep.subr.mxu1 %v6944_v47  ;;  %v6934_v37 = vld [vmem:[%s10690_s3 + $0xc3] sm:$0xff]  ;;  %v6935_v62 = vld [vmem:[%s10690_s3 + $0xcb] sm:$0xff]  ;;  %v6936_v8 = vld [vmem:[%s10690_s3 + $0xdb] sm:$0xff] }
 0x5b3   : > { %8817 = vmatprep.subr.mxu0 %v6911_v21  ;;  %8872 = vmatpush3.msra.mxu1 %v6944_v47  ;;  %v6937_v57 = vld [vmem:[%s10690_s3 + $0xe3] sm:$0xff]  ;;  %v3343_v41 = vld [vmem:[#allocation3 + $0x30] sm:$0xff]  ;;  %v3346_v58 = vld [vmem:[#allocation3 + $0x18] sm:$0xff] }
 0x5b4   : > { %8818 = vmatpush3.msra.mxu0 %v6911_v21  ;;  %8873 = vmatprep.subr.mxu1 %v6943_v60  ;;  %v3344_v17 = vld [vmem:[#allocation3] sm:$0xff]  ;;  %v3345_v20 = vld [vmem:[#allocation3 + $0x58] sm:$0xff]  ;;  %v3348_v14 = vld [vmem:[#allocation3 + $0x68] sm:$0xff] }
 0x5b5   : > { %8819 = vmatprep.subr.mxu0 %v6910_v48  ;;  %8874 = vmatpush3.msra.mxu1 %v6943_v60  ;;  %v3347_v47 = vld [vmem:[#allocation3 + $0x50] sm:$0xff] }
 0x5b6   : > { %8820 = vmatpush3.msra.mxu0 %v6910_v48  ;;  %8875 = vmatprep.subr.mxu1 %v6942_v3 }
 0x5b7   : > { %8821 = vmatprep.subr.mxu0 %v6909_v34  ;;  %8829 = vmatprep.mubr.f32.mxu0 %v6890_v19 }
 0x5b8   : > { %8822 = vmatpush3.msra.mxu0 %v6909_v34  ;;  %8876 = vmatpush3.msra.mxu1 %v6942_v3  ;;  %v3350_v34 = vld [vmem:[#allocation3 + $0x48] sm:$0xff] }
 0x5b9   : > { %8823 = vmatprep.subr.mxu0 %v6908_v28  ;;  %8877 = vmatprep.subr.mxu1 %v6941_v15 }
 0x5ba   : > { %8824 = vmatpush3.msra.mxu0 %v6908_v28  ;;  %8878 = vmatpush3.msra.mxu1 %v6941_v15 }
 0x5bb   : > { %8825 = vmatprep.subr.mxu0 %v6907_v1  ;;  %8879 = vmatprep.subr.mxu1 %v6940_v10 }
 0x5bc   : > { %8826 = vmatpush3.msra.mxu0 %v6907_v1  ;;  %8880 = vmatpush3.msra.mxu1 %v6940_v10  ;;  %v3349_v10 = vld [vmem:[#allocation3 + $0x8] sm:$0xff] }
 0x5bd   : > { %8827 = vmatprep.subr.mxu0 %v6906_v59  ;;  %8881 = vmatprep.subr.mxu1 %v6939_v16 }
 0x5be   : > { %8828 = vmatpush3.msra.mxu0 %v6906_v59  ;;  %8882 = vmatpush3.msra.mxu1 %v6939_v16 }
 0x5bf   : > { %8830 = vmatmul.mubr.f32.vlgmr.msra.gmra.mxu0 %v6891_v42  ;;  %8883 = vmatprep.subr.mxu1 %v6938_v50 }
 0x5c0   : > { %8832 = vmatprep.mubr.f32.mxu0 %v6892_v44  ;;  %8884 = vmatpush3.msra.mxu1 %v6938_v50  ;;  %v3352_v44 = vld [vmem:[#allocation3 + $0x20] sm:$0xff] }
 0x5c1   : > { %8885 = vmatprep.mubr.f32.mxu1 %v6922_v43 }
 0x5c2   : > { %8886 = vmatmul.mubr.f32.vlgmr.msra.gmra.mxu1 %v6923_v9 }
 0x5c3   : > { %8833 = vmatmul.mubr.f32.gmra.mxu0 %v6893_v38  ;;  %8888 = vmatprep.mubr.f32.mxu1 %v6924_v55 }
 0x5c4   : > { %8835 = vmatprep.mubr.f32.mxu0 %v6894_v51  ;;  %v3351_v51 = vld [vmem:[#allocation3 + $0x40] sm:$0xff] }
 0x5c6   : > { %8889 = vmatmul.mubr.f32.gmra.mxu1 %v6925_v22 }
 0x5c7   : > { %8836 = vmatmul.mubr.f32.gmra.mxu0 %v6895_v4  ;;  %8891 = vmatprep.mubr.f32.mxu1 %v6926_v27 }
 0x5c8   : > { %8838 = vmatprep.mubr.f32.mxu0 %v6896_v29 }
 0x5ca   : > { %8892 = vmatmul.mubr.f32.gmra.mxu1 %v6927_v24  ;;  %v3354_v24 = vld [vmem:[#allocation3 + $0x38] sm:$0xff] }
 0x5cb   : > { %8839 = vmatmul.mubr.f32.gmra.mxu0 %v6897_v35  ;;  %8894 = vmatprep.mubr.f32.mxu1 %v6928_v26 }
 0x5cc   : > { %8841 = vmatprep.mubr.f32.mxu0 %v6898_v56 }
 0x5ce   : > { %8895 = vmatmul.mubr.f32.gmra.mxu1 %v6929_v23 }
 0x5cf   : > { %8842 = vmatmul.mubr.f32.gmra.mxu0 %v6899_v31  ;;  %8897 = vmatprep.mubr.f32.mxu1 %v6930_v46  ;;  %v3353_v31 = vld [vmem:[#allocation3 + $0x10] sm:$0xff] }
 0x5d0   : > { %8844 = vmatprep.mubr.f32.mxu0 %v6900_v13 }
 0x5d2   : > { %8898 = vmatmul.mubr.f32.gmra.mxu1 %v6931_v63 }
 0x5d3   : > { %8845 = vmatmul.mubr.f32.gmra.mxu0 %v6901_v18  ;;  %8900 = vmatprep.mubr.f32.mxu1 %v6932_v7  ;;  %v3356_v7 = vld [vmem:[#allocation3 + $0x70] sm:$0xff] }
 0x5d4   : > { %8847 = vmatprep.mubr.f32.mxu0 %v6902_v32 }
 0x5d6   : > { %8901 = vmatmul.mubr.f32.gmra.mxu1 %v6933_v36 }
 0x5d7   : > { %8848 = vmatmul.mubr.f32.gmra.mxu0 %v6903_v30  ;;  %8903 = vmatprep.mubr.f32.mxu1 %v6934_v37 }
 0x5d8   : > { %8850 = vmatprep.mubr.f32.mxu0 %v6904_v54  ;;  %v3355_v54 = vld [vmem:[#allocation3 + $0x60] sm:$0xff] }
 0x5da   : > { %8904 = vmatmul.mubr.f32.gmra.mxu1 %v6935_v62 }
 0x5db   : > { %8851 = vmatmul.mubr.f32.gmra.mxu0 %v6905_v0  ;;  %8906 = vmatprep.mubr.f32.mxu1 %v6936_v8 }
 0x5de   : > { %8907 = vmatmul.mubr.f32.gmra.mxu1 %v6937_v57 }
 0x67f   : > { %v8831_v33 = vpop.f32.mrf.mxu0 }
 0x680   : > { %v3538_v49 = vadd.f32 %v8831_v33, %v3344_v17  ;;  %v3358_v17 = vld [vmem:[#allocation3 + $0x28] sm:$0xff] }
 0x681   : > { %v3458_v25 = vpop.f32.mrf.mxu0 }
 0x682   : > { %v3537_v6 = vadd.f32 %v3458_v25, %v3343_v41  ;;  %v8887_v12 = vpop.f32.mrf.mxu1 }
 0x683   : > { %v8834_v5 = vpop.f32.mrf.mxu0  ;;  %v3764_v52 = vadd.f32 %v8887_v12, %v3538_v49 }
 0x684   : > { %v3540_v61 = vadd.f32 %v8834_v5, %v3346_v58  ;;  %v3684_v39 = vpop.f32.mrf.mxu1  ;;  %v3357_v58 = vld [vmem:[#allocation3 + $0x78] sm:$0xff] }
 0x685   : > { %v3468_v53 = vpop.f32.mrf.mxu0  ;;  %3780 = vst [vmem:[#allocation3] sm:$0xff] %v3764_v52  ;;  %v3763_v45 = vadd.f32 %v3684_v39, %v3537_v6 }
 0x686   : > { %v3539_v11 = vadd.f32 %v3468_v53, %v3345_v20  ;;  %v8890_v2 = vpop.f32.mrf.mxu1 }
 0x687   : > { %v8837_v40 = vpop.f32.mrf.mxu0  ;;  %3779 = vst [vmem:[#allocation3 + $0x30] sm:$0xff] %v3763_v45  ;;  %v3766_v21 = vadd.f32 %v8890_v2, %v3540_v61 }
 0x688   : > { %v3542_v60 = vadd.f32 %v8837_v40, %v3348_v14  ;;  %v3694_v48 = vpop.f32.mrf.mxu1 }
 0x689   : > { %v3478_v3 = vpop.f32.mrf.mxu0  ;;  %3782 = vst [vmem:[#allocation3 + $0x18] sm:$0xff] %v3766_v21  ;;  %v3765_v19 = vadd.f32 %v3694_v48, %v3539_v11 }
 0x68a   : > { %v3541_v28 = vadd.f32 %v3478_v3, %v3347_v47  ;;  %v8893_v15 = vpop.f32.mrf.mxu1 }
 0x68b   : > { %v8840_v1 = vpop.f32.mrf.mxu0  ;;  %3781 = vst [vmem:[#allocation3 + $0x58] sm:$0xff] %v3765_v19  ;;  %v3768_v59 = vadd.f32 %v8893_v15, %v3542_v60 }
 0x68c   : > { %v3544_v16 = vadd.f32 %v8840_v1, %v3350_v34  ;;  %v3704_v42 = vpop.f32.mrf.mxu1 }
 0x68d   : > { %v3488_v50 = vpop.f32.mrf.mxu0  ;;  %3784 = vst [vmem:[#allocation3 + $0x68] sm:$0xff] %v3768_v59  ;;  %v3767_v43 = vadd.f32 %v3704_v42, %v3541_v28 }
 0x68e   : > { %v3543_v9 = vadd.f32 %v3488_v50, %v3349_v10  ;;  %v8896_v38 = vpop.f32.mrf.mxu1 }
 0x68f   : > { %v8843_v55 = vpop.f32.mrf.mxu0  ;;  %3783 = vst [vmem:[#allocation3 + $0x50] sm:$0xff] %v3767_v43  ;;  %v3770_v22 = vadd.f32 %v8896_v38, %v3544_v16 }
 0x690   : > { %v3546_v4 = vadd.f32 %v8843_v55, %v3352_v44  ;;  %v3714_v27 = vpop.f32.mrf.mxu1 }
 0x691   : > { %v3498_v29 = vpop.f32.mrf.mxu0  ;;  %3786 = vst [vmem:[#allocation3 + $0x48] sm:$0xff] %v3770_v22  ;;  %v3769_v35 = vadd.f32 %v3714_v27, %v3543_v9 }
 0x692   : > { %v3545_v26 = vadd.f32 %v3498_v29, %v3351_v51  ;;  %v8899_v56 = vpop.f32.mrf.mxu1 }
 0x693   : > { %v8846_v23 = vpop.f32.mrf.mxu0  ;;  %3785 = vst [vmem:[#allocation3 + $0x8] sm:$0xff] %v3769_v35  ;;  %v3772_v46 = vadd.f32 %v8899_v56, %v3546_v4 }
 0x694   : > { %v3548_v13 = vadd.f32 %v8846_v23, %v3354_v24  ;;  %v3724_v63 = vpop.f32.mrf.mxu1 }
 0x695   : > { %v3508_v18 = vpop.f32.mrf.mxu0  ;;  %3788 = vst [vmem:[#allocation3 + $0x20] sm:$0xff] %v3772_v46  ;;  %v3771_v32 = vadd.f32 %v3724_v63, %v3545_v26 }
 0x696   : > { %v3547_v36 = vadd.f32 %v3508_v18, %v3353_v31  ;;  %v8902_v30 = vpop.f32.mrf.mxu1 }
 0x697   : > { %v8849_v37 = vpop.f32.mrf.mxu0  ;;  %3787 = vst [vmem:[#allocation3 + $0x40] sm:$0xff] %v3771_v32  ;;  %v3774_v62 = vadd.f32 %v8902_v30, %v3548_v13 }
 0x698   : > { %v3550_v0 = vadd.f32 %v8849_v37, %v3356_v7  ;;  %v3734_v8 = vpop.f32.mrf.mxu1 }
 0x699   : > { %v3518_v57 = vpop.f32.mrf.mxu0  ;;  %3790 = vst [vmem:[#allocation3 + $0x38] sm:$0xff] %v3774_v62  ;;  %v3773_v33 = vadd.f32 %v3734_v8, %v3547_v36 }
 0x69a   : > { %v3549_v41 = vadd.f32 %v3518_v57, %v3355_v54  ;;  %v8905_v49 = vpop.f32.mrf.mxu1 }
 0x69b   : > { %v8852_v25 = vpop.f32.mrf.mxu0  ;;  %3789 = vst [vmem:[#allocation3 + $0x10] sm:$0xff] %v3773_v33  ;;  %v3776_v6 = vadd.f32 %v8905_v49, %v3550_v0 }
 0x69c   : > { %v3552_v12 = vadd.f32 %v8852_v25, %v3358_v17  ;;  %v3744_v5 = vpop.f32.mrf.mxu1 }
 0x69d   : > { %v3528_v20 = vpop.f32.mrf.mxu0  ;;  %3792 = vst [vmem:[#allocation3 + $0x70] sm:$0xff] %v3776_v6  ;;  %v3775_v52 = vadd.f32 %v3744_v5, %v3549_v41 }
 0x69e   : > { %v3551_v61 = vadd.f32 %v3528_v20, %v3357_v58  ;;  %v8908_v39 = vpop.f32.mrf.mxu1 }
 0x69f   : > { %3791 = vst [vmem:[#allocation3 + $0x60] sm:$0xff] %v3775_v52  ;;  %v3778_v53 = vadd.f32 %v8908_v39, %v3552_v12 }
 0x6a0   : > { %v3754_v14 = vpop.f32.mrf.mxu1 }
 0x6a1   : > { %3794 = vst [vmem:[#allocation3 + $0x28] sm:$0xff] %v3778_v53  ;;  %v3777_v45 = vadd.f32 %v3754_v14, %v3551_v61 }
 0x6a3   : > { %3793 = vst [vmem:[#allocation3 + $0x78] sm:$0xff] %v3777_v45 }
 0x6a4 PF: > { %3797 = sbr.rel (%p6623_p11) target bundleno = 1967 (0x7af), region = 84 }
 0x6a9   : > { %v6986_v11 = vld [vmem:[%s10551_s14 + $0x778] sm:$0xff]  ;;  %v6985_v2 = vld [vmem:[%s10551_s14 + $0x770] sm:$0xff]  ;;  %v6984_v47 = vld [vmem:[%s10551_s14 + $0x768] sm:$0xff] }
 0x6aa   : > { %8909 = vmatprep.subr.mxu0 %v6986_v11  ;;  %v7020_v40 = vld [vmem:[%s10551_s14 + $0x7f8] sm:$0xff]  ;;  %v7019_v21 = vld [vmem:[%s10551_s14 + $0x7f0] sm:$0xff]  ;;  %v7018_v60 = vld [vmem:[%s10551_s14 + $0x7e8] sm:$0xff] }
 0x6ab   : > { %8910 = vmatpush3.msra.mxu0 %v6986_v11  ;;  %8965 = vmatprep.subr.mxu1 %v7020_v40  ;;  %v6983_v48 = vld [vmem:[%s10551_s14 + $0x760] sm:$0xff]  ;;  %v6982_v34 = vld [vmem:[%s10551_s14 + $0x758] sm:$0xff]  ;;  %v6981_v28 = vld [vmem:[%s10551_s14 + $0x750] sm:$0xff] }
 0x6ac   : > { %8911 = vmatprep.subr.mxu0 %v6985_v2  ;;  %8966 = vmatpush3.msra.mxu1 %v7020_v40  ;;  %v7017_v3 = vld [vmem:[%s10551_s14 + $0x7e0] sm:$0xff]  ;;  %v7016_v19 = vld [vmem:[%s10551_s14 + $0x7d8] sm:$0xff]  ;;  %v7015_v15 = vld [vmem:[%s10551_s14 + $0x7d0] sm:$0xff] }
 0x6ad   : > { %8912 = vmatpush3.msra.mxu0 %v6985_v2  ;;  %8967 = vmatprep.subr.mxu1 %v7019_v21  ;;  %v6980_v1 = vld [vmem:[%s10551_s14 + $0x748] sm:$0xff]  ;;  %v6979_v59 = vld [vmem:[%s10551_s14 + $0x740] sm:$0xff]  ;;  %v6978_v42 = vld [vmem:[%s10551_s14 + $0x738] sm:$0xff] }
 0x6ae   : > { %8913 = vmatprep.subr.mxu0 %v6984_v47  ;;  %8968 = vmatpush3.msra.mxu1 %v7019_v21  ;;  %v7014_v10 = vld [vmem:[%s10551_s14 + $0x7c8] sm:$0xff]  ;;  %v7013_v16 = vld [vmem:[%s10551_s14 + $0x7c0] sm:$0xff]  ;;  %v7012_v50 = vld [vmem:[%s10551_s14 + $0x7b8] sm:$0xff] }
 0x6af   : > { %8914 = vmatpush3.msra.mxu0 %v6984_v47  ;;  %8969 = vmatprep.subr.mxu1 %v7018_v60  ;;  %v6977_v44 = vld [vmem:[%s10551_s14 + $0x730] sm:$0xff]  ;;  %v6976_v9 = vld [vmem:[%s10551_s14 + $0x728] sm:$0xff]  ;;  %v6975_v55 = vld [vmem:[%s10551_s14 + $0x720] sm:$0xff] }
 0x6b0   : > { %8915 = vmatprep.subr.mxu0 %v6983_v48  ;;  %8970 = vmatpush3.msra.mxu1 %v7018_v60  ;;  %v7011_v43 = vld [vmem:[%s10551_s14 + $0x7b0] sm:$0xff]  ;;  %v7010_v38 = vld [vmem:[%s10551_s14 + $0x7a8] sm:$0xff]  ;;  %v7009_v51 = vld [vmem:[%s10551_s14 + $0x7a0] sm:$0xff] }
 0x6b1   : > { %8916 = vmatpush3.msra.mxu0 %v6983_v48  ;;  %8971 = vmatprep.subr.mxu1 %v7017_v3  ;;  %v6974_v22 = vld [vmem:[%s10551_s14 + $0x718] sm:$0xff]  ;;  %v6955_v4 = vld [vmem:[%s10690_s3 + $0x34] sm:$0xff]  ;;  %v6972_v24 = vld [vmem:[%s10551_s14 + $0x708] sm:$0xff] }
 0x6b2   : > { %8917 = vmatprep.subr.mxu0 %v6982_v34  ;;  %8972 = vmatpush3.msra.mxu1 %v7017_v3  ;;  %v6973_v27 = vld [vmem:[%s10551_s14 + $0x710] sm:$0xff]  ;;  %v7008_v29 = vld [vmem:[%s10551_s14 + $0x798] sm:$0xff]  ;;  %v6971_v26 = vld [vmem:[%s10551_s14 + $0x700] sm:$0xff] }
 0x6b3   : > { %8918 = vmatpush3.msra.mxu0 %v6982_v34  ;;  %8973 = vmatprep.subr.mxu1 %v7016_v19  ;;  %v7007_v35 = vld [vmem:[%s10551_s14 + $0x790] sm:$0xff]  ;;  %v7006_v56 = vld [vmem:[%s10551_s14 + $0x788] sm:$0xff]  ;;  %v6956_v23 = vld [vmem:[%s10690_s3 + $0x3c] sm:$0xff] }
 0x6b4   : > { %8919 = vmatprep.subr.mxu0 %v6981_v28  ;;  %8974 = vmatpush3.msra.mxu1 %v7016_v19  ;;  %v7005_v31 = vld [vmem:[%s10551_s14 + $0x780] sm:$0xff]  ;;  %v6957_v46 = vld [vmem:[%s10690_s3 + $0x4c] sm:$0xff]  ;;  %v6958_v18 = vld [vmem:[%s10690_s3 + $0x54] sm:$0xff] }
 0x6b5   : > { %8920 = vmatpush3.msra.mxu0 %v6981_v28  ;;  %8975 = vmatprep.subr.mxu1 %v7015_v15  ;;  %v6989_v13 = vld [vmem:[%s10690_s3 + $0x48] sm:$0xff]  ;;  %v6990_v63 = vld [vmem:[%s10690_s3 + $0x50] sm:$0xff]  ;;  %v6991_v7 = vld [vmem:[%s10690_s3 + $0x60] sm:$0xff] }
 0x6b6   : > { %8921 = vmatprep.subr.mxu0 %v6980_v1  ;;  %8976 = vmatpush3.msra.mxu1 %v7015_v15  ;;  %v6959_v32 = vld [vmem:[%s10690_s3 + $0x64] sm:$0xff]  ;;  %v6960_v30 = vld [vmem:[%s10690_s3 + $0x6c] sm:$0xff]  ;;  %v6993_v37 = vld [vmem:[%s10690_s3 + $0x78] sm:$0xff] }
 0x6b7   : > { %8922 = vmatpush3.msra.mxu0 %v6980_v1  ;;  %8977 = vmatprep.subr.mxu1 %v7014_v10  ;;  %v6992_v36 = vld [vmem:[%s10690_s3 + $0x68] sm:$0xff]  ;;  %v6961_v54 = vld [vmem:[%s10690_s3 + $0x7c] sm:$0xff]  ;;  %v6995_v8 = vld [vmem:[%s10690_s3 + $0x90] sm:$0xff] }
 0x6b8   : > { %8923 = vmatprep.subr.mxu0 %v6979_v59  ;;  %8978 = vmatpush3.msra.mxu1 %v7014_v10  ;;  %v6994_v62 = vld [vmem:[%s10690_s3 + $0x80] sm:$0xff]  ;;  %v6963_v57 = vld [vmem:[%s10690_s3 + $0x94] sm:$0xff]  ;;  %v6997_v41 = vld [vmem:[%s10690_s3 + $0xa8] sm:$0xff] }
 0x6b9   : > { %8924 = vmatpush3.msra.mxu0 %v6979_v59  ;;  %8979 = vmatprep.subr.mxu1 %v7013_v16  ;;  %v6962_v0 = vld [vmem:[%s10690_s3 + $0x84] sm:$0xff]  ;;  %v6996_v17 = vld [vmem:[%s10690_s3 + $0x98] sm:$0xff]  ;;  %v6965_v49 = vld [vmem:[%s10690_s3 + $0xac] sm:$0xff] }
 0x6ba   : > { %8925 = vmatprep.subr.mxu0 %v6978_v42  ;;  %8980 = vmatpush3.msra.mxu1 %v7013_v16  ;;  %v6964_v33 = vld [vmem:[%s10690_s3 + $0x9c] sm:$0xff]  ;;  %v6998_v25 = vld [vmem:[%s10690_s3 + $0xb0] sm:$0xff]  ;;  %v6967_v12 = vld [vmem:[%s10690_s3 + $0xc4] sm:$0xff] }
 0x6bb   : > { %8926 = vmatpush3.msra.mxu0 %v6978_v42  ;;  %8981 = vmatprep.subr.mxu1 %v7012_v50  ;;  %v6966_v58 = vld [vmem:[%s10690_s3 + $0xb4] sm:$0xff]  ;;  %v6999_v6 = vld [vmem:[%s10690_s3 + $0xc0] sm:$0xff]  ;;  %v7000_v5 = vld [vmem:[%s10690_s3 + $0xc8] sm:$0xff] }
 0x6bc   : > { %8927 = vmatprep.subr.mxu0 %v6977_v44  ;;  %8982 = vmatpush3.msra.mxu1 %v7012_v50  ;;  %v6968_v20 = vld [vmem:[%s10690_s3 + $0xcc] sm:$0xff]  ;;  %v7001_v52 = vld [vmem:[%s10690_s3 + $0xd8] sm:$0xff]  ;;  %v7002_v39 = vld [vmem:[%s10690_s3 + $0xe0] sm:$0xff] }
 0x6bd   : > { %8928 = vmatpush3.msra.mxu0 %v6977_v44  ;;  %8983 = vmatprep.subr.mxu1 %v7011_v43  ;;  %v6969_v61 = vld [vmem:[%s10690_s3 + $0xdc] sm:$0xff]  ;;  %v6970_v53 = vld [vmem:[%s10690_s3 + $0xe4] sm:$0xff]  ;;  %v7003_v14 = vld [vmem:[%s10690_s3 + $0xf0] sm:$0xff] }
 0x6be   : > { %8929 = vmatprep.subr.mxu0 %v6976_v9  ;;  %8984 = vmatpush3.msra.mxu1 %v7011_v43  ;;  %v7004_v45 = vld [vmem:[%s10690_s3 + $0xf8] sm:$0xff]  ;;  %v3799_v11 = vld [vmem:[#allocation3] sm:$0xff]  ;;  %v3798_v40 = vld [vmem:[#allocation3 + $0x30] sm:$0xff] }
 0x6bf   : > { %8930 = vmatpush3.msra.mxu0 %v6976_v9  ;;  %8985 = vmatprep.subr.mxu1 %v7010_v38  ;;  %v3801_v60 = vld [vmem:[#allocation3 + $0x18] sm:$0xff]  ;;  %v3803_v59 = vld [vmem:[#allocation3 + $0x68] sm:$0xff]  ;;  %v3802_v43 = vld [vmem:[#allocation3 + $0x50] sm:$0xff] }
 0x6c0   : > { %8931 = vmatprep.subr.mxu0 %v6975_v55  ;;  %8986 = vmatpush3.msra.mxu1 %v7010_v38  ;;  %v3800_v19 = vld [vmem:[#allocation3 + $0x58] sm:$0xff] }
 0x6c1   : > { %8932 = vmatpush3.msra.mxu0 %v6975_v55  ;;  %8987 = vmatprep.subr.mxu1 %v7009_v51 }
 0x6c2   : > { %8933 = vmatprep.subr.mxu0 %v6974_v22  ;;  %8941 = vmatprep.mubr.f32.mxu0 %v6955_v4 }
 0x6c3   : > { %8934 = vmatpush3.msra.mxu0 %v6974_v22  ;;  %8988 = vmatpush3.msra.mxu1 %v7009_v51  ;;  %v3805_v22 = vld [vmem:[#allocation3 + $0x48] sm:$0xff] }
 0x6c4   : > { %8935 = vmatprep.subr.mxu0 %v6973_v27  ;;  %8989 = vmatprep.subr.mxu1 %v7008_v29 }
 0x6c5   : > { %8936 = vmatpush3.msra.mxu0 %v6973_v27  ;;  %8990 = vmatpush3.msra.mxu1 %v7008_v29 }
 0x6c6   : > { %8937 = vmatprep.subr.mxu0 %v6972_v24  ;;  %8991 = vmatprep.subr.mxu1 %v7007_v35 }
 0x6c7   : > { %8938 = vmatpush3.msra.mxu0 %v6972_v24  ;;  %8992 = vmatpush3.msra.mxu1 %v7007_v35  ;;  %v3804_v35 = vld [vmem:[#allocation3 + $0x8] sm:$0xff] }
 0x6c8   : > { %8939 = vmatprep.subr.mxu0 %v6971_v26  ;;  %8993 = vmatprep.subr.mxu1 %v7006_v56 }
 0x6c9   : > { %8940 = vmatpush3.msra.mxu0 %v6971_v26  ;;  %8994 = vmatpush3.msra.mxu1 %v7006_v56 }
 0x6ca   : > { %8942 = vmatmul.mubr.f32.vlgmr.msra.gmra.mxu0 %v6956_v23  ;;  %8995 = vmatprep.subr.mxu1 %v7005_v31 }
 0x6cb   : > { %8944 = vmatprep.mubr.f32.mxu0 %v6957_v46  ;;  %8996 = vmatpush3.msra.mxu1 %v7005_v31  ;;  %v3807_v46 = vld [vmem:[#allocation3 + $0x20] sm:$0xff] }
 0x6cc   : > { %8997 = vmatprep.mubr.f32.mxu1 %v6989_v13 }
 0x6cd   : > { %8998 = vmatmul.mubr.f32.vlgmr.msra.gmra.mxu1 %v6990_v63 }
 0x6ce   : > { %8945 = vmatmul.mubr.f32.gmra.mxu0 %v6958_v18  ;;  %9000 = vmatprep.mubr.f32.mxu1 %v6991_v7 }
 0x6cf   : > { %8947 = vmatprep.mubr.f32.mxu0 %v6959_v32  ;;  %v3806_v32 = vld [vmem:[#allocation3 + $0x40] sm:$0xff] }
 0x6d1   : > { %9001 = vmatmul.mubr.f32.gmra.mxu1 %v6992_v36 }
 0x6d2   : > { %8948 = vmatmul.mubr.f32.gmra.mxu0 %v6960_v30  ;;  %9003 = vmatprep.mubr.f32.mxu1 %v6993_v37 }
 0x6d3   : > { %8950 = vmatprep.mubr.f32.mxu0 %v6961_v54 }
 0x6d5   : > { %9004 = vmatmul.mubr.f32.gmra.mxu1 %v6994_v62  ;;  %v3809_v62 = vld [vmem:[#allocation3 + $0x38] sm:$0xff] }
 0x6d6   : > { %8951 = vmatmul.mubr.f32.gmra.mxu0 %v6962_v0  ;;  %9006 = vmatprep.mubr.f32.mxu1 %v6995_v8 }
 0x6d7   : > { %8953 = vmatprep.mubr.f32.mxu0 %v6963_v57 }
 0x6d9   : > { %9007 = vmatmul.mubr.f32.gmra.mxu1 %v6996_v17 }
 0x6da   : > { %8954 = vmatmul.mubr.f32.gmra.mxu0 %v6964_v33  ;;  %9009 = vmatprep.mubr.f32.mxu1 %v6997_v41  ;;  %v3808_v33 = vld [vmem:[#allocation3 + $0x10] sm:$0xff] }
 0x6db   : > { %8956 = vmatprep.mubr.f32.mxu0 %v6965_v49 }
 0x6dd   : > { %9010 = vmatmul.mubr.f32.gmra.mxu1 %v6998_v25 }
 0x6de   : > { %8957 = vmatmul.mubr.f32.gmra.mxu0 %v6966_v58  ;;  %9012 = vmatprep.mubr.f32.mxu1 %v6999_v6  ;;  %v3811_v6 = vld [vmem:[#allocation3 + $0x70] sm:$0xff] }
 0x6df   : > { %8959 = vmatprep.mubr.f32.mxu0 %v6967_v12 }
 0x6e1   : > { %9013 = vmatmul.mubr.f32.gmra.mxu1 %v7000_v5 }
 0x6e2   : > { %8960 = vmatmul.mubr.f32.gmra.mxu0 %v6968_v20  ;;  %9015 = vmatprep.mubr.f32.mxu1 %v7001_v52 }
 0x6e3   : > { %8962 = vmatprep.mubr.f32.mxu0 %v6969_v61  ;;  %v3810_v61 = vld [vmem:[#allocation3 + $0x60] sm:$0xff] }
 0x6e5   : > { %9016 = vmatmul.mubr.f32.gmra.mxu1 %v7002_v39 }
 0x6e6   : > { %8963 = vmatmul.mubr.f32.gmra.mxu0 %v6970_v53  ;;  %9018 = vmatprep.mubr.f32.mxu1 %v7003_v14 }
 0x6e9   : > { %9019 = vmatmul.mubr.f32.gmra.mxu1 %v7004_v45 }
 0x78a   : > { %v8943_v2 = vpop.f32.mrf.mxu0 }
 0x78b   : > { %v3993_v47 = vadd.f32 %v8943_v2, %v3799_v11  ;;  %v3813_v11 = vld [vmem:[#allocation3 + $0x28] sm:$0xff] }
 0x78c   : > { %v3913_v21 = vpop.f32.mrf.mxu0 }
 0x78d   : > { %v3992_v48 = vadd.f32 %v3913_v21, %v3798_v40  ;;  %v8999_v3 = vpop.f32.mrf.mxu1 }
 0x78e   : > { %v8946_v34 = vpop.f32.mrf.mxu0  ;;  %v4222_v28 = vadd.f32 %v8999_v3, %v3993_v47 }
 0x78f   : > { %v3995_v15 = vadd.f32 %v8946_v34, %v3801_v60  ;;  %v4142_v1 = vpop.f32.mrf.mxu1  ;;  %v3812_v60 = vld [vmem:[#allocation3 + $0x78] sm:$0xff] }
 0x790   : > { %v3923_v10 = vpop.f32.mrf.mxu0  ;;  %4238 = vst [vmem:[#allocation3] sm:$0xff] %v4222_v28  ;;  %v4221_v16 = vadd.f32 %v4142_v1, %v3992_v48 }
 0x791   : > { %v3994_v42 = vadd.f32 %v3923_v10, %v3800_v19  ;;  %v9002_v50 = vpop.f32.mrf.mxu1 }
 0x792   : > { %v8949_v44 = vpop.f32.mrf.mxu0  ;;  %4237 = vst [vmem:[#allocation3 + $0x30] sm:$0xff] %v4221_v16  ;;  %v4224_v9 = vadd.f32 %v9002_v50, %v3995_v15 }
 0x793   : > { %v3997_v38 = vadd.f32 %v8949_v44, %v3803_v59  ;;  %v4152_v55 = vpop.f32.mrf.mxu1 }
 0x794   : > { %v3933_v51 = vpop.f32.mrf.mxu0  ;;  %4240 = vst [vmem:[#allocation3 + $0x18] sm:$0xff] %v4224_v9  ;;  %v4223_v4 = vadd.f32 %v4152_v55, %v3994_v42 }
 0x795   : > { %v3996_v27 = vadd.f32 %v3933_v51, %v3802_v43  ;;  %v9005_v29 = vpop.f32.mrf.mxu1 }
 0x796   : > { %v8952_v24 = vpop.f32.mrf.mxu0  ;;  %4239 = vst [vmem:[#allocation3 + $0x58] sm:$0xff] %v4223_v4  ;;  %v4226_v26 = vadd.f32 %v9005_v29, %v3997_v38 }
 0x797   : > { %v3999_v56 = vadd.f32 %v8952_v24, %v3805_v22  ;;  %v4162_v23 = vpop.f32.mrf.mxu1 }
 0x798   : > { %v3943_v31 = vpop.f32.mrf.mxu0  ;;  %4242 = vst [vmem:[#allocation3 + $0x68] sm:$0xff] %v4226_v26  ;;  %v4225_v13 = vadd.f32 %v4162_v23, %v3996_v27 }
 0x799   : > { %v3998_v63 = vadd.f32 %v3943_v31, %v3804_v35  ;;  %v9008_v18 = vpop.f32.mrf.mxu1 }
 0x79a   : > { %v8955_v7 = vpop.f32.mrf.mxu0  ;;  %4241 = vst [vmem:[#allocation3 + $0x50] sm:$0xff] %v4225_v13  ;;  %v4228_v36 = vadd.f32 %v9008_v18, %v3999_v56 }
 0x79b   : > { %v4001_v30 = vadd.f32 %v8955_v7, %v3807_v46  ;;  %v4172_v37 = vpop.f32.mrf.mxu1 }
 0x79c   : > { %v3953_v54 = vpop.f32.mrf.mxu0  ;;  %4244 = vst [vmem:[#allocation3 + $0x48] sm:$0xff] %v4228_v36  ;;  %v4227_v0 = vadd.f32 %v4172_v37, %v3998_v63 }
 0x79d   : > { %v4000_v8 = vadd.f32 %v3953_v54, %v3806_v32  ;;  %v9011_v57 = vpop.f32.mrf.mxu1 }
 0x79e   : > { %v8958_v17 = vpop.f32.mrf.mxu0  ;;  %4243 = vst [vmem:[#allocation3 + $0x8] sm:$0xff] %v4227_v0  ;;  %v4230_v41 = vadd.f32 %v9011_v57, %v4001_v30 }
 0x79f   : > { %v4003_v49 = vadd.f32 %v8958_v17, %v3809_v62  ;;  %v4182_v25 = vpop.f32.mrf.mxu1 }
 0x7a0   : > { %v3963_v58 = vpop.f32.mrf.mxu0  ;;  %4246 = vst [vmem:[#allocation3 + $0x20] sm:$0xff] %v4230_v41  ;;  %v4229_v12 = vadd.f32 %v4182_v25, %v4000_v8 }
 0x7a1   : > { %v4002_v5 = vadd.f32 %v3963_v58, %v3808_v33  ;;  %v9014_v20 = vpop.f32.mrf.mxu1 }
 0x7a2   : > { %v8961_v52 = vpop.f32.mrf.mxu0  ;;  %4245 = vst [vmem:[#allocation3 + $0x40] sm:$0xff] %v4229_v12  ;;  %v4232_v39 = vadd.f32 %v9014_v20, %v4003_v49 }
 0x7a3   : > { %v4005_v53 = vadd.f32 %v8961_v52, %v3811_v6  ;;  %v4192_v14 = vpop.f32.mrf.mxu1 }
 0x7a4   : > { %v3973_v45 = vpop.f32.mrf.mxu0  ;;  %4248 = vst [vmem:[#allocation3 + $0x38] sm:$0xff] %v4232_v39  ;;  %v4231_v2 = vadd.f32 %v4192_v14, %v4002_v5 }
 0x7a5   : > { %v4004_v40 = vadd.f32 %v3973_v45, %v3810_v61  ;;  %v9017_v47 = vpop.f32.mrf.mxu1 }
 0x7a6   : > { %v8964_v21 = vpop.f32.mrf.mxu0  ;;  %4247 = vst [vmem:[#allocation3 + $0x10] sm:$0xff] %v4231_v2  ;;  %v4234_v48 = vadd.f32 %v9017_v47, %v4005_v53 }
 0x7a7   : > { %v4007_v3 = vadd.f32 %v8964_v21, %v3813_v11  ;;  %v4202_v34 = vpop.f32.mrf.mxu1 }
 0x7a8   : > { %v3983_v19 = vpop.f32.mrf.mxu0  ;;  %4250 = vst [vmem:[#allocation3 + $0x70] sm:$0xff] %v4234_v48  ;;  %v4233_v28 = vadd.f32 %v4202_v34, %v4004_v40 }
 0x7a9   : > { %v4006_v15 = vadd.f32 %v3983_v19, %v3812_v60  ;;  %v9020_v1 = vpop.f32.mrf.mxu1 }
 0x7aa   : > { %4249 = vst [vmem:[#allocation3 + $0x60] sm:$0xff] %v4233_v28  ;;  %v4236_v10 = vadd.f32 %v9020_v1, %v4007_v3 }
 0x7ab   : > { %v4212_v59 = vpop.f32.mrf.mxu1 }
 0x7ac   : > { %4252 = vst [vmem:[#allocation3 + $0x28] sm:$0xff] %v4236_v10  ;;  %v4235_v16 = vadd.f32 %v4212_v59, %v4006_v15 }
 0x7ae   : > { %4251 = vst [vmem:[#allocation3 + $0x78] sm:$0xff] %v4235_v16 }
 0x7af PF: > { %4255 = sbr.rel (%p6723_p2) target bundleno = 2265 (0x8d9), region = 88 }
 0x7b4   : > { %v7055_v42 = vld [vmem:[%s10551_s14 + $0x878] sm:$0xff]  ;;  %v7054_v50 = vld [vmem:[%s10551_s14 + $0x870] sm:$0xff]  ;;  %v7053_v9 = vld [vmem:[%s10551_s14 + $0x868] sm:$0xff] }
 0x7b5   : > { %v7087_v44 = vld [vmem:[%s10551_s14 + $0x8f8] sm:$0xff]  ;;  %9021 = vmatprep.subr.mxu0 %v7055_v42  ;;  %v7086_v43 = vld [vmem:[%s10551_s14 + $0x8f0] sm:$0xff]  ;;  %v7085_v38 = vld [vmem:[%s10551_s14 + $0x8e8] sm:$0xff] }
 0x7b6   : > { %9077 = vmatprep.subr.mxu1 %v7087_v44  ;;  %9022 = vmatpush3.msra.mxu0 %v7055_v42  ;;  %v7052_v55 = vld [vmem:[%s10551_s14 + $0x860] sm:$0xff]  ;;  %v7051_v22 = vld [vmem:[%s10551_s14 + $0x858] sm:$0xff]  ;;  %v7050_v27 = vld [vmem:[%s10551_s14 + $0x850] sm:$0xff] }
 0x7b7   : > { %9078 = vmatpush3.msra.mxu1 %v7087_v44  ;;  %9023 = vmatprep.subr.mxu0 %v7054_v50  ;;  %v7084_v51 = vld [vmem:[%s10551_s14 + $0x8e0] sm:$0xff]  ;;  %v7083_v4 = vld [vmem:[%s10551_s14 + $0x8d8] sm:$0xff]  ;;  %v7082_v29 = vld [vmem:[%s10551_s14 + $0x8d0] sm:$0xff] }
 0x7b8   : > { %9079 = vmatprep.subr.mxu1 %v7086_v43  ;;  %9024 = vmatpush3.msra.mxu0 %v7054_v50  ;;  %v7049_v24 = vld [vmem:[%s10551_s14 + $0x848] sm:$0xff]  ;;  %v7048_v26 = vld [vmem:[%s10551_s14 + $0x840] sm:$0xff]  ;;  %v7047_v23 = vld [vmem:[%s10551_s14 + $0x838] sm:$0xff] }
 0x7b9   : > { %9080 = vmatpush3.msra.mxu1 %v7086_v43  ;;  %9025 = vmatprep.subr.mxu0 %v7053_v9  ;;  %v7081_v35 = vld [vmem:[%s10551_s14 + $0x8c8] sm:$0xff]  ;;  %v7080_v56 = vld [vmem:[%s10551_s14 + $0x8c0] sm:$0xff]  ;;  %v7079_v31 = vld [vmem:[%s10551_s14 + $0x8b8] sm:$0xff] }
 0x7ba   : > { %9081 = vmatprep.subr.mxu1 %v7085_v38  ;;  %9026 = vmatpush3.msra.mxu0 %v7053_v9  ;;  %v7046_v46 = vld [vmem:[%s10551_s14 + $0x830] sm:$0xff]  ;;  %v7045_v63 = vld [vmem:[%s10551_s14 + $0x828] sm:$0xff]  ;;  %v7044_v7 = vld [vmem:[%s10551_s14 + $0x820] sm:$0xff] }
 0x7bb   : > { %9082 = vmatpush3.msra.mxu1 %v7085_v38  ;;  %9027 = vmatprep.subr.mxu0 %v7052_v55  ;;  %v7078_v13 = vld [vmem:[%s10551_s14 + $0x8b0] sm:$0xff]  ;;  %v7077_v18 = vld [vmem:[%s10551_s14 + $0x8a8] sm:$0xff]  ;;  %v7076_v32 = vld [vmem:[%s10551_s14 + $0x8a0] sm:$0xff] }
 0x7bc   : > { %9083 = vmatprep.subr.mxu1 %v7084_v51  ;;  %9028 = vmatpush3.msra.mxu0 %v7052_v55  ;;  %v7043_v36 = vld [vmem:[%s10551_s14 + $0x818] sm:$0xff]  ;;  %v7042_v37 = vld [vmem:[%s10551_s14 + $0x810] sm:$0xff]  ;;  %v7041_v62 = vld [vmem:[%s10551_s14 + $0x808] sm:$0xff] }
 0x7bd   : > { %9084 = vmatpush3.msra.mxu1 %v7084_v51  ;;  %9029 = vmatprep.subr.mxu0 %v7051_v22  ;;  %v7075_v30 = vld [vmem:[%s10551_s14 + $0x898] sm:$0xff]  ;;  %v7074_v54 = vld [vmem:[%s10551_s14 + $0x890] sm:$0xff]  ;;  %v7073_v0 = vld [vmem:[%s10551_s14 + $0x888] sm:$0xff] }
 0x7be   : > { %9085 = vmatprep.subr.mxu1 %v7083_v4  ;;  %9030 = vmatpush3.msra.mxu0 %v7051_v22  ;;  %v7024_v8 = vld [vmem:[%s10690_s3 + $0x49] sm:$0xff]  ;;  %v7025_v33 = vld [vmem:[%s10690_s3 + $0x51] sm:$0xff]  ;;  %v7119_v41 = vld [vmem:[%s10551_s14 + $0x978] sm:$0xff] }
 0x7bf   : > { %9086 = vmatpush3.msra.mxu1 %v7083_v4  ;;  %9031 = vmatprep.subr.mxu0 %v7050_v27  ;;  %v7040_v57 = vld [vmem:[%s10551_s14 + $0x800] sm:$0xff]  ;;  %v7057_v25 = vld [vmem:[%s10690_s3 + $0x52] sm:$0xff]  ;;  %v7115_v14 = vld [vmem:[%s10551_s14 + $0x958] sm:$0xff] }
 0x7c0   : > { %9087 = vmatprep.subr.mxu1 %v7082_v29  ;;  %9032 = vmatpush3.msra.mxu0 %v7050_v27  ;;  %v7072_v17 = vld [vmem:[%s10551_s14 + $0x880] sm:$0xff]  ;;  %v7118_v58 = vld [vmem:[%s10551_s14 + $0x970] sm:$0xff]  ;;  %v7117_v5 = vld [vmem:[%s10551_s14 + $0x968] sm:$0xff] }
 0x7c1   : > { %9088 = vmatpush3.msra.mxu1 %v7082_v29  ;;  %9033 = vmatprep.subr.mxu0 %v7049_v24  ;;  %v7056_v49 = vld [vmem:[%s10690_s3 + $0x4a] sm:$0xff]  ;;  %v7026_v6 = vld [vmem:[%s10690_s3 + $0x61] sm:$0xff]  ;;  %v7028_v39 = vld [vmem:[%s10690_s3 + $0x79] sm:$0xff] }
 0x7c2   : > { %9089 = vmatprep.subr.mxu1 %v7081_v35  ;;  %9034 = vmatpush3.msra.mxu0 %v7049_v24  ;;  %v7027_v12 = vld [vmem:[%s10690_s3 + $0x69] sm:$0xff]  ;;  %v7029_v53 = vld [vmem:[%s10690_s3 + $0x81] sm:$0xff]  ;;  %v7114_v2 = vld [vmem:[%s10551_s14 + $0x950] sm:$0xff] }
 0x7c3   : > { %9090 = vmatpush3.msra.mxu1 %v7081_v35  ;;  %9035 = vmatprep.subr.mxu0 %v7048_v26  ;;  %v7058_v20 = vld [vmem:[%s10690_s3 + $0x62] sm:$0xff]  ;;  %v7059_v52 = vld [vmem:[%s10690_s3 + $0x6a] sm:$0xff]  ;;  %v7060_v45 = vld [vmem:[%s10690_s3 + $0x7a] sm:$0xff] }
 0x7c4   : > { %9091 = vmatprep.subr.mxu1 %v7080_v56  ;;  %9036 = vmatpush3.msra.mxu0 %v7048_v26  ;;  %v7116_v61 = vld [vmem:[%s10551_s14 + $0x960] sm:$0xff]  ;;  %v7030_v40 = vld [vmem:[%s10690_s3 + $0x91] sm:$0xff]  ;;  %v7031_v47 = vld [vmem:[%s10690_s3 + $0x99] sm:$0xff] }
 0x7c5   : > { %9092 = vmatpush3.msra.mxu1 %v7080_v56  ;;  %9037 = vmatprep.subr.mxu0 %v7047_v23  ;;  %v7061_v11 = vld [vmem:[%s10690_s3 + $0x82] sm:$0xff]  ;;  %v7113_v21 = vld [vmem:[%s10551_s14 + $0x948] sm:$0xff]  ;;  %v7063_v48 = vld [vmem:[%s10690_s3 + $0x9a] sm:$0xff] }
 0x7c6   : > { %9093 = vmatprep.subr.mxu1 %v7079_v31  ;;  %9038 = vmatpush3.msra.mxu0 %v7047_v23  ;;  %v7062_v60 = vld [vmem:[%s10690_s3 + $0x92] sm:$0xff]  ;;  %v7112_v3 = vld [vmem:[%s10551_s14 + $0x940] sm:$0xff]  ;;  %v7111_v28 = vld [vmem:[%s10551_s14 + $0x938] sm:$0xff] }
 0x7c7   : > { %9094 = vmatpush3.msra.mxu1 %v7079_v31  ;;  %9039 = vmatprep.subr.mxu0 %v7046_v46  ;;  %v7032_v34 = vld [vmem:[%s10690_s3 + $0xa9] sm:$0xff]  ;;  %v7033_v19 = vld [vmem:[%s10690_s3 + $0xb1] sm:$0xff]  ;;  %v7034_v59 = vld [vmem:[%s10690_s3 + $0xc1] sm:$0xff] }
 0x7c8   : > { %9095 = vmatprep.subr.mxu1 %v7078_v13  ;;  %9040 = vmatpush3.msra.mxu0 %v7046_v46  ;;  %v7064_v15 = vld [vmem:[%s10690_s3 + $0xaa] sm:$0xff]  ;;  %v7065_v1 = vld [vmem:[%s10690_s3 + $0xb2] sm:$0xff]  ;;  %v7066_v50 = vld [vmem:[%s10690_s3 + $0xc2] sm:$0xff] }
 0x7c9   : > { %9096 = vmatpush3.msra.mxu1 %v7078_v13  ;;  %9041 = vmatprep.subr.mxu0 %v7045_v63  ;;  %v7110_v10 = vld [vmem:[%s10551_s14 + $0x930] sm:$0xff]  ;;  %v7035_v16 = vld [vmem:[%s10690_s3 + $0xc9] sm:$0xff]  ;;  %v7037_v38 = vld [vmem:[%s10690_s3 + $0xe1] sm:$0xff] }
 0x7ca   : > { %9097 = vmatprep.subr.mxu1 %v7077_v18  ;;  %9042 = vmatpush3.msra.mxu0 %v7045_v63  ;;  %v7109_v42 = vld [vmem:[%s10551_s14 + $0x928] sm:$0xff]  ;;  %v7108_v43 = vld [vmem:[%s10551_s14 + $0x920] sm:$0xff]  ;;  %v7036_v9 = vld [vmem:[%s10690_s3 + $0xd9] sm:$0xff] }
 0x7cb   : > { %9098 = vmatpush3.msra.mxu1 %v7077_v18  ;;  %9043 = vmatprep.subr.mxu0 %v7044_v7  ;;  %v7067_v44 = vld [vmem:[%s10690_s3 + $0xca] sm:$0xff]  ;;  %v7107_v55 = vld [vmem:[%s10551_s14 + $0x918] sm:$0xff]  ;;  %v7106_v4 = vld [vmem:[%s10551_s14 + $0x910] sm:$0xff] }
 0x7cc   : > { %9099 = vmatprep.subr.mxu1 %v7076_v32  ;;  %9044 = vmatpush3.msra.mxu0 %v7044_v7  ;;  %v7068_v51 = vld [vmem:[%s10690_s3 + $0xda] sm:$0xff]  ;;  %v7069_v22 = vld [vmem:[%s10690_s3 + $0xe2] sm:$0xff]  ;;  %v7038_v27 = vld [vmem:[%s10690_s3 + $0xf1] sm:$0xff] }
 0x7cd   : > { %9100 = vmatpush3.msra.mxu1 %v7076_v32  ;;  %9045 = vmatprep.subr.mxu0 %v7043_v36  ;;  %v7039_v29 = vld [vmem:[%s10690_s3 + $0xf9] sm:$0xff]  ;;  %v7105_v24 = vld [vmem:[%s10551_s14 + $0x908] sm:$0xff]  ;;  %v7104_v56 = vld [vmem:[%s10551_s14 + $0x900] sm:$0xff] }
 0x7ce   : > { %9101 = vmatprep.subr.mxu1 %v7075_v30  ;;  %9046 = vmatpush3.msra.mxu0 %v7043_v36  ;;  %v7070_v35 = vld [vmem:[%s10690_s3 + $0xf2] sm:$0xff]  ;;  %v7071_v26 = vld [vmem:[%s10690_s3 + $0xfa] sm:$0xff]  ;;  %v7090_v13 = vld [vmem:[%s10690_s3 + $0x63] sm:$0xff] }
 0x7cf   : > { %9102 = vmatpush3.msra.mxu1 %v7075_v30  ;;  %9047 = vmatprep.subr.mxu0 %v7042_v37  ;;  %v7088_v23 = vld [vmem:[%s10690_s3 + $0x4b] sm:$0xff]  ;;  %v7089_v31 = vld [vmem:[%s10690_s3 + $0x53] sm:$0xff]  ;;  %v7098_v18 = vld [vmem:[%s10690_s3 + $0xc3] sm:$0xff] }
 0x7d0   : > { %9103 = vmatprep.subr.mxu1 %v7074_v54  ;;  %9048 = vmatpush3.msra.mxu0 %v7042_v37  ;;  %v7096_v46 = vld [vmem:[%s10690_s3 + $0xab] sm:$0xff]  ;;  %v7097_v63 = vld [vmem:[%s10690_s3 + $0xb3] sm:$0xff]  ;;  %v7092_v32 = vld [vmem:[%s10690_s3 + $0x7b] sm:$0xff] }
 0x7d1   : > { %9104 = vmatpush3.msra.mxu1 %v7074_v54  ;;  %9049 = vmatprep.subr.mxu0 %v7041_v62  ;;  %v7091_v7 = vld [vmem:[%s10690_s3 + $0x6b] sm:$0xff]  ;;  %v7100_v30 = vld [vmem:[%s10690_s3 + $0xdb] sm:$0xff]  ;;  %v7093_v37 = vld [vmem:[%s10690_s3 + $0x83] sm:$0xff] }
 0x7d2   : > { %9105 = vmatprep.subr.mxu1 %v7073_v0  ;;  %9050 = vmatpush3.msra.mxu0 %v7041_v62  ;;  %v7099_v36 = vld [vmem:[%s10690_s3 + $0xcb] sm:$0xff]  ;;  %v7094_v54 = vld [vmem:[%s10690_s3 + $0x93] sm:$0xff]  ;;  %v7101_v62 = vld [vmem:[%s10690_s3 + $0xe3] sm:$0xff] }
 0x7d3   : > { %9053 = vmatprep.mubr.f32.mxu0 %v7024_v8  ;;  %9051 = vmatprep.subr.mxu0 %v7040_v57  ;;  %v7095_v8 = vld [vmem:[%s10690_s3 + $0x9b] sm:$0xff] }
 0x7d4   : > { %9106 = vmatpush3.msra.mxu1 %v7073_v0  ;;  %9052 = vmatpush3.msra.mxu0 %v7040_v57  ;;  %v7102_v0 = vld [vmem:[%s10690_s3 + $0xf3] sm:$0xff]  ;;  %v7103_v57 = vld [vmem:[%s10690_s3 + $0xfb] sm:$0xff] }
 0x7d5   : > { %9107 = vmatprep.subr.mxu1 %v7072_v17  ;;  %9054 = vmatmul.mubr.f32.vlgmr.msra.gmra.mxu0 %v7025_v33 }
 0x7d6   : > { %9133 = vmatprep.subr.mxu0 %v7119_v41  ;;  %9108 = vmatpush3.msra.mxu1 %v7072_v17 }
 0x7d7   : > { %9109 = vmatprep.mubr.f32.mxu1 %v7056_v49  ;;  %9134 = vmatpush3.msra.mxu0 %v7119_v41 }
 0x7d8   : > { %9110 = vmatmul.mubr.f32.vlgmr.msra.gmra.mxu1 %v7057_v25  ;;  %9589 = vmatprep.subr.mxu1 %v7119_v41 }
 0x7d9   : > { %9135 = vmatprep.subr.mxu0 %v7118_v58  ;;  %9056 = vmatprep.mubr.f32.mxu0 %v7026_v6 }
 0x7da   : > { %9605 = vmatpush3.msra.mxu1 %v7119_v41  ;;  %9136 = vmatpush3.msra.mxu0 %v7118_v58 }
 0x7db   : > { %9590 = vmatprep.subr.mxu1 %v7118_v58  ;;  %9057 = vmatmul.mubr.f32.gmra.mxu0 %v7027_v12 }
 0x7dc   : > { %9137 = vmatprep.subr.mxu0 %v7117_v5  ;;  %9112 = vmatprep.mubr.f32.mxu1 %v7058_v20 }
 0x7dd   : > { %9606 = vmatpush3.msra.mxu1 %v7118_v58  ;;  %9138 = vmatpush3.msra.mxu0 %v7117_v5 }
 0x7de   : > { %9113 = vmatmul.mubr.f32.gmra.mxu1 %v7059_v52  ;;  %9591 = vmatprep.subr.mxu1 %v7117_v5 }
 0x7df   : > { %9139 = vmatprep.subr.mxu0 %v7116_v61  ;;  %9059 = vmatprep.mubr.f32.mxu0 %v7028_v39 }
 0x7e0   : > { %9607 = vmatpush3.msra.mxu1 %v7117_v5  ;;  %9140 = vmatpush3.msra.mxu0 %v7116_v61 }
 0x7e1   : > { %9592 = vmatprep.subr.mxu1 %v7116_v61  ;;  %9060 = vmatmul.mubr.f32.gmra.mxu0 %v7029_v53 }
 0x7e2   : > { %9141 = vmatprep.subr.mxu0 %v7115_v14  ;;  %9115 = vmatprep.mubr.f32.mxu1 %v7060_v45 }
 0x7e3   : > { %9608 = vmatpush3.msra.mxu1 %v7116_v61  ;;  %9142 = vmatpush3.msra.mxu0 %v7115_v14 }
 0x7e4   : > { %9116 = vmatmul.mubr.f32.gmra.mxu1 %v7061_v11  ;;  %9593 = vmatprep.subr.mxu1 %v7115_v14 }
 0x7e5   : > { %9143 = vmatprep.subr.mxu0 %v7114_v2  ;;  %9062 = vmatprep.mubr.f32.mxu0 %v7030_v40 }
 0x7e6   : > { %9609 = vmatpush3.msra.mxu1 %v7115_v14  ;;  %9144 = vmatpush3.msra.mxu0 %v7114_v2 }
 0x7e7   : > { %9594 = vmatprep.subr.mxu1 %v7114_v2  ;;  %9063 = vmatmul.mubr.f32.gmra.mxu0 %v7031_v47 }
 0x7e8   : > { %9145 = vmatprep.subr.mxu0 %v7113_v21  ;;  %9118 = vmatprep.mubr.f32.mxu1 %v7062_v60 }
 0x7e9   : > { %9610 = vmatpush3.msra.mxu1 %v7114_v2  ;;  %9146 = vmatpush3.msra.mxu0 %v7113_v21 }
 0x7ea   : > { %9119 = vmatmul.mubr.f32.gmra.mxu1 %v7063_v48  ;;  %9595 = vmatprep.subr.mxu1 %v7113_v21 }
 0x7eb   : > { %9147 = vmatprep.subr.mxu0 %v7112_v3  ;;  %9065 = vmatprep.mubr.f32.mxu0 %v7032_v34 }
 0x7ec   : > { %9611 = vmatpush3.msra.mxu1 %v7113_v21  ;;  %9148 = vmatpush3.msra.mxu0 %v7112_v3 }
 0x7ed   : > { %9596 = vmatprep.subr.mxu1 %v7112_v3  ;;  %9066 = vmatmul.mubr.f32.gmra.mxu0 %v7033_v19 }
 0x7ee   : > { %9149 = vmatprep.subr.mxu0 %v7111_v28  ;;  %9121 = vmatprep.mubr.f32.mxu1 %v7064_v15  ;;  %v4257_v15 = vld [vmem:[#allocation3] sm:$0xff] }
 0x7ef   : > { %9612 = vmatpush3.msra.mxu1 %v7112_v3  ;;  %9150 = vmatpush3.msra.mxu0 %v7111_v28 }
 0x7f0   : > { %9122 = vmatmul.mubr.f32.gmra.mxu1 %v7065_v1  ;;  %9597 = vmatprep.subr.mxu1 %v7111_v28 }
 0x7f1   : > { %9151 = vmatprep.subr.mxu0 %v7110_v10  ;;  %9068 = vmatprep.mubr.f32.mxu0 %v7034_v59  ;;  %v4265_v59 = vld [vmem:[#allocation3 + $0x20] sm:$0xff] }
 0x7f2   : > { %9613 = vmatpush3.msra.mxu1 %v7111_v28  ;;  %9152 = vmatpush3.msra.mxu0 %v7110_v10 }
 0x7f3   : > { %9598 = vmatprep.subr.mxu1 %v7110_v10  ;;  %9069 = vmatmul.mubr.f32.gmra.mxu0 %v7035_v16 }
 0x7f4   : > { %9153 = vmatprep.subr.mxu0 %v7109_v42  ;;  %9124 = vmatprep.mubr.f32.mxu1 %v7066_v50  ;;  %v4259_v50 = vld [vmem:[#allocation3 + $0x18] sm:$0xff] }
 0x7f5   : > { %9614 = vmatpush3.msra.mxu1 %v7110_v10  ;;  %9154 = vmatpush3.msra.mxu0 %v7109_v42  ;;  %v4256_v10 = vld [vmem:[#allocation3 + $0x30] sm:$0xff] }
 0x7f6   : > { %9125 = vmatmul.mubr.f32.gmra.mxu1 %v7067_v44  ;;  %9599 = vmatprep.subr.mxu1 %v7109_v42  ;;  %v4264_v44 = vld [vmem:[#allocation3 + $0x40] sm:$0xff] }
 0x7f7   : > { %9155 = vmatprep.subr.mxu0 %v7108_v43  ;;  %9071 = vmatprep.mubr.f32.mxu0 %v7036_v9 }
 0x7f8   : > { %9615 = vmatpush3.msra.mxu1 %v7109_v42  ;;  %9156 = vmatpush3.msra.mxu0 %v7108_v43 }
 0x7f9   : > { %9600 = vmatprep.subr.mxu1 %v7108_v43  ;;  %9072 = vmatmul.mubr.f32.gmra.mxu0 %v7037_v38 }
 0x7fa   : > { %9157 = vmatprep.subr.mxu0 %v7107_v55  ;;  %9127 = vmatprep.mubr.f32.mxu1 %v7068_v51 }
 0x7fb   : > { %9616 = vmatpush3.msra.mxu1 %v7108_v43  ;;  %9158 = vmatpush3.msra.mxu0 %v7107_v55 }
 0x7fc   : > { %9128 = vmatmul.mubr.f32.gmra.mxu1 %v7069_v22  ;;  %9601 = vmatprep.subr.mxu1 %v7107_v55 }
 0x7fd   : > { %9159 = vmatprep.subr.mxu0 %v7106_v4  ;;  %9074 = vmatprep.mubr.f32.mxu0 %v7038_v27 }
 0x7fe   : > { %9617 = vmatpush3.msra.mxu1 %v7107_v55  ;;  %9160 = vmatpush3.msra.mxu0 %v7106_v4  ;;  %v4258_v55 = vld [vmem:[#allocation3 + $0x58] sm:$0xff] }
 0x7ff   : > { %9602 = vmatprep.subr.mxu1 %v7106_v4  ;;  %9075 = vmatmul.mubr.f32.gmra.mxu0 %v7039_v29 }
 0x800   : > { %9161 = vmatprep.subr.mxu0 %v7105_v24  ;;  %9130 = vmatprep.mubr.f32.mxu1 %v7070_v35 }
 0x801   : > { %9618 = vmatpush3.msra.mxu1 %v7106_v4  ;;  %9162 = vmatpush3.msra.mxu0 %v7105_v24  ;;  %v4267_v4 = vld [vmem:[#allocation3 + $0x38] sm:$0xff] }
 0x802   : > { %9131 = vmatmul.mubr.f32.gmra.mxu1 %v7071_v26  ;;  %9603 = vmatprep.subr.mxu1 %v7105_v24 }
 0x803   : > { %9163 = vmatprep.subr.mxu0 %v7104_v56  ;;  %9619 = vmatpush3.msra.mxu1 %v7105_v24  ;;  %v4261_v24 = vld [vmem:[#allocation3 + $0x68] sm:$0xff] }
 0x804   : > { %9164 = vmatpush3.msra.mxu0 %v7104_v56  ;;  %9165 = vmatprep.mubr.f32.mxu0 %v7088_v23 }
 0x805   : > { %9604 = vmatprep.subr.mxu1 %v7104_v56  ;;  %9166 = vmatmul.mubr.f32.vlgmr.msra.gmra.mxu0 %v7089_v31 }
 0x806   : > { %9620 = vmatpush3.msra.mxu1 %v7104_v56  ;;  %9177 = vmatprep.mubr.f32.mxu1 %v7096_v46  ;;  %v4266_v56 = vld [vmem:[#allocation3 + $0x10] sm:$0xff] }
 0x807   : > { %9168 = vmatprep.mubr.f32.mxu0 %v7090_v13  ;;  %9178 = vmatmul.mubr.f32.vlgmr.msra.gmra.mxu1 %v7097_v63  ;;  %v4260_v46 = vld [vmem:[#allocation3 + $0x50] sm:$0xff] }
 0x808   : > { %9180 = vmatprep.mubr.f32.mxu1 %v7098_v18 }
 0x809   : > { %9169 = vmatmul.mubr.f32.gmra.mxu0 %v7091_v7 }
 0x80a   : > { %9171 = vmatprep.mubr.f32.mxu0 %v7092_v32 }
 0x80b   : > { %9181 = vmatmul.mubr.f32.gmra.mxu1 %v7099_v36  ;;  %v4269_v36 = vld [vmem:[#allocation3 + $0x70] sm:$0xff] }
 0x80c   : > { %9183 = vmatprep.mubr.f32.mxu1 %v7100_v30 }
 0x80d   : > { %9172 = vmatmul.mubr.f32.gmra.mxu0 %v7093_v37 }
 0x80e   : > { %9174 = vmatprep.mubr.f32.mxu0 %v7094_v54  ;;  %v4263_v54 = vld [vmem:[#allocation3 + $0x48] sm:$0xff] }
 0x80f   : > { %9184 = vmatmul.mubr.f32.gmra.mxu1 %v7101_v62 }
 0x810   : > { %9186 = vmatprep.mubr.f32.mxu1 %v7102_v0 }
 0x811   : > { %9175 = vmatmul.mubr.f32.gmra.mxu0 %v7095_v8 }
 0x813   : > { %9187 = vmatmul.mubr.f32.gmra.mxu1 %v7103_v57 }
 0x895   : > { %v9055_v17 = vpop.f32.mrf.mxu0 }
 0x896   : > { %v4454_v42 = vadd.f32 %v9055_v17, %v4257_v15 }
 0x897   : > { %v4374_v33 = vpop.f32.mrf.mxu0 }
 0x898   : > { %v9111_v41 = vpop.f32.mrf.mxu1  ;;  %v4453_v38 = vadd.f32 %v4374_v33, %v4256_v10 }
 0x899   : > { %v4680_v29 = vadd.f32 %v9111_v41, %v4454_v42  ;;  %v4268_v41 = vld [vmem:[#allocation3 + $0x60] sm:$0xff]  ;;  %v4270_v42 = vld [vmem:[#allocation3 + $0x78] sm:$0xff] }
 0x89a   : > { %v4600_v49 = vpop.f32.mrf.mxu1 }
 0x89b   : > { %v9058_v25 = vpop.f32.mrf.mxu0  ;;  %v4679_v31 = vadd.f32 %v4600_v49, %v4453_v38 }
 0x89c   : > { %v4456_v22 = vadd.f32 %v9058_v25, %v4259_v50 }
 0x89d   : > { %v4384_v58 = vpop.f32.mrf.mxu0 }
 0x89e   : > { %v9114_v6 = vpop.f32.mrf.mxu1  ;;  %v4455_v26 = vadd.f32 %v4384_v58, %v4258_v55  ;;  %v4262_v58 = vld [vmem:[#allocation3 + $0x8] sm:$0xff] }
 0x89f   : > { %v4682_v7 = vadd.f32 %v9114_v6, %v4456_v22 }
 0x8a0   : > { %v4610_v12 = vpop.f32.mrf.mxu1 }
 0x8a1   : > { %v9061_v5 = vpop.f32.mrf.mxu0  ;;  %v4681_v17 = vadd.f32 %v4610_v12, %v4455_v26 }
 0x8a2   : > { %v4458_v32 = vadd.f32 %v9061_v5, %v4261_v24 }
 0x8a3   : > { %v4394_v20 = vpop.f32.mrf.mxu0 }
 0x8a4   : > { %v11538_v52 = vpop.f32.mrf.mxu1  ;;  %v4457_v33 = vadd.f32 %v4394_v20, %v4260_v46 }
 0x8a6   : > { %v11540_v61 = vpop.f32.mrf.mxu1 }
 0x8a7   : > { %v11542_v39 = vpop.f32.mrf.mxu0 }
 0x8a9   : > { %v11544_v53 = vpop.f32.mrf.mxu0 }
 0x8aa   : > { %v11546_v14 = vpop.f32.mrf.mxu1 }
 0x8ac   : > { %v11548_v45 = vpop.f32.mrf.mxu1 }
 0x8ad   : > { %v9067_v11 = vpop.f32.mrf.mxu0 }
 0x8ae   : > { %v4462_v51 = vadd.f32 %v9067_v11, %v4265_v59 }
 0x8af   : > { %v4414_v2 = vpop.f32.mrf.mxu0 }
 0x8b0   : > { %v9123_v40 = vpop.f32.mrf.mxu1  ;;  %v4461_v35 = vadd.f32 %v4414_v2, %v4264_v44 }
 0x8b1   : > { %v4688_v13 = vadd.f32 %v9123_v40, %v4462_v51  ;;  %v4684_v40 = vadd.f32 %v11538_v52, %v4458_v32 }
 0x8b2   : > { %v4640_v47 = vpop.f32.mrf.mxu1 }
 0x8b3   : > { %v9070_v21 = vpop.f32.mrf.mxu0  ;;  %v4687_v62 = vadd.f32 %v4640_v47, %v4461_v35  ;;  %v4460_v47 = vadd.f32 %v11542_v39, %v4263_v54 }
 0x8b4   : > { %v4464_v63 = vadd.f32 %v9070_v21, %v4267_v4  ;;  %v4271_v21 = vld [vmem:[#allocation3 + $0x28] sm:$0xff] }
 0x8b5   : > { %v4424_v60 = vpop.f32.mrf.mxu0 }
 0x8b6   : > { %v9126_v48 = vpop.f32.mrf.mxu1  ;;  %v4463_v0 = vadd.f32 %v4424_v60, %v4266_v56 }
 0x8b7   : > { %v4690_v11 = vadd.f32 %v9126_v48, %v4464_v63  ;;  %v4683_v48 = vadd.f32 %v11540_v61, %v4457_v33 }
 0x8b8   : > { %v4650_v3 = vpop.f32.mrf.mxu1 }
 0x8b9   : > { %v9073_v34 = vpop.f32.mrf.mxu0  ;;  %v4689_v10 = vadd.f32 %v4650_v3, %v4463_v0 }
 0x8ba   : > { %v4466_v2 = vadd.f32 %v9073_v34, %v4269_v36  ;;  %v4459_v34 = vadd.f32 %v11544_v53, %v4262_v58 }
 0x8bb   : > { %v4434_v19 = vpop.f32.mrf.mxu0 }
 0x8bc   : > { %v11550_v28 = vpop.f32.mrf.mxu1  ;;  %v4465_v12 = vadd.f32 %v4434_v19, %v4268_v41  ;;  %v4686_v19 = vadd.f32 %v11546_v14, %v4460_v47 }
 0x8bd   : > { %v4692_v52 = vadd.f32 %v11550_v28, %v4466_v2 }
 0x8be   : > { %v11552_v1 = vpop.f32.mrf.mxu1 }
 0x8bf   : > { %v11554_v16 = vpop.f32.mrf.mxu0  ;;  %v4691_v22 = vadd.f32 %v11552_v1, %v4465_v12 }
 0x8c0   : > { %v4468_v39 = vadd.f32 %v11554_v16, %v4271_v21  ;;  %v4685_v16 = vadd.f32 %v11548_v45, %v4459_v34 }
 0x8c1   : > { %v11556_v43 = vpop.f32.mrf.mxu0 }
 0x8c2   : > { %v11558_v9 = vpop.f32.mrf.mxu1  ;;  %v4467_v61 = vadd.f32 %v11556_v43, %v4270_v42 }
 0x8c3   : > { %v4694_v24 = vadd.f32 %v11558_v9, %v4468_v39 }
 0x8c4   : > { %v11560_v27 = vpop.f32.mrf.mxu1 }
 0x8c5   : > { %v9167_v23 = vpop.f32.mrf.mxu0  ;;  %v4693_v1 = vadd.f32 %v11560_v27, %v4467_v61 }
 0x8c6   : > { %v4906_v18 = vadd.f32 %v9167_v23, %v4680_v29 }
 0x8c7   : > { %v4826_v30 = vpop.f32.mrf.mxu0  ;;  %v9179_v37 = vpop.f32.mrf.mxu1 }
 0x8c8   : > { %4922 = vst [vmem:[#allocation3] sm:$0xff] %v4906_v18  ;;  %v4905_v8 = vadd.f32 %v4826_v30, %v4679_v31  ;;  %v4914_v57 = vadd.f32 %v9179_v37, %v4688_v13 }
 0x8c9   : > { %v9170_v25 = vpop.f32.mrf.mxu0  ;;  %v4866_v49 = vpop.f32.mrf.mxu1 }
 0x8ca   : > { %4921 = vst [vmem:[#allocation3 + $0x30] sm:$0xff] %v4905_v8  ;;  %4930 = vst [vmem:[#allocation3 + $0x20] sm:$0xff] %v4914_v57  ;;  %v4908_v6 = vadd.f32 %v9170_v25, %v4682_v7  ;;  %v4913_v5 = vadd.f32 %v4866_v49, %v4687_v62 }
 0x8cb   : > { %v4836_v60 = vpop.f32.mrf.mxu0  ;;  %v9182_v15 = vpop.f32.mrf.mxu1 }
 0x8cc   : > { %4924 = vst [vmem:[#allocation3 + $0x18] sm:$0xff] %v4908_v6  ;;  %4929 = vst [vmem:[#allocation3 + $0x40] sm:$0xff] %v4913_v5  ;;  %v4907_v20 = vadd.f32 %v4836_v60, %v4681_v17  ;;  %v4916_v59 = vadd.f32 %v9182_v15, %v4690_v11 }
 0x8cd   : > { %v9173_v50 = vpop.f32.mrf.mxu0  ;;  %v4876_v44 = vpop.f32.mrf.mxu1 }
 0x8ce   : > { %4923 = vst [vmem:[#allocation3 + $0x58] sm:$0xff] %v4907_v20  ;;  %4932 = vst [vmem:[#allocation3 + $0x38] sm:$0xff] %v4916_v59  ;;  %v4910_v38 = vadd.f32 %v9173_v50, %v4684_v40  ;;  %v4915_v3 = vadd.f32 %v4876_v44, %v4689_v10 }
 0x8cf   : > { %v4846_v55 = vpop.f32.mrf.mxu0  ;;  %v9185_v51 = vpop.f32.mrf.mxu1 }
 0x8d0   : > { %4926 = vst [vmem:[#allocation3 + $0x68] sm:$0xff] %v4910_v38  ;;  %4931 = vst [vmem:[#allocation3 + $0x10] sm:$0xff] %v4915_v3  ;;  %v4909_v53 = vadd.f32 %v4846_v55, %v4683_v48  ;;  %v4918_v4 = vadd.f32 %v9185_v51, %v4692_v52 }
 0x8d1   : > { %v9176_v29 = vpop.f32.mrf.mxu0  ;;  %v4886_v28 = vpop.f32.mrf.mxu1 }
 0x8d2   : > { %4925 = vst [vmem:[#allocation3 + $0x50] sm:$0xff] %v4909_v53  ;;  %4934 = vst [vmem:[#allocation3 + $0x70] sm:$0xff] %v4918_v4  ;;  %v4912_v35 = vadd.f32 %v9176_v29, %v4686_v19  ;;  %v4917_v14 = vadd.f32 %v4886_v28, %v4691_v22 }
 0x8d3   : > { %v4856_v26 = vpop.f32.mrf.mxu0  ;;  %v9188_v56 = vpop.f32.mrf.mxu1 }
 0x8d4   : > { %4928 = vst [vmem:[#allocation3 + $0x48] sm:$0xff] %v4912_v35  ;;  %4933 = vst [vmem:[#allocation3 + $0x60] sm:$0xff] %v4917_v14  ;;  %v4911_v43 = vadd.f32 %v4856_v26, %v4685_v16  ;;  %v4920_v23 = vadd.f32 %v9188_v56, %v4694_v24 }
 0x8d5   : > { %v4896_v31 = vpop.f32.mrf.mxu1 }
 0x8d6   : > { %4927 = vst [vmem:[#allocation3 + $0x8] sm:$0xff] %v4911_v43  ;;  %4936 = vst [vmem:[#allocation3 + $0x28] sm:$0xff] %v4920_v23  ;;  %v4919_v46 = vadd.f32 %v4896_v31, %v4693_v1 }
 0x8d8   : > { %4935 = vst [vmem:[#allocation3 + $0x78] sm:$0xff] %v4919_v46 }
 0x8d9 PF: > { %4939 = sbr.rel (%p6623_p11) target bundleno = 2629 (0xa45), region = 92 }
 0x8de   : > { %v7154_v45 = vld [vmem:[%s10551_s14 + $0x9f8] sm:$0xff]  ;;  %v7153_v9 = vld [vmem:[%s10551_s14 + $0x9f0] sm:$0xff]  ;;  %v7152_v13 = vld [vmem:[%s10551_s14 + $0x9e8] sm:$0xff] }
 0x8df   : > { %9189 = vmatprep.subr.mxu0 %v7154_v45  ;;  %v7188_v27 = vld [vmem:[%s10551_s14 + $0xa78] sm:$0xff]  ;;  %v7187_v63 = vld [vmem:[%s10551_s14 + $0xa70] sm:$0xff]  ;;  %v7186_v18 = vld [vmem:[%s10551_s14 + $0xa68] sm:$0xff] }
 0x8e0   : > { %9190 = vmatpush3.msra.mxu0 %v7154_v45  ;;  %9245 = vmatprep.subr.mxu1 %v7188_v27  ;;  %v7151_v7 = vld [vmem:[%s10551_s14 + $0x9e0] sm:$0xff]  ;;  %v7150_v36 = vld [vmem:[%s10551_s14 + $0x9d8] sm:$0xff]  ;;  %v7149_v37 = vld [vmem:[%s10551_s14 + $0x9d0] sm:$0xff] }
 0x8e1   : > { %9191 = vmatprep.subr.mxu0 %v7153_v9  ;;  %9246 = vmatpush3.msra.mxu1 %v7188_v27  ;;  %v7185_v32 = vld [vmem:[%s10551_s14 + $0xa60] sm:$0xff]  ;;  %v7184_v30 = vld [vmem:[%s10551_s14 + $0xa58] sm:$0xff]  ;;  %v7183_v54 = vld [vmem:[%s10551_s14 + $0xa50] sm:$0xff] }
 0x8e2   : > { %9192 = vmatpush3.msra.mxu0 %v7153_v9  ;;  %9247 = vmatprep.subr.mxu1 %v7187_v63  ;;  %v7148_v62 = vld [vmem:[%s10551_s14 + $0x9c8] sm:$0xff]  ;;  %v7147_v8 = vld [vmem:[%s10551_s14 + $0x9c0] sm:$0xff]  ;;  %v7146_v17 = vld [vmem:[%s10551_s14 + $0x9b8] sm:$0xff] }
 0x8e3   : > { %9193 = vmatprep.subr.mxu0 %v7152_v13  ;;  %9248 = vmatpush3.msra.mxu1 %v7187_v63  ;;  %v7182_v0 = vld [vmem:[%s10551_s14 + $0xa48] sm:$0xff]  ;;  %v7181_v57 = vld [vmem:[%s10551_s14 + $0xa40] sm:$0xff]  ;;  %v7180_v33 = vld [vmem:[%s10551_s14 + $0xa38] sm:$0xff] }
 0x8e4   : > { %9194 = vmatpush3.msra.mxu0 %v7152_v13  ;;  %9249 = vmatprep.subr.mxu1 %v7186_v18  ;;  %v7145_v41 = vld [vmem:[%s10551_s14 + $0x9b0] sm:$0xff]  ;;  %v7144_v49 = vld [vmem:[%s10551_s14 + $0x9a8] sm:$0xff]  ;;  %v7143_v11 = vld [vmem:[%s10551_s14 + $0x9a0] sm:$0xff] }
 0x8e5   : > { %9195 = vmatprep.subr.mxu0 %v7151_v7  ;;  %9250 = vmatpush3.msra.mxu1 %v7186_v18  ;;  %v7179_v25 = vld [vmem:[%s10551_s14 + $0xa30] sm:$0xff]  ;;  %v7178_v58 = vld [vmem:[%s10551_s14 + $0xa28] sm:$0xff]  ;;  %v7142_v6 = vld [vmem:[%s10551_s14 + $0x998] sm:$0xff] }
 0x8e6   : > { %9196 = vmatpush3.msra.mxu0 %v7151_v7  ;;  %9251 = vmatprep.subr.mxu1 %v7185_v32  ;;  %v7123_v2 = vld [vmem:[%s10690_s3 + $0x4c] sm:$0xff]  ;;  %v7177_v5 = vld [vmem:[%s10551_s14 + $0xa20] sm:$0xff]  ;;  %v7141_v40 = vld [vmem:[%s10551_s14 + $0x990] sm:$0xff] }
 0x8e7   : > { %9197 = vmatprep.subr.mxu0 %v7150_v36  ;;  %9252 = vmatpush3.msra.mxu1 %v7185_v32  ;;  %v7176_v47 = vld [vmem:[%s10551_s14 + $0xa18] sm:$0xff]  ;;  %v7140_v21 = vld [vmem:[%s10551_s14 + $0x988] sm:$0xff]  ;;  %v7175_v60 = vld [vmem:[%s10551_s14 + $0xa10] sm:$0xff] }
 0x8e8   : > { %9198 = vmatpush3.msra.mxu0 %v7150_v36  ;;  %9253 = vmatprep.subr.mxu1 %v7184_v30  ;;  %v7139_v15 = vld [vmem:[%s10551_s14 + $0x980] sm:$0xff]  ;;  %v7174_v10 = vld [vmem:[%s10551_s14 + $0xa08] sm:$0xff]  ;;  %v7124_v12 = vld [vmem:[%s10690_s3 + $0x54] sm:$0xff] }
 0x8e9   : > { %9199 = vmatprep.subr.mxu0 %v7149_v37  ;;  %9254 = vmatpush3.msra.mxu1 %v7184_v30  ;;  %v7220_v20 = vld [vmem:[%s10551_s14 + $0xaf8] sm:$0xff]  ;;  %v11611_v59 = vld [vmem:[%s10690_s3 + $0x64] sm:$0xff]  ;;  %v7219_v48 = vld [vmem:[%s10551_s14 + $0xaf0] sm:$0xff] }
 0x8ea   : > { %9200 = vmatpush3.msra.mxu0 %v7149_v37  ;;  %9255 = vmatprep.subr.mxu1 %v7183_v54  ;;  %v7173_v34 = vld [vmem:[%s10551_s14 + $0xa00] sm:$0xff]  ;;  %v11617_v42 = vld [vmem:[%s10690_s3 + $0x6c] sm:$0xff]  ;;  %v11621_v44 = vld [vmem:[%s10690_s3 + $0x7c] sm:$0xff] }
 0x8eb   : > { %9201 = vmatprep.subr.mxu0 %v7148_v62  ;;  %9256 = vmatpush3.msra.mxu1 %v7183_v54  ;;  %v7218_v50 = vld [vmem:[%s10551_s14 + $0xae8] sm:$0xff]  ;;  %v7217_v52 = vld [vmem:[%s10551_s14 + $0xae0] sm:$0xff]  ;;  %v7216_v19 = vld [vmem:[%s10551_s14 + $0xad8] sm:$0xff] }
 0x8ec   : > { %9202 = vmatpush3.msra.mxu0 %v7148_v62  ;;  %9257 = vmatprep.subr.mxu1 %v7182_v0  ;;  %v7157_v39 = vld [vmem:[%s10690_s3 + $0x60] sm:$0xff]  ;;  %v7158_v38 = vld [vmem:[%s10690_s3 + $0x68] sm:$0xff]  ;;  %v7215_v51 = vld [vmem:[%s10551_s14 + $0xad0] sm:$0xff] }
 0x8ed   : > { %9203 = vmatprep.subr.mxu0 %v7147_v8  ;;  %9258 = vmatpush3.msra.mxu1 %v7182_v0  ;;  %v11629_v3 = vld [vmem:[%s10690_s3 + $0x84] sm:$0xff]  ;;  %v7252_v55 = vld [vmem:[%s10551_s14 + $0xb78] sm:$0xff]  ;;  %v11636_v22 = vld [vmem:[%s10690_s3 + $0x94] sm:$0xff] }
 0x8ee   : > { %9204 = vmatpush3.msra.mxu0 %v7147_v8  ;;  %9259 = vmatprep.subr.mxu1 %v7181_v57  ;;  %v7251_v61 = vld [vmem:[%s10551_s14 + $0xb70] sm:$0xff]  ;;  %v11640_v53 = vld [vmem:[%s10690_s3 + $0x9c] sm:$0xff]  ;;  %v7214_v29 = vld [vmem:[%s10551_s14 + $0xac8] sm:$0xff] }
 0x8ef   : > { %9205 = vmatprep.subr.mxu0 %v7146_v17  ;;  %9260 = vmatpush3.msra.mxu1 %v7181_v57  ;;  %v7159_v4 = vld [vmem:[%s10690_s3 + $0x78] sm:$0xff]  ;;  %v7160_v28 = vld [vmem:[%s10690_s3 + $0x80] sm:$0xff]  ;;  %v7250_v16 = vld [vmem:[%s10551_s14 + $0xb68] sm:$0xff] }
 0x8f0   : > { %9206 = vmatpush3.msra.mxu0 %v7146_v17  ;;  %9261 = vmatprep.subr.mxu1 %v7180_v33  ;;  %v7213_v24 = vld [vmem:[%s10551_s14 + $0xac0] sm:$0xff]  ;;  %v11650_v35 = vld [vmem:[%s10690_s3 + $0xac] sm:$0xff]  ;;  %v11654_v26 = vld [vmem:[%s10690_s3 + $0xb4] sm:$0xff] }
 0x8f1   : > { %9207 = vmatprep.subr.mxu0 %v7145_v41  ;;  %9262 = vmatpush3.msra.mxu1 %v7180_v33  ;;  %v7249_v14 = vld [vmem:[%s10551_s14 + $0xb60] sm:$0xff]  ;;  %v7161_v56 = vld [vmem:[%s10690_s3 + $0x90] sm:$0xff]  ;;  %v7212_v1 = vld [vmem:[%s10551_s14 + $0xab8] sm:$0xff] }
 0x8f2   : > { %9208 = vmatpush3.msra.mxu0 %v7145_v41  ;;  %9263 = vmatprep.subr.mxu1 %v7179_v25  ;;  %v7162_v43 = vld [vmem:[%s10690_s3 + $0x98] sm:$0xff]  ;;  %v11664_v46 = vld [vmem:[%s10690_s3 + $0xc4] sm:$0xff]  ;;  %v11668_v9 = vld [vmem:[%s10690_s3 + $0xcc] sm:$0xff] }
 0x8f3   : > { %9209 = vmatprep.subr.mxu0 %v7144_v49  ;;  %9264 = vmatpush3.msra.mxu1 %v7179_v25  ;;  %v7248_v23 = vld [vmem:[%s10551_s14 + $0xb58] sm:$0xff]  ;;  %v7211_v31 = vld [vmem:[%s10551_s14 + $0xab0] sm:$0xff]  ;;  %v7163_v27 = vld [vmem:[%s10690_s3 + $0xa8] sm:$0xff] }
 0x8f4   : > { %9210 = vmatpush3.msra.mxu0 %v7144_v49  ;;  %9265 = vmatprep.subr.mxu1 %v7178_v58  ;;  %v7247_v45 = vld [vmem:[%s10551_s14 + $0xb50] sm:$0xff]  ;;  %v7210_v13 = vld [vmem:[%s10551_s14 + $0xaa8] sm:$0xff]  ;;  %v7209_v7 = vld [vmem:[%s10551_s14 + $0xaa0] sm:$0xff] }
 0x8f5   : > { %9211 = vmatprep.subr.mxu0 %v7143_v11  ;;  %9266 = vmatpush3.msra.mxu1 %v7178_v58  ;;  %v7164_v63 = vld [vmem:[%s10690_s3 + $0xb0] sm:$0xff]  ;;  %v11678_v32 = vld [vmem:[%s10690_s3 + $0xdc] sm:$0xff]  ;;  %v7245_v36 = vld [vmem:[%s10551_s14 + $0xb40] sm:$0xff] }
 0x8f6   : > { %9212 = vmatpush3.msra.mxu0 %v7143_v11  ;;  %9221 = vmatprep.mubr.f32.mxu0 %v7123_v2  ;;  %v7246_v18 = vld [vmem:[%s10551_s14 + $0xb48] sm:$0xff]  ;;  %v11682_v30 = vld [vmem:[%s10690_s3 + $0xe4] sm:$0xff]  ;;  %v7208_v54 = vld [vmem:[%s10551_s14 + $0xa98] sm:$0xff] }
 0x8f7   : > { %9213 = vmatprep.subr.mxu0 %v7142_v6  ;;  %9267 = vmatprep.subr.mxu1 %v7177_v5  ;;  %v7165_v37 = vld [vmem:[%s10690_s3 + $0xc0] sm:$0xff]  ;;  %v7166_v62 = vld [vmem:[%s10690_s3 + $0xc8] sm:$0xff]  ;;  %v7207_v8 = vld [vmem:[%s10551_s14 + $0xa90] sm:$0xff] }
 0x8f8   : > { %9214 = vmatpush3.msra.mxu0 %v7142_v6  ;;  %9268 = vmatpush3.msra.mxu1 %v7177_v5  ;;  %v7244_v0 = vld [vmem:[%s10551_s14 + $0xb38] sm:$0xff]  ;;  %v11692_v57 = vld [vmem:[%s10690_s3 + $0xf4] sm:$0xff]  ;;  %v7206_v25 = vld [vmem:[%s10551_s14 + $0xa88] sm:$0xff] }
 0x8f9   : > { %9215 = vmatprep.subr.mxu0 %v7141_v40  ;;  %9269 = vmatprep.subr.mxu1 %v7176_v47  ;;  %v7243_v17 = vld [vmem:[%s10551_s14 + $0xb30] sm:$0xff]  ;;  %v11696_v33 = vld [vmem:[%s10690_s3 + $0xfc] sm:$0xff]  ;;  %v7242_v58 = vld [vmem:[%s10551_s14 + $0xb28] sm:$0xff] }
 0x8fa   : > { %9216 = vmatpush3.msra.mxu0 %v7141_v40  ;;  %9270 = vmatpush3.msra.mxu1 %v7176_v47  ;;  %v7167_v41 = vld [vmem:[%s10690_s3 + $0xd8] sm:$0xff]  ;;  %v7168_v49 = vld [vmem:[%s10690_s3 + $0xe0] sm:$0xff]  ;;  %v7169_v5 = vld [vmem:[%s10690_s3 + $0xf0] sm:$0xff] }
 0x8fb   : > { %9217 = vmatprep.subr.mxu0 %v7140_v21  ;;  %9271 = vmatprep.subr.mxu1 %v7175_v60  ;;  %v7205_v11 = vld [vmem:[%s10551_s14 + $0xa80] sm:$0xff]  ;;  %v7284_v47 = vld [vmem:[%s10551_s14 + $0xbf8] sm:$0xff] }
 0x8fc   : > { %9218 = vmatpush3.msra.mxu0 %v7140_v21  ;;  %9272 = vmatpush3.msra.mxu1 %v7175_v60  ;;  %v7189_v2 = vld [vmem:[%s10690_s3 + $0x61] sm:$0xff]  ;;  %v7190_v40 = vld [vmem:[%s10690_s3 + $0x69] sm:$0xff]  ;;  %v7170_v21 = vld [vmem:[%s10690_s3 + $0xf8] sm:$0xff] }
 0x8fd   : > { %9219 = vmatprep.subr.mxu0 %v7139_v15  ;;  %9273 = vmatprep.subr.mxu1 %v7174_v10  ;;  %v7241_v6 = vld [vmem:[%s10551_s14 + $0xb20] sm:$0xff]  ;;  %v7240_v60 = vld [vmem:[%s10551_s14 + $0xb18] sm:$0xff] }
 0x8fe   : > { %9220 = vmatpush3.msra.mxu0 %v7139_v15  ;;  %9274 = vmatpush3.msra.mxu1 %v7174_v10  ;;  %v7283_v15 = vld [vmem:[%s10551_s14 + $0xbf0] sm:$0xff] }
 0x8ff   : > { %9222 = vmatmul.mubr.f32.vlgmr.msra.gmra.mxu0 %v7124_v12  ;;  %9301 = vmatprep.subr.mxu0 %v7220_v20  ;;  %v7191_v10 = vld [vmem:[%s10690_s3 + $0x79] sm:$0xff] }
 0x900   : > { %9302 = vmatpush3.msra.mxu0 %v7220_v20  ;;  %9224 = vmatprep.mubr.f32.mxu0 %v11611_v59  ;;  %v7239_v12 = vld [vmem:[%s10551_s14 + $0xb10] sm:$0xff]  ;;  %v7171_v20 = vld [vmem:[%s10690_s3 + $0x108] sm:$0xff] }
 0x901   : > { %9303 = vmatprep.subr.mxu0 %v7219_v48  ;;  %9275 = vmatprep.subr.mxu1 %v7173_v34 }
 0x902   : > { %9304 = vmatpush3.msra.mxu0 %v7219_v48  ;;  %9276 = vmatpush3.msra.mxu1 %v7173_v34  ;;  %v7192_v48 = vld [vmem:[%s10690_s3 + $0x81] sm:$0xff]  ;;  %v7282_v34 = vld [vmem:[%s10551_s14 + $0xbe8] sm:$0xff] }
 0x903   : > { %9225 = vmatmul.mubr.f32.gmra.mxu0 %v11617_v42  ;;  %9305 = vmatprep.subr.mxu0 %v7218_v50 }
 0x904   : > { %9306 = vmatpush3.msra.mxu0 %v7218_v50  ;;  %9227 = vmatprep.mubr.f32.mxu0 %v11621_v44  ;;  %v7172_v50 = vld [vmem:[%s10690_s3 + $0x110] sm:$0xff] }
 0x905   : > { %9307 = vmatprep.subr.mxu0 %v7217_v52  ;;  %9277 = vmatprep.mubr.f32.mxu1 %v7157_v39  ;;  %v7281_v39 = vld [vmem:[%s10551_s14 + $0xbe0] sm:$0xff] }
 0x906   : > { %9308 = vmatpush3.msra.mxu0 %v7217_v52  ;;  %9278 = vmatmul.mubr.f32.vlgmr.msra.gmra.mxu1 %v7158_v38  ;;  %v7238_v52 = vld [vmem:[%s10551_s14 + $0xb08] sm:$0xff] }
 0x907   : > { %9228 = vmatmul.mubr.f32.gmra.mxu0 %v11629_v3  ;;  %9309 = vmatprep.subr.mxu0 %v7216_v19  ;;  %v7193_v38 = vld [vmem:[%s10690_s3 + $0x91] sm:$0xff] }
 0x908   : > { %9310 = vmatpush3.msra.mxu0 %v7216_v19  ;;  %9357 = vmatprep.subr.mxu1 %v7252_v55  ;;  %v7237_v19 = vld [vmem:[%s10551_s14 + $0xb00] sm:$0xff] }
 0x909   : > { %9311 = vmatprep.subr.mxu0 %v7215_v51  ;;  %9358 = vmatpush3.msra.mxu1 %v7252_v55  ;;  %v7194_v55 = vld [vmem:[%s10690_s3 + $0x99] sm:$0xff] }
 0x90a   : > { %9230 = vmatprep.mubr.f32.mxu0 %v11636_v22  ;;  %9312 = vmatpush3.msra.mxu0 %v7215_v51  ;;  %v7221_v51 = vld [vmem:[%s10690_s3 + $0x62] sm:$0xff] }
 0x90b   : > { %9359 = vmatprep.subr.mxu1 %v7251_v61  ;;  %9231 = vmatmul.mubr.f32.gmra.mxu0 %v11640_v53 }
 0x90c   : > { %9280 = vmatprep.mubr.f32.mxu1 %v7159_v4  ;;  %9313 = vmatprep.subr.mxu0 %v7214_v29  ;;  %v7222_v4 = vld [vmem:[%s10690_s3 + $0x6a] sm:$0xff] }
 0x90d   : > { %9360 = vmatpush3.msra.mxu1 %v7251_v61  ;;  %9314 = vmatpush3.msra.mxu0 %v7214_v29  ;;  %v7280_v61 = vld [vmem:[%s10551_s14 + $0xbd8] sm:$0xff] }
 0x90e   : > { %9281 = vmatmul.mubr.f32.gmra.mxu1 %v7160_v28  ;;  %9361 = vmatprep.subr.mxu1 %v7250_v16  ;;  %v7316_v29 = vld [vmem:[%s10551_s14 + $0xc78] sm:$0xff]  ;;  %v7279_v28 = vld [vmem:[%s10551_s14 + $0xbd0] sm:$0xff] }
 0x90f   : > { %9315 = vmatprep.subr.mxu0 %v7213_v24  ;;  %9362 = vmatpush3.msra.mxu1 %v7250_v16  ;;  %v7195_v16 = vld [vmem:[%s10690_s3 + $0xa9] sm:$0xff] }
 0x910   : > { %9233 = vmatprep.mubr.f32.mxu0 %v11650_v35  ;;  %9316 = vmatpush3.msra.mxu0 %v7213_v24  ;;  %v7315_v24 = vld [vmem:[%s10551_s14 + $0xc70] sm:$0xff] }
 0x911   : > { %9363 = vmatprep.subr.mxu1 %v7249_v14  ;;  %9234 = vmatmul.mubr.f32.gmra.mxu0 %v11654_v26 }
 0x912   : > { %9283 = vmatprep.mubr.f32.mxu1 %v7161_v56  ;;  %9317 = vmatprep.subr.mxu0 %v7212_v1  ;;  %v7223_v56 = vld [vmem:[%s10690_s3 + $0x7a] sm:$0xff] }
 0x913   : > { %9364 = vmatpush3.msra.mxu1 %v7249_v14  ;;  %9318 = vmatpush3.msra.mxu0 %v7212_v1  ;;  %v7196_v14 = vld [vmem:[%s10690_s3 + $0xb1] sm:$0xff] }
 0x914   : > { %9284 = vmatmul.mubr.f32.gmra.mxu1 %v7162_v43  ;;  %9365 = vmatprep.subr.mxu1 %v7248_v23  ;;  %v7278_v1 = vld [vmem:[%s10551_s14 + $0xbc8] sm:$0xff]  ;;  %v7224_v43 = vld [vmem:[%s10690_s3 + $0x82] sm:$0xff] }
 0x915   : > { %9319 = vmatprep.subr.mxu0 %v7211_v31  ;;  %9366 = vmatpush3.msra.mxu1 %v7248_v23  ;;  %v7314_v23 = vld [vmem:[%s10551_s14 + $0xc68] sm:$0xff] }
 0x916   : > { %9236 = vmatprep.mubr.f32.mxu0 %v11664_v46  ;;  %9320 = vmatpush3.msra.mxu0 %v7211_v31  ;;  %v7277_v31 = vld [vmem:[%s10551_s14 + $0xbc0] sm:$0xff] }
 0x917   : > { %9367 = vmatprep.subr.mxu1 %v7247_v45  ;;  %9237 = vmatmul.mubr.f32.gmra.mxu0 %v11668_v9 }
 0x918   : > { %9286 = vmatprep.mubr.f32.mxu1 %v7163_v27  ;;  %9321 = vmatprep.subr.mxu0 %v7210_v13  ;;  %v7313_v27 = vld [vmem:[%s10551_s14 + $0xc60] sm:$0xff] }
 0x919   : > { %9368 = vmatpush3.msra.mxu1 %v7247_v45  ;;  %9322 = vmatpush3.msra.mxu0 %v7210_v13  ;;  %v7197_v45 = vld [vmem:[%s10690_s3 + $0xc1] sm:$0xff]  ;;  %v7198_v13 = vld [vmem:[%s10690_s3 + $0xc9] sm:$0xff] }
 0x91a   : > { %9287 = vmatmul.mubr.f32.gmra.mxu1 %v7164_v63  ;;  %9369 = vmatprep.subr.mxu1 %v7246_v18  ;;  %v7225_v63 = vld [vmem:[%s10690_s3 + $0x92] sm:$0xff] }
 0x91b   : > { %9323 = vmatprep.subr.mxu0 %v7209_v7  ;;  %9370 = vmatpush3.msra.mxu1 %v7246_v18  ;;  %v7276_v18 = vld [vmem:[%s10551_s14 + $0xbb8] sm:$0xff] }
 0x91c   : > { %9239 = vmatprep.mubr.f32.mxu0 %v11678_v32  ;;  %9324 = vmatpush3.msra.mxu0 %v7209_v7  ;;  %v7226_v7 = vld [vmem:[%s10690_s3 + $0x9a] sm:$0xff] }
 0x91d   : > { %9371 = vmatprep.subr.mxu1 %v7245_v36  ;;  %9240 = vmatmul.mubr.f32.gmra.mxu0 %v11682_v30 }
 0x91e   : > { %9289 = vmatprep.mubr.f32.mxu1 %v7165_v37  ;;  %9325 = vmatprep.subr.mxu0 %v7208_v54  ;;  %v7275_v37 = vld [vmem:[%s10551_s14 + $0xbb0] sm:$0xff] }
 0x91f   : > { %9372 = vmatpush3.msra.mxu1 %v7245_v36  ;;  %9326 = vmatpush3.msra.mxu0 %v7208_v54  ;;  %v7312_v36 = vld [vmem:[%s10551_s14 + $0xc58] sm:$0xff] }
 0x920   : > { %9290 = vmatmul.mubr.f32.gmra.mxu1 %v7166_v62  ;;  %9373 = vmatprep.subr.mxu1 %v7244_v0  ;;  %v7199_v54 = vld [vmem:[%s10690_s3 + $0xd9] sm:$0xff] }
 0x921   : > { %9327 = vmatprep.subr.mxu0 %v7207_v8  ;;  %9374 = vmatpush3.msra.mxu1 %v7244_v0  ;;  %v7311_v62 = vld [vmem:[%s10551_s14 + $0xc50] sm:$0xff]  ;;  %v7200_v0 = vld [vmem:[%s10690_s3 + $0xe1] sm:$0xff] }
 0x922   : > { %9242 = vmatprep.mubr.f32.mxu0 %v11692_v57  ;;  %9328 = vmatpush3.msra.mxu0 %v7207_v8  ;;  %v7227_v8 = vld [vmem:[%s10690_s3 + $0xaa] sm:$0xff] }
 0x923   : > { %9375 = vmatprep.subr.mxu1 %v7243_v17  ;;  %9243 = vmatmul.mubr.f32.gmra.mxu0 %v11696_v33 }
 0x924   : > { %9292 = vmatprep.mubr.f32.mxu1 %v7167_v41  ;;  %9329 = vmatprep.subr.mxu0 %v7206_v25  ;;  %v7228_v41 = vld [vmem:[%s10690_s3 + $0xb2] sm:$0xff] }
 0x925   : > { %9376 = vmatpush3.msra.mxu1 %v7243_v17  ;;  %9330 = vmatpush3.msra.mxu0 %v7206_v25  ;;  %v7274_v17 = vld [vmem:[%s10551_s14 + $0xba8] sm:$0xff] }
 0x926   : > { %9293 = vmatmul.mubr.f32.gmra.mxu1 %v7168_v49  ;;  %9377 = vmatprep.subr.mxu1 %v7242_v58  ;;  %v7310_v25 = vld [vmem:[%s10551_s14 + $0xc48] sm:$0xff]  ;;  %v7273_v49 = vld [vmem:[%s10551_s14 + $0xba0] sm:$0xff] }
 0x927   : > { %9331 = vmatprep.subr.mxu0 %v7205_v11  ;;  %9378 = vmatpush3.msra.mxu1 %v7242_v58  ;;  %v7201_v58 = vld [vmem:[%s10690_s3 + $0xf1] sm:$0xff] }
 0x928   : > { %9332 = vmatpush3.msra.mxu0 %v7205_v11  ;;  %9333 = vmatprep.mubr.f32.mxu0 %v7189_v2  ;;  %v7309_v11 = vld [vmem:[%s10551_s14 + $0xc40] sm:$0xff]  ;;  %v7202_v2 = vld [vmem:[%s10690_s3 + $0xf9] sm:$0xff] }
 0x929   : > { %9379 = vmatprep.subr.mxu1 %v7241_v6  ;;  %9295 = vmatprep.mubr.f32.mxu1 %v7169_v5  ;;  %v7272_v5 = vld [vmem:[%s10551_s14 + $0xb98] sm:$0xff] }
 0x92a   : > { %9334 = vmatmul.mubr.f32.vlgmr.msra.gmra.mxu0 %v7190_v40  ;;  %9380 = vmatpush3.msra.mxu1 %v7241_v6  ;;  %v7229_v6 = vld [vmem:[%s10690_s3 + $0xc2] sm:$0xff]  ;;  %v7230_v40 = vld [vmem:[%s10690_s3 + $0xca] sm:$0xff] }
 0x92b   : > { %9413 = vmatprep.subr.mxu0 %v7284_v47  ;;  %9296 = vmatmul.mubr.f32.gmra.mxu1 %v7170_v21  ;;  %v7271_v21 = vld [vmem:[%s10551_s14 + $0xb90] sm:$0xff] }
 0x92c   : > { %9381 = vmatprep.subr.mxu1 %v7240_v60  ;;  %9414 = vmatpush3.msra.mxu0 %v7284_v47  ;;  %v7308_v47 = vld [vmem:[%s10551_s14 + $0xc38] sm:$0xff] }
 0x92d   : > { %9382 = vmatpush3.msra.mxu1 %v7240_v60  ;;  %9415 = vmatprep.subr.mxu0 %v7283_v15  ;;  %v7203_v60 = vld [vmem:[%s10690_s3 + $0x109] sm:$0xff] }
 0x92e   : > { %9336 = vmatprep.mubr.f32.mxu0 %v7191_v10  ;;  %9383 = vmatprep.subr.mxu1 %v7239_v12  ;;  %v7204_v10 = vld [vmem:[%s10690_s3 + $0x111] sm:$0xff] }
 0x92f   : > { %9416 = vmatpush3.msra.mxu0 %v7283_v15  ;;  %9298 = vmatprep.mubr.f32.mxu1 %v7171_v20  ;;  %v7307_v15 = vld [vmem:[%s10551_s14 + $0xc30] sm:$0xff]  ;;  %v7270_v20 = vld [vmem:[%s10551_s14 + $0xb88] sm:$0xff] }
 0x930   : > { %9337 = vmatmul.mubr.f32.gmra.mxu0 %v7192_v48  ;;  %9384 = vmatpush3.msra.mxu1 %v7239_v12  ;;  %v7231_v12 = vld [vmem:[%s10690_s3 + $0xda] sm:$0xff]  ;;  %v7232_v48 = vld [vmem:[%s10690_s3 + $0xe2] sm:$0xff] }
 0x931   : > { %9417 = vmatprep.subr.mxu0 %v7282_v34  ;;  %9299 = vmatmul.mubr.f32.gmra.mxu1 %v7172_v50  ;;  %v7269_v50 = vld [vmem:[%s10551_s14 + $0xb80] sm:$0xff] }
 0x932   : > { %9385 = vmatprep.subr.mxu1 %v7238_v52  ;;  %9418 = vmatpush3.msra.mxu0 %v7282_v34  ;;  %v7306_v34 = vld [vmem:[%s10551_s14 + $0xc28] sm:$0xff] }
 0x933   : > { %9386 = vmatpush3.msra.mxu1 %v7238_v52  ;;  %9419 = vmatprep.subr.mxu0 %v7281_v39  ;;  %v7253_v52 = vld [vmem:[%s10690_s3 + $0x63] sm:$0xff] }
 0x934   : > { %9339 = vmatprep.mubr.f32.mxu0 %v7193_v38  ;;  %9387 = vmatprep.subr.mxu1 %v7237_v19  ;;  %v7233_v38 = vld [vmem:[%s10690_s3 + $0xf2] sm:$0xff] }
 0x935   : > { %9420 = vmatpush3.msra.mxu0 %v7281_v39  ;;  %9388 = vmatpush3.msra.mxu1 %v7237_v19  ;;  %v7305_v39 = vld [vmem:[%s10551_s14 + $0xc20] sm:$0xff] }
 0x936   : > { %9340 = vmatmul.mubr.f32.gmra.mxu0 %v7194_v55  ;;  %9389 = vmatprep.mubr.f32.mxu1 %v7221_v51  ;;  %v7254_v19 = vld [vmem:[%s10690_s3 + $0x6b] sm:$0xff]  ;;  %v7234_v55 = vld [vmem:[%s10690_s3 + $0xfa] sm:$0xff] }
 0x937   : > { %9421 = vmatprep.subr.mxu0 %v7280_v61  ;;  %9390 = vmatmul.mubr.f32.vlgmr.msra.gmra.mxu1 %v7222_v4  ;;  %v7304_v51 = vld [vmem:[%s10551_s14 + $0xc18] sm:$0xff]  ;;  %v7303_v4 = vld [vmem:[%s10551_s14 + $0xc10] sm:$0xff] }
 0x938   : > { %9422 = vmatpush3.msra.mxu0 %v7280_v61  ;;  %9469 = vmatprep.subr.mxu1 %v7316_v29  ;;  %v7255_v61 = vld [vmem:[%s10690_s3 + $0x7b] sm:$0xff] }
 0x939   : > { %9423 = vmatprep.subr.mxu0 %v7279_v28  ;;  %9470 = vmatpush3.msra.mxu1 %v7316_v29  ;;  %v7235_v29 = vld [vmem:[%s10690_s3 + $0x10a] sm:$0xff] }
 0x93a   : > { %9342 = vmatprep.mubr.f32.mxu0 %v7195_v16  ;;  %9424 = vmatpush3.msra.mxu0 %v7279_v28  ;;  %v7256_v28 = vld [vmem:[%s10690_s3 + $0x83] sm:$0xff]  ;;  %v7236_v16 = vld [vmem:[%s10690_s3 + $0x112] sm:$0xff] }
 0x93b   : > { %9471 = vmatprep.subr.mxu1 %v7315_v24  ;;  %9343 = vmatmul.mubr.f32.gmra.mxu0 %v7196_v14  ;;  %v7257_v14 = vld [vmem:[%s10690_s3 + $0x93] sm:$0xff] }
 0x93c   : > { %9392 = vmatprep.mubr.f32.mxu1 %v7223_v56  ;;  %9425 = vmatprep.subr.mxu0 %v7278_v1  ;;  %v7301_v56 = vld [vmem:[%s10551_s14 + $0xc00] sm:$0xff] }
 0x93d   : > { %9472 = vmatpush3.msra.mxu1 %v7315_v24  ;;  %9426 = vmatpush3.msra.mxu0 %v7278_v1  ;;  %v7302_v24 = vld [vmem:[%s10551_s14 + $0xc08] sm:$0xff]  ;;  %v7258_v1 = vld [vmem:[%s10690_s3 + $0x9b] sm:$0xff] }
 0x93e   : > { %9393 = vmatmul.mubr.f32.gmra.mxu1 %v7224_v43  ;;  %9473 = vmatprep.subr.mxu1 %v7314_v23  ;;  %v7259_v43 = vld [vmem:[%s10690_s3 + $0xab] sm:$0xff] }
 0x93f   : > { %9427 = vmatprep.subr.mxu0 %v7277_v31  ;;  %9474 = vmatpush3.msra.mxu1 %v7314_v23  ;;  %v7260_v23 = vld [vmem:[%s10690_s3 + $0xb3] sm:$0xff] }
 0x940   : > { %9345 = vmatprep.mubr.f32.mxu0 %v7197_v45  ;;  %9428 = vmatpush3.msra.mxu0 %v7277_v31  ;;  %v7261_v31 = vld [vmem:[%s10690_s3 + $0xc3] sm:$0xff]  ;;  %v7262_v45 = vld [vmem:[%s10690_s3 + $0xcb] sm:$0xff] }
 0x941   : > { %9475 = vmatprep.subr.mxu1 %v7313_v27  ;;  %9346 = vmatmul.mubr.f32.gmra.mxu0 %v7198_v13 }
 0x942   : > { %9395 = vmatprep.mubr.f32.mxu1 %v7225_v63  ;;  %9429 = vmatprep.subr.mxu0 %v7276_v18 }
 0x943   : > { %9476 = vmatpush3.msra.mxu1 %v7313_v27  ;;  %9430 = vmatpush3.msra.mxu0 %v7276_v18 }
 0x944   : > { %9396 = vmatmul.mubr.f32.gmra.mxu1 %v7226_v7  ;;  %9477 = vmatprep.subr.mxu1 %v7312_v36 }
 0x945   : > { %9431 = vmatprep.subr.mxu0 %v7275_v37  ;;  %9478 = vmatpush3.msra.mxu1 %v7312_v36 }
 0x946   : > { %9348 = vmatprep.mubr.f32.mxu0 %v7199_v54  ;;  %9432 = vmatpush3.msra.mxu0 %v7275_v37 }
 0x947   : > { %9479 = vmatprep.subr.mxu1 %v7311_v62  ;;  %9349 = vmatmul.mubr.f32.gmra.mxu0 %v7200_v0 }
 0x948   : > { %9398 = vmatprep.mubr.f32.mxu1 %v7227_v8  ;;  %9433 = vmatprep.subr.mxu0 %v7274_v17 }
 0x949   : > { %9480 = vmatpush3.msra.mxu1 %v7311_v62  ;;  %9434 = vmatpush3.msra.mxu0 %v7274_v17 }
 0x94a   : > { %9399 = vmatmul.mubr.f32.gmra.mxu1 %v7228_v41  ;;  %9481 = vmatprep.subr.mxu1 %v7310_v25 }
 0x94b   : > { %9435 = vmatprep.subr.mxu0 %v7273_v49  ;;  %9482 = vmatpush3.msra.mxu1 %v7310_v25 }
 0x94c   : > { %9351 = vmatprep.mubr.f32.mxu0 %v7201_v58  ;;  %9436 = vmatpush3.msra.mxu0 %v7273_v49 }
 0x94d   : > { %9483 = vmatprep.subr.mxu1 %v7309_v11  ;;  %9352 = vmatmul.mubr.f32.gmra.mxu0 %v7202_v2 }
 0x94e   : > { %9401 = vmatprep.mubr.f32.mxu1 %v7229_v6  ;;  %9437 = vmatprep.subr.mxu0 %v7272_v5 }
 0x94f   : > { %9484 = vmatpush3.msra.mxu1 %v7309_v11  ;;  %9438 = vmatpush3.msra.mxu0 %v7272_v5 }
 0x950   : > { %9402 = vmatmul.mubr.f32.gmra.mxu1 %v7230_v40  ;;  %9485 = vmatprep.subr.mxu1 %v7308_v47 }
 0x951   : > { %9439 = vmatprep.subr.mxu0 %v7271_v21  ;;  %9486 = vmatpush3.msra.mxu1 %v7308_v47 }
 0x952   : > { %9354 = vmatprep.mubr.f32.mxu0 %v7203_v60  ;;  %9440 = vmatpush3.msra.mxu0 %v7271_v21 }
 0x953   : > { %9487 = vmatprep.subr.mxu1 %v7307_v15  ;;  %9355 = vmatmul.mubr.f32.gmra.mxu0 %v7204_v10 }
 0x954   : > { %9404 = vmatprep.mubr.f32.mxu1 %v7231_v12  ;;  %9441 = vmatprep.subr.mxu0 %v7270_v20 }
 0x955   : > { %9488 = vmatpush3.msra.mxu1 %v7307_v15  ;;  %9442 = vmatpush3.msra.mxu0 %v7270_v20 }
 0x956   : > { %9405 = vmatmul.mubr.f32.gmra.mxu1 %v7232_v48  ;;  %9489 = vmatprep.subr.mxu1 %v7306_v34 }
 0x957   : > { %9443 = vmatprep.subr.mxu0 %v7269_v50  ;;  %9490 = vmatpush3.msra.mxu1 %v7306_v34 }
 0x958   : > { %9444 = vmatpush3.msra.mxu0 %v7269_v50  ;;  %9445 = vmatprep.mubr.f32.mxu0 %v7253_v52 }
 0x959   : > { %9491 = vmatprep.subr.mxu1 %v7305_v39  ;;  %9407 = vmatprep.mubr.f32.mxu1 %v7233_v38 }
 0x95a   : > { %9446 = vmatmul.mubr.f32.vlgmr.msra.gmra.mxu0 %v7254_v19  ;;  %9492 = vmatpush3.msra.mxu1 %v7305_v39 }
 0x95b   : > { %9408 = vmatmul.mubr.f32.gmra.mxu1 %v7234_v55  ;;  %9493 = vmatprep.subr.mxu1 %v7304_v51 }
 0x95c   : > { %9494 = vmatpush3.msra.mxu1 %v7304_v51  ;;  %9448 = vmatprep.mubr.f32.mxu0 %v7255_v61 }
 0x95d   : > { %9495 = vmatprep.subr.mxu1 %v7303_v4  ;;  %9410 = vmatprep.mubr.f32.mxu1 %v7235_v29 }
 0x95e   : > { %9449 = vmatmul.mubr.f32.gmra.mxu0 %v7256_v28  ;;  %9496 = vmatpush3.msra.mxu1 %v7303_v4 }
 0x95f   : > { %9411 = vmatmul.mubr.f32.gmra.mxu1 %v7236_v16  ;;  %9497 = vmatprep.subr.mxu1 %v7302_v24 }
 0x960   : > { %9498 = vmatpush3.msra.mxu1 %v7302_v24  ;;  %9451 = vmatprep.mubr.f32.mxu0 %v7257_v14 }
 0x961   : > { %9499 = vmatprep.subr.mxu1 %v7301_v56  ;;  %9501 = vmatprep.mubr.f32.mxu1 %v11611_v59  ;;  %v7263_v59 = vld [vmem:[%s10690_s3 + $0xdb] sm:$0xff] }
 0x962   : > { %9452 = vmatmul.mubr.f32.gmra.mxu0 %v7258_v1  ;;  %9500 = vmatpush3.msra.mxu1 %v7301_v56 }
 0x963   : > { %9502 = vmatmul.mubr.f32.vlgmr.msra.gmra.mxu1 %v11617_v42  ;;  %9454 = vmatprep.mubr.f32.mxu0 %v7259_v43  ;;  %v7264_v42 = vld [vmem:[%s10690_s3 + $0xe3] sm:$0xff] }
 0x964   : > { %9504 = vmatprep.mubr.f32.mxu1 %v11621_v44  ;;  %v7265_v44 = vld [vmem:[%s10690_s3 + $0xf3] sm:$0xff] }
 0x966   : > { %9455 = vmatmul.mubr.f32.gmra.mxu0 %v7260_v23 }
 0x967   : > { %9505 = vmatmul.mubr.f32.gmra.mxu1 %v11629_v3  ;;  %9457 = vmatprep.mubr.f32.mxu0 %v7261_v31  ;;  %v7266_v3 = vld [vmem:[%s10690_s3 + $0xfb] sm:$0xff] }
 0x968   : > { %9507 = vmatprep.mubr.f32.mxu1 %v11636_v22  ;;  %v7267_v22 = vld [vmem:[%s10690_s3 + $0x10b] sm:$0xff] }
 0x96a   : > { %9458 = vmatmul.mubr.f32.gmra.mxu0 %v7262_v45  ;;  %v4941_v45 = vld [vmem:[#allocation3] sm:$0xff] }
 0x96b   : > { %9508 = vmatmul.mubr.f32.gmra.mxu1 %v11640_v53  ;;  %9460 = vmatprep.mubr.f32.mxu0 %v7263_v59  ;;  %v7268_v53 = vld [vmem:[%s10690_s3 + $0x113] sm:$0xff] }
 0x96c   : > { %9510 = vmatprep.mubr.f32.mxu1 %v11650_v35  ;;  %v7299_v35 = vld [vmem:[%s10690_s3 + $0x10c] sm:$0xff] }
 0x96e   : > { %9461 = vmatmul.mubr.f32.gmra.mxu0 %v7264_v42  ;;  %v4940_v42 = vld [vmem:[#allocation3 + $0x30] sm:$0xff] }
 0x96f   : > { %9511 = vmatmul.mubr.f32.gmra.mxu1 %v11654_v26  ;;  %9463 = vmatprep.mubr.f32.mxu0 %v7265_v44  ;;  %v7300_v26 = vld [vmem:[%s10690_s3 + $0x114] sm:$0xff] }
 0x970   : > { %9513 = vmatprep.mubr.f32.mxu1 %v11664_v46 }
 0x972   : > { %9464 = vmatmul.mubr.f32.gmra.mxu0 %v7266_v3 }
 0x973   : > { %9514 = vmatmul.mubr.f32.gmra.mxu1 %v11668_v9  ;;  %9466 = vmatprep.mubr.f32.mxu0 %v7267_v22  ;;  %v4943_v22 = vld [vmem:[#allocation3 + $0x18] sm:$0xff] }
 0x974   : > { %9516 = vmatprep.mubr.f32.mxu1 %v11678_v32 }
 0x976   : > { %9467 = vmatmul.mubr.f32.gmra.mxu0 %v7268_v53 }
 0x977   : > { %9517 = vmatmul.mubr.f32.gmra.mxu1 %v11682_v30 }
 0x978   : > { %9519 = vmatprep.mubr.f32.mxu1 %v11692_v57 }
 0x97b   : > { %9520 = vmatmul.mubr.f32.gmra.mxu1 %v11696_v33 }
 0x97c   : > { %9522 = vmatprep.mubr.f32.mxu1 %v7299_v35 }
 0x97f   : > { %9523 = vmatmul.mubr.f32.gmra.mxu1 %v7300_v26 }
 0x9bf   : > { %v9223_v46 = vpop.f32.mrf.mxu0 }
 0x9c0   : > { %v5138_v3 = vadd.f32 %v9223_v46, %v4941_v45  ;;  %v4944_v46 = vld [vmem:[#allocation3 + $0x50] sm:$0xff] }
 0x9c1   : > { %v5058_v27 = vpop.f32.mrf.mxu0 }
 0x9c2   : > { %v5137_v53 = vadd.f32 %v5058_v27, %v4940_v42  ;;  %v4947_v42 = vld [vmem:[#allocation3 + $0x48] sm:$0xff] }
 0x9c3   : > { %v11810_v13 = vpop.f32.mrf.mxu0 }
 0x9c5   : > { %v11812_v9 = vpop.f32.mrf.mxu0 }
 0x9c6   : > { %v9279_v63 = vpop.f32.mrf.mxu1 }
 0x9c7   : > { %v11814_v18 = vpop.f32.mrf.mxu0 }
 0x9c8   : > { %v11818_v30 = vpop.f32.mrf.mxu1 }
 0x9c9   : > { %v11816_v32 = vpop.f32.mrf.mxu0 }
 0x9cb   : > { %v11820_v57 = vpop.f32.mrf.mxu0 }
 0x9cd   : > { %v11822_v7 = vpop.f32.mrf.mxu0 }
 0x9ce   : > { %v11824_v33 = vpop.f32.mrf.mxu1 }
 0x9d0   : > { %v11826_v36 = vpop.f32.mrf.mxu1 }
 0x9d1   : > { %v11828_v37 = vpop.f32.mrf.mxu0 }
 0x9d3   : > { %v11830_v54 = vpop.f32.mrf.mxu0 }
 0x9d4   : > { %v11832_v62 = vpop.f32.mrf.mxu1 }
 0x9d6   : > { %v11834_v0 = vpop.f32.mrf.mxu1 }
 0x9d7   : > { %v11836_v8 = vpop.f32.mrf.mxu0 }
 0x9d9   : > { %v11838_v17 = vpop.f32.mrf.mxu0 }
 0x9da   : > { %v11840_v41 = vpop.f32.mrf.mxu1 }
 0x9dc   : > { %v11842_v25 = vpop.f32.mrf.mxu1 }
 0x9dd   : > { %v11844_v49 = vpop.f32.mrf.mxu0 }
 0x9df   : > { %v11846_v58 = vpop.f32.mrf.mxu0 }
 0x9e0   : > { %v11848_v11 = vpop.f32.mrf.mxu1 }
 0x9e2   : > { %v11850_v2 = vpop.f32.mrf.mxu1 }
 0x9e3   : > { %v11852_v6 = vpop.f32.mrf.mxu0 }
 0x9e5   : > { %v11856_v40 = vpop.f32.mrf.mxu0 }
 0x9e6   : > { %v11854_v5 = vpop.f32.mrf.mxu1  ;;  %12206 = vst [vmem:[#allocation57_spill] sm:$0xff] %v11856_v40 }
 0x9e8   : > { %v11858_v47 = vpop.f32.mrf.mxu1 }
 0x9ea   : > { %v9335_v21 = vpop.f32.mrf.mxu0 }
 0x9eb   : > { %v11860_v60 = vpop.f32.mrf.mxu1 }
 0x9ec   : > { %v5513_v15 = vpop.f32.mrf.mxu0 }
 0x9ed   : > { %v11862_v10 = vpop.f32.mrf.mxu1 }
 0x9ee   : > { %12207 = vst [vmem:[#allocation58_spill] sm:$0xff] %v11862_v10  ;;  %v4945_v10 = vld [vmem:[#allocation3 + $0x68] sm:$0xff] }
 0x9ef   : > { %v5142_v27 = vadd.f32 %v11814_v18, %v4945_v10  ;;  %v4949_v18 = vld [vmem:[#allocation3 + $0x20] sm:$0xff] }
 0x9f0   : > { %v9338_v12 = vpop.f32.mrf.mxu0 }
 0x9f1   : > { %v11864_v20 = vpop.f32.mrf.mxu1  ;;  %v5371_v10 = vadd.f32 %v11832_v62, %v5142_v27 }
 0x9f2   : > { %12208 = vst [vmem:[#allocation59_spill] sm:$0xff] %v11864_v20  ;;  %v5523_v48 = vpop.f32.mrf.mxu0  ;;  %v5140_v20 = vadd.f32 %v11810_v13, %v4943_v22  ;;  %v4946_v22 = vld [vmem:[#allocation3 + $0x8] sm:$0xff] }
 0x9f3   : > { %v11866_v34 = vpop.f32.mrf.mxu1 }
 0x9f4   : > { %12209 = vst [vmem:[#allocation60_spill] sm:$0xff] %v11866_v34  ;;  %v4942_v34 = vld [vmem:[#allocation3 + $0x58] sm:$0xff] }
 0x9f5   : > { %v5139_v40 = vadd.f32 %v11812_v9, %v4942_v34 }
 0x9f6   : > { %v11868_v50 = vpop.f32.mrf.mxu0 }
 0x9f7   : > { %v9391_v52 = vpop.f32.mrf.mxu1  ;;  %v5368_v9 = vadd.f32 %v11826_v36, %v5139_v40  ;;  %v5597_v40 = vadd.f32 %v11868_v50, %v5371_v10 }
 0x9f8   : > { %v11870_v39 = vpop.f32.mrf.mxu0 }
 0x9f9   : > { %v5739_v38 = vpop.f32.mrf.mxu1 }
 0x9fb   : > { %v11872_v19 = vpop.f32.mrf.mxu0 }
 0x9fd   : > { %v11874_v55 = vpop.f32.mrf.mxu0 }
 0x9fe   : > { %v9394_v51 = vpop.f32.mrf.mxu1 }
 0xa00   : > { %v11876_v61 = vpop.f32.mrf.mxu1 }
 0xa01   : > { %v11878_v4 = vpop.f32.mrf.mxu0 }
 0xa03   : > { %v11880_v29 = vpop.f32.mrf.mxu0 }
 0xa04   : > { %v11882_v28 = vpop.f32.mrf.mxu1 }
 0xa06   : > { %v11884_v16 = vpop.f32.mrf.mxu1 }
 0xa07   : > { %v11886_v24 = vpop.f32.mrf.mxu0 }
 0xa09   : > { %v11888_v14 = vpop.f32.mrf.mxu0 }
 0xa0a   : > { %12210 = vst [vmem:[#allocation61_spill] sm:$0xff] %v11888_v14  ;;  %v11890_v56 = vpop.f32.mrf.mxu1 }
 0xa0c   : > { %v11892_v1 = vpop.f32.mrf.mxu1 }
 0xa0d   : > { %v11894_v43 = vpop.f32.mrf.mxu0 }
 0xa0e   : > { %12211 = vst [vmem:[#allocation62_spill] sm:$0xff] %v11894_v43  ;;  %v5367_v43 = vadd.f32 %v9279_v63, %v5138_v3  ;;  %v5141_v3 = vadd.f32 %v11816_v32, %v4944_v46  ;;  %v4948_v46 = vld [vmem:[#allocation3 + $0x40] sm:$0xff] }
 0xa0f   : > { %v11896_v23 = vpop.f32.mrf.mxu0 }
 0xa10   : > { %12212 = vst [vmem:[#allocation63_spill] sm:$0xff] %v11896_v23  ;;  %v11898_v31 = vpop.f32.mrf.mxu1  ;;  %v5593_v14 = vadd.f32 %v9335_v21, %v5367_v43  ;;  %v5144_v43 = vadd.f32 %v11820_v57, %v4947_v42  ;;  %v5370_v36 = vadd.f32 %v11834_v0, %v5141_v3  ;;  %v5145_v0 = vadd.f32 %v11830_v54, %v4948_v46  ;;  %v4950_v42 = vld [vmem:[#allocation3 + $0x10] sm:$0xff] }
 0xa12   : > { %v11900_v59 = vpop.f32.mrf.mxu1  ;;  %v5819_v21 = vadd.f32 %v9391_v52, %v5593_v14  ;;  %v5146_v14 = vadd.f32 %v11828_v37, %v4949_v18  ;;  %v5373_v62 = vadd.f32 %v11840_v41, %v5144_v43  ;;  %v5823_v37 = vadd.f32 %v11882_v28, %v5597_v40  ;;  %v4952_v18 = vld [vmem:[#allocation3 + $0x60] sm:$0xff] }
 0xa13   : > { %12213 = vst [vmem:[#allocation64_spill] sm:$0xff] %v11900_v59  ;;  %v11902_v44 = vpop.f32.mrf.mxu0  ;;  %v5366_v59 = vadd.f32 %v11818_v30, %v5137_v53  ;;  %v5147_v28 = vadd.f32 %v11838_v17, %v4950_v42 }
 0xa14   : > { %12214 = vst [vmem:[#allocation65_spill] sm:$0xff] %v11902_v44 }
 0xa15   : > { %v11906_v26 = vpop.f32.mrf.mxu0  ;;  %v5376_v40 = vadd.f32 %v11858_v47, %v5147_v28 }
 0xa16   : > { %v11904_v35 = vpop.f32.mrf.mxu1  ;;  %12216 = vst [vmem:[#allocation67_spill] sm:$0xff] %v11906_v26  ;;  %v5369_v26 = vadd.f32 %v11824_v33, %v5140_v20  ;;  %v5594_v33 = vadd.f32 %v5523_v48, %v5368_v9 }
 0xa17   : > { %12215 = vst [vmem:[#allocation66_spill] sm:$0xff] %v11904_v35  ;;  %v5592_v35 = vadd.f32 %v5513_v15, %v5366_v59 }
 0xa18   : > { %v11909_v23 = vpop.f32.mrf.mxu1  ;;  %v5595_v30 = vadd.f32 %v9338_v12, %v5369_v26 }
 0xa19   : > { %v5818_v15 = vadd.f32 %v5739_v38, %v5592_v35  ;;  %v4951_v38 = vld [vmem:[#allocation3 + $0x38] sm:$0xff] }
 0xa1a   : > { %v9447_v44 = vpop.f32.mrf.mxu0  ;;  %v5821_v12 = vadd.f32 %v9394_v51, %v5595_v30  ;;  %v4953_v30 = vld [vmem:[#allocation3 + $0x70] sm:$0xff] }
 0xa1b   : > { %v11913_v45 = vpop.f32.mrf.mxu1  ;;  %v6045_v20 = vadd.f32 %v9447_v44, %v5819_v21  ;;  %v5596_v44 = vadd.f32 %v11870_v39, %v5370_v36  ;;  %v5148_v39 = vadd.f32 %v11836_v8, %v4951_v38  ;;  %v12218_v38 = vld [vmem:[#allocation61_spill] sm:$0xff] }
 0xa1c   : > { %v5965_v13 = vpop.f32.mrf.mxu0 }
 0xa1d   : > { %v11917_v63 = vpop.f32.mrf.mxu1  ;;  %v6044_v57 = vadd.f32 %v5965_v13, %v5818_v15  ;;  %v5599_v13 = vadd.f32 %v11872_v19, %v5373_v62  ;;  %v5377_v15 = vadd.f32 %v11854_v5, %v5148_v39 }
 0xa1e   : > { %12217 = vst [vmem:[#allocation68_spill] sm:$0xff] %v11917_v63  ;;  %v9450_v34 = vpop.f32.mrf.mxu0  ;;  %v5143_v63 = vadd.f32 %v11822_v7, %v4946_v22  ;;  %v5820_v7 = vadd.f32 %v11876_v61, %v5594_v33  ;;  %v5375_v61 = vadd.f32 %v11848_v11, %v5146_v14 }
 0xa1f   : > { %v11922_v53 = vpop.f32.mrf.mxu1  ;;  %v6047_v35 = vadd.f32 %v9450_v34, %v5821_v12  ;;  %v5374_v34 = vadd.f32 %v11850_v2, %v5145_v0  ;;  %v5825_v11 = vadd.f32 %v11890_v56, %v5599_v13  ;;  %v5149_v56 = vadd.f32 %v11846_v58, %v4952_v18  ;;  %v12219_v58 = vld [vmem:[#allocation64_spill] sm:$0xff]  ;;  %v12223_v13 = vld [vmem:[#allocation66_spill] sm:$0xff] }
 0xa20   : > { %v5975_v59 = vpop.f32.mrf.mxu0  ;;  %v5372_v50 = vadd.f32 %v11842_v25, %v5143_v63  ;;  %v5822_v25 = vadd.f32 %v11884_v16, %v5596_v44  ;;  %v5601_v8 = vadd.f32 %v11878_v4, %v5375_v61  ;;  %v5150_v16 = vadd.f32 %v11844_v49, %v4953_v30  ;;  %v12225_v61 = vld [vmem:[#allocation63_spill] sm:$0xff] }
 0xa21   : > { %v11926_v32 = vpop.f32.mrf.mxu1  ;;  %v6046_v41 = vadd.f32 %v5975_v59, %v5820_v7  ;;  %v4955_v59 = vld [vmem:[#allocation3 + $0x28] sm:$0xff]  ;;  %v5600_v17 = vadd.f32 %v11880_v29, %v5374_v34  ;;  %v5603_v49 = vadd.f32 %v11886_v24, %v5377_v15  ;;  %v5602_v44 = vadd.f32 %v12218_v38, %v5376_v40 }
 0xa22   : > { %v9453_v52 = vpop.f32.mrf.mxu0  ;;  %v5598_v54 = vadd.f32 %v11874_v55, %v5372_v50  ;;  %v5827_v5 = vadd.f32 %v11898_v31, %v5601_v8  ;;  %v5379_v62 = vadd.f32 %v11860_v60, %v5150_v16  ;;  %v12220_v24 = vld [vmem:[#allocation57_spill] sm:$0xff]  ;;  %v12221_v31 = vld [vmem:[#allocation58_spill] sm:$0xff] }
 0xa23   : > { %v9503_v48 = vpop.f32.mrf.mxu1  ;;  %v6049_v63 = vadd.f32 %v9453_v52, %v5823_v37  ;;  %v5826_v7 = vadd.f32 %v12219_v58, %v5600_v17  ;;  %v5378_v0 = vadd.f32 %v12221_v31, %v5149_v56  ;;  %v5828_v30 = vadd.f32 %v11909_v23, %v5602_v44  ;;  %v12227_v34 = vld [vmem:[#allocation65_spill] sm:$0xff] }
 0xa24   : > { %v6271_v26 = vadd.f32 %v9503_v48, %v6045_v20  ;;  %v5985_v27 = vpop.f32.mrf.mxu0  ;;  %v5824_v2 = vadd.f32 %v11892_v1, %v5598_v54  ;;  %v5152_v1 = vadd.f32 %v11852_v6, %v4955_v59  ;;  %v5829_v6 = vadd.f32 %v12223_v13, %v5603_v49 }
 0xa25   : > { %v6191_v51 = vpop.f32.mrf.mxu1  ;;  %v6048_v10 = vadd.f32 %v5985_v27, %v5822_v25  ;;  %v12229_v15 = vld [vmem:[#allocation68_spill] sm:$0xff] }
 0xa26   : > { %6287 = vst [vmem:[#allocation3] sm:$0xff] %v6271_v26  ;;  %v6270_v3 = vadd.f32 %v6191_v51, %v6044_v57  ;;  %v9456_v22 = vpop.f32.mrf.mxu0  ;;  %v4954_v57 = vld [vmem:[#allocation3 + $0x78] sm:$0xff]  ;;  %v12222_v51 = vld [vmem:[#allocation62_spill] sm:$0xff] }
 0xa27   : > { %v9506_v9 = vpop.f32.mrf.mxu1  ;;  %v6051_v46 = vadd.f32 %v9456_v22, %v5825_v11  ;;  %v5151_v27 = vadd.f32 %v12220_v24, %v4954_v57  ;;  %v5605_v42 = vadd.f32 %v12222_v51, %v5379_v62 }
 0xa28   : > { %6286 = vst [vmem:[#allocation3 + $0x30] sm:$0xff] %v6270_v3  ;;  %v6273_v21 = vadd.f32 %v9506_v9, %v6047_v35  ;;  %v5995_v19 = vpop.f32.mrf.mxu0  ;;  %v12224_v3 = vld [vmem:[#allocation59_spill] sm:$0xff]  ;;  %v5604_v9 = vadd.f32 %v12225_v61, %v5378_v0 }
 0xa29   : > { %v6201_v43 = vpop.f32.mrf.mxu1  ;;  %v6050_v52 = vadd.f32 %v5995_v19, %v5824_v2  ;;  %v5381_v22 = vadd.f32 %v12224_v3, %v5152_v1  ;;  %v5831_v18 = vadd.f32 %v11913_v45, %v5605_v42 }
 0xa2a   : > { %6289 = vst [vmem:[#allocation3 + $0x18] sm:$0xff] %v6273_v21  ;;  %v6272_v33 = vadd.f32 %v6201_v43, %v6046_v41  ;;  %v9459_v55 = vpop.f32.mrf.mxu0  ;;  %v12226_v21 = vld [vmem:[#allocation60_spill] sm:$0xff]  ;;  %v5830_v23 = vadd.f32 %v12229_v15, %v5604_v9 }
 0xa2b   : > { %v9509_v20 = vpop.f32.mrf.mxu1  ;;  %v6053_v47 = vadd.f32 %v9459_v55, %v5827_v5  ;;  %v5380_v19 = vadd.f32 %v12226_v21, %v5151_v27  ;;  %v5607_v43 = vadd.f32 %v12227_v34, %v5381_v22  ;;  %v12228_v55 = vld [vmem:[#allocation67_spill] sm:$0xff] }
 0xa2c   : > { %6288 = vst [vmem:[#allocation3 + $0x58] sm:$0xff] %v6272_v33  ;;  %v6275_v36 = vadd.f32 %v9509_v20, %v6049_v63  ;;  %v6005_v4 = vpop.f32.mrf.mxu0 }
 0xa2d   : > { %v6211_v12 = vpop.f32.mrf.mxu1  ;;  %v6052_v37 = vadd.f32 %v6005_v4, %v5826_v7  ;;  %v5606_v16 = vadd.f32 %v12228_v55, %v5380_v19  ;;  %v5833_v2 = vadd.f32 %v11922_v53, %v5607_v43 }
 0xa2e   : > { %6291 = vst [vmem:[#allocation3 + $0x68] sm:$0xff] %v6275_v36  ;;  %v6274_v14 = vadd.f32 %v6211_v12, %v6048_v10  ;;  %v9462_v29 = vpop.f32.mrf.mxu0 }
 0xa2f   : > { %v9512_v48 = vpop.f32.mrf.mxu1  ;;  %v6055_v54 = vadd.f32 %v9462_v29, %v5829_v6  ;;  %v5832_v56 = vadd.f32 %v11926_v32, %v5606_v16 }
 0xa30   : > { %6290 = vst [vmem:[#allocation3 + $0x50] sm:$0xff] %v6274_v14  ;;  %v6277_v35 = vadd.f32 %v9512_v48, %v6051_v46  ;;  %v6015_v26 = vpop.f32.mrf.mxu0 }
 0xa31   : > { %v6221_v50 = vpop.f32.mrf.mxu1  ;;  %v6054_v8 = vadd.f32 %v6015_v26, %v5828_v30 }
 0xa32   : > { %6293 = vst [vmem:[#allocation3 + $0x48] sm:$0xff] %v6277_v35  ;;  %v6276_v60 = vadd.f32 %v6221_v50, %v6050_v52  ;;  %v9465_v41 = vpop.f32.mrf.mxu0 }
 0xa33   : > { %v9515_v39 = vpop.f32.mrf.mxu1  ;;  %v6057_v20 = vadd.f32 %v9465_v41, %v5831_v18 }
 0xa34   : > { %6292 = vst [vmem:[#allocation3 + $0x8] sm:$0xff] %v6276_v60  ;;  %v6279_v25 = vadd.f32 %v9515_v39, %v6053_v47  ;;  %v6025_v63 = vpop.f32.mrf.mxu0 }
 0xa35   : > { %v6231_v28 = vpop.f32.mrf.mxu1  ;;  %v6056_v46 = vadd.f32 %v6025_v63, %v5830_v23 }
 0xa36   : > { %6295 = vst [vmem:[#allocation3 + $0x20] sm:$0xff] %v6279_v25  ;;  %v6278_v11 = vadd.f32 %v6231_v28, %v6052_v37  ;;  %v9468_v10 = vpop.f32.mrf.mxu0 }
 0xa37   : > { %v9518_v33 = vpop.f32.mrf.mxu1  ;;  %v6059_v40 = vadd.f32 %v9468_v10, %v5833_v2 }
 0xa38   : > { %6294 = vst [vmem:[#allocation3 + $0x40] sm:$0xff] %v6278_v11  ;;  %v6281_v59 = vadd.f32 %v9518_v33, %v6055_v54  ;;  %v6035_v4 = vpop.f32.mrf.mxu0 }
 0xa39   : > { %v6241_v17 = vpop.f32.mrf.mxu1  ;;  %v6058_v49 = vadd.f32 %v6035_v4, %v5832_v56 }
 0xa3a   : > { %6297 = vst [vmem:[#allocation3 + $0x38] sm:$0xff] %v6281_v59  ;;  %v6280_v36 = vadd.f32 %v6241_v17, %v6054_v8 }
 0xa3b   : > { %v9521_v45 = vpop.f32.mrf.mxu1 }
 0xa3c   : > { %6296 = vst [vmem:[#allocation3 + $0x10] sm:$0xff] %v6280_v36  ;;  %v6283_v12 = vadd.f32 %v9521_v45, %v6057_v20 }
 0xa3d   : > { %v6251_v57 = vpop.f32.mrf.mxu1 }
 0xa3e   : > { %6299 = vst [vmem:[#allocation3 + $0x70] sm:$0xff] %v6283_v12  ;;  %v6282_v5 = vadd.f32 %v6251_v57, %v6056_v46 }
 0xa3f   : > { %v9524_v52 = vpop.f32.mrf.mxu1 }
 0xa40   : > { %6298 = vst [vmem:[#allocation3 + $0x60] sm:$0xff] %v6282_v5  ;;  %v6285_v14 = vadd.f32 %v9524_v52, %v6059_v40 }
 0xa41   : > { %v6261_v29 = vpop.f32.mrf.mxu1 }
 0xa42   : > { %6301 = vst [vmem:[#allocation3 + $0x28] sm:$0xff] %v6285_v14  ;;  %v6284_v53 = vadd.f32 %v6261_v29, %v6058_v49 }
 0xa44   : > { %6300 = vst [vmem:[#allocation3 + $0x78] sm:$0xff] %v6284_v53 }
 0xa45 PF: > { %v6302_v1 = vld [vmem:[#allocation3 + $0x30] sm:$0xff]  ;;  %s12230_s30 = sld [smem:[#allocation34_spill]]  ;;  %v7317_v32 = vld [vmem:[%s10558_s28] ss:$0 sm:$0xff]  ;;  %v6304_v44 = vld [vmem:[#allocation3 + $0x58] sm:$0xff]  ;;  %s6373_s23 = sshll.u32 %s10570_s26, 4  ;;  %s11987_s23 = int_to_ptr.vmem [resolvable:$true] %s6373_s23 }
 0xa46   : > { %s12231_s24 = sld [smem:[#allocation35_spill]]  ;;  %v6303_v62 = vld [vmem:[#allocation3] sm:$0xff]  ;;  %v6325_v48 = vadd.f32 %v7317_v32, %v6302_v1  ;;  %v6305_v58 = vld [vmem:[#allocation3 + $0x18] sm:$0xff]  ;;  %v6306_v7 = vld [vmem:[#allocation3 + $0x50] sm:$0xff]  ;;  %v6327_v47 = vadd.f32 %v7317_v32, %v6304_v44  ;;  %s12004_s16 = scalar_lea.sflag [#allocation9], %s404_s0 }
 0xa47   : > { %v6326_v38 = vadd.f32 %v7317_v32, %v6303_v62  ;;  %v6328_v35 = vadd.f32 %v7317_v32, %v6305_v58  ;;  %v6329_v26 = vadd.f32 %v7317_v32, %v6306_v7  ;;  %v6307_v24 = vld [vmem:[#allocation3 + $0x68] sm:$0xff]  ;;  %v6310_v42 = vld [vmem:[#allocation3 + $0x40] sm:$0xff]  ;;  %v6312_v6 = vld [vmem:[#allocation3 + $0x10] sm:$0xff]  ;;  %s12233_s17 = sld [smem:[#allocation39_spill]]  ;;  %s9965_s9 = scalar_lea.vmem %s11987_s23, 2048 }
 0xa48   : > { %v6308_v27 = vld [vmem:[#allocation3 + $0x8] sm:$0xff]  ;;  %6341 = vst [vmem:[%s10570_s26] sm:$0xff] %v6325_v48  ;;  %v6330_v0 = vadd.f32 %v7317_v32, %v6307_v24  ;;  %v6311_v13 = vld [vmem:[#allocation3 + $0x20] sm:$0xff]  ;;  %6343 = vst [vmem:[%s10570_s26 + $0x10] sm:$0xff] %v6327_v47  ;;  %v6333_v37 = vadd.f32 %v7317_v32, %v6310_v42  ;;  %v6335_v41 = vadd.f32 %v7317_v32, %v6312_v6  ;;  %s12234_s28 = sld [smem:[#allocation71_spill]]  ;;  %p9966_p13 = scmp.ne.s32.totalorder %s11987_s23, %s9965_s9 }
 0xa49   : > { %v6309_v31 = vld [vmem:[#allocation3 + $0x48] sm:$0xff]  ;;  %6342 = vst [vmem:[%s10570_s26 + $0x8] sm:$0xff] %v6326_v38  ;;  %v6331_v50 = vadd.f32 %v7317_v32, %v6308_v27  ;;  %6344 = vst [vmem:[%s10570_s26 + $0x18] sm:$0xff] %v6328_v35  ;;  %v6334_v60 = vadd.f32 %v7317_v32, %v6311_v13  ;;  %v6313_v3 = vld [vmem:[#allocation3 + $0x38] sm:$0xff]  ;;  %s10159_s27 = smov [#allocation16]  }
 0xa4a   : > { %v6332_v51 = vadd.f32 %v7317_v32, %v6309_v31  ;;  %6345 = vst [vmem:[%s10570_s26 + $0x20] sm:$0xff] %v6329_v26  ;;  %v6314_v22 = vld [vmem:[#allocation3 + $0x60] sm:$0xff]  ;;  %v6315_v39 = vld [vmem:[#allocation3 + $0x70] sm:$0xff]  ;;  %6346 = vst [vmem:[%s10570_s26 + $0x28] sm:$0xff] %v6330_v0  ;;  %v6336_v61 = vadd.f32 %v7317_v32, %v6313_v3  ;;  %s9969_s8 = sshll.u32 %s10159_s27, 4  ;;  %s9970_s8 = int_to_ptr.vmem [resolvable:$false] %s9969_s8 }
 0xa4b   : > { %s7319_s7 = sshll.u32 %s12230_s30, 4  ;;  %6347 = vst [vmem:[%s10570_s26 + $0x30] sm:$0xff] %v6331_v50  ;;  %v6337_v9 = vadd.f32 %v7317_v32, %v6314_v22  ;;  %v6338_v30 = vadd.f32 %v7317_v32, %v6315_v39  ;;  %v6316_v54 = vld [vmem:[#allocation3 + $0x78] sm:$0xff]  ;;  %v6317_v25 = vld [vmem:[#allocation3 + $0x28] sm:$0xff]  ;;  %6349 = vst [vmem:[%s10570_s26 + $0x40] sm:$0xff] %v6333_v37  ;;  %s9971_s18 = scalar_lea.vmem %s9970_s8, 4096 }
 0xa4c   : > { %s7320_s13 = sshll.u32 %s12231_s24, 5  ;;  %6348 = vst [vmem:[%s10570_s26 + $0x38] sm:$0xff] %v6332_v51  ;;  %6350 = vst [vmem:[%s10570_s26 + $0x48] sm:$0xff] %v6334_v60  ;;  %v6339_v63 = vadd.f32 %v7317_v32, %v6316_v54  ;;  %v6340_v21 = vadd.f32 %v7317_v32, %v6317_v25  ;;  %p9972_p7 = scmp.lt.s32.totalorder %s11987_s23, %s9970_s8 }
 0xa4d   : > { %s11975_s19 = sadd.s32 %s7320_s13, %s7319_s7  ;;  %6351 = vst [vmem:[%s10570_s26 + $0x50] sm:$0xff] %v6335_v41  ;;  %6352 = vst [vmem:[%s10570_s26 + $0x58] sm:$0xff] %v6336_v61  ;;  %p12235_p0 = scmp.ne.s32.totalorder %s12233_s17, 0 }
 0xa4e   : > { %s7321_s11 = sshll.u32 %s11975_s19, 7  ;;  %6353 = vst [vmem:[%s10570_s26 + $0x60] sm:$0xff] %v6337_v9  ;;  %6354 = vst [vmem:[%s10570_s26 + $0x68] sm:$0xff] %v6338_v30  ;;  %p9973_p1 = scmp.lt.s32.totalorder %s9971_s18, %s9965_s9 }
 0xa4f   : > { %s11995_s12 = scalar_lea.hbm %s12234_s28, %s7321_s11  ;;  %6355 = vst [vmem:[%s10570_s26 + $0x70] sm:$0xff] %v6339_v63  ;;  %6356 = vst [vmem:[%s10570_s26 + $0x78] sm:$0xff] %v6340_v21  ;;  %p9967_p3 = pnand %p9966_p13, %p12235_p0 }
 0xa50   : > { %p9974_p8 = por %p9973_p1, %p9972_p7 }
 0xa51   : > { %p9968_p4 = pneg %p9967_p3 }
 0xa53   : > { %p9975_p9 = pnand %p9974_p8, %p9968_p4 }
 0xa55   : > { %9978 = shalt.err (!%p9975_p9)
}
 0xa56   : > { %s9979_s0 = scalar_lea.hbm %s11995_s12, 2048  ;;  %s9983_s3 = scalar_lea.hbm %s12234_s28, 8192 }
 0xa57   : > { %p9980_p6 = scmp.ne.s32.totalorder %s11995_s12, %s9979_s0  ;;  %p9984_p10 = scmp.lt.s32.totalorder %s11995_s12, %s12234_s28 }
 0xa58   : > { %p9985_p11 = scmp.lt.s32.totalorder %s9983_s3, %s9979_s0 }
 0xa59   : > { %p9981_p12 = pnand %p9980_p6, %p12235_p0 }
 0xa5a   : > { %p9986_p2 = por %p9985_p11, %p9984_p10 }
 0xa5b   : > { %p9982_p5 = pneg %p9981_p12 }
 0xa5d   : > { %p9987_p13 = pnand %p9986_p2, %p9982_p5 }
 0xa5f   : > { %9990 = shalt.err (!%p9987_p13)
}
 0xa60   : > { %s10160_s7 = smov 128   ;;  %s10161_s13 = smov 8  }
 0xa61   : > { %9638 = dma.vmem_to_hbm [thread:$0]  (%p12235_p0), %s11987_s23, 2048, %s11995_s12, %s12004_s16, %s10160_s7, %s10160_s7, %s10161_s13  }
 0xa62 PF: > { %s12236_s19 = sld [smem:[#allocation27_spill]]  ;;  %p9665_p3 = scmp.ge.s32.totalorder %s10147_s21, 2 }
 0xa63   : > { %s12237_s11 = sld [smem:[#allocation42_spill]] }
 0xa68   : > { %s6388_s4 = sand.u32 1, %s12236_s19  }
 0xa69   : > { %p12238_p4 = scmp.ne.s32.totalorder %s12237_s11, 0  ;;  %s6389_s14 = scalar_lea.sflag [#allocation9], %s6388_s4 }
 0xa6b   : > { %p9661_p7 = pnand %p9665_p3, %p12238_p4 }
 0xa6d   : > { %p9662_p1 = pneg %p9661_p7 }
 0xa6f   : > { %10078 = dma.done.wait (%p9662_p1), %s6389_s14, 2048  }
 0xa70   : > { %10080 = vsyncadd (%p9662_p1), %s6389_s14, 4294965248  ;;  %s35_s21 = sadd.s32 1, %s10147_s21   ;;  %s12240_s30 = sld [smem:[#allocation28_spill]] }
 0xa71   : > { %p12032_p8 = scmp.ge.s32.totalorder %s35_s21, 6   ;;  %s12241_s8 = sld [smem:[#allocation29_spill]] }
 0xa72   : > { %s12242_s0 = sld [smem:[#allocation41_spill]]  ;;  %s12251_s9 = smov %s10099_s1 }
 0xa73   : > { %s12243_s11 = sld [smem:[#allocation30_spill]]  ;;  %s12252_s1 = smov %s10103_s10 }
 0xa74   : > { %s12244_s12 = sld [smem:[#allocation31_spill]]  ;;  %s12253_s10 = smov %s10504_s15 }
 0xa75   : > { %s12245_s13 = sld [smem:[#allocation44_spill]]  ;;  %s12255_s18 = smov %s10143_s20 }
 0xa76   : > { %s12246_s14 = sld [smem:[#allocation32_spill]]  ;;  %s12256_s20 = smov %s12262_s25 }
 0xa77   : > { %s12247_s23 = sld [smem:[#allocation33_spill]] }
 0xa78   : > { %s12248_s16 = sld [smem:[#allocation40_spill]] }
 0xa79   : > { %s12249_s17 = sld [smem:[#allocation36_spill]]  ;;  %34 = sbr.rel (!%p12032_p8) target bundleno = 25 (0x19), region = 200 }
 0xa7a   : > { %s12250_s19 = sld [smem:[#allocation37_spill]] }
 0xa7d   : > { %s12254_s15 = smov %s12247_s23 }
 0xa7e   :  { %6394 = vsyncpa [#allocation8], 1 }
 0xa7f   :  { %6396 = vsyncpa [#allocation8 + $0x1], 1 }
 0xa80   :  { %6397 = vsyncpa [#allocation11], 1 }
 0xa81   :  { %6399 = vsyncpa [#allocation11 + $0x1], 1 }
 0xa82   :  { %6400 = vsyncpa [#allocation14], 1 }
 0xa83   :  { %6402 = vsyncpa [#allocation14 + $0x1], 1 }
 0xa84   :  { %6403 = vsyncpa [#allocation9], 1 }
 0xa85   :  { %6405 = vsyncpa [#allocation9 + $0x1], 1 }

</bundles_post_ra>
